<compile_context>
chip_gen: v7x
topology: tpu7x:2x2x1
jax: 0.10.0
libtpu: 0.0.40
codegen_flags: <defaults>
</compile_context>

<pallas_src>
import jax
import jax.numpy as jnp
from jax import lax
from jax.experimental import pallas as pl
from jax.experimental.pallas import tpu as pltpu

SEQ = 31
SEQ_PAD = 32                    # padded sequence rows (row 31 = zero pad)
IN_F = 54
N_HIDDEN = 64
D_MODEL = 2 * N_HIDDEN          # 128
N_GATES = 4 * N_HIDDEN          # 256 gates per direction
FUSED_GATES = 2 * N_GATES       # 512 fused fwd+bwd gate lanes
SIG_LANES = 3 * D_MODEL         # 384: [i_f|i_b|f_f|f_b|o_f|o_b]
N_HEADS = 4
D_K = 32
D_V = 32
C_OUT = 8
KH = KW = 6
STRIDE = 2
H_OUT = (SEQ - KH) // STRIDE + 1          # 13
W_OUT = (D_MODEL - KW) // STRIDE + 1      # 62
W_POOL = W_OUT // 2                       # 31
CH_LANES = 32                             # lanes per channel in conv layout
CONV_LANES = 2 * C_OUT * CH_LANES         # 512: [even-j block | odd-j block]
POOL_LANES = C_OUT * CH_LANES             # 256
FLAT = C_OUT * H_OUT * W_POOL             # 3224
FC_HID = 64
LN_EPS = 1e-5
BN_EPS = 1e-5
NEG_INF = -1e30

# Permuted-row start for each conv kernel row kh: natural rows {kh, kh+2, ...,
# kh+24} are the contiguous permuted rows [start, start+13).
CONV_ROW_START = (0, 16, 1, 17, 2, 18)

_VMEM = pl.BlockSpec(memory_space=pltpu.MemorySpace.VMEM)
_ANY = pl.BlockSpec(memory_space=pl.ANY)


# ----------------------------------------------------------------------------
# The single fused kernel.
# ----------------------------------------------------------------------------
def network_kernel(
        xcat_ref, wih_ref, bg_ref, whh_ref,
        wqkv_ref, wfc_ref, kmask_ref,
        mconv_hbm,
        gamma_ref, beta_ref, gm_ref, gb_ref,
        wfold_ref, sel_ref, bfold_ref,
        out_ref,
        xg_ref, h_ref, a_ref, mconv_vmem, dma_sem):

    bf16 = jnp.bfloat16

    # Kick off the big conv-weight DMA (HBM -> VMEM) immediately; it is only
    # needed in Stage 3, so it hides behind the LSTM recurrence.
    conv_cp = pltpu.make_async_copy(mconv_hbm, mconv_vmem, dma_sem)
    conv_cp.start()

    # ===== Stage 1: fused bidirectional LSTM (batch = 1) =====================
    # xcat = [x | flip(x, axis=0)]  (31, 108).  One matmul precomputes the
    # input-side gates for BOTH directions, already in the fused gate layout:
    # XG[t] = [fwd gates from x[t] | bwd gates from x[SEQ-1-t]].
    xg_ref[...] = jnp.dot(xcat_ref[...].astype(bf16), wih_ref[...],
                          preferred_element_type=jnp.float32) + bg_ref[...]
    whh = whh_ref[...]                          # (128, 512) block-diagonal

    # Only the pad row needs zeroing; rows 0..30 are fully written below.
    h_ref[SEQ:SEQ_PAD, :] = jnp.zeros((SEQ_PAD - SEQ, D_MODEL), jnp.float32)

    # State is the fused [fwd | bwd] vector; gate columns are pre-permuted to
    # [i_f|i_b|f_f|f_b|o_f|o_b|g_f|g_b] so one sigmoid covers lanes 0:384 and
    # one tanh covers the g block.
    h = jnp.zeros((1, D_MODEL), jnp.float32)
    c = jnp.zeros((1, D_MODEL), jnp.float32)
    for t in range(SEQ):                        # fully unrolled (static t)
        gates = xg_ref[t:t + 1, :] + jnp.dot(
            h, whh, preferred_element_type=jnp.float32)          # (1, 512)
        sig = jax.nn.sigmoid(gates[:, :SIG_LANES])
        g = jnp.tanh(gates[:, SIG_LANES:])
        i_g = sig[:, 0:D_MODEL]
        f_g = sig[:, D_MODEL:2 * D_MODEL]
        o_g = sig[:, 2 * D_MODEL:3 * D_MODEL]
        c = f_g * c + i_g * g
        h = o_g * jnp.tanh(c)
        # Parity-permuted row stores (static indices): fwd half at time t,
        # bwd half corresponds to timestep SEQ-1-t.
        rf = t // 2 + 16 * (t % 2)
        tb = SEQ - 1 - t
        rb = tb // 2 + 16 * (tb % 2)
        h_ref[rf:rf + 1, 0:N_HIDDEN] = h[:, 0:N_HIDDEN]
        h_ref[rb:rb + 1, N_HIDDEN:D_MODEL] = h[:, N_HIDDEN:D_MODEL]

    # ===== Stage 2: multi-head self-attention + residual + LayerNorm ========
    h_all = h_ref[...]                                           # (32, 128)
    qkv = jnp.dot(h_all.astype(bf16), wqkv_ref[...],             # fused QKV
                  preferred_element_type=jnp.float32)            # (32, 384)
    kmask = kmask_ref[...]                                       # (1, 32)

    ao = h_all                                                   # residual
    for hd in range(N_HEADS):
        q = qkv[:, hd * D_K:(hd + 1) * D_K].astype(bf16)
        k = qkv[:, D_MODEL + hd * D_K:D_MODEL + (hd + 1) * D_K].astype(bf16)
        v = qkv[:, 2 * D_MODEL + hd * D_V:2 * D_MODEL + (hd + 1) * D_V].astype(bf16)
        s = lax.dot_general(q, k, (((1,), (1,)), ((), ())),
                            preferred_element_type=jnp.float32) + kmask
        m = jnp.max(s, axis=-1, keepdims=True)
        p = jnp.exp(s - m)
        attn = p * pl.reciprocal(jnp.sum(p, axis=-1, keepdims=True), approx=True)
        ctx = jnp.dot(attn.astype(bf16), v,
                      preferred_element_type=jnp.float32)        # (32, 32)
        # block-matmul form of concat(heads) @ W_fc
        ao = ao + jnp.dot(ctx.astype(bf16), wfc_ref[hd * D_V:(hd + 1) * D_V, :],
                          preferred_element_type=jnp.float32)
    mu = jnp.mean(ao, axis=-1, keepdims=True)
    var = jnp.mean((ao - mu) ** 2, axis=-1, keepdims=True)
    a_ref[...] = (ao - mu) * lax.rsqrt(var + LN_EPS)   # fresh LayerNorm: w=1, b=0

    # ===== Stage 3: Conv2d(1->8,k=6,s=2) as ONE K=768 GEMM + BN(batch stats)
    #        + ReLU + MaxPool2d((1,2)) =========================================
    conv_cp.wait()                               # conv weight now in VMEM
    a_cat = jnp.concatenate(
        [a_ref[s:s + H_OUT, :] for s in CONV_ROW_START], axis=1).astype(bf16)
    y = jnp.dot(a_cat, mconv_vmem[...],
                preferred_element_type=jnp.float32)              # (13, 512)
    # Conv bias is omitted: it is exactly cancelled by batch-statistic BN.

    # BatchNorm2d with batch statistics (training-mode forward) over the 806
    # valid positions per channel; pad lanes excluded via gm.
    colsum = jnp.sum(y, axis=0, keepdims=True)                   # (1, 512)
    colsq = jnp.sum(y * y, axis=0, keepdims=True)                # (1, 512)
    ch_mean = jnp.dot(colsum, gm_ref[...], preferred_element_type=jnp.float32)
    ch_msq = jnp.dot(colsq, gm_ref[...], preferred_element_type=jnp.float32)
    ch_var = jnp.maximum(ch_msq - ch_mean * ch_mean, 0.0)
    inv = lax.rsqrt(ch_var + BN_EPS)
    sc = gamma_ref[...] * inv
    sh = beta_ref[...] - ch_mean * sc
    scale_l = jnp.dot(sc, gb_ref[...], preferred_element_type=jnp.float32)
    shift_l = jnp.dot(sh, gb_ref[...], preferred_element_type=jnp.float32)
    y = jnp.maximum(y * scale_l + shift_l, 0.0)                  # BN affine + ReLU

    # MaxPool2d((1,2)): even-j / odd-j conv columns live in lane blocks
    # [0:256) and [256:512) -> plain elementwise max, no lane shuffles.
    pooled = jnp.maximum(y[:, 0:POOL_LANES], y[:, POOL_LANES:])  # (13, 256)

    # ===== Stage 4: folded FC head: Linear(3224,64) -> Dropout -> Linear(64,2)
    #        -> Sigmoid ========================================================
    # TODO(synk): nn.Dropout(0.5) implemented with eval semantics (identity);
    # the offline W1@W2 fold below is only valid under that assumption.
    pooled2 = jnp.concatenate([pooled, pooled], axis=1)          # (13, 512)
    colsum_fc = jnp.sum(pooled2 * wfold_ref[...], axis=0, keepdims=True)  # (1, 512)
    logits = jnp.dot(colsum_fc, sel_ref[...],
                     preferred_element_type=jnp.float32) + bfold_ref[...]  # (1, 2)
    out_ref[...] = jax.nn.sigmoid(logits)


# ----------------------------------------------------------------------------
# Wrapper: one grid-less pallas_call, everything VMEM-resident except the big
# conv weight, which stays in HBM and is async-copied behind Stage 1.
# ----------------------------------------------------------------------------
def network_forward(x, kp):
    x_cat = jnp.concatenate([x, x[::-1]], axis=1)     # (31, 108) = [x | flip(x)]
    return pl.pallas_call(
        network_kernel,
        out_shape=jax.ShapeDtypeStruct((1, 2), jnp.float32),
        in_specs=[_VMEM] * 7 + [_ANY] + [_VMEM] * 7,
        out_specs=_VMEM,
        scratch_shapes=[
            pltpu.VMEM((SEQ, FUSED_GATES), jnp.float32),       # fused input gates
            pltpu.VMEM((SEQ_PAD, D_MODEL), jnp.float32),       # BLSTM output (permuted rows)
            pltpu.VMEM((SEQ_PAD, D_MODEL), jnp.float32),       # attention output
            pltpu.VMEM((KH * D_MODEL, CONV_LANES), jnp.bfloat16),  # conv weight landing buf
            pltpu.SemaphoreType.DMA(()),                       # conv-weight DMA sem
        ],
    )(x_cat,
      kp["wih_big"], kp["b_cat"], kp["whh_cat"],
      kp["wqkv"], kp["wfc"], kp["kmask"],
      kp["mconv"],
      kp["bn_gamma"], kp["bn_beta"], kp["gm"], kp["gb"],
      kp["wfold"], kp["sel"], kp["bfold"])


# ----------------------------------------------------------------------------
# Deterministic synthetic parameters (torch-like layouts), plus one-time
# preprocessing into the kernel's matmul-friendly layouts.
# ----------------------------------------------------------------------------
def init_params(key):
    ks = jax.random.split(key, 16)
    s = 0.05
    norm = lambda k, shp: (s * jax.random.normal(k, shp)).astype(jnp.float32)
    return {
        # BLSTM: weights pre-transposed to (in, 4*hidden); bias = b_ih + b_hh.
        "wih_f": norm(ks[0], (IN_F, N_GATES)),
        "whh_f": norm(ks[1], (N_HIDDEN, N_GATES)),
        "b_f":   norm(ks[2], (1, N_GATES)),
        "wih_b": norm(ks[3], (IN_F, N_GATES)),
        "whh_b": norm(ks[4], (N_HIDDEN, N_GATES)),
        "b_b":   norm(ks[5], (1, N_GATES)),
        # attention projections (pre-transposed (in, out)), bias=False
        "wq":  norm(ks[6], (D_MODEL, N_HEADS * D_K)),
        "wk":  norm(ks[7], (D_MODEL, N_HEADS * D_K)),
        "wv":  norm(ks[8], (D_MODEL, N_HEADS * D_V)),
        "wfc": norm(ks[9], (N_HEADS * D_V, D_MODEL)),
        # conv weight = torch (8,1,6,6) squeezed; conv bias exists in torch but
        # cancels exactly under batch-statistic BN, so it is not used.
        "w_conv": norm(ks[10], (C_OUT, KH, KW)),
        "b_conv": norm(ks[11], (C_OUT,)),
        "bn_gamma": jnp.ones((1, C_OUT), jnp.float32),
        "bn_beta": jnp.zeros((1, C_OUT), jnp.float32),
        # FC head (pre-transposed)
        "w_fc1": norm(ks[12], (FLAT, FC_HID)),
        "b_fc1": norm(ks[13], (1, FC_HID)),
        "w_fc2": norm(ks[14], (FC_HID, 2)),
        "b_fc2": norm(ks[15], (1, 2)),
    }


def prepare_kernel_params(p):
    f32, bf16 = jnp.float32, jnp.bfloat16
    H = N_HIDDEN

    # ---- Fused BLSTM weights.  Torch gate order per direction is [i,f,g,o];
    # fused 512-lane layout is [i_f|i_b|f_f|f_b|o_f|o_b|g_f|g_b] so the kernel
    # runs ONE sigmoid on lanes 0:384 and ONE tanh on the g block. ----
    def gate_cols(w, direction):
        i, f, g, o = (w[..., 0 * H:1 * H], w[..., 1 * H:2 * H],
                      w[..., 2 * H:3 * H], w[..., 3 * H:4 * H])
        z = jnp.zeros_like(i)
        if direction == 0:                       # forward slots
            blocks = [i, z, f, z, o, z, g, z]
        else:                                    # backward slots
            blocks = [z, i, z, f, z, o, z, g]
        return jnp.concatenate(blocks, axis=-1)  # (..., 512)

    wih_big = jnp.concatenate(
        [gate_cols(p["wih_f"], 0), gate_cols(p["wih_b"], 1)], axis=0
    ).astype(bf16)                                              # (108, 512)
    whh_cat = jnp.concatenate(
        [gate_cols(p["whh_f"], 0), gate_cols(p["whh_b"], 1)], axis=0
    ).astype(f32)                                               # (128, 512) block-diag
    b_cat = (gate_cols(p["b_f"], 0) + gate_cols(p["b_b"], 1)).astype(f32)  # (1, 512)

    # ---- Fused QKV projection; softmax scale folded into W_Q. ----
    wqkv = jnp.concatenate(
        [p["wq"] * (D_K ** -0.5), p["wk"], p["wv"]], axis=1).astype(bf16)  # (128, 384)
    wfc = p["wfc"].astype(bf16)                                            # (128, 128)

    # Precomputed key-pad mask (column 31 = padded key).
    kmask = jnp.where(jnp.arange(SEQ_PAD)[None, :] < SEQ, 0.0, NEG_INF).astype(f32)

    # ---- Conv weight as one (768, 512) GEMM operand.  512 output lanes =
    # [even-j block | odd-j block], each block = 8 channels x 32 pooled cols
    # (jp = 31 is padding); 768 rows = 6 kernel rows x 128 image columns. ----
    L = jnp.arange(CONV_LANES)[None, :]
    blk = L // (CONV_LANES // 2)                 # 0: even j, 1: odd j
    ch = (L % (CONV_LANES // 2)) // CH_LANES     # output channel
    jp = L % CH_LANES                            # pooled column
    j = 2 * jp + blk                             # conv output column (0..61)
    l_in = jnp.arange(D_MODEL)[:, None]          # (128, 1) image W index
    kw = l_in - STRIDE * j
    valid = (kw >= 0) & (kw < KW) & (jp < W_POOL)
    kw_c = jnp.clip(kw, 0, KW - 1)
    mconv = jnp.concatenate(
        [jnp.where(valid, p["w_conv"][ch, kh, kw_c], 0.0) for kh in range(KH)],
        axis=0).astype(bf16)                     # (768, 512)

    cc = jnp.arange(C_OUT)
    gm = ((ch.reshape(-1, 1) == cc[None, :]) &
          (jp.reshape(-1, 1) < W_POOL)).astype(f32) / float(H_OUT * W_OUT)  # (512, 8)
    gb = (cc[:, None] == ch).astype(f32)         # (8, 512)

    # ---- FC head folded offline (valid because dropout is identity):
    # Wfold[i, lane, class] with pad lanes zeroed, laid out as (13, 512) with
    # class 0 in lanes [0:256) and class 1 in [256:512). ----
    w1 = p["w_fc1"].reshape(C_OUT, H_OUT, W_POOL, FC_HID)        # torch .view order
    w1 = jnp.transpose(w1, (1, 0, 2, 3))                         # (13, 8, 31, 64)
    w1 = jnp.pad(w1, ((0, 0), (0, 0), (0, CH_LANES - W_POOL), (0, 0)))
    w1p = w1.reshape(H_OUT, POOL_LANES, FC_HID)                  # (13, 256, 64)
    wf = jnp.einsum('ilh,hc->cil', w1p, p["w_fc2"])              # (2, 13, 256)
    wfold = jnp.concatenate([wf[0], wf[1]], axis=1).astype(f32)  # (13, 512)
    bfold = (p["b_fc1"] @ p["w_fc2"] + p["b_fc2"]).astype(f32)   # (1, 2)
    lane = jnp.arange(2 * POOL_LANES)
    sel = jnp.stack([(lane < POOL_LANES).astype(f32),
                     (lane >= POOL_LANES).astype(f32)], axis=1)  # (512, 2)

    return {
        "wih_big": wih_big, "b_cat": b_cat, "whh_cat": whh_cat,
        "wqkv": wqkv, "wfc": wfc, "kmask": kmask,
        "mconv": mconv,
        "bn_gamma": p["bn_gamma"], "bn_beta": p["bn_beta"], "gm": gm, "gb": gb,
        "wfold": wfold, "sel": sel, "bfold": bfold,
    }


if __name__ == "__main__":
    key = jax.random.PRNGKey(0)
    k_x, k_p = jax.random.split(key)
    x = jax.random.normal(k_x, (SEQ, IN_F), dtype=jnp.float32)   # torch input X
    kparams = prepare_kernel_params(init_params(k_p))

    out = jax.jit(network_forward)(x, kparams)
    out = jax.block_until_ready(out)
    assert out.shape == (1, 2), out.shape
    assert bool(jnp.all(jnp.isfinite(out)))
    print("KERNEL_OK")
</pallas_src>

<mosaic_0001>
module attributes {stable_mosaic.version = 11 : i64} {
  func.func @network_kernel(%arg0: memref<31x108xf32, #tpu.memory_space<vmem>>, %arg1: memref<108x512xbf16, #tpu.memory_space<vmem>>, %arg2: memref<1x512xf32, #tpu.memory_space<vmem>>, %arg3: memref<128x512xf32, #tpu.memory_space<vmem>>, %arg4: memref<128x384xbf16, #tpu.memory_space<vmem>>, %arg5: memref<128x128xbf16, #tpu.memory_space<vmem>>, %arg6: memref<1x32xf32, #tpu.memory_space<vmem>>, %arg7: memref<768x512xbf16, #tpu.memory_space<any>>, %arg8: memref<1x8xf32, #tpu.memory_space<vmem>>, %arg9: memref<1x8xf32, #tpu.memory_space<vmem>>, %arg10: memref<512x8xf32, #tpu.memory_space<vmem>>, %arg11: memref<8x512xf32, #tpu.memory_space<vmem>>, %arg12: memref<13x512xf32, #tpu.memory_space<vmem>>, %arg13: memref<512x2xf32, #tpu.memory_space<vmem>>, %arg14: memref<1x2xf32, #tpu.memory_space<vmem>>, %arg15: memref<1x2xf32, #tpu.memory_space<vmem>>, %arg16: memref<31x512xf32, #tpu.memory_space<vmem>>, %arg17: memref<32x128xf32, #tpu.memory_space<vmem>>, %arg18: memref<32x128xf32, #tpu.memory_space<vmem>>, %arg19: memref<768x512xbf16, #tpu.memory_space<vmem>>, %arg20: memref<!tpu.dma_semaphore, #tpu.memory_space<semaphore_mem>>) attributes {dimension_semantics = [], scalar_prefetch = 0 : i64, scratch_operands = 5 : i64, tpu.core_type = #tpu.core_type<tc>} {
    tpu.enqueue_dma source(%arg7 : memref<768x512xbf16, #tpu.memory_space<any>>) target(%arg19 : memref<768x512xbf16, #tpu.memory_space<vmem>>) target_semaphore(%arg20 : memref<!tpu.dma_semaphore, #tpu.memory_space<semaphore_mem>>)
    %c0 = arith.constant 0 : index
    %c0_0 = arith.constant 0 : index
    %0 = vector.load %arg0[%c0, %c0_0] : memref<31x108xf32, #tpu.memory_space<vmem>>, vector<31x108xf32>
    %1 = arith.truncf %0 : vector<31x108xf32> to vector<31x108xbf16>
    %c0_1 = arith.constant 0 : index
    %c0_2 = arith.constant 0 : index
    %2 = vector.load %arg1[%c0_1, %c0_2] : memref<108x512xbf16, #tpu.memory_space<vmem>>, vector<108x512xbf16>
    %cst = arith.constant dense<0.000000e+00> : vector<31x512xf32>
    %3 = tpu.matmul %1, %2, %cst {dimension_numbers = #tpu.dot_dimension_numbers<[1], [0], [0], [1], [0, 0, 1, 1], [], []>} : vector<31x108xbf16>, vector<108x512xbf16>, vector<31x512xf32> -> vector<31x512xf32>
    %c0_3 = arith.constant 0 : index
    %c0_4 = arith.constant 0 : index
    %4 = vector.load %arg2[%c0_3, %c0_4] : memref<1x512xf32, #tpu.memory_space<vmem>>, vector<1x512xf32>
    %5 = vector.broadcast %4 : vector<1x512xf32> to vector<31x512xf32>
    %6 = arith.addf %3, %5 : vector<31x512xf32>
    %c0_5 = arith.constant 0 : index
    %c0_6 = arith.constant 0 : index
    %7 = vector.load %arg16[%c0_5, %c0_6] : memref<31x512xf32, #tpu.memory_space<vmem>>, vector<31x512xf32>
    tpu.vector_store %arg16[%c0_5, %c0_6], %6 {strides = array<i32>} : memref<31x512xf32, #tpu.memory_space<vmem>>, vector<31x512xf32>,
    %c0_7 = arith.constant 0 : index
    %c0_8 = arith.constant 0 : index
    %8 = vector.load %arg3[%c0_7, %c0_8] : memref<128x512xf32, #tpu.memory_space<vmem>>, vector<128x512xf32>
    %cst_9 = arith.constant 0.000000e+00 : f32
    %9 = vector.broadcast %cst_9 : f32 to vector<1x128xf32>
    %c31 = arith.constant 31 : index
    %c0_10 = arith.constant 0 : index
    %10 = vector.load %arg17[%c31, %c0_10] : memref<32x128xf32, #tpu.memory_space<vmem>>, vector<1x128xf32>
    tpu.vector_store %arg17[%c31, %c0_10], %9 {strides = array<i32>} : memref<32x128xf32, #tpu.memory_space<vmem>>, vector<1x128xf32>,
    %cst_11 = arith.constant 0.000000e+00 : f32
    %11 = vector.broadcast %cst_11 : f32 to vector<1x128xf32>
    %cst_12 = arith.constant 0.000000e+00 : f32
    %12 = vector.broadcast %cst_12 : f32 to vector<1x128xf32>
    %c0_13 = arith.constant 0 : index
    %c0_14 = arith.constant 0 : index
    %13 = vector.load %arg16[%c0_13, %c0_14] : memref<31x512xf32, #tpu.memory_space<vmem>>, vector<1x512xf32>
    %cst_15 = arith.constant dense<0.000000e+00> : vector<1x512xf32>
    %14 = tpu.matmul %11, %8, %cst_15 {dimension_numbers = #tpu.dot_dimension_numbers<[1], [0], [0], [1], [0, 0, 1, 1], [], []>} : vector<1x128xf32>, vector<128x512xf32>, vector<1x512xf32> -> vector<1x512xf32>
    %15 = arith.addf %13, %14 : vector<1x512xf32>
    %16 = vector.extract_strided_slice %15 {offsets = [0, 0], sizes = [1, 384], strides = [1, 1]} : vector<1x512xf32> to vector<1x384xf32>
    %17 = arith.negf %16 : vector<1x384xf32>
    %18 = math.exp %17 : vector<1x384xf32>
    %cst_16 = arith.constant 1.000000e+00 : f32
    %19 = vector.broadcast %cst_16 : f32 to vector<1x384xf32>
    %20 = arith.addf %19, %18 : vector<1x384xf32>
    %21 = arith.divf %19, %20 : vector<1x384xf32>
    %22 = vector.extract_strided_slice %15 {offsets = [0, 384], sizes = [1, 128], strides = [1, 1]} : vector<1x512xf32> to vector<1x128xf32>
    %23 = math.tanh %22 : vector<1x128xf32>
    %24 = vector.extract_strided_slice %21 {offsets = [0, 0], sizes = [1, 128], strides = [1, 1]} : vector<1x384xf32> to vector<1x128xf32>
    %25 = vector.extract_strided_slice %21 {offsets = [0, 128], sizes = [1, 128], strides = [1, 1]} : vector<1x384xf32> to vector<1x128xf32>
    %26 = vector.extract_strided_slice %21 {offsets = [0, 256], sizes = [1, 128], strides = [1, 1]} : vector<1x384xf32> to vector<1x128xf32>
    %27 = arith.mulf %25, %12 : vector<1x128xf32>
    %28 = arith.mulf %24, %23 : vector<1x128xf32>
    %29 = arith.addf %27, %28 : vector<1x128xf32>
    %30 = math.tanh %29 : vector<1x128xf32>
    %31 = arith.mulf %26, %30 : vector<1x128xf32>
    %32 = vector.extract_strided_slice %31 {offsets = [0, 0], sizes = [1, 64], strides = [1, 1]} : vector<1x128xf32> to vector<1x64xf32>
    %c0_17 = arith.constant 0 : index
    %c0_18 = arith.constant 0 : index
    %33 = vector.load %arg17[%c0_17, %c0_18] : memref<32x128xf32, #tpu.memory_space<vmem>>, vector<1x64xf32>
    tpu.vector_store %arg17[%c0_17, %c0_18], %32 {strides = array<i32>} : memref<32x128xf32, #tpu.memory_space<vmem>>, vector<1x64xf32>,
    %34 = vector.extract_strided_slice %31 {offsets = [0, 64], sizes = [1, 64], strides = [1, 1]} : vector<1x128xf32> to vector<1x64xf32>
    %c15 = arith.constant 15 : index
    %c64 = arith.constant 64 : index
    %35 = vector.load %arg17[%c15, %c64] : memref<32x128xf32, #tpu.memory_space<vmem>>, vector<1x64xf32>
    tpu.vector_store %arg17[%c15, %c64], %34 {strides = array<i32>} : memref<32x128xf32, #tpu.memory_space<vmem>>, vector<1x64xf32>,
    %c1 = arith.constant 1 : index
    %c0_19 = arith.constant 0 : index
    %36 = vector.load %arg16[%c1, %c0_19] : memref<31x512xf32, #tpu.memory_space<vmem>>, vector<1x512xf32>
    %cst_20 = arith.constant dense<0.000000e+00> : vector<1x512xf32>
    %37 = tpu.matmul %31, %8, %cst_20 {dimension_numbers = #tpu.dot_dimension_numbers<[1], [0], [0], [1], [0, 0, 1, 1], [], []>} : vector<1x128xf32>, vector<128x512xf32>, vector<1x512xf32> -> vector<1x512xf32>
    %38 = arith.addf %36, %37 : vector<1x512xf32>
    %39 = vector.extract_strided_slice %38 {offsets = [0, 0], sizes = [1, 384], strides = [1, 1]} : vector<1x512xf32> to vector<1x384xf32>
    %40 = arith.negf %39 : vector<1x384xf32>
    %41 = math.exp %40 : vector<1x384xf32>
    %cst_21 = arith.constant 1.000000e+00 : f32
    %42 = vector.broadcast %cst_21 : f32 to vector<1x384xf32>
    %43 = arith.addf %42, %41 : vector<1x384xf32>
    %44 = arith.divf %42, %43 : vector<1x384xf32>
    %45 = vector.extract_strided_slice %38 {offsets = [0, 384], sizes = [1, 128], strides = [1, 1]} : vector<1x512xf32> to vector<1x128xf32>
    %46 = math.tanh %45 : vector<1x128xf32>
    %47 = vector.extract_strided_slice %44 {offsets = [0, 0], sizes = [1, 128], strides = [1, 1]} : vector<1x384xf32> to vector<1x128xf32>
    %48 = vector.extract_strided_slice %44 {offsets = [0, 128], sizes = [1, 128], strides = [1, 1]} : vector<1x384xf32> to vector<1x128xf32>
    %49 = vector.extract_strided_slice %44 {offsets = [0, 256], sizes = [1, 128], strides = [1, 1]} : vector<1x384xf32> to vector<1x128xf32>
    %50 = arith.mulf %48, %29 : vector<1x128xf32>
    %51 = arith.mulf %47, %46 : vector<1x128xf32>
    %52 = arith.addf %50, %51 : vector<1x128xf32>
    %53 = math.tanh %52 : vector<1x128xf32>
    %54 = arith.mulf %49, %53 : vector<1x128xf32>
    %55 = vector.extract_strided_slice %54 {offsets = [0, 0], sizes = [1, 64], strides = [1, 1]} : vector<1x128xf32> to vector<1x64xf32>
    %c16 = arith.constant 16 : index
    %c0_22 = arith.constant 0 : index
    %56 = vector.load %arg17[%c16, %c0_22] : memref<32x128xf32, #tpu.memory_space<vmem>>, vector<1x64xf32>
    tpu.vector_store %arg17[%c16, %c0_22], %55 {strides = array<i32>} : memref<32x128xf32, #tpu.memory_space<vmem>>, vector<1x64xf32>,
    %57 = vector.extract_strided_slice %54 {offsets = [0, 64], sizes = [1, 64], strides = [1, 1]} : vector<1x128xf32> to vector<1x64xf32>
    %c30 = arith.constant 30 : index
    %c64_23 = arith.constant 64 : index
    %58 = vector.load %arg17[%c30, %c64_23] : memref<32x128xf32, #tpu.memory_space<vmem>>, vector<1x64xf32>
    tpu.vector_store %arg17[%c30, %c64_23], %57 {strides = array<i32>} : memref<32x128xf32, #tpu.memory_space<vmem>>, vector<1x64xf32>,
    %c2 = arith.constant 2 : index
    %c0_24 = arith.constant 0 : index
    %59 = vector.load %arg16[%c2, %c0_24] : memref<31x512xf32, #tpu.memory_space<vmem>>, vector<1x512xf32>
    %cst_25 = arith.constant dense<0.000000e+00> : vector<1x512xf32>
    %60 = tpu.matmul %54, %8, %cst_25 {dimension_numbers = #tpu.dot_dimension_numbers<[1], [0], [0], [1], [0, 0, 1, 1], [], []>} : vector<1x128xf32>, vector<128x512xf32>, vector<1x512xf32> -> vector<1x512xf32>
    %61 = arith.addf %59, %60 : vector<1x512xf32>
    %62 = vector.extract_strided_slice %61 {offsets = [0, 0], sizes = [1, 384], strides = [1, 1]} : vector<1x512xf32> to vector<1x384xf32>
    %63 = arith.negf %62 : vector<1x384xf32>
    %64 = math.exp %63 : vector<1x384xf32>
    %cst_26 = arith.constant 1.000000e+00 : f32
    %65 = vector.broadcast %cst_26 : f32 to vector<1x384xf32>
    %66 = arith.addf %65, %64 : vector<1x384xf32>
    %67 = arith.divf %65, %66 : vector<1x384xf32>
    %68 = vector.extract_strided_slice %61 {offsets = [0, 384], sizes = [1, 128], strides = [1, 1]} : vector<1x512xf32> to vector<1x128xf32>
    %69 = math.tanh %68 : vector<1x128xf32>
    %70 = vector.extract_strided_slice %67 {offsets = [0, 0], sizes = [1, 128], strides = [1, 1]} : vector<1x384xf32> to vector<1x128xf32>
    %71 = vector.extract_strided_slice %67 {offsets = [0, 128], sizes = [1, 128], strides = [1, 1]} : vector<1x384xf32> to vector<1x128xf32>
    %72 = vector.extract_strided_slice %67 {offsets = [0, 256], sizes = [1, 128], strides = [1, 1]} : vector<1x384xf32> to vector<1x128xf32>
    %73 = arith.mulf %71, %52 : vector<1x128xf32>
    %74 = arith.mulf %70, %69 : vector<1x128xf32>
    %75 = arith.addf %73, %74 : vector<1x128xf32>
    %76 = math.tanh %75 : vector<1x128xf32>
    %77 = arith.mulf %72, %76 : vector<1x128xf32>
    %78 = vector.extract_strided_slice %77 {offsets = [0, 0], sizes = [1, 64], strides = [1, 1]} : vector<1x128xf32> to vector<1x64xf32>
    %c1_27 = arith.constant 1 : index
    %c0_28 = arith.constant 0 : index
    %79 = vector.load %arg17[%c1_27, %c0_28] : memref<32x128xf32, #tpu.memory_space<vmem>>, vector<1x64xf32>
    tpu.vector_store %arg17[%c1_27, %c0_28], %78 {strides = array<i32>} : memref<32x128xf32, #tpu.memory_space<vmem>>, vector<1x64xf32>,
    %80 = vector.extract_strided_slice %77 {offsets = [0, 64], sizes = [1, 64], strides = [1, 1]} : vector<1x128xf32> to vector<1x64xf32>
    %c14 = arith.constant 14 : index
    %c64_29 = arith.constant 64 : index
    %81 = vector.load %arg17[%c14, %c64_29] : memref<32x128xf32, #tpu.memory_space<vmem>>, vector<1x64xf32>
    tpu.vector_store %arg17[%c14, %c64_29], %80 {strides = array<i32>} : memref<32x128xf32, #tpu.memory_space<vmem>>, vector<1x64xf32>,
    %c3 = arith.constant 3 : index
    %c0_30 = arith.constant 0 : index
    %82 = vector.load %arg16[%c3, %c0_30] : memref<31x512xf32, #tpu.memory_space<vmem>>, vector<1x512xf32>
    %cst_31 = arith.constant dense<0.000000e+00> : vector<1x512xf32>
    %83 = tpu.matmul %77, %8, %cst_31 {dimension_numbers = #tpu.dot_dimension_numbers<[1], [0], [0], [1], [0, 0, 1, 1], [], []>} : vector<1x128xf32>, vector<128x512xf32>, vector<1x512xf32> -> vector<1x512xf32>
    %84 = arith.addf %82, %83 : vector<1x512xf32>
    %85 = vector.extract_strided_slice %84 {offsets = [0, 0], sizes = [1, 384], strides = [1, 1]} : vector<1x512xf32> to vector<1x384xf32>
    %86 = arith.negf %85 : vector<1x384xf32>
    %87 = math.exp %86 : vector<1x384xf32>
    %cst_32 = arith.constant 1.000000e+00 : f32
    %88 = vector.broadcast %cst_32 : f32 to vector<1x384xf32>
    %89 = arith.addf %88, %87 : vector<1x384xf32>
    %90 = arith.divf %88, %89 : vector<1x384xf32>
    %91 = vector.extract_strided_slice %84 {offsets = [0, 384], sizes = [1, 128], strides = [1, 1]} : vector<1x512xf32> to vector<1x128xf32>
    %92 = math.tanh %91 : vector<1x128xf32>
    %93 = vector.extract_strided_slice %90 {offsets = [0, 0], sizes = [1, 128], strides = [1, 1]} : vector<1x384xf32> to vector<1x128xf32>
    %94 = vector.extract_strided_slice %90 {offsets = [0, 128], sizes = [1, 128], strides = [1, 1]} : vector<1x384xf32> to vector<1x128xf32>
    %95 = vector.extract_strided_slice %90 {offsets = [0, 256], sizes = [1, 128], strides = [1, 1]} : vector<1x384xf32> to vector<1x128xf32>
    %96 = arith.mulf %94, %75 : vector<1x128xf32>
    %97 = arith.mulf %93, %92 : vector<1x128xf32>
    %98 = arith.addf %96, %97 : vector<1x128xf32>
    %99 = math.tanh %98 : vector<1x128xf32>
    %100 = arith.mulf %95, %99 : vector<1x128xf32>
    %101 = vector.extract_strided_slice %100 {offsets = [0, 0], sizes = [1, 64], strides = [1, 1]} : vector<1x128xf32> to vector<1x64xf32>
    %c17 = arith.constant 17 : index
    %c0_33 = arith.constant 0 : index
    %102 = vector.load %arg17[%c17, %c0_33] : memref<32x128xf32, #tpu.memory_space<vmem>>, vector<1x64xf32>
    tpu.vector_store %arg17[%c17, %c0_33], %101 {strides = array<i32>} : memref<32x128xf32, #tpu.memory_space<vmem>>, vector<1x64xf32>,
    %103 = vector.extract_strided_slice %100 {offsets = [0, 64], sizes = [1, 64], strides = [1, 1]} : vector<1x128xf32> to vector<1x64xf32>
    %c29 = arith.constant 29 : index
    %c64_34 = arith.constant 64 : index
    %104 = vector.load %arg17[%c29, %c64_34] : memref<32x128xf32, #tpu.memory_space<vmem>>, vector<1x64xf32>
    tpu.vector_store %arg17[%c29, %c64_34], %103 {strides = array<i32>} : memref<32x128xf32, #tpu.memory_space<vmem>>, vector<1x64xf32>,
    %c4 = arith.constant 4 : index
    %c0_35 = arith.constant 0 : index
    %105 = vector.load %arg16[%c4, %c0_35] : memref<31x512xf32, #tpu.memory_space<vmem>>, vector<1x512xf32>
    %cst_36 = arith.constant dense<0.000000e+00> : vector<1x512xf32>
    %106 = tpu.matmul %100, %8, %cst_36 {dimension_numbers = #tpu.dot_dimension_numbers<[1], [0], [0], [1], [0, 0, 1, 1], [], []>} : vector<1x128xf32>, vector<128x512xf32>, vector<1x512xf32> -> vector<1x512xf32>
    %107 = arith.addf %105, %106 : vector<1x512xf32>
    %108 = vector.extract_strided_slice %107 {offsets = [0, 0], sizes = [1, 384], strides = [1, 1]} : vector<1x512xf32> to vector<1x384xf32>
    %109 = arith.negf %108 : vector<1x384xf32>
    %110 = math.exp %109 : vector<1x384xf32>
    %cst_37 = arith.constant 1.000000e+00 : f32
    %111 = vector.broadcast %cst_37 : f32 to vector<1x384xf32>
    %112 = arith.addf %111, %110 : vector<1x384xf32>
    %113 = arith.divf %111, %112 : vector<1x384xf32>
    %114 = vector.extract_strided_slice %107 {offsets = [0, 384], sizes = [1, 128], strides = [1, 1]} : vector<1x512xf32> to vector<1x128xf32>
    %115 = math.tanh %114 : vector<1x128xf32>
    %116 = vector.extract_strided_slice %113 {offsets = [0, 0], sizes = [1, 128], strides = [1, 1]} : vector<1x384xf32> to vector<1x128xf32>
    %117 = vector.extract_strided_slice %113 {offsets = [0, 128], sizes = [1, 128], strides = [1, 1]} : vector<1x384xf32> to vector<1x128xf32>
    %118 = vector.extract_strided_slice %113 {offsets = [0, 256], sizes = [1, 128], strides = [1, 1]} : vector<1x384xf32> to vector<1x128xf32>
    %119 = arith.mulf %117, %98 : vector<1x128xf32>
    %120 = arith.mulf %116, %115 : vector<1x128xf32>
    %121 = arith.addf %119, %120 : vector<1x128xf32>
    %122 = math.tanh %121 : vector<1x128xf32>
    %123 = arith.mulf %118, %122 : vector<1x128xf32>
    %124 = vector.extract_strided_slice %123 {offsets = [0, 0], sizes = [1, 64], strides = [1, 1]} : vector<1x128xf32> to vector<1x64xf32>
    %c2_38 = arith.constant 2 : index
    %c0_39 = arith.constant 0 : index
    %125 = vector.load %arg17[%c2_38, %c0_39] : memref<32x128xf32, #tpu.memory_space<vmem>>, vector<1x64xf32>
    tpu.vector_store %arg17[%c2_38, %c0_39], %124 {strides = array<i32>} : memref<32x128xf32, #tpu.memory_space<vmem>>, vector<1x64xf32>,
    %126 = vector.extract_strided_slice %123 {offsets = [0, 64], sizes = [1, 64], strides = [1, 1]} : vector<1x128xf32> to vector<1x64xf32>
    %c13 = arith.constant 13 : index
    %c64_40 = arith.constant 64 : index
    %127 = vector.load %arg17[%c13, %c64_40] : memref<32x128xf32, #tpu.memory_space<vmem>>, vector<1x64xf32>
    tpu.vector_store %arg17[%c13, %c64_40], %126 {strides = array<i32>} : memref<32x128xf32, #tpu.memory_space<vmem>>, vector<1x64xf32>,
    %c5 = arith.constant 5 : index
    %c0_41 = arith.constant 0 : index
    %128 = vector.load %arg16[%c5, %c0_41] : memref<31x512xf32, #tpu.memory_space<vmem>>, vector<1x512xf32>
    %cst_42 = arith.constant dense<0.000000e+00> : vector<1x512xf32>
    %129 = tpu.matmul %123, %8, %cst_42 {dimension_numbers = #tpu.dot_dimension_numbers<[1], [0], [0], [1], [0, 0, 1, 1], [], []>} : vector<1x128xf32>, vector<128x512xf32>, vector<1x512xf32> -> vector<1x512xf32>
    %130 = arith.addf %128, %129 : vector<1x512xf32>
    %131 = vector.extract_strided_slice %130 {offsets = [0, 0], sizes = [1, 384], strides = [1, 1]} : vector<1x512xf32> to vector<1x384xf32>
    %132 = arith.negf %131 : vector<1x384xf32>
    %133 = math.exp %132 : vector<1x384xf32>
    %cst_43 = arith.constant 1.000000e+00 : f32
    %134 = vector.broadcast %cst_43 : f32 to vector<1x384xf32>
    %135 = arith.addf %134, %133 : vector<1x384xf32>
    %136 = arith.divf %134, %135 : vector<1x384xf32>
    %137 = vector.extract_strided_slice %130 {offsets = [0, 384], sizes = [1, 128], strides = [1, 1]} : vector<1x512xf32> to vector<1x128xf32>
    %138 = math.tanh %137 : vector<1x128xf32>
    %139 = vector.extract_strided_slice %136 {offsets = [0, 0], sizes = [1, 128], strides = [1, 1]} : vector<1x384xf32> to vector<1x128xf32>
    %140 = vector.extract_strided_slice %136 {offsets = [0, 128], sizes = [1, 128], strides = [1, 1]} : vector<1x384xf32> to vector<1x128xf32>
    %141 = vector.extract_strided_slice %136 {offsets = [0, 256], sizes = [1, 128], strides = [1, 1]} : vector<1x384xf32> to vector<1x128xf32>
    %142 = arith.mulf %140, %121 : vector<1x128xf32>
    %143 = arith.mulf %139, %138 : vector<1x128xf32>
    %144 = arith.addf %142, %143 : vector<1x128xf32>
    %145 = math.tanh %144 : vector<1x128xf32>
    %146 = arith.mulf %141, %145 : vector<1x128xf32>
    %147 = vector.extract_strided_slice %146 {offsets = [0, 0], sizes = [1, 64], strides = [1, 1]} : vector<1x128xf32> to vector<1x64xf32>
    %c18 = arith.constant 18 : index
    %c0_44 = arith.constant 0 : index
    %148 = vector.load %arg17[%c18, %c0_44] : memref<32x128xf32, #tpu.memory_space<vmem>>, vector<1x64xf32>
    tpu.vector_store %arg17[%c18, %c0_44], %147 {strides = array<i32>} : memref<32x128xf32, #tpu.memory_space<vmem>>, vector<1x64xf32>,
    %149 = vector.extract_strided_slice %146 {offsets = [0, 64], sizes = [1, 64], strides = [1, 1]} : vector<1x128xf32> to vector<1x64xf32>
    %c28 = arith.constant 28 : index
    %c64_45 = arith.constant 64 : index
    %150 = vector.load %arg17[%c28, %c64_45] : memref<32x128xf32, #tpu.memory_space<vmem>>, vector<1x64xf32>
    tpu.vector_store %arg17[%c28, %c64_45], %149 {strides = array<i32>} : memref<32x128xf32, #tpu.memory_space<vmem>>, vector<1x64xf32>,
    %c6 = arith.constant 6 : index
    %c0_46 = arith.constant 0 : index
    %151 = vector.load %arg16[%c6, %c0_46] : memref<31x512xf32, #tpu.memory_space<vmem>>, vector<1x512xf32>
    %cst_47 = arith.constant dense<0.000000e+00> : vector<1x512xf32>
    %152 = tpu.matmul %146, %8, %cst_47 {dimension_numbers = #tpu.dot_dimension_numbers<[1], [0], [0], [1], [0, 0, 1, 1], [], []>} : vector<1x128xf32>, vector<128x512xf32>, vector<1x512xf32> -> vector<1x512xf32>
    %153 = arith.addf %151, %152 : vector<1x512xf32>
    %154 = vector.extract_strided_slice %153 {offsets = [0, 0], sizes = [1, 384], strides = [1, 1]} : vector<1x512xf32> to vector<1x384xf32>
    %155 = arith.negf %154 : vector<1x384xf32>
    %156 = math.exp %155 : vector<1x384xf32>
    %cst_48 = arith.constant 1.000000e+00 : f32
    %157 = vector.broadcast %cst_48 : f32 to vector<1x384xf32>
    %158 = arith.addf %157, %156 : vector<1x384xf32>
    %159 = arith.divf %157, %158 : vector<1x384xf32>
    %160 = vector.extract_strided_slice %153 {offsets = [0, 384], sizes = [1, 128], strides = [1, 1]} : vector<1x512xf32> to vector<1x128xf32>
    %161 = math.tanh %160 : vector<1x128xf32>
    %162 = vector.extract_strided_slice %159 {offsets = [0, 0], sizes = [1, 128], strides = [1, 1]} : vector<1x384xf32> to vector<1x128xf32>
    %163 = vector.extract_strided_slice %159 {offsets = [0, 128], sizes = [1, 128], strides = [1, 1]} : vector<1x384xf32> to vector<1x128xf32>
    %164 = vector.extract_strided_slice %159 {offsets = [0, 256], sizes = [1, 128], strides = [1, 1]} : vector<1x384xf32> to vector<1x128xf32>
    %165 = arith.mulf %163, %144 : vector<1x128xf32>
    %166 = arith.mulf %162, %161 : vector<1x128xf32>
    %167 = arith.addf %165, %166 : vector<1x128xf32>
    %168 = math.tanh %167 : vector<1x128xf32>
    %169 = arith.mulf %164, %168 : vector<1x128xf32>
    %170 = vector.extract_strided_slice %169 {offsets = [0, 0], sizes = [1, 64], strides = [1, 1]} : vector<1x128xf32> to vector<1x64xf32>
    %c3_49 = arith.constant 3 : index
    %c0_50 = arith.constant 0 : index
    %171 = vector.load %arg17[%c3_49, %c0_50] : memref<32x128xf32, #tpu.memory_space<vmem>>, vector<1x64xf32>
    tpu.vector_store %arg17[%c3_49, %c0_50], %170 {strides = array<i32>} : memref<32x128xf32, #tpu.memory_space<vmem>>, vector<1x64xf32>,
    %172 = vector.extract_strided_slice %169 {offsets = [0, 64], sizes = [1, 64], strides = [1, 1]} : vector<1x128xf32> to vector<1x64xf32>
    %c12 = arith.constant 12 : index
    %c64_51 = arith.constant 64 : index
    %173 = vector.load %arg17[%c12, %c64_51] : memref<32x128xf32, #tpu.memory_space<vmem>>, vector<1x64xf32>
    tpu.vector_store %arg17[%c12, %c64_51], %172 {strides = array<i32>} : memref<32x128xf32, #tpu.memory_space<vmem>>, vector<1x64xf32>,
    %c7 = arith.constant 7 : index
    %c0_52 = arith.constant 0 : index
    %174 = vector.load %arg16[%c7, %c0_52] : memref<31x512xf32, #tpu.memory_space<vmem>>, vector<1x512xf32>
    %cst_53 = arith.constant dense<0.000000e+00> : vector<1x512xf32>
    %175 = tpu.matmul %169, %8, %cst_53 {dimension_numbers = #tpu.dot_dimension_numbers<[1], [0], [0], [1], [0, 0, 1, 1], [], []>} : vector<1x128xf32>, vector<128x512xf32>, vector<1x512xf32> -> vector<1x512xf32>
    %176 = arith.addf %174, %175 : vector<1x512xf32>
    %177 = vector.extract_strided_slice %176 {offsets = [0, 0], sizes = [1, 384], strides = [1, 1]} : vector<1x512xf32> to vector<1x384xf32>
    %178 = arith.negf %177 : vector<1x384xf32>
    %179 = math.exp %178 : vector<1x384xf32>
    %cst_54 = arith.constant 1.000000e+00 : f32
    %180 = vector.broadcast %cst_54 : f32 to vector<1x384xf32>
    %181 = arith.addf %180, %179 : vector<1x384xf32>
    %182 = arith.divf %180, %181 : vector<1x384xf32>
    %183 = vector.extract_strided_slice %176 {offsets = [0, 384], sizes = [1, 128], strides = [1, 1]} : vector<1x512xf32> to vector<1x128xf32>
    %184 = math.tanh %183 : vector<1x128xf32>
    %185 = vector.extract_strided_slice %182 {offsets = [0, 0], sizes = [1, 128], strides = [1, 1]} : vector<1x384xf32> to vector<1x128xf32>
    %186 = vector.extract_strided_slice %182 {offsets = [0, 128], sizes = [1, 128], strides = [1, 1]} : vector<1x384xf32> to vector<1x128xf32>
    %187 = vector.extract_strided_slice %182 {offsets = [0, 256], sizes = [1, 128], strides = [1, 1]} : vector<1x384xf32> to vector<1x128xf32>
    %188 = arith.mulf %186, %167 : vector<1x128xf32>
    %189 = arith.mulf %185, %184 : vector<1x128xf32>
    %190 = arith.addf %188, %189 : vector<1x128xf32>
    %191 = math.tanh %190 : vector<1x128xf32>
    %192 = arith.mulf %187, %191 : vector<1x128xf32>
    %193 = vector.extract_strided_slice %192 {offsets = [0, 0], sizes = [1, 64], strides = [1, 1]} : vector<1x128xf32> to vector<1x64xf32>
    %c19 = arith.constant 19 : index
    %c0_55 = arith.constant 0 : index
    %194 = vector.load %arg17[%c19, %c0_55] : memref<32x128xf32, #tpu.memory_space<vmem>>, vector<1x64xf32>
    tpu.vector_store %arg17[%c19, %c0_55], %193 {strides = array<i32>} : memref<32x128xf32, #tpu.memory_space<vmem>>, vector<1x64xf32>,
    %195 = vector.extract_strided_slice %192 {offsets = [0, 64], sizes = [1, 64], strides = [1, 1]} : vector<1x128xf32> to vector<1x64xf32>
    %c27 = arith.constant 27 : index
    %c64_56 = arith.constant 64 : index
    %196 = vector.load %arg17[%c27, %c64_56] : memref<32x128xf32, #tpu.memory_space<vmem>>, vector<1x64xf32>
    tpu.vector_store %arg17[%c27, %c64_56], %195 {strides = array<i32>} : memref<32x128xf32, #tpu.memory_space<vmem>>, vector<1x64xf32>,
    %c8 = arith.constant 8 : index
    %c0_57 = arith.constant 0 : index
    %197 = vector.load %arg16[%c8, %c0_57] : memref<31x512xf32, #tpu.memory_space<vmem>>, vector<1x512xf32>
    %cst_58 = arith.constant dense<0.000000e+00> : vector<1x512xf32>
    %198 = tpu.matmul %192, %8, %cst_58 {dimension_numbers = #tpu.dot_dimension_numbers<[1], [0], [0], [1], [0, 0, 1, 1], [], []>} : vector<1x128xf32>, vector<128x512xf32>, vector<1x512xf32> -> vector<1x512xf32>
    %199 = arith.addf %197, %198 : vector<1x512xf32>
    %200 = vector.extract_strided_slice %199 {offsets = [0, 0], sizes = [1, 384], strides = [1, 1]} : vector<1x512xf32> to vector<1x384xf32>
    %201 = arith.negf %200 : vector<1x384xf32>
    %202 = math.exp %201 : vector<1x384xf32>
    %cst_59 = arith.constant 1.000000e+00 : f32
    %203 = vector.broadcast %cst_59 : f32 to vector<1x384xf32>
    %204 = arith.addf %203, %202 : vector<1x384xf32>
    %205 = arith.divf %203, %204 : vector<1x384xf32>
    %206 = vector.extract_strided_slice %199 {offsets = [0, 384], sizes = [1, 128], strides = [1, 1]} : vector<1x512xf32> to vector<1x128xf32>
    %207 = math.tanh %206 : vector<1x128xf32>
    %208 = vector.extract_strided_slice %205 {offsets = [0, 0], sizes = [1, 128], strides = [1, 1]} : vector<1x384xf32> to vector<1x128xf32>
    %209 = vector.extract_strided_slice %205 {offsets = [0, 128], sizes = [1, 128], strides = [1, 1]} : vector<1x384xf32> to vector<1x128xf32>
    %210 = vector.extract_strided_slice %205 {offsets = [0, 256], sizes = [1, 128], strides = [1, 1]} : vector<1x384xf32> to vector<1x128xf32>
    %211 = arith.mulf %209, %190 : vector<1x128xf32>
    %212 = arith.mulf %208, %207 : vector<1x128xf32>
    %213 = arith.addf %211, %212 : vector<1x128xf32>
    %214 = math.tanh %213 : vector<1x128xf32>
    %215 = arith.mulf %210, %214 : vector<1x128xf32>
    %216 = vector.extract_strided_slice %215 {offsets = [0, 0], sizes = [1, 64], strides = [1, 1]} : vector<1x128xf32> to vector<1x64xf32>
    %c4_60 = arith.constant 4 : index
    %c0_61 = arith.constant 0 : index
    %217 = vector.load %arg17[%c4_60, %c0_61] : memref<32x128xf32, #tpu.memory_space<vmem>>, vector<1x64xf32>
    tpu.vector_store %arg17[%c4_60, %c0_61], %216 {strides = array<i32>} : memref<32x128xf32, #tpu.memory_space<vmem>>, vector<1x64xf32>,
    %218 = vector.extract_strided_slice %215 {offsets = [0, 64], sizes = [1, 64], strides = [1, 1]} : vector<1x128xf32> to vector<1x64xf32>
    %c11 = arith.constant 11 : index
    %c64_62 = arith.constant 64 : index
    %219 = vector.load %arg17[%c11, %c64_62] : memref<32x128xf32, #tpu.memory_space<vmem>>, vector<1x64xf32>
    tpu.vector_store %arg17[%c11, %c64_62], %218 {strides = array<i32>} : memref<32x128xf32, #tpu.memory_space<vmem>>, vector<1x64xf32>,
    %c9 = arith.constant 9 : index
    %c0_63 = arith.constant 0 : index
    %220 = vector.load %arg16[%c9, %c0_63] : memref<31x512xf32, #tpu.memory_space<vmem>>, vector<1x512xf32>
    %cst_64 = arith.constant dense<0.000000e+00> : vector<1x512xf32>
    %221 = tpu.matmul %215, %8, %cst_64 {dimension_numbers = #tpu.dot_dimension_numbers<[1], [0], [0], [1], [0, 0, 1, 1], [], []>} : vector<1x128xf32>, vector<128x512xf32>, vector<1x512xf32> -> vector<1x512xf32>
    %222 = arith.addf %220, %221 : vector<1x512xf32>
    %223 = vector.extract_strided_slice %222 {offsets = [0, 0], sizes = [1, 384], strides = [1, 1]} : vector<1x512xf32> to vector<1x384xf32>
    %224 = arith.negf %223 : vector<1x384xf32>
    %225 = math.exp %224 : vector<1x384xf32>
    %cst_65 = arith.constant 1.000000e+00 : f32
    %226 = vector.broadcast %cst_65 : f32 to vector<1x384xf32>
    %227 = arith.addf %226, %225 : vector<1x384xf32>
    %228 = arith.divf %226, %227 : vector<1x384xf32>
    %229 = vector.extract_strided_slice %222 {offsets = [0, 384], sizes = [1, 128], strides = [1, 1]} : vector<1x512xf32> to vector<1x128xf32>
    %230 = math.tanh %229 : vector<1x128xf32>
    %231 = vector.extract_strided_slice %228 {offsets = [0, 0], sizes = [1, 128], strides = [1, 1]} : vector<1x384xf32> to vector<1x128xf32>
    %232 = vector.extract_strided_slice %228 {offsets = [0, 128], sizes = [1, 128], strides = [1, 1]} : vector<1x384xf32> to vector<1x128xf32>
    %233 = vector.extract_strided_slice %228 {offsets = [0, 256], sizes = [1, 128], strides = [1, 1]} : vector<1x384xf32> to vector<1x128xf32>
    %234 = arith.mulf %232, %213 : vector<1x128xf32>
    %235 = arith.mulf %231, %230 : vector<1x128xf32>
    %236 = arith.addf %234, %235 : vector<1x128xf32>
    %237 = math.tanh %236 : vector<1x128xf32>
    %238 = arith.mulf %233, %237 : vector<1x128xf32>
    %239 = vector.extract_strided_slice %238 {offsets = [0, 0], sizes = [1, 64], strides = [1, 1]} : vector<1x128xf32> to vector<1x64xf32>
    %c20 = arith.constant 20 : index
    %c0_66 = arith.constant 0 : index
    %240 = vector.load %arg17[%c20, %c0_66] : memref<32x128xf32, #tpu.memory_space<vmem>>, vector<1x64xf32>
    tpu.vector_store %arg17[%c20, %c0_66], %239 {strides = array<i32>} : memref<32x128xf32, #tpu.memory_space<vmem>>, vector<1x64xf32>,
    %241 = vector.extract_strided_slice %238 {offsets = [0, 64], sizes = [1, 64], strides = [1, 1]} : vector<1x128xf32> to vector<1x64xf32>
    %c26 = arith.constant 26 : index
    %c64_67 = arith.constant 64 : index
    %242 = vector.load %arg17[%c26, %c64_67] : memref<32x128xf32, #tpu.memory_space<vmem>>, vector<1x64xf32>
    tpu.vector_store %arg17[%c26, %c64_67], %241 {strides = array<i32>} : memref<32x128xf32, #tpu.memory_space<vmem>>, vector<1x64xf32>,
    %c10 = arith.constant 10 : index
    %c0_68 = arith.constant 0 : index
    %243 = vector.load %arg16[%c10, %c0_68] : memref<31x512xf32, #tpu.memory_space<vmem>>, vector<1x512xf32>
    %cst_69 = arith.constant dense<0.000000e+00> : vector<1x512xf32>
    %244 = tpu.matmul %238, %8, %cst_69 {dimension_numbers = #tpu.dot_dimension_numbers<[1], [0], [0], [1], [0, 0, 1, 1], [], []>} : vector<1x128xf32>, vector<128x512xf32>, vector<1x512xf32> -> vector<1x512xf32>
    %245 = arith.addf %243, %244 : vector<1x512xf32>
    %246 = vector.extract_strided_slice %245 {offsets = [0, 0], sizes = [1, 384], strides = [1, 1]} : vector<1x512xf32> to vector<1x384xf32>
    %247 = arith.negf %246 : vector<1x384xf32>
    %248 = math.exp %247 : vector<1x384xf32>
    %cst_70 = arith.constant 1.000000e+00 : f32
    %249 = vector.broadcast %cst_70 : f32 to vector<1x384xf32>
    %250 = arith.addf %249, %248 : vector<1x384xf32>
    %251 = arith.divf %249, %250 : vector<1x384xf32>
    %252 = vector.extract_strided_slice %245 {offsets = [0, 384], sizes = [1, 128], strides = [1, 1]} : vector<1x512xf32> to vector<1x128xf32>
    %253 = math.tanh %252 : vector<1x128xf32>
    %254 = vector.extract_strided_slice %251 {offsets = [0, 0], sizes = [1, 128], strides = [1, 1]} : vector<1x384xf32> to vector<1x128xf32>
    %255 = vector.extract_strided_slice %251 {offsets = [0, 128], sizes = [1, 128], strides = [1, 1]} : vector<1x384xf32> to vector<1x128xf32>
    %256 = vector.extract_strided_slice %251 {offsets = [0, 256], sizes = [1, 128], strides = [1, 1]} : vector<1x384xf32> to vector<1x128xf32>
    %257 = arith.mulf %255, %236 : vector<1x128xf32>
    %258 = arith.mulf %254, %253 : vector<1x128xf32>
    %259 = arith.addf %257, %258 : vector<1x128xf32>
    %260 = math.tanh %259 : vector<1x128xf32>
    %261 = arith.mulf %256, %260 : vector<1x128xf32>
    %262 = vector.extract_strided_slice %261 {offsets = [0, 0], sizes = [1, 64], strides = [1, 1]} : vector<1x128xf32> to vector<1x64xf32>
    %c5_71 = arith.constant 5 : index
    %c0_72 = arith.constant 0 : index
    %263 = vector.load %arg17[%c5_71, %c0_72] : memref<32x128xf32, #tpu.memory_space<vmem>>, vector<1x64xf32>
    tpu.vector_store %arg17[%c5_71, %c0_72], %262 {strides = array<i32>} : memref<32x128xf32, #tpu.memory_space<vmem>>, vector<1x64xf32>,
    %264 = vector.extract_strided_slice %261 {offsets = [0, 64], sizes = [1, 64], strides = [1, 1]} : vector<1x128xf32> to vector<1x64xf32>
    %c10_73 = arith.constant 10 : index
    %c64_74 = arith.constant 64 : index
    %265 = vector.load %arg17[%c10_73, %c64_74] : memref<32x128xf32, #tpu.memory_space<vmem>>, vector<1x64xf32>
    tpu.vector_store %arg17[%c10_73, %c64_74], %264 {strides = array<i32>} : memref<32x128xf32, #tpu.memory_space<vmem>>, vector<1x64xf32>,
    %c11_75 = arith.constant 11 : index
    %c0_76 = arith.constant 0 : index
    %266 = vector.load %arg16[%c11_75, %c0_76] : memref<31x512xf32, #tpu.memory_space<vmem>>, vector<1x512xf32>
    %cst_77 = arith.constant dense<0.000000e+00> : vector<1x512xf32>
    %267 = tpu.matmul %261, %8, %cst_77 {dimension_numbers = #tpu.dot_dimension_numbers<[1], [0], [0], [1], [0, 0, 1, 1], [], []>} : vector<1x128xf32>, vector<128x512xf32>, vector<1x512xf32> -> vector<1x512xf32>
    %268 = arith.addf %266, %267 : vector<1x512xf32>
    %269 = vector.extract_strided_slice %268 {offsets = [0, 0], sizes = [1, 384], strides = [1, 1]} : vector<1x512xf32> to vector<1x384xf32>
    %270 = arith.negf %269 : vector<1x384xf32>
    %271 = math.exp %270 : vector<1x384xf32>
    %cst_78 = arith.constant 1.000000e+00 : f32
    %272 = vector.broadcast %cst_78 : f32 to vector<1x384xf32>
    %273 = arith.addf %272, %271 : vector<1x384xf32>
    %274 = arith.divf %272, %273 : vector<1x384xf32>
    %275 = vector.extract_strided_slice %268 {offsets = [0, 384], sizes = [1, 128], strides = [1, 1]} : vector<1x512xf32> to vector<1x128xf32>
    %276 = math.tanh %275 : vector<1x128xf32>
    %277 = vector.extract_strided_slice %274 {offsets = [0, 0], sizes = [1, 128], strides = [1, 1]} : vector<1x384xf32> to vector<1x128xf32>
    %278 = vector.extract_strided_slice %274 {offsets = [0, 128], sizes = [1, 128], strides = [1, 1]} : vector<1x384xf32> to vector<1x128xf32>
    %279 = vector.extract_strided_slice %274 {offsets = [0, 256], sizes = [1, 128], strides = [1, 1]} : vector<1x384xf32> to vector<1x128xf32>
    %280 = arith.mulf %278, %259 : vector<1x128xf32>
    %281 = arith.mulf %277, %276 : vector<1x128xf32>
    %282 = arith.addf %280, %281 : vector<1x128xf32>
    %283 = math.tanh %282 : vector<1x128xf32>
    %284 = arith.mulf %279, %283 : vector<1x128xf32>
    %285 = vector.extract_strided_slice %284 {offsets = [0, 0], sizes = [1, 64], strides = [1, 1]} : vector<1x128xf32> to vector<1x64xf32>
    %c21 = arith.constant 21 : index
    %c0_79 = arith.constant 0 : index
    %286 = vector.load %arg17[%c21, %c0_79] : memref<32x128xf32, #tpu.memory_space<vmem>>, vector<1x64xf32>
    tpu.vector_store %arg17[%c21, %c0_79], %285 {strides = array<i32>} : memref<32x128xf32, #tpu.memory_space<vmem>>, vector<1x64xf32>,
    %287 = vector.extract_strided_slice %284 {offsets = [0, 64], sizes = [1, 64], strides = [1, 1]} : vector<1x128xf32> to vector<1x64xf32>
    %c25 = arith.constant 25 : index
    %c64_80 = arith.constant 64 : index
    %288 = vector.load %arg17[%c25, %c64_80] : memref<32x128xf32, #tpu.memory_space<vmem>>, vector<1x64xf32>
    tpu.vector_store %arg17[%c25, %c64_80], %287 {strides = array<i32>} : memref<32x128xf32, #tpu.memory_space<vmem>>, vector<1x64xf32>,
    %c12_81 = arith.constant 12 : index
    %c0_82 = arith.constant 0 : index
    %289 = vector.load %arg16[%c12_81, %c0_82] : memref<31x512xf32, #tpu.memory_space<vmem>>, vector<1x512xf32>
    %cst_83 = arith.constant dense<0.000000e+00> : vector<1x512xf32>
    %290 = tpu.matmul %284, %8, %cst_83 {dimension_numbers = #tpu.dot_dimension_numbers<[1], [0], [0], [1], [0, 0, 1, 1], [], []>} : vector<1x128xf32>, vector<128x512xf32>, vector<1x512xf32> -> vector<1x512xf32>
    %291 = arith.addf %289, %290 : vector<1x512xf32>
    %292 = vector.extract_strided_slice %291 {offsets = [0, 0], sizes = [1, 384], strides = [1, 1]} : vector<1x512xf32> to vector<1x384xf32>
    %293 = arith.negf %292 : vector<1x384xf32>
    %294 = math.exp %293 : vector<1x384xf32>
    %cst_84 = arith.constant 1.000000e+00 : f32
    %295 = vector.broadcast %cst_84 : f32 to vector<1x384xf32>
    %296 = arith.addf %295, %294 : vector<1x384xf32>
    %297 = arith.divf %295, %296 : vector<1x384xf32>
    %298 = vector.extract_strided_slice %291 {offsets = [0, 384], sizes = [1, 128], strides = [1, 1]} : vector<1x512xf32> to vector<1x128xf32>
    %299 = math.tanh %298 : vector<1x128xf32>
    %300 = vector.extract_strided_slice %297 {offsets = [0, 0], sizes = [1, 128], strides = [1, 1]} : vector<1x384xf32> to vector<1x128xf32>
    %301 = vector.extract_strided_slice %297 {offsets = [0, 128], sizes = [1, 128], strides = [1, 1]} : vector<1x384xf32> to vector<1x128xf32>
    %302 = vector.extract_strided_slice %297 {offsets = [0, 256], sizes = [1, 128], strides = [1, 1]} : vector<1x384xf32> to vector<1x128xf32>
    %303 = arith.mulf %301, %282 : vector<1x128xf32>
    %304 = arith.mulf %300, %299 : vector<1x128xf32>
    %305 = arith.addf %303, %304 : vector<1x128xf32>
    %306 = math.tanh %305 : vector<1x128xf32>
    %307 = arith.mulf %302, %306 : vector<1x128xf32>
    %308 = vector.extract_strided_slice %307 {offsets = [0, 0], sizes = [1, 64], strides = [1, 1]} : vector<1x128xf32> to vector<1x64xf32>
    %c6_85 = arith.constant 6 : index
    %c0_86 = arith.constant 0 : index
    %309 = vector.load %arg17[%c6_85, %c0_86] : memref<32x128xf32, #tpu.memory_space<vmem>>, vector<1x64xf32>
    tpu.vector_store %arg17[%c6_85, %c0_86], %308 {strides = array<i32>} : memref<32x128xf32, #tpu.memory_space<vmem>>, vector<1x64xf32>,
    %310 = vector.extract_strided_slice %307 {offsets = [0, 64], sizes = [1, 64], strides = [1, 1]} : vector<1x128xf32> to vector<1x64xf32>
    %c9_87 = arith.constant 9 : index
    %c64_88 = arith.constant 64 : index
    %311 = vector.load %arg17[%c9_87, %c64_88] : memref<32x128xf32, #tpu.memory_space<vmem>>, vector<1x64xf32>
    tpu.vector_store %arg17[%c9_87, %c64_88], %310 {strides = array<i32>} : memref<32x128xf32, #tpu.memory_space<vmem>>, vector<1x64xf32>,
    %c13_89 = arith.constant 13 : index
    %c0_90 = arith.constant 0 : index
    %312 = vector.load %arg16[%c13_89, %c0_90] : memref<31x512xf32, #tpu.memory_space<vmem>>, vector<1x512xf32>
    %cst_91 = arith.constant dense<0.000000e+00> : vector<1x512xf32>
    %313 = tpu.matmul %307, %8, %cst_91 {dimension_numbers = #tpu.dot_dimension_numbers<[1], [0], [0], [1], [0, 0, 1, 1], [], []>} : vector<1x128xf32>, vector<128x512xf32>, vector<1x512xf32> -> vector<1x512xf32>
    %314 = arith.addf %312, %313 : vector<1x512xf32>
    %315 = vector.extract_strided_slice %314 {offsets = [0, 0], sizes = [1, 384], strides = [1, 1]} : vector<1x512xf32> to vector<1x384xf32>
    %316 = arith.negf %315 : vector<1x384xf32>
    %317 = math.exp %316 : vector<1x384xf32>
    %cst_92 = arith.constant 1.000000e+00 : f32
    %318 = vector.broadcast %cst_92 : f32 to vector<1x384xf32>
    %319 = arith.addf %318, %317 : vector<1x384xf32>
    %320 = arith.divf %318, %319 : vector<1x384xf32>
    %321 = vector.extract_strided_slice %314 {offsets = [0, 384], sizes = [1, 128], strides = [1, 1]} : vector<1x512xf32> to vector<1x128xf32>
    %322 = math.tanh %321 : vector<1x128xf32>
    %323 = vector.extract_strided_slice %320 {offsets = [0, 0], sizes = [1, 128], strides = [1, 1]} : vector<1x384xf32> to vector<1x128xf32>
    %324 = vector.extract_strided_slice %320 {offsets = [0, 128], sizes = [1, 128], strides = [1, 1]} : vector<1x384xf32> to vector<1x128xf32>
    %325 = vector.extract_strided_slice %320 {offsets = [0, 256], sizes = [1, 128], strides = [1, 1]} : vector<1x384xf32> to vector<1x128xf32>
    %326 = arith.mulf %324, %305 : vector<1x128xf32>
    %327 = arith.mulf %323, %322 : vector<1x128xf32>
    %328 = arith.addf %326, %327 : vector<1x128xf32>
    %329 = math.tanh %328 : vector<1x128xf32>
    %330 = arith.mulf %325, %329 : vector<1x128xf32>
    %331 = vector.extract_strided_slice %330 {offsets = [0, 0], sizes = [1, 64], strides = [1, 1]} : vector<1x128xf32> to vector<1x64xf32>
    %c22 = arith.constant 22 : index
    %c0_93 = arith.constant 0 : index
    %332 = vector.load %arg17[%c22, %c0_93] : memref<32x128xf32, #tpu.memory_space<vmem>>, vector<1x64xf32>
    tpu.vector_store %arg17[%c22, %c0_93], %331 {strides = array<i32>} : memref<32x128xf32, #tpu.memory_space<vmem>>, vector<1x64xf32>,
    %333 = vector.extract_strided_slice %330 {offsets = [0, 64], sizes = [1, 64], strides = [1, 1]} : vector<1x128xf32> to vector<1x64xf32>
    %c24 = arith.constant 24 : index
    %c64_94 = arith.constant 64 : index
    %334 = vector.load %arg17[%c24, %c64_94] : memref<32x128xf32, #tpu.memory_space<vmem>>, vector<1x64xf32>
    tpu.vector_store %arg17[%c24, %c64_94], %333 {strides = array<i32>} : memref<32x128xf32, #tpu.memory_space<vmem>>, vector<1x64xf32>,
    %c14_95 = arith.constant 14 : index
    %c0_96 = arith.constant 0 : index
    %335 = vector.load %arg16[%c14_95, %c0_96] : memref<31x512xf32, #tpu.memory_space<vmem>>, vector<1x512xf32>
    %cst_97 = arith.constant dense<0.000000e+00> : vector<1x512xf32>
    %336 = tpu.matmul %330, %8, %cst_97 {dimension_numbers = #tpu.dot_dimension_numbers<[1], [0], [0], [1], [0, 0, 1, 1], [], []>} : vector<1x128xf32>, vector<128x512xf32>, vector<1x512xf32> -> vector<1x512xf32>
    %337 = arith.addf %335, %336 : vector<1x512xf32>
    %338 = vector.extract_strided_slice %337 {offsets = [0, 0], sizes = [1, 384], strides = [1, 1]} : vector<1x512xf32> to vector<1x384xf32>
    %339 = arith.negf %338 : vector<1x384xf32>
    %340 = math.exp %339 : vector<1x384xf32>
    %cst_98 = arith.constant 1.000000e+00 : f32
    %341 = vector.broadcast %cst_98 : f32 to vector<1x384xf32>
    %342 = arith.addf %341, %340 : vector<1x384xf32>
    %343 = arith.divf %341, %342 : vector<1x384xf32>
    %344 = vector.extract_strided_slice %337 {offsets = [0, 384], sizes = [1, 128], strides = [1, 1]} : vector<1x512xf32> to vector<1x128xf32>
    %345 = math.tanh %344 : vector<1x128xf32>
    %346 = vector.extract_strided_slice %343 {offsets = [0, 0], sizes = [1, 128], strides = [1, 1]} : vector<1x384xf32> to vector<1x128xf32>
    %347 = vector.extract_strided_slice %343 {offsets = [0, 128], sizes = [1, 128], strides = [1, 1]} : vector<1x384xf32> to vector<1x128xf32>
    %348 = vector.extract_strided_slice %343 {offsets = [0, 256], sizes = [1, 128], strides = [1, 1]} : vector<1x384xf32> to vector<1x128xf32>
    %349 = arith.mulf %347, %328 : vector<1x128xf32>
    %350 = arith.mulf %346, %345 : vector<1x128xf32>
    %351 = arith.addf %349, %350 : vector<1x128xf32>
    %352 = math.tanh %351 : vector<1x128xf32>
    %353 = arith.mulf %348, %352 : vector<1x128xf32>
    %354 = vector.extract_strided_slice %353 {offsets = [0, 0], sizes = [1, 64], strides = [1, 1]} : vector<1x128xf32> to vector<1x64xf32>
    %c7_99 = arith.constant 7 : index
    %c0_100 = arith.constant 0 : index
    %355 = vector.load %arg17[%c7_99, %c0_100] : memref<32x128xf32, #tpu.memory_space<vmem>>, vector<1x64xf32>
    tpu.vector_store %arg17[%c7_99, %c0_100], %354 {strides = array<i32>} : memref<32x128xf32, #tpu.memory_space<vmem>>, vector<1x64xf32>,
    %356 = vector.extract_strided_slice %353 {offsets = [0, 64], sizes = [1, 64], strides = [1, 1]} : vector<1x128xf32> to vector<1x64xf32>
    %c8_101 = arith.constant 8 : index
    %c64_102 = arith.constant 64 : index
    %357 = vector.load %arg17[%c8_101, %c64_102] : memref<32x128xf32, #tpu.memory_space<vmem>>, vector<1x64xf32>
    tpu.vector_store %arg17[%c8_101, %c64_102], %356 {strides = array<i32>} : memref<32x128xf32, #tpu.memory_space<vmem>>, vector<1x64xf32>,
    %c15_103 = arith.constant 15 : index
    %c0_104 = arith.constant 0 : index
    %358 = vector.load %arg16[%c15_103, %c0_104] : memref<31x512xf32, #tpu.memory_space<vmem>>, vector<1x512xf32>
    %cst_105 = arith.constant dense<0.000000e+00> : vector<1x512xf32>
    %359 = tpu.matmul %353, %8, %cst_105 {dimension_numbers = #tpu.dot_dimension_numbers<[1], [0], [0], [1], [0, 0, 1, 1], [], []>} : vector<1x128xf32>, vector<128x512xf32>, vector<1x512xf32> -> vector<1x512xf32>
    %360 = arith.addf %358, %359 : vector<1x512xf32>
    %361 = vector.extract_strided_slice %360 {offsets = [0, 0], sizes = [1, 384], strides = [1, 1]} : vector<1x512xf32> to vector<1x384xf32>
    %362 = arith.negf %361 : vector<1x384xf32>
    %363 = math.exp %362 : vector<1x384xf32>
    %cst_106 = arith.constant 1.000000e+00 : f32
    %364 = vector.broadcast %cst_106 : f32 to vector<1x384xf32>
    %365 = arith.addf %364, %363 : vector<1x384xf32>
    %366 = arith.divf %364, %365 : vector<1x384xf32>
    %367 = vector.extract_strided_slice %360 {offsets = [0, 384], sizes = [1, 128], strides = [1, 1]} : vector<1x512xf32> to vector<1x128xf32>
    %368 = math.tanh %367 : vector<1x128xf32>
    %369 = vector.extract_strided_slice %366 {offsets = [0, 0], sizes = [1, 128], strides = [1, 1]} : vector<1x384xf32> to vector<1x128xf32>
    %370 = vector.extract_strided_slice %366 {offsets = [0, 128], sizes = [1, 128], strides = [1, 1]} : vector<1x384xf32> to vector<1x128xf32>
    %371 = vector.extract_strided_slice %366 {offsets = [0, 256], sizes = [1, 128], strides = [1, 1]} : vector<1x384xf32> to vector<1x128xf32>
    %372 = arith.mulf %370, %351 : vector<1x128xf32>
    %373 = arith.mulf %369, %368 : vector<1x128xf32>
    %374 = arith.addf %372, %373 : vector<1x128xf32>
    %375 = math.tanh %374 : vector<1x128xf32>
    %376 = arith.mulf %371, %375 : vector<1x128xf32>
    %377 = vector.extract_strided_slice %376 {offsets = [0, 0], sizes = [1, 64], strides = [1, 1]} : vector<1x128xf32> to vector<1x64xf32>
    %c23 = arith.constant 23 : index
    %c0_107 = arith.constant 0 : index
    %378 = vector.load %arg17[%c23, %c0_107] : memref<32x128xf32, #tpu.memory_space<vmem>>, vector<1x64xf32>
    tpu.vector_store %arg17[%c23, %c0_107], %377 {strides = array<i32>} : memref<32x128xf32, #tpu.memory_space<vmem>>, vector<1x64xf32>,
    %379 = vector.extract_strided_slice %376 {offsets = [0, 64], sizes = [1, 64], strides = [1, 1]} : vector<1x128xf32> to vector<1x64xf32>
    %c23_108 = arith.constant 23 : index
    %c64_109 = arith.constant 64 : index
    %380 = vector.load %arg17[%c23_108, %c64_109] : memref<32x128xf32, #tpu.memory_space<vmem>>, vector<1x64xf32>
    tpu.vector_store %arg17[%c23_108, %c64_109], %379 {strides = array<i32>} : memref<32x128xf32, #tpu.memory_space<vmem>>, vector<1x64xf32>,
    %c16_110 = arith.constant 16 : index
    %c0_111 = arith.constant 0 : index
    %381 = vector.load %arg16[%c16_110, %c0_111] : memref<31x512xf32, #tpu.memory_space<vmem>>, vector<1x512xf32>
    %cst_112 = arith.constant dense<0.000000e+00> : vector<1x512xf32>
    %382 = tpu.matmul %376, %8, %cst_112 {dimension_numbers = #tpu.dot_dimension_numbers<[1], [0], [0], [1], [0, 0, 1, 1], [], []>} : vector<1x128xf32>, vector<128x512xf32>, vector<1x512xf32> -> vector<1x512xf32>
    %383 = arith.addf %381, %382 : vector<1x512xf32>
    %384 = vector.extract_strided_slice %383 {offsets = [0, 0], sizes = [1, 384], strides = [1, 1]} : vector<1x512xf32> to vector<1x384xf32>
    %385 = arith.negf %384 : vector<1x384xf32>
    %386 = math.exp %385 : vector<1x384xf32>
    %cst_113 = arith.constant 1.000000e+00 : f32
    %387 = vector.broadcast %cst_113 : f32 to vector<1x384xf32>
    %388 = arith.addf %387, %386 : vector<1x384xf32>
    %389 = arith.divf %387, %388 : vector<1x384xf32>
    %390 = vector.extract_strided_slice %383 {offsets = [0, 384], sizes = [1, 128], strides = [1, 1]} : vector<1x512xf32> to vector<1x128xf32>
    %391 = math.tanh %390 : vector<1x128xf32>
    %392 = vector.extract_strided_slice %389 {offsets = [0, 0], sizes = [1, 128], strides = [1, 1]} : vector<1x384xf32> to vector<1x128xf32>
    %393 = vector.extract_strided_slice %389 {offsets = [0, 128], sizes = [1, 128], strides = [1, 1]} : vector<1x384xf32> to vector<1x128xf32>
    %394 = vector.extract_strided_slice %389 {offsets = [0, 256], sizes = [1, 128], strides = [1, 1]} : vector<1x384xf32> to vector<1x128xf32>
    %395 = arith.mulf %393, %374 : vector<1x128xf32>
    %396 = arith.mulf %392, %391 : vector<1x128xf32>
    %397 = arith.addf %395, %396 : vector<1x128xf32>
    %398 = math.tanh %397 : vector<1x128xf32>
    %399 = arith.mulf %394, %398 : vector<1x128xf32>
    %400 = vector.extract_strided_slice %399 {offsets = [0, 0], sizes = [1, 64], strides = [1, 1]} : vector<1x128xf32> to vector<1x64xf32>
    %c8_114 = arith.constant 8 : index
    %c0_115 = arith.constant 0 : index
    %401 = vector.load %arg17[%c8_114, %c0_115] : memref<32x128xf32, #tpu.memory_space<vmem>>, vector<1x64xf32>
    tpu.vector_store %arg17[%c8_114, %c0_115], %400 {strides = array<i32>} : memref<32x128xf32, #tpu.memory_space<vmem>>, vector<1x64xf32>,
    %402 = vector.extract_strided_slice %399 {offsets = [0, 64], sizes = [1, 64], strides = [1, 1]} : vector<1x128xf32> to vector<1x64xf32>
    %c7_116 = arith.constant 7 : index
    %c64_117 = arith.constant 64 : index
    %403 = vector.load %arg17[%c7_116, %c64_117] : memref<32x128xf32, #tpu.memory_space<vmem>>, vector<1x64xf32>
    tpu.vector_store %arg17[%c7_116, %c64_117], %402 {strides = array<i32>} : memref<32x128xf32, #tpu.memory_space<vmem>>, vector<1x64xf32>,
    %c17_118 = arith.constant 17 : index
    %c0_119 = arith.constant 0 : index
    %404 = vector.load %arg16[%c17_118, %c0_119] : memref<31x512xf32, #tpu.memory_space<vmem>>, vector<1x512xf32>
    %cst_120 = arith.constant dense<0.000000e+00> : vector<1x512xf32>
    %405 = tpu.matmul %399, %8, %cst_120 {dimension_numbers = #tpu.dot_dimension_numbers<[1], [0], [0], [1], [0, 0, 1, 1], [], []>} : vector<1x128xf32>, vector<128x512xf32>, vector<1x512xf32> -> vector<1x512xf32>
    %406 = arith.addf %404, %405 : vector<1x512xf32>
    %407 = vector.extract_strided_slice %406 {offsets = [0, 0], sizes = [1, 384], strides = [1, 1]} : vector<1x512xf32> to vector<1x384xf32>
    %408 = arith.negf %407 : vector<1x384xf32>
    %409 = math.exp %408 : vector<1x384xf32>
    %cst_121 = arith.constant 1.000000e+00 : f32
    %410 = vector.broadcast %cst_121 : f32 to vector<1x384xf32>
    %411 = arith.addf %410, %409 : vector<1x384xf32>
    %412 = arith.divf %410, %411 : vector<1x384xf32>
    %413 = vector.extract_strided_slice %406 {offsets = [0, 384], sizes = [1, 128], strides = [1, 1]} : vector<1x512xf32> to vector<1x128xf32>
    %414 = math.tanh %413 : vector<1x128xf32>
    %415 = vector.extract_strided_slice %412 {offsets = [0, 0], sizes = [1, 128], strides = [1, 1]} : vector<1x384xf32> to vector<1x128xf32>
    %416 = vector.extract_strided_slice %412 {offsets = [0, 128], sizes = [1, 128], strides = [1, 1]} : vector<1x384xf32> to vector<1x128xf32>
    %417 = vector.extract_strided_slice %412 {offsets = [0, 256], sizes = [1, 128], strides = [1, 1]} : vector<1x384xf32> to vector<1x128xf32>
    %418 = arith.mulf %416, %397 : vector<1x128xf32>
    %419 = arith.mulf %415, %414 : vector<1x128xf32>
    %420 = arith.addf %418, %419 : vector<1x128xf32>
    %421 = math.tanh %420 : vector<1x128xf32>
    %422 = arith.mulf %417, %421 : vector<1x128xf32>
    %423 = vector.extract_strided_slice %422 {offsets = [0, 0], sizes = [1, 64], strides = [1, 1]} : vector<1x128xf32> to vector<1x64xf32>
    %c24_122 = arith.constant 24 : index
    %c0_123 = arith.constant 0 : index
    %424 = vector.load %arg17[%c24_122, %c0_123] : memref<32x128xf32, #tpu.memory_space<vmem>>, vector<1x64xf32>
    tpu.vector_store %arg17[%c24_122, %c0_123], %423 {strides = array<i32>} : memref<32x128xf32, #tpu.memory_space<vmem>>, vector<1x64xf32>,
    %425 = vector.extract_strided_slice %422 {offsets = [0, 64], sizes = [1, 64], strides = [1, 1]} : vector<1x128xf32> to vector<1x64xf32>
    %c22_124 = arith.constant 22 : index
    %c64_125 = arith.constant 64 : index
    %426 = vector.load %arg17[%c22_124, %c64_125] : memref<32x128xf32, #tpu.memory_space<vmem>>, vector<1x64xf32>
    tpu.vector_store %arg17[%c22_124, %c64_125], %425 {strides = array<i32>} : memref<32x128xf32, #tpu.memory_space<vmem>>, vector<1x64xf32>,
    %c18_126 = arith.constant 18 : index
    %c0_127 = arith.constant 0 : index
    %427 = vector.load %arg16[%c18_126, %c0_127] : memref<31x512xf32, #tpu.memory_space<vmem>>, vector<1x512xf32>
    %cst_128 = arith.constant dense<0.000000e+00> : vector<1x512xf32>
    %428 = tpu.matmul %422, %8, %cst_128 {dimension_numbers = #tpu.dot_dimension_numbers<[1], [0], [0], [1], [0, 0, 1, 1], [], []>} : vector<1x128xf32>, vector<128x512xf32>, vector<1x512xf32> -> vector<1x512xf32>
    %429 = arith.addf %427, %428 : vector<1x512xf32>
    %430 = vector.extract_strided_slice %429 {offsets = [0, 0], sizes = [1, 384], strides = [1, 1]} : vector<1x512xf32> to vector<1x384xf32>
    %431 = arith.negf %430 : vector<1x384xf32>
    %432 = math.exp %431 : vector<1x384xf32>
    %cst_129 = arith.constant 1.000000e+00 : f32
    %433 = vector.broadcast %cst_129 : f32 to vector<1x384xf32>
    %434 = arith.addf %433, %432 : vector<1x384xf32>
    %435 = arith.divf %433, %434 : vector<1x384xf32>
    %436 = vector.extract_strided_slice %429 {offsets = [0, 384], sizes = [1, 128], strides = [1, 1]} : vector<1x512xf32> to vector<1x128xf32>
    %437 = math.tanh %436 : vector<1x128xf32>
    %438 = vector.extract_strided_slice %435 {offsets = [0, 0], sizes = [1, 128], strides = [1, 1]} : vector<1x384xf32> to vector<1x128xf32>
    %439 = vector.extract_strided_slice %435 {offsets = [0, 128], sizes = [1, 128], strides = [1, 1]} : vector<1x384xf32> to vector<1x128xf32>
    %440 = vector.extract_strided_slice %435 {offsets = [0, 256], sizes = [1, 128], strides = [1, 1]} : vector<1x384xf32> to vector<1x128xf32>
    %441 = arith.mulf %439, %420 : vector<1x128xf32>
    %442 = arith.mulf %438, %437 : vector<1x128xf32>
    %443 = arith.addf %441, %442 : vector<1x128xf32>
    %444 = math.tanh %443 : vector<1x128xf32>
    %445 = arith.mulf %440, %444 : vector<1x128xf32>
    %446 = vector.extract_strided_slice %445 {offsets = [0, 0], sizes = [1, 64], strides = [1, 1]} : vector<1x128xf32> to vector<1x64xf32>
    %c9_130 = arith.constant 9 : index
    %c0_131 = arith.constant 0 : index
    %447 = vector.load %arg17[%c9_130, %c0_131] : memref<32x128xf32, #tpu.memory_space<vmem>>, vector<1x64xf32>
    tpu.vector_store %arg17[%c9_130, %c0_131], %446 {strides = array<i32>} : memref<32x128xf32, #tpu.memory_space<vmem>>, vector<1x64xf32>,
    %448 = vector.extract_strided_slice %445 {offsets = [0, 64], sizes = [1, 64], strides = [1, 1]} : vector<1x128xf32> to vector<1x64xf32>
    %c6_132 = arith.constant 6 : index
    %c64_133 = arith.constant 64 : index
    %449 = vector.load %arg17[%c6_132, %c64_133] : memref<32x128xf32, #tpu.memory_space<vmem>>, vector<1x64xf32>
    tpu.vector_store %arg17[%c6_132, %c64_133], %448 {strides = array<i32>} : memref<32x128xf32, #tpu.memory_space<vmem>>, vector<1x64xf32>,
    %c19_134 = arith.constant 19 : index
    %c0_135 = arith.constant 0 : index
    %450 = vector.load %arg16[%c19_134, %c0_135] : memref<31x512xf32, #tpu.memory_space<vmem>>, vector<1x512xf32>
    %cst_136 = arith.constant dense<0.000000e+00> : vector<1x512xf32>
    %451 = tpu.matmul %445, %8, %cst_136 {dimension_numbers = #tpu.dot_dimension_numbers<[1], [0], [0], [1], [0, 0, 1, 1], [], []>} : vector<1x128xf32>, vector<128x512xf32>, vector<1x512xf32> -> vector<1x512xf32>
    %452 = arith.addf %450, %451 : vector<1x512xf32>
    %453 = vector.extract_strided_slice %452 {offsets = [0, 0], sizes = [1, 384], strides = [1, 1]} : vector<1x512xf32> to vector<1x384xf32>
    %454 = arith.negf %453 : vector<1x384xf32>
    %455 = math.exp %454 : vector<1x384xf32>
    %cst_137 = arith.constant 1.000000e+00 : f32
    %456 = vector.broadcast %cst_137 : f32 to vector<1x384xf32>
    %457 = arith.addf %456, %455 : vector<1x384xf32>
    %458 = arith.divf %456, %457 : vector<1x384xf32>
    %459 = vector.extract_strided_slice %452 {offsets = [0, 384], sizes = [1, 128], strides = [1, 1]} : vector<1x512xf32> to vector<1x128xf32>
    %460 = math.tanh %459 : vector<1x128xf32>
    %461 = vector.extract_strided_slice %458 {offsets = [0, 0], sizes = [1, 128], strides = [1, 1]} : vector<1x384xf32> to vector<1x128xf32>
    %462 = vector.extract_strided_slice %458 {offsets = [0, 128], sizes = [1, 128], strides = [1, 1]} : vector<1x384xf32> to vector<1x128xf32>
    %463 = vector.extract_strided_slice %458 {offsets = [0, 256], sizes = [1, 128], strides = [1, 1]} : vector<1x384xf32> to vector<1x128xf32>
    %464 = arith.mulf %462, %443 : vector<1x128xf32>
    %465 = arith.mulf %461, %460 : vector<1x128xf32>
    %466 = arith.addf %464, %465 : vector<1x128xf32>
    %467 = math.tanh %466 : vector<1x128xf32>
    %468 = arith.mulf %463, %467 : vector<1x128xf32>
    %469 = vector.extract_strided_slice %468 {offsets = [0, 0], sizes = [1, 64], strides = [1, 1]} : vector<1x128xf32> to vector<1x64xf32>
    %c25_138 = arith.constant 25 : index
    %c0_139 = arith.constant 0 : index
    %470 = vector.load %arg17[%c25_138, %c0_139] : memref<32x128xf32, #tpu.memory_space<vmem>>, vector<1x64xf32>
    tpu.vector_store %arg17[%c25_138, %c0_139], %469 {strides = array<i32>} : memref<32x128xf32, #tpu.memory_space<vmem>>, vector<1x64xf32>,
    %471 = vector.extract_strided_slice %468 {offsets = [0, 64], sizes = [1, 64], strides = [1, 1]} : vector<1x128xf32> to vector<1x64xf32>
    %c21_140 = arith.constant 21 : index
    %c64_141 = arith.constant 64 : index
    %472 = vector.load %arg17[%c21_140, %c64_141] : memref<32x128xf32, #tpu.memory_space<vmem>>, vector<1x64xf32>
    tpu.vector_store %arg17[%c21_140, %c64_141], %471 {strides = array<i32>} : memref<32x128xf32, #tpu.memory_space<vmem>>, vector<1x64xf32>,
    %c20_142 = arith.constant 20 : index
    %c0_143 = arith.constant 0 : index
    %473 = vector.load %arg16[%c20_142, %c0_143] : memref<31x512xf32, #tpu.memory_space<vmem>>, vector<1x512xf32>
    %cst_144 = arith.constant dense<0.000000e+00> : vector<1x512xf32>
    %474 = tpu.matmul %468, %8, %cst_144 {dimension_numbers = #tpu.dot_dimension_numbers<[1], [0], [0], [1], [0, 0, 1, 1], [], []>} : vector<1x128xf32>, vector<128x512xf32>, vector<1x512xf32> -> vector<1x512xf32>
    %475 = arith.addf %473, %474 : vector<1x512xf32>
    %476 = vector.extract_strided_slice %475 {offsets = [0, 0], sizes = [1, 384], strides = [1, 1]} : vector<1x512xf32> to vector<1x384xf32>
    %477 = arith.negf %476 : vector<1x384xf32>
    %478 = math.exp %477 : vector<1x384xf32>
    %cst_145 = arith.constant 1.000000e+00 : f32
    %479 = vector.broadcast %cst_145 : f32 to vector<1x384xf32>
    %480 = arith.addf %479, %478 : vector<1x384xf32>
    %481 = arith.divf %479, %480 : vector<1x384xf32>
    %482 = vector.extract_strided_slice %475 {offsets = [0, 384], sizes = [1, 128], strides = [1, 1]} : vector<1x512xf32> to vector<1x128xf32>
    %483 = math.tanh %482 : vector<1x128xf32>
    %484 = vector.extract_strided_slice %481 {offsets = [0, 0], sizes = [1, 128], strides = [1, 1]} : vector<1x384xf32> to vector<1x128xf32>
    %485 = vector.extract_strided_slice %481 {offsets = [0, 128], sizes = [1, 128], strides = [1, 1]} : vector<1x384xf32> to vector<1x128xf32>
    %486 = vector.extract_strided_slice %481 {offsets = [0, 256], sizes = [1, 128], strides = [1, 1]} : vector<1x384xf32> to vector<1x128xf32>
    %487 = arith.mulf %485, %466 : vector<1x128xf32>
    %488 = arith.mulf %484, %483 : vector<1x128xf32>
    %489 = arith.addf %487, %488 : vector<1x128xf32>
    %490 = math.tanh %489 : vector<1x128xf32>
    %491 = arith.mulf %486, %490 : vector<1x128xf32>
    %492 = vector.extract_strided_slice %491 {offsets = [0, 0], sizes = [1, 64], strides = [1, 1]} : vector<1x128xf32> to vector<1x64xf32>
    %c10_146 = arith.constant 10 : index
    %c0_147 = arith.constant 0 : index
    %493 = vector.load %arg17[%c10_146, %c0_147] : memref<32x128xf32, #tpu.memory_space<vmem>>, vector<1x64xf32>
    tpu.vector_store %arg17[%c10_146, %c0_147], %492 {strides = array<i32>} : memref<32x128xf32, #tpu.memory_space<vmem>>, vector<1x64xf32>,
    %494 = vector.extract_strided_slice %491 {offsets = [0, 64], sizes = [1, 64], strides = [1, 1]} : vector<1x128xf32> to vector<1x64xf32>
    %c5_148 = arith.constant 5 : index
    %c64_149 = arith.constant 64 : index
    %495 = vector.load %arg17[%c5_148, %c64_149] : memref<32x128xf32, #tpu.memory_space<vmem>>, vector<1x64xf32>
    tpu.vector_store %arg17[%c5_148, %c64_149], %494 {strides = array<i32>} : memref<32x128xf32, #tpu.memory_space<vmem>>, vector<1x64xf32>,
    %c21_150 = arith.constant 21 : index
    %c0_151 = arith.constant 0 : index
    %496 = vector.load %arg16[%c21_150, %c0_151] : memref<31x512xf32, #tpu.memory_space<vmem>>, vector<1x512xf32>
    %cst_152 = arith.constant dense<0.000000e+00> : vector<1x512xf32>
    %497 = tpu.matmul %491, %8, %cst_152 {dimension_numbers = #tpu.dot_dimension_numbers<[1], [0], [0], [1], [0, 0, 1, 1], [], []>} : vector<1x128xf32>, vector<128x512xf32>, vector<1x512xf32> -> vector<1x512xf32>
    %498 = arith.addf %496, %497 : vector<1x512xf32>
    %499 = vector.extract_strided_slice %498 {offsets = [0, 0], sizes = [1, 384], strides = [1, 1]} : vector<1x512xf32> to vector<1x384xf32>
    %500 = arith.negf %499 : vector<1x384xf32>
    %501 = math.exp %500 : vector<1x384xf32>
    %cst_153 = arith.constant 1.000000e+00 : f32
    %502 = vector.broadcast %cst_153 : f32 to vector<1x384xf32>
    %503 = arith.addf %502, %501 : vector<1x384xf32>
    %504 = arith.divf %502, %503 : vector<1x384xf32>
    %505 = vector.extract_strided_slice %498 {offsets = [0, 384], sizes = [1, 128], strides = [1, 1]} : vector<1x512xf32> to vector<1x128xf32>
    %506 = math.tanh %505 : vector<1x128xf32>
    %507 = vector.extract_strided_slice %504 {offsets = [0, 0], sizes = [1, 128], strides = [1, 1]} : vector<1x384xf32> to vector<1x128xf32>
    %508 = vector.extract_strided_slice %504 {offsets = [0, 128], sizes = [1, 128], strides = [1, 1]} : vector<1x384xf32> to vector<1x128xf32>
    %509 = vector.extract_strided_slice %504 {offsets = [0, 256], sizes = [1, 128], strides = [1, 1]} : vector<1x384xf32> to vector<1x128xf32>
    %510 = arith.mulf %508, %489 : vector<1x128xf32>
    %511 = arith.mulf %507, %506 : vector<1x128xf32>
    %512 = arith.addf %510, %511 : vector<1x128xf32>
    %513 = math.tanh %512 : vector<1x128xf32>
    %514 = arith.mulf %509, %513 : vector<1x128xf32>
    %515 = vector.extract_strided_slice %514 {offsets = [0, 0], sizes = [1, 64], strides = [1, 1]} : vector<1x128xf32> to vector<1x64xf32>
    %c26_154 = arith.constant 26 : index
    %c0_155 = arith.constant 0 : index
    %516 = vector.load %arg17[%c26_154, %c0_155] : memref<32x128xf32, #tpu.memory_space<vmem>>, vector<1x64xf32>
    tpu.vector_store %arg17[%c26_154, %c0_155], %515 {strides = array<i32>} : memref<32x128xf32, #tpu.memory_space<vmem>>, vector<1x64xf32>,
    %517 = vector.extract_strided_slice %514 {offsets = [0, 64], sizes = [1, 64], strides = [1, 1]} : vector<1x128xf32> to vector<1x64xf32>
    %c20_156 = arith.constant 20 : index
    %c64_157 = arith.constant 64 : index
    %518 = vector.load %arg17[%c20_156, %c64_157] : memref<32x128xf32, #tpu.memory_space<vmem>>, vector<1x64xf32>
    tpu.vector_store %arg17[%c20_156, %c64_157], %517 {strides = array<i32>} : memref<32x128xf32, #tpu.memory_space<vmem>>, vector<1x64xf32>,
    %c22_158 = arith.constant 22 : index
    %c0_159 = arith.constant 0 : index
    %519 = vector.load %arg16[%c22_158, %c0_159] : memref<31x512xf32, #tpu.memory_space<vmem>>, vector<1x512xf32>
    %cst_160 = arith.constant dense<0.000000e+00> : vector<1x512xf32>
    %520 = tpu.matmul %514, %8, %cst_160 {dimension_numbers = #tpu.dot_dimension_numbers<[1], [0], [0], [1], [0, 0, 1, 1], [], []>} : vector<1x128xf32>, vector<128x512xf32>, vector<1x512xf32> -> vector<1x512xf32>
    %521 = arith.addf %519, %520 : vector<1x512xf32>
    %522 = vector.extract_strided_slice %521 {offsets = [0, 0], sizes = [1, 384], strides = [1, 1]} : vector<1x512xf32> to vector<1x384xf32>
    %523 = arith.negf %522 : vector<1x384xf32>
    %524 = math.exp %523 : vector<1x384xf32>
    %cst_161 = arith.constant 1.000000e+00 : f32
    %525 = vector.broadcast %cst_161 : f32 to vector<1x384xf32>
    %526 = arith.addf %525, %524 : vector<1x384xf32>
    %527 = arith.divf %525, %526 : vector<1x384xf32>
    %528 = vector.extract_strided_slice %521 {offsets = [0, 384], sizes = [1, 128], strides = [1, 1]} : vector<1x512xf32> to vector<1x128xf32>
    %529 = math.tanh %528 : vector<1x128xf32>
    %530 = vector.extract_strided_slice %527 {offsets = [0, 0], sizes = [1, 128], strides = [1, 1]} : vector<1x384xf32> to vector<1x128xf32>
    %531 = vector.extract_strided_slice %527 {offsets = [0, 128], sizes = [1, 128], strides = [1, 1]} : vector<1x384xf32> to vector<1x128xf32>
    %532 = vector.extract_strided_slice %527 {offsets = [0, 256], sizes = [1, 128], strides = [1, 1]} : vector<1x384xf32> to vector<1x128xf32>
    %533 = arith.mulf %531, %512 : vector<1x128xf32>
    %534 = arith.mulf %530, %529 : vector<1x128xf32>
    %535 = arith.addf %533, %534 : vector<1x128xf32>
    %536 = math.tanh %535 : vector<1x128xf32>
    %537 = arith.mulf %532, %536 : vector<1x128xf32>
    %538 = vector.extract_strided_slice %537 {offsets = [0, 0], sizes = [1, 64], strides = [1, 1]} : vector<1x128xf32> to vector<1x64xf32>
    %c11_162 = arith.constant 11 : index
    %c0_163 = arith.constant 0 : index
    %539 = vector.load %arg17[%c11_162, %c0_163] : memref<32x128xf32, #tpu.memory_space<vmem>>, vector<1x64xf32>
    tpu.vector_store %arg17[%c11_162, %c0_163], %538 {strides = array<i32>} : memref<32x128xf32, #tpu.memory_space<vmem>>, vector<1x64xf32>,
    %540 = vector.extract_strided_slice %537 {offsets = [0, 64], sizes = [1, 64], strides = [1, 1]} : vector<1x128xf32> to vector<1x64xf32>
    %c4_164 = arith.constant 4 : index
    %c64_165 = arith.constant 64 : index
    %541 = vector.load %arg17[%c4_164, %c64_165] : memref<32x128xf32, #tpu.memory_space<vmem>>, vector<1x64xf32>
    tpu.vector_store %arg17[%c4_164, %c64_165], %540 {strides = array<i32>} : memref<32x128xf32, #tpu.memory_space<vmem>>, vector<1x64xf32>,
    %c23_166 = arith.constant 23 : index
    %c0_167 = arith.constant 0 : index
    %542 = vector.load %arg16[%c23_166, %c0_167] : memref<31x512xf32, #tpu.memory_space<vmem>>, vector<1x512xf32>
    %cst_168 = arith.constant dense<0.000000e+00> : vector<1x512xf32>
    %543 = tpu.matmul %537, %8, %cst_168 {dimension_numbers = #tpu.dot_dimension_numbers<[1], [0], [0], [1], [0, 0, 1, 1], [], []>} : vector<1x128xf32>, vector<128x512xf32>, vector<1x512xf32> -> vector<1x512xf32>
    %544 = arith.addf %542, %543 : vector<1x512xf32>
    %545 = vector.extract_strided_slice %544 {offsets = [0, 0], sizes = [1, 384], strides = [1, 1]} : vector<1x512xf32> to vector<1x384xf32>
    %546 = arith.negf %545 : vector<1x384xf32>
    %547 = math.exp %546 : vector<1x384xf32>
    %cst_169 = arith.constant 1.000000e+00 : f32
    %548 = vector.broadcast %cst_169 : f32 to vector<1x384xf32>
    %549 = arith.addf %548, %547 : vector<1x384xf32>
    %550 = arith.divf %548, %549 : vector<1x384xf32>
    %551 = vector.extract_strided_slice %544 {offsets = [0, 384], sizes = [1, 128], strides = [1, 1]} : vector<1x512xf32> to vector<1x128xf32>
    %552 = math.tanh %551 : vector<1x128xf32>
    %553 = vector.extract_strided_slice %550 {offsets = [0, 0], sizes = [1, 128], strides = [1, 1]} : vector<1x384xf32> to vector<1x128xf32>
    %554 = vector.extract_strided_slice %550 {offsets = [0, 128], sizes = [1, 128], strides = [1, 1]} : vector<1x384xf32> to vector<1x128xf32>
    %555 = vector.extract_strided_slice %550 {offsets = [0, 256], sizes = [1, 128], strides = [1, 1]} : vector<1x384xf32> to vector<1x128xf32>
    %556 = arith.mulf %554, %535 : vector<1x128xf32>
    %557 = arith.mulf %553, %552 : vector<1x128xf32>
    %558 = arith.addf %556, %557 : vector<1x128xf32>
    %559 = math.tanh %558 : vector<1x128xf32>
    %560 = arith.mulf %555, %559 : vector<1x128xf32>
    %561 = vector.extract_strided_slice %560 {offsets = [0, 0], sizes = [1, 64], strides = [1, 1]} : vector<1x128xf32> to vector<1x64xf32>
    %c27_170 = arith.constant 27 : index
    %c0_171 = arith.constant 0 : index
    %562 = vector.load %arg17[%c27_170, %c0_171] : memref<32x128xf32, #tpu.memory_space<vmem>>, vector<1x64xf32>
    tpu.vector_store %arg17[%c27_170, %c0_171], %561 {strides = array<i32>} : memref<32x128xf32, #tpu.memory_space<vmem>>, vector<1x64xf32>,
    %563 = vector.extract_strided_slice %560 {offsets = [0, 64], sizes = [1, 64], strides = [1, 1]} : vector<1x128xf32> to vector<1x64xf32>
    %c19_172 = arith.constant 19 : index
    %c64_173 = arith.constant 64 : index
    %564 = vector.load %arg17[%c19_172, %c64_173] : memref<32x128xf32, #tpu.memory_space<vmem>>, vector<1x64xf32>
    tpu.vector_store %arg17[%c19_172, %c64_173], %563 {strides = array<i32>} : memref<32x128xf32, #tpu.memory_space<vmem>>, vector<1x64xf32>,
    %c24_174 = arith.constant 24 : index
    %c0_175 = arith.constant 0 : index
    %565 = vector.load %arg16[%c24_174, %c0_175] : memref<31x512xf32, #tpu.memory_space<vmem>>, vector<1x512xf32>
    %cst_176 = arith.constant dense<0.000000e+00> : vector<1x512xf32>
    %566 = tpu.matmul %560, %8, %cst_176 {dimension_numbers = #tpu.dot_dimension_numbers<[1], [0], [0], [1], [0, 0, 1, 1], [], []>} : vector<1x128xf32>, vector<128x512xf32>, vector<1x512xf32> -> vector<1x512xf32>
    %567 = arith.addf %565, %566 : vector<1x512xf32>
    %568 = vector.extract_strided_slice %567 {offsets = [0, 0], sizes = [1, 384], strides = [1, 1]} : vector<1x512xf32> to vector<1x384xf32>
    %569 = arith.negf %568 : vector<1x384xf32>
    %570 = math.exp %569 : vector<1x384xf32>
    %cst_177 = arith.constant 1.000000e+00 : f32
    %571 = vector.broadcast %cst_177 : f32 to vector<1x384xf32>
    %572 = arith.addf %571, %570 : vector<1x384xf32>
    %573 = arith.divf %571, %572 : vector<1x384xf32>
    %574 = vector.extract_strided_slice %567 {offsets = [0, 384], sizes = [1, 128], strides = [1, 1]} : vector<1x512xf32> to vector<1x128xf32>
    %575 = math.tanh %574 : vector<1x128xf32>
    %576 = vector.extract_strided_slice %573 {offsets = [0, 0], sizes = [1, 128], strides = [1, 1]} : vector<1x384xf32> to vector<1x128xf32>
    %577 = vector.extract_strided_slice %573 {offsets = [0, 128], sizes = [1, 128], strides = [1, 1]} : vector<1x384xf32> to vector<1x128xf32>
    %578 = vector.extract_strided_slice %573 {offsets = [0, 256], sizes = [1, 128], strides = [1, 1]} : vector<1x384xf32> to vector<1x128xf32>
    %579 = arith.mulf %577, %558 : vector<1x128xf32>
    %580 = arith.mulf %576, %575 : vector<1x128xf32>
    %581 = arith.addf %579, %580 : vector<1x128xf32>
    %582 = math.tanh %581 : vector<1x128xf32>
    %583 = arith.mulf %578, %582 : vector<1x128xf32>
    %584 = vector.extract_strided_slice %583 {offsets = [0, 0], sizes = [1, 64], strides = [1, 1]} : vector<1x128xf32> to vector<1x64xf32>
    %c12_178 = arith.constant 12 : index
    %c0_179 = arith.constant 0 : index
    %585 = vector.load %arg17[%c12_178, %c0_179] : memref<32x128xf32, #tpu.memory_space<vmem>>, vector<1x64xf32>
    tpu.vector_store %arg17[%c12_178, %c0_179], %584 {strides = array<i32>} : memref<32x128xf32, #tpu.memory_space<vmem>>, vector<1x64xf32>,
    %586 = vector.extract_strided_slice %583 {offsets = [0, 64], sizes = [1, 64], strides = [1, 1]} : vector<1x128xf32> to vector<1x64xf32>
    %c3_180 = arith.constant 3 : index
    %c64_181 = arith.constant 64 : index
    %587 = vector.load %arg17[%c3_180, %c64_181] : memref<32x128xf32, #tpu.memory_space<vmem>>, vector<1x64xf32>
    tpu.vector_store %arg17[%c3_180, %c64_181], %586 {strides = array<i32>} : memref<32x128xf32, #tpu.memory_space<vmem>>, vector<1x64xf32>,
    %c25_182 = arith.constant 25 : index
    %c0_183 = arith.constant 0 : index
    %588 = vector.load %arg16[%c25_182, %c0_183] : memref<31x512xf32, #tpu.memory_space<vmem>>, vector<1x512xf32>
    %cst_184 = arith.constant dense<0.000000e+00> : vector<1x512xf32>
    %589 = tpu.matmul %583, %8, %cst_184 {dimension_numbers = #tpu.dot_dimension_numbers<[1], [0], [0], [1], [0, 0, 1, 1], [], []>} : vector<1x128xf32>, vector<128x512xf32>, vector<1x512xf32> -> vector<1x512xf32>
    %590 = arith.addf %588, %589 : vector<1x512xf32>
    %591 = vector.extract_strided_slice %590 {offsets = [0, 0], sizes = [1, 384], strides = [1, 1]} : vector<1x512xf32> to vector<1x384xf32>
    %592 = arith.negf %591 : vector<1x384xf32>
    %593 = math.exp %592 : vector<1x384xf32>
    %cst_185 = arith.constant 1.000000e+00 : f32
    %594 = vector.broadcast %cst_185 : f32 to vector<1x384xf32>
    %595 = arith.addf %594, %593 : vector<1x384xf32>
    %596 = arith.divf %594, %595 : vector<1x384xf32>
    %597 = vector.extract_strided_slice %590 {offsets = [0, 384], sizes = [1, 128], strides = [1, 1]} : vector<1x512xf32> to vector<1x128xf32>
    %598 = math.tanh %597 : vector<1x128xf32>
    %599 = vector.extract_strided_slice %596 {offsets = [0, 0], sizes = [1, 128], strides = [1, 1]} : vector<1x384xf32> to vector<1x128xf32>
    %600 = vector.extract_strided_slice %596 {offsets = [0, 128], sizes = [1, 128], strides = [1, 1]} : vector<1x384xf32> to vector<1x128xf32>
    %601 = vector.extract_strided_slice %596 {offsets = [0, 256], sizes = [1, 128], strides = [1, 1]} : vector<1x384xf32> to vector<1x128xf32>
    %602 = arith.mulf %600, %581 : vector<1x128xf32>
    %603 = arith.mulf %599, %598 : vector<1x128xf32>
    %604 = arith.addf %602, %603 : vector<1x128xf32>
    %605 = math.tanh %604 : vector<1x128xf32>
    %606 = arith.mulf %601, %605 : vector<1x128xf32>
    %607 = vector.extract_strided_slice %606 {offsets = [0, 0], sizes = [1, 64], strides = [1, 1]} : vector<1x128xf32> to vector<1x64xf32>
    %c28_186 = arith.constant 28 : index
    %c0_187 = arith.constant 0 : index
    %608 = vector.load %arg17[%c28_186, %c0_187] : memref<32x128xf32, #tpu.memory_space<vmem>>, vector<1x64xf32>
    tpu.vector_store %arg17[%c28_186, %c0_187], %607 {strides = array<i32>} : memref<32x128xf32, #tpu.memory_space<vmem>>, vector<1x64xf32>,
    %609 = vector.extract_strided_slice %606 {offsets = [0, 64], sizes = [1, 64], strides = [1, 1]} : vector<1x128xf32> to vector<1x64xf32>
    %c18_188 = arith.constant 18 : index
    %c64_189 = arith.constant 64 : index
    %610 = vector.load %arg17[%c18_188, %c64_189] : memref<32x128xf32, #tpu.memory_space<vmem>>, vector<1x64xf32>
    tpu.vector_store %arg17[%c18_188, %c64_189], %609 {strides = array<i32>} : memref<32x128xf32, #tpu.memory_space<vmem>>, vector<1x64xf32>,
    %c26_190 = arith.constant 26 : index
    %c0_191 = arith.constant 0 : index
    %611 = vector.load %arg16[%c26_190, %c0_191] : memref<31x512xf32, #tpu.memory_space<vmem>>, vector<1x512xf32>
    %cst_192 = arith.constant dense<0.000000e+00> : vector<1x512xf32>
    %612 = tpu.matmul %606, %8, %cst_192 {dimension_numbers = #tpu.dot_dimension_numbers<[1], [0], [0], [1], [0, 0, 1, 1], [], []>} : vector<1x128xf32>, vector<128x512xf32>, vector<1x512xf32> -> vector<1x512xf32>
    %613 = arith.addf %611, %612 : vector<1x512xf32>
    %614 = vector.extract_strided_slice %613 {offsets = [0, 0], sizes = [1, 384], strides = [1, 1]} : vector<1x512xf32> to vector<1x384xf32>
    %615 = arith.negf %614 : vector<1x384xf32>
    %616 = math.exp %615 : vector<1x384xf32>
    %cst_193 = arith.constant 1.000000e+00 : f32
    %617 = vector.broadcast %cst_193 : f32 to vector<1x384xf32>
    %618 = arith.addf %617, %616 : vector<1x384xf32>
    %619 = arith.divf %617, %618 : vector<1x384xf32>
    %620 = vector.extract_strided_slice %613 {offsets = [0, 384], sizes = [1, 128], strides = [1, 1]} : vector<1x512xf32> to vector<1x128xf32>
    %621 = math.tanh %620 : vector<1x128xf32>
    %622 = vector.extract_strided_slice %619 {offsets = [0, 0], sizes = [1, 128], strides = [1, 1]} : vector<1x384xf32> to vector<1x128xf32>
    %623 = vector.extract_strided_slice %619 {offsets = [0, 128], sizes = [1, 128], strides = [1, 1]} : vector<1x384xf32> to vector<1x128xf32>
    %624 = vector.extract_strided_slice %619 {offsets = [0, 256], sizes = [1, 128], strides = [1, 1]} : vector<1x384xf32> to vector<1x128xf32>
    %625 = arith.mulf %623, %604 : vector<1x128xf32>
    %626 = arith.mulf %622, %621 : vector<1x128xf32>
    %627 = arith.addf %625, %626 : vector<1x128xf32>
    %628 = math.tanh %627 : vector<1x128xf32>
    %629 = arith.mulf %624, %628 : vector<1x128xf32>
    %630 = vector.extract_strided_slice %629 {offsets = [0, 0], sizes = [1, 64], strides = [1, 1]} : vector<1x128xf32> to vector<1x64xf32>
    %c13_194 = arith.constant 13 : index
    %c0_195 = arith.constant 0 : index
    %631 = vector.load %arg17[%c13_194, %c0_195] : memref<32x128xf32, #tpu.memory_space<vmem>>, vector<1x64xf32>
    tpu.vector_store %arg17[%c13_194, %c0_195], %630 {strides = array<i32>} : memref<32x128xf32, #tpu.memory_space<vmem>>, vector<1x64xf32>,
    %632 = vector.extract_strided_slice %629 {offsets = [0, 64], sizes = [1, 64], strides = [1, 1]} : vector<1x128xf32> to vector<1x64xf32>
    %c2_196 = arith.constant 2 : index
    %c64_197 = arith.constant 64 : index
    %633 = vector.load %arg17[%c2_196, %c64_197] : memref<32x128xf32, #tpu.memory_space<vmem>>, vector<1x64xf32>
    tpu.vector_store %arg17[%c2_196, %c64_197], %632 {strides = array<i32>} : memref<32x128xf32, #tpu.memory_space<vmem>>, vector<1x64xf32>,
    %c27_198 = arith.constant 27 : index
    %c0_199 = arith.constant 0 : index
    %634 = vector.load %arg16[%c27_198, %c0_199] : memref<31x512xf32, #tpu.memory_space<vmem>>, vector<1x512xf32>
    %cst_200 = arith.constant dense<0.000000e+00> : vector<1x512xf32>
    %635 = tpu.matmul %629, %8, %cst_200 {dimension_numbers = #tpu.dot_dimension_numbers<[1], [0], [0], [1], [0, 0, 1, 1], [], []>} : vector<1x128xf32>, vector<128x512xf32>, vector<1x512xf32> -> vector<1x512xf32>
    %636 = arith.addf %634, %635 : vector<1x512xf32>
    %637 = vector.extract_strided_slice %636 {offsets = [0, 0], sizes = [1, 384], strides = [1, 1]} : vector<1x512xf32> to vector<1x384xf32>
    %638 = arith.negf %637 : vector<1x384xf32>
    %639 = math.exp %638 : vector<1x384xf32>
    %cst_201 = arith.constant 1.000000e+00 : f32
    %640 = vector.broadcast %cst_201 : f32 to vector<1x384xf32>
    %641 = arith.addf %640, %639 : vector<1x384xf32>
    %642 = arith.divf %640, %641 : vector<1x384xf32>
    %643 = vector.extract_strided_slice %636 {offsets = [0, 384], sizes = [1, 128], strides = [1, 1]} : vector<1x512xf32> to vector<1x128xf32>
    %644 = math.tanh %643 : vector<1x128xf32>
    %645 = vector.extract_strided_slice %642 {offsets = [0, 0], sizes = [1, 128], strides = [1, 1]} : vector<1x384xf32> to vector<1x128xf32>
    %646 = vector.extract_strided_slice %642 {offsets = [0, 128], sizes = [1, 128], strides = [1, 1]} : vector<1x384xf32> to vector<1x128xf32>
    %647 = vector.extract_strided_slice %642 {offsets = [0, 256], sizes = [1, 128], strides = [1, 1]} : vector<1x384xf32> to vector<1x128xf32>
    %648 = arith.mulf %646, %627 : vector<1x128xf32>
    %649 = arith.mulf %645, %644 : vector<1x128xf32>
    %650 = arith.addf %648, %649 : vector<1x128xf32>
    %651 = math.tanh %650 : vector<1x128xf32>
    %652 = arith.mulf %647, %651 : vector<1x128xf32>
    %653 = vector.extract_strided_slice %652 {offsets = [0, 0], sizes = [1, 64], strides = [1, 1]} : vector<1x128xf32> to vector<1x64xf32>
    %c29_202 = arith.constant 29 : index
    %c0_203 = arith.constant 0 : index
    %654 = vector.load %arg17[%c29_202, %c0_203] : memref<32x128xf32, #tpu.memory_space<vmem>>, vector<1x64xf32>
    tpu.vector_store %arg17[%c29_202, %c0_203], %653 {strides = array<i32>} : memref<32x128xf32, #tpu.memory_space<vmem>>, vector<1x64xf32>,
    %655 = vector.extract_strided_slice %652 {offsets = [0, 64], sizes = [1, 64], strides = [1, 1]} : vector<1x128xf32> to vector<1x64xf32>
    %c17_204 = arith.constant 17 : index
    %c64_205 = arith.constant 64 : index
    %656 = vector.load %arg17[%c17_204, %c64_205] : memref<32x128xf32, #tpu.memory_space<vmem>>, vector<1x64xf32>
    tpu.vector_store %arg17[%c17_204, %c64_205], %655 {strides = array<i32>} : memref<32x128xf32, #tpu.memory_space<vmem>>, vector<1x64xf32>,
    %c28_206 = arith.constant 28 : index
    %c0_207 = arith.constant 0 : index
    %657 = vector.load %arg16[%c28_206, %c0_207] : memref<31x512xf32, #tpu.memory_space<vmem>>, vector<1x512xf32>
    %cst_208 = arith.constant dense<0.000000e+00> : vector<1x512xf32>
    %658 = tpu.matmul %652, %8, %cst_208 {dimension_numbers = #tpu.dot_dimension_numbers<[1], [0], [0], [1], [0, 0, 1, 1], [], []>} : vector<1x128xf32>, vector<128x512xf32>, vector<1x512xf32> -> vector<1x512xf32>
    %659 = arith.addf %657, %658 : vector<1x512xf32>
    %660 = vector.extract_strided_slice %659 {offsets = [0, 0], sizes = [1, 384], strides = [1, 1]} : vector<1x512xf32> to vector<1x384xf32>
    %661 = arith.negf %660 : vector<1x384xf32>
    %662 = math.exp %661 : vector<1x384xf32>
    %cst_209 = arith.constant 1.000000e+00 : f32
    %663 = vector.broadcast %cst_209 : f32 to vector<1x384xf32>
    %664 = arith.addf %663, %662 : vector<1x384xf32>
    %665 = arith.divf %663, %664 : vector<1x384xf32>
    %666 = vector.extract_strided_slice %659 {offsets = [0, 384], sizes = [1, 128], strides = [1, 1]} : vector<1x512xf32> to vector<1x128xf32>
    %667 = math.tanh %666 : vector<1x128xf32>
    %668 = vector.extract_strided_slice %665 {offsets = [0, 0], sizes = [1, 128], strides = [1, 1]} : vector<1x384xf32> to vector<1x128xf32>
    %669 = vector.extract_strided_slice %665 {offsets = [0, 128], sizes = [1, 128], strides = [1, 1]} : vector<1x384xf32> to vector<1x128xf32>
    %670 = vector.extract_strided_slice %665 {offsets = [0, 256], sizes = [1, 128], strides = [1, 1]} : vector<1x384xf32> to vector<1x128xf32>
    %671 = arith.mulf %669, %650 : vector<1x128xf32>
    %672 = arith.mulf %668, %667 : vector<1x128xf32>
    %673 = arith.addf %671, %672 : vector<1x128xf32>
    %674 = math.tanh %673 : vector<1x128xf32>
    %675 = arith.mulf %670, %674 : vector<1x128xf32>
    %676 = vector.extract_strided_slice %675 {offsets = [0, 0], sizes = [1, 64], strides = [1, 1]} : vector<1x128xf32> to vector<1x64xf32>
    %c14_210 = arith.constant 14 : index
    %c0_211 = arith.constant 0 : index
    %677 = vector.load %arg17[%c14_210, %c0_211] : memref<32x128xf32, #tpu.memory_space<vmem>>, vector<1x64xf32>
    tpu.vector_store %arg17[%c14_210, %c0_211], %676 {strides = array<i32>} : memref<32x128xf32, #tpu.memory_space<vmem>>, vector<1x64xf32>,
    %678 = vector.extract_strided_slice %675 {offsets = [0, 64], sizes = [1, 64], strides = [1, 1]} : vector<1x128xf32> to vector<1x64xf32>
    %c1_212 = arith.constant 1 : index
    %c64_213 = arith.constant 64 : index
    %679 = vector.load %arg17[%c1_212, %c64_213] : memref<32x128xf32, #tpu.memory_space<vmem>>, vector<1x64xf32>
    tpu.vector_store %arg17[%c1_212, %c64_213], %678 {strides = array<i32>} : memref<32x128xf32, #tpu.memory_space<vmem>>, vector<1x64xf32>,
    %c29_214 = arith.constant 29 : index
    %c0_215 = arith.constant 0 : index
    %680 = vector.load %arg16[%c29_214, %c0_215] : memref<31x512xf32, #tpu.memory_space<vmem>>, vector<1x512xf32>
    %cst_216 = arith.constant dense<0.000000e+00> : vector<1x512xf32>
    %681 = tpu.matmul %675, %8, %cst_216 {dimension_numbers = #tpu.dot_dimension_numbers<[1], [0], [0], [1], [0, 0, 1, 1], [], []>} : vector<1x128xf32>, vector<128x512xf32>, vector<1x512xf32> -> vector<1x512xf32>
    %682 = arith.addf %680, %681 : vector<1x512xf32>
    %683 = vector.extract_strided_slice %682 {offsets = [0, 0], sizes = [1, 384], strides = [1, 1]} : vector<1x512xf32> to vector<1x384xf32>
    %684 = arith.negf %683 : vector<1x384xf32>
    %685 = math.exp %684 : vector<1x384xf32>
    %cst_217 = arith.constant 1.000000e+00 : f32
    %686 = vector.broadcast %cst_217 : f32 to vector<1x384xf32>
    %687 = arith.addf %686, %685 : vector<1x384xf32>
    %688 = arith.divf %686, %687 : vector<1x384xf32>
    %689 = vector.extract_strided_slice %682 {offsets = [0, 384], sizes = [1, 128], strides = [1, 1]} : vector<1x512xf32> to vector<1x128xf32>
    %690 = math.tanh %689 : vector<1x128xf32>
    %691 = vector.extract_strided_slice %688 {offsets = [0, 0], sizes = [1, 128], strides = [1, 1]} : vector<1x384xf32> to vector<1x128xf32>
    %692 = vector.extract_strided_slice %688 {offsets = [0, 128], sizes = [1, 128], strides = [1, 1]} : vector<1x384xf32> to vector<1x128xf32>
    %693 = vector.extract_strided_slice %688 {offsets = [0, 256], sizes = [1, 128], strides = [1, 1]} : vector<1x384xf32> to vector<1x128xf32>
    %694 = arith.mulf %692, %673 : vector<1x128xf32>
    %695 = arith.mulf %691, %690 : vector<1x128xf32>
    %696 = arith.addf %694, %695 : vector<1x128xf32>
    %697 = math.tanh %696 : vector<1x128xf32>
    %698 = arith.mulf %693, %697 : vector<1x128xf32>
    %699 = vector.extract_strided_slice %698 {offsets = [0, 0], sizes = [1, 64], strides = [1, 1]} : vector<1x128xf32> to vector<1x64xf32>
    %c30_218 = arith.constant 30 : index
    %c0_219 = arith.constant 0 : index
    %700 = vector.load %arg17[%c30_218, %c0_219] : memref<32x128xf32, #tpu.memory_space<vmem>>, vector<1x64xf32>
    tpu.vector_store %arg17[%c30_218, %c0_219], %699 {strides = array<i32>} : memref<32x128xf32, #tpu.memory_space<vmem>>, vector<1x64xf32>,
    %701 = vector.extract_strided_slice %698 {offsets = [0, 64], sizes = [1, 64], strides = [1, 1]} : vector<1x128xf32> to vector<1x64xf32>
    %c16_220 = arith.constant 16 : index
    %c64_221 = arith.constant 64 : index
    %702 = vector.load %arg17[%c16_220, %c64_221] : memref<32x128xf32, #tpu.memory_space<vmem>>, vector<1x64xf32>
    tpu.vector_store %arg17[%c16_220, %c64_221], %701 {strides = array<i32>} : memref<32x128xf32, #tpu.memory_space<vmem>>, vector<1x64xf32>,
    %c30_222 = arith.constant 30 : index
    %c0_223 = arith.constant 0 : index
    %703 = vector.load %arg16[%c30_222, %c0_223] : memref<31x512xf32, #tpu.memory_space<vmem>>, vector<1x512xf32>
    %cst_224 = arith.constant dense<0.000000e+00> : vector<1x512xf32>
    %704 = tpu.matmul %698, %8, %cst_224 {dimension_numbers = #tpu.dot_dimension_numbers<[1], [0], [0], [1], [0, 0, 1, 1], [], []>} : vector<1x128xf32>, vector<128x512xf32>, vector<1x512xf32> -> vector<1x512xf32>
    %705 = arith.addf %703, %704 : vector<1x512xf32>
    %706 = vector.extract_strided_slice %705 {offsets = [0, 0], sizes = [1, 384], strides = [1, 1]} : vector<1x512xf32> to vector<1x384xf32>
    %707 = arith.negf %706 : vector<1x384xf32>
    %708 = math.exp %707 : vector<1x384xf32>
    %cst_225 = arith.constant 1.000000e+00 : f32
    %709 = vector.broadcast %cst_225 : f32 to vector<1x384xf32>
    %710 = arith.addf %709, %708 : vector<1x384xf32>
    %711 = arith.divf %709, %710 : vector<1x384xf32>
    %712 = vector.extract_strided_slice %705 {offsets = [0, 384], sizes = [1, 128], strides = [1, 1]} : vector<1x512xf32> to vector<1x128xf32>
    %713 = math.tanh %712 : vector<1x128xf32>
    %714 = vector.extract_strided_slice %711 {offsets = [0, 0], sizes = [1, 128], strides = [1, 1]} : vector<1x384xf32> to vector<1x128xf32>
    %715 = vector.extract_strided_slice %711 {offsets = [0, 128], sizes = [1, 128], strides = [1, 1]} : vector<1x384xf32> to vector<1x128xf32>
    %716 = vector.extract_strided_slice %711 {offsets = [0, 256], sizes = [1, 128], strides = [1, 1]} : vector<1x384xf32> to vector<1x128xf32>
    %717 = arith.mulf %715, %696 : vector<1x128xf32>
    %718 = arith.mulf %714, %713 : vector<1x128xf32>
    %719 = arith.addf %717, %718 : vector<1x128xf32>
    %720 = math.tanh %719 : vector<1x128xf32>
    %721 = arith.mulf %716, %720 : vector<1x128xf32>
    %722 = vector.extract_strided_slice %721 {offsets = [0, 0], sizes = [1, 64], strides = [1, 1]} : vector<1x128xf32> to vector<1x64xf32>
    %c15_226 = arith.constant 15 : index
    %c0_227 = arith.constant 0 : index
    %723 = vector.load %arg17[%c15_226, %c0_227] : memref<32x128xf32, #tpu.memory_space<vmem>>, vector<1x64xf32>
    tpu.vector_store %arg17[%c15_226, %c0_227], %722 {strides = array<i32>} : memref<32x128xf32, #tpu.memory_space<vmem>>, vector<1x64xf32>,
    %724 = vector.extract_strided_slice %721 {offsets = [0, 64], sizes = [1, 64], strides = [1, 1]} : vector<1x128xf32> to vector<1x64xf32>
    %c0_228 = arith.constant 0 : index
    %c64_229 = arith.constant 64 : index
    %725 = vector.load %arg17[%c0_228, %c64_229] : memref<32x128xf32, #tpu.memory_space<vmem>>, vector<1x64xf32>
    tpu.vector_store %arg17[%c0_228, %c64_229], %724 {strides = array<i32>} : memref<32x128xf32, #tpu.memory_space<vmem>>, vector<1x64xf32>,
    %c0_230 = arith.constant 0 : index
    %c0_231 = arith.constant 0 : index
    %726 = vector.load %arg17[%c0_230, %c0_231] : memref<32x128xf32, #tpu.memory_space<vmem>>, vector<32x128xf32>
    %727 = arith.truncf %726 : vector<32x128xf32> to vector<32x128xbf16>
    %c0_232 = arith.constant 0 : index
    %c0_233 = arith.constant 0 : index
    %728 = vector.load %arg4[%c0_232, %c0_233] : memref<128x384xbf16, #tpu.memory_space<vmem>>, vector<128x384xbf16>
    %cst_234 = arith.constant dense<0.000000e+00> : vector<32x384xf32>
    %729 = tpu.matmul %727, %728, %cst_234 {dimension_numbers = #tpu.dot_dimension_numbers<[1], [0], [0], [1], [0, 0, 1, 1], [], []>} : vector<32x128xbf16>, vector<128x384xbf16>, vector<32x384xf32> -> vector<32x384xf32>
    %c0_235 = arith.constant 0 : index
    %c0_236 = arith.constant 0 : index
    %730 = vector.load %arg6[%c0_235, %c0_236] : memref<1x32xf32, #tpu.memory_space<vmem>>, vector<1x32xf32>
    %731 = vector.extract_strided_slice %729 {offsets = [0, 0], sizes = [32, 32], strides = [1, 1]} : vector<32x384xf32> to vector<32x32xf32>
    %732 = arith.truncf %731 : vector<32x32xf32> to vector<32x32xbf16>
    %733 = vector.extract_strided_slice %729 {offsets = [0, 128], sizes = [32, 32], strides = [1, 1]} : vector<32x384xf32> to vector<32x32xf32>
    %734 = arith.truncf %733 : vector<32x32xf32> to vector<32x32xbf16>
    %735 = vector.extract_strided_slice %729 {offsets = [0, 256], sizes = [32, 32], strides = [1, 1]} : vector<32x384xf32> to vector<32x32xf32>
    %736 = arith.truncf %735 : vector<32x32xf32> to vector<32x32xbf16>
    %cst_237 = arith.constant dense<0.000000e+00> : vector<32x32xf32>
    %737 = tpu.matmul %732, %734, %cst_237 {dimension_numbers = #tpu.dot_dimension_numbers<[1], [1], [0], [0], [0, 0, 1, 0], [], []>} : vector<32x32xbf16>, vector<32x32xbf16>, vector<32x32xf32> -> vector<32x32xf32>
    %738 = vector.broadcast %730 : vector<1x32xf32> to vector<32x32xf32>
    %739 = arith.addf %737, %738 : vector<32x32xf32>
    %cst_238 = arith.constant dense<0xFF800000> : vector<32xf32>
    %740 = vector.multi_reduction <maximumf>, %739, %cst_238 [1] : vector<32x32xf32> to vector<32xf32>
    %741 = vector.shape_cast %740 : vector<32xf32> to vector<32x1xf32>
    %742 = vector.broadcast %741 : vector<32x1xf32> to vector<32x32xf32>
    %743 = arith.subf %739, %742 : vector<32x32xf32>
    %744 = math.exp %743 : vector<32x32xf32>
    %cst_239 = arith.constant dense<0.000000e+00> : vector<32xf32>
    %745 = vector.multi_reduction <add>, %744, %cst_239 [1] : vector<32x32xf32> to vector<32xf32>
    %746 = vector.shape_cast %745 : vector<32xf32> to vector<32x1xf32>
    %747 = tpu.reciprocal %746 {approx = true} : vector<32x1xf32> -> vector<32x1xf32>
    %748 = vector.broadcast %747 : vector<32x1xf32> to vector<32x32xf32>
    %749 = arith.mulf %744, %748 : vector<32x32xf32>
    %750 = arith.truncf %749 : vector<32x32xf32> to vector<32x32xbf16>
    %cst_240 = arith.constant dense<0.000000e+00> : vector<32x32xf32>
    %751 = tpu.matmul %750, %736, %cst_240 {dimension_numbers = #tpu.dot_dimension_numbers<[1], [0], [0], [1], [0, 0, 1, 1], [], []>} : vector<32x32xbf16>, vector<32x32xbf16>, vector<32x32xf32> -> vector<32x32xf32>
    %752 = arith.truncf %751 : vector<32x32xf32> to vector<32x32xbf16>
    %c0_241 = arith.constant 0 : index
    %c0_242 = arith.constant 0 : index
    %753 = vector.load %arg5[%c0_241, %c0_242] : memref<128x128xbf16, #tpu.memory_space<vmem>>, vector<32x128xbf16>
    %cst_243 = arith.constant dense<0.000000e+00> : vector<32x128xf32>
    %754 = tpu.matmul %752, %753, %cst_243 {dimension_numbers = #tpu.dot_dimension_numbers<[1], [0], [0], [1], [0, 0, 1, 1], [], []>} : vector<32x32xbf16>, vector<32x128xbf16>, vector<32x128xf32> -> vector<32x128xf32>
    %755 = arith.addf %726, %754 : vector<32x128xf32>
    %756 = vector.extract_strided_slice %729 {offsets = [0, 32], sizes = [32, 32], strides = [1, 1]} : vector<32x384xf32> to vector<32x32xf32>
    %757 = arith.truncf %756 : vector<32x32xf32> to vector<32x32xbf16>
    %758 = vector.extract_strided_slice %729 {offsets = [0, 160], sizes = [32, 32], strides = [1, 1]} : vector<32x384xf32> to vector<32x32xf32>
    %759 = arith.truncf %758 : vector<32x32xf32> to vector<32x32xbf16>
    %760 = vector.extract_strided_slice %729 {offsets = [0, 288], sizes = [32, 32], strides = [1, 1]} : vector<32x384xf32> to vector<32x32xf32>
    %761 = arith.truncf %760 : vector<32x32xf32> to vector<32x32xbf16>
    %cst_244 = arith.constant dense<0.000000e+00> : vector<32x32xf32>
    %762 = tpu.matmul %757, %759, %cst_244 {dimension_numbers = #tpu.dot_dimension_numbers<[1], [1], [0], [0], [0, 0, 1, 0], [], []>} : vector<32x32xbf16>, vector<32x32xbf16>, vector<32x32xf32> -> vector<32x32xf32>
    %763 = vector.broadcast %730 : vector<1x32xf32> to vector<32x32xf32>
    %764 = arith.addf %762, %763 : vector<32x32xf32>
    %cst_245 = arith.constant dense<0xFF800000> : vector<32xf32>
    %765 = vector.multi_reduction <maximumf>, %764, %cst_245 [1] : vector<32x32xf32> to vector<32xf32>
    %766 = vector.shape_cast %765 : vector<32xf32> to vector<32x1xf32>
    %767 = vector.broadcast %766 : vector<32x1xf32> to vector<32x32xf32>
    %768 = arith.subf %764, %767 : vector<32x32xf32>
    %769 = math.exp %768 : vector<32x32xf32>
    %cst_246 = arith.constant dense<0.000000e+00> : vector<32xf32>
    %770 = vector.multi_reduction <add>, %769, %cst_246 [1] : vector<32x32xf32> to vector<32xf32>
    %771 = vector.shape_cast %770 : vector<32xf32> to vector<32x1xf32>
    %772 = tpu.reciprocal %771 {approx = true} : vector<32x1xf32> -> vector<32x1xf32>
    %773 = vector.broadcast %772 : vector<32x1xf32> to vector<32x32xf32>
    %774 = arith.mulf %769, %773 : vector<32x32xf32>
    %775 = arith.truncf %774 : vector<32x32xf32> to vector<32x32xbf16>
    %cst_247 = arith.constant dense<0.000000e+00> : vector<32x32xf32>
    %776 = tpu.matmul %775, %761, %cst_247 {dimension_numbers = #tpu.dot_dimension_numbers<[1], [0], [0], [1], [0, 0, 1, 1], [], []>} : vector<32x32xbf16>, vector<32x32xbf16>, vector<32x32xf32> -> vector<32x32xf32>
    %777 = arith.truncf %776 : vector<32x32xf32> to vector<32x32xbf16>
    %c32 = arith.constant 32 : index
    %c0_248 = arith.constant 0 : index
    %778 = vector.load %arg5[%c32, %c0_248] : memref<128x128xbf16, #tpu.memory_space<vmem>>, vector<32x128xbf16>
    %cst_249 = arith.constant dense<0.000000e+00> : vector<32x128xf32>
    %779 = tpu.matmul %777, %778, %cst_249 {dimension_numbers = #tpu.dot_dimension_numbers<[1], [0], [0], [1], [0, 0, 1, 1], [], []>} : vector<32x32xbf16>, vector<32x128xbf16>, vector<32x128xf32> -> vector<32x128xf32>
    %780 = arith.addf %755, %779 : vector<32x128xf32>
    %781 = vector.extract_strided_slice %729 {offsets = [0, 64], sizes = [32, 32], strides = [1, 1]} : vector<32x384xf32> to vector<32x32xf32>
    %782 = arith.truncf %781 : vector<32x32xf32> to vector<32x32xbf16>
    %783 = vector.extract_strided_slice %729 {offsets = [0, 192], sizes = [32, 32], strides = [1, 1]} : vector<32x384xf32> to vector<32x32xf32>
    %784 = arith.truncf %783 : vector<32x32xf32> to vector<32x32xbf16>
    %785 = vector.extract_strided_slice %729 {offsets = [0, 320], sizes = [32, 32], strides = [1, 1]} : vector<32x384xf32> to vector<32x32xf32>
    %786 = arith.truncf %785 : vector<32x32xf32> to vector<32x32xbf16>
    %cst_250 = arith.constant dense<0.000000e+00> : vector<32x32xf32>
    %787 = tpu.matmul %782, %784, %cst_250 {dimension_numbers = #tpu.dot_dimension_numbers<[1], [1], [0], [0], [0, 0, 1, 0], [], []>} : vector<32x32xbf16>, vector<32x32xbf16>, vector<32x32xf32> -> vector<32x32xf32>
    %788 = vector.broadcast %730 : vector<1x32xf32> to vector<32x32xf32>
    %789 = arith.addf %787, %788 : vector<32x32xf32>
    %cst_251 = arith.constant dense<0xFF800000> : vector<32xf32>
    %790 = vector.multi_reduction <maximumf>, %789, %cst_251 [1] : vector<32x32xf32> to vector<32xf32>
    %791 = vector.shape_cast %790 : vector<32xf32> to vector<32x1xf32>
    %792 = vector.broadcast %791 : vector<32x1xf32> to vector<32x32xf32>
    %793 = arith.subf %789, %792 : vector<32x32xf32>
    %794 = math.exp %793 : vector<32x32xf32>
    %cst_252 = arith.constant dense<0.000000e+00> : vector<32xf32>
    %795 = vector.multi_reduction <add>, %794, %cst_252 [1] : vector<32x32xf32> to vector<32xf32>
    %796 = vector.shape_cast %795 : vector<32xf32> to vector<32x1xf32>
    %797 = tpu.reciprocal %796 {approx = true} : vector<32x1xf32> -> vector<32x1xf32>
    %798 = vector.broadcast %797 : vector<32x1xf32> to vector<32x32xf32>
    %799 = arith.mulf %794, %798 : vector<32x32xf32>
    %800 = arith.truncf %799 : vector<32x32xf32> to vector<32x32xbf16>
    %cst_253 = arith.constant dense<0.000000e+00> : vector<32x32xf32>
    %801 = tpu.matmul %800, %786, %cst_253 {dimension_numbers = #tpu.dot_dimension_numbers<[1], [0], [0], [1], [0, 0, 1, 1], [], []>} : vector<32x32xbf16>, vector<32x32xbf16>, vector<32x32xf32> -> vector<32x32xf32>
    %802 = arith.truncf %801 : vector<32x32xf32> to vector<32x32xbf16>
    %c64_254 = arith.constant 64 : index
    %c0_255 = arith.constant 0 : index
    %803 = vector.load %arg5[%c64_254, %c0_255] : memref<128x128xbf16, #tpu.memory_space<vmem>>, vector<32x128xbf16>
    %cst_256 = arith.constant dense<0.000000e+00> : vector<32x128xf32>
    %804 = tpu.matmul %802, %803, %cst_256 {dimension_numbers = #tpu.dot_dimension_numbers<[1], [0], [0], [1], [0, 0, 1, 1], [], []>} : vector<32x32xbf16>, vector<32x128xbf16>, vector<32x128xf32> -> vector<32x128xf32>
    %805 = arith.addf %780, %804 : vector<32x128xf32>
    %806 = vector.extract_strided_slice %729 {offsets = [0, 96], sizes = [32, 32], strides = [1, 1]} : vector<32x384xf32> to vector<32x32xf32>
    %807 = arith.truncf %806 : vector<32x32xf32> to vector<32x32xbf16>
    %808 = vector.extract_strided_slice %729 {offsets = [0, 224], sizes = [32, 32], strides = [1, 1]} : vector<32x384xf32> to vector<32x32xf32>
    %809 = arith.truncf %808 : vector<32x32xf32> to vector<32x32xbf16>
    %810 = vector.extract_strided_slice %729 {offsets = [0, 352], sizes = [32, 32], strides = [1, 1]} : vector<32x384xf32> to vector<32x32xf32>
    %811 = arith.truncf %810 : vector<32x32xf32> to vector<32x32xbf16>
    %cst_257 = arith.constant dense<0.000000e+00> : vector<32x32xf32>
    %812 = tpu.matmul %807, %809, %cst_257 {dimension_numbers = #tpu.dot_dimension_numbers<[1], [1], [0], [0], [0, 0, 1, 0], [], []>} : vector<32x32xbf16>, vector<32x32xbf16>, vector<32x32xf32> -> vector<32x32xf32>
    %813 = vector.broadcast %730 : vector<1x32xf32> to vector<32x32xf32>
    %814 = arith.addf %812, %813 : vector<32x32xf32>
    %cst_258 = arith.constant dense<0xFF800000> : vector<32xf32>
    %815 = vector.multi_reduction <maximumf>, %814, %cst_258 [1] : vector<32x32xf32> to vector<32xf32>
    %816 = vector.shape_cast %815 : vector<32xf32> to vector<32x1xf32>
    %817 = vector.broadcast %816 : vector<32x1xf32> to vector<32x32xf32>
    %818 = arith.subf %814, %817 : vector<32x32xf32>
    %819 = math.exp %818 : vector<32x32xf32>
    %cst_259 = arith.constant dense<0.000000e+00> : vector<32xf32>
    %820 = vector.multi_reduction <add>, %819, %cst_259 [1] : vector<32x32xf32> to vector<32xf32>
    %821 = vector.shape_cast %820 : vector<32xf32> to vector<32x1xf32>
    %822 = tpu.reciprocal %821 {approx = true} : vector<32x1xf32> -> vector<32x1xf32>
    %823 = vector.broadcast %822 : vector<32x1xf32> to vector<32x32xf32>
    %824 = arith.mulf %819, %823 : vector<32x32xf32>
    %825 = arith.truncf %824 : vector<32x32xf32> to vector<32x32xbf16>
    %cst_260 = arith.constant dense<0.000000e+00> : vector<32x32xf32>
    %826 = tpu.matmul %825, %811, %cst_260 {dimension_numbers = #tpu.dot_dimension_numbers<[1], [0], [0], [1], [0, 0, 1, 1], [], []>} : vector<32x32xbf16>, vector<32x32xbf16>, vector<32x32xf32> -> vector<32x32xf32>
    %827 = arith.truncf %826 : vector<32x32xf32> to vector<32x32xbf16>
    %c96 = arith.constant 96 : index
    %c0_261 = arith.constant 0 : index
    %828 = vector.load %arg5[%c96, %c0_261] : memref<128x128xbf16, #tpu.memory_space<vmem>>, vector<32x128xbf16>
    %cst_262 = arith.constant dense<0.000000e+00> : vector<32x128xf32>
    %829 = tpu.matmul %827, %828, %cst_262 {dimension_numbers = #tpu.dot_dimension_numbers<[1], [0], [0], [1], [0, 0, 1, 1], [], []>} : vector<32x32xbf16>, vector<32x128xbf16>, vector<32x128xf32> -> vector<32x128xf32>
    %830 = arith.addf %805, %829 : vector<32x128xf32>
    %cst_263 = arith.constant dense<0.000000e+00> : vector<32xf32>
    %831 = vector.multi_reduction <add>, %830, %cst_263 [1] : vector<32x128xf32> to vector<32xf32>
    %832 = vector.shape_cast %831 : vector<32xf32> to vector<32x1xf32>
    %cst_264 = arith.constant 1.280000e+02 : f32
    %833 = vector.broadcast %cst_264 : f32 to vector<32x1xf32>
    %834 = arith.divf %832, %833 : vector<32x1xf32>
    %835 = vector.broadcast %834 : vector<32x1xf32> to vector<32x128xf32>
    %836 = arith.subf %830, %835 : vector<32x128xf32>
    %837 = arith.mulf %836, %836 : vector<32x128xf32>
    %cst_265 = arith.constant dense<0.000000e+00> : vector<32xf32>
    %838 = vector.multi_reduction <add>, %837, %cst_265 [1] : vector<32x128xf32> to vector<32xf32>
    %839 = vector.shape_cast %838 : vector<32xf32> to vector<32x1xf32>
    %cst_266 = arith.constant 1.280000e+02 : f32
    %840 = vector.broadcast %cst_266 : f32 to vector<32x1xf32>
    %841 = arith.divf %839, %840 : vector<32x1xf32>
    %842 = vector.broadcast %834 : vector<32x1xf32> to vector<32x128xf32>
    %843 = arith.subf %830, %842 : vector<32x128xf32>
    %cst_267 = arith.constant 9.99999974E-6 : f32
    %844 = vector.broadcast %cst_267 : f32 to vector<32x1xf32>
    %845 = arith.addf %841, %844 : vector<32x1xf32>
    %846 = math.rsqrt %845 : vector<32x1xf32>
    %847 = vector.broadcast %846 : vector<32x1xf32> to vector<32x128xf32>
    %848 = arith.mulf %843, %847 : vector<32x128xf32>
    %c0_268 = arith.constant 0 : index
    %c0_269 = arith.constant 0 : index
    %849 = vector.load %arg18[%c0_268, %c0_269] : memref<32x128xf32, #tpu.memory_space<vmem>>, vector<32x128xf32>
    tpu.vector_store %arg18[%c0_268, %c0_269], %848 {strides = array<i32>} : memref<32x128xf32, #tpu.memory_space<vmem>>, vector<32x128xf32>,
    tpu.wait_dma2 semaphore(%arg20 : memref<!tpu.dma_semaphore, #tpu.memory_space<semaphore_mem>>) src(%arg7 : memref<768x512xbf16, #tpu.memory_space<any>>) dst(%arg19 : memref<768x512xbf16, #tpu.memory_space<vmem>>)
    %c0_270 = arith.constant 0 : index
    %c0_271 = arith.constant 0 : index
    %850 = vector.load %arg18[%c0_270, %c0_271] : memref<32x128xf32, #tpu.memory_space<vmem>>, vector<13x128xf32>
    %c16_272 = arith.constant 16 : index
    %c0_273 = arith.constant 0 : index
    %851 = vector.load %arg18[%c16_272, %c0_273] : memref<32x128xf32, #tpu.memory_space<vmem>>, vector<13x128xf32>
    %c1_274 = arith.constant 1 : index
    %c0_275 = arith.constant 0 : index
    %852 = vector.load %arg18[%c1_274, %c0_275] : memref<32x128xf32, #tpu.memory_space<vmem>>, vector<13x128xf32>
    %c17_276 = arith.constant 17 : index
    %c0_277 = arith.constant 0 : index
    %853 = vector.load %arg18[%c17_276, %c0_277] : memref<32x128xf32, #tpu.memory_space<vmem>>, vector<13x128xf32>
    %c2_278 = arith.constant 2 : index
    %c0_279 = arith.constant 0 : index
    %854 = vector.load %arg18[%c2_278, %c0_279] : memref<32x128xf32, #tpu.memory_space<vmem>>, vector<13x128xf32>
    %c18_280 = arith.constant 18 : index
    %c0_281 = arith.constant 0 : index
    %855 = vector.load %arg18[%c18_280, %c0_281] : memref<32x128xf32, #tpu.memory_space<vmem>>, vector<13x128xf32>
    %856 = tpu.concatenate %850, %851, %852, %853, %854, %855 in 1 : vector<13x128xf32>, vector<13x128xf32>, vector<13x128xf32>, vector<13x128xf32>, vector<13x128xf32>, vector<13x128xf32> -> vector<13x768xf32>
    %857 = arith.truncf %856 : vector<13x768xf32> to vector<13x768xbf16>
    %c0_282 = arith.constant 0 : index
    %c0_283 = arith.constant 0 : index
    %858 = vector.load %arg19[%c0_282, %c0_283] : memref<768x512xbf16, #tpu.memory_space<vmem>>, vector<768x512xbf16>
    %cst_284 = arith.constant dense<0.000000e+00> : vector<13x512xf32>
    %859 = tpu.matmul %857, %858, %cst_284 {dimension_numbers = #tpu.dot_dimension_numbers<[1], [0], [0], [1], [0, 0, 1, 1], [], []>} : vector<13x768xbf16>, vector<768x512xbf16>, vector<13x512xf32> -> vector<13x512xf32>
    %cst_285 = arith.constant dense<0.000000e+00> : vector<512xf32>
    %860 = vector.multi_reduction <add>, %859, %cst_285 [0] : vector<13x512xf32> to vector<512xf32>
    %861 = vector.shape_cast %860 : vector<512xf32> to vector<1x512xf32>
    %862 = arith.mulf %859, %859 : vector<13x512xf32>
    %cst_286 = arith.constant dense<0.000000e+00> : vector<512xf32>
    %863 = vector.multi_reduction <add>, %862, %cst_286 [0] : vector<13x512xf32> to vector<512xf32>
    %864 = vector.shape_cast %863 : vector<512xf32> to vector<1x512xf32>
    %c0_287 = arith.constant 0 : index
    %c0_288 = arith.constant 0 : index
    %865 = vector.load %arg10[%c0_287, %c0_288] : memref<512x8xf32, #tpu.memory_space<vmem>>, vector<512x8xf32>
    %cst_289 = arith.constant dense<0.000000e+00> : vector<1x8xf32>
    %866 = tpu.matmul %861, %865, %cst_289 {dimension_numbers = #tpu.dot_dimension_numbers<[1], [0], [0], [1], [0, 0, 1, 1], [], []>} : vector<1x512xf32>, vector<512x8xf32>, vector<1x8xf32> -> vector<1x8xf32>
    %c0_290 = arith.constant 0 : index
    %c0_291 = arith.constant 0 : index
    %867 = vector.load %arg10[%c0_290, %c0_291] : memref<512x8xf32, #tpu.memory_space<vmem>>, vector<512x8xf32>
    %cst_292 = arith.constant dense<0.000000e+00> : vector<1x8xf32>
    %868 = tpu.matmul %864, %867, %cst_292 {dimension_numbers = #tpu.dot_dimension_numbers<[1], [0], [0], [1], [0, 0, 1, 1], [], []>} : vector<1x512xf32>, vector<512x8xf32>, vector<1x8xf32> -> vector<1x8xf32>
    %869 = arith.mulf %866, %866 : vector<1x8xf32>
    %870 = arith.subf %868, %869 : vector<1x8xf32>
    %cst_293 = arith.constant 0.000000e+00 : f32
    %871 = vector.broadcast %cst_293 : f32 to vector<1x8xf32>
    %872 = arith.maximumf %870, %871 : vector<1x8xf32>
    %cst_294 = arith.constant 9.99999974E-6 : f32
    %873 = vector.broadcast %cst_294 : f32 to vector<1x8xf32>
    %874 = arith.addf %872, %873 : vector<1x8xf32>
    %875 = math.rsqrt %874 : vector<1x8xf32>
    %c0_295 = arith.constant 0 : index
    %c0_296 = arith.constant 0 : index
    %876 = vector.load %arg8[%c0_295, %c0_296] : memref<1x8xf32, #tpu.memory_space<vmem>>, vector<1x8xf32>
    %877 = arith.mulf %876, %875 : vector<1x8xf32>
    %c0_297 = arith.constant 0 : index
    %c0_298 = arith.constant 0 : index
    %878 = vector.load %arg9[%c0_297, %c0_298] : memref<1x8xf32, #tpu.memory_space<vmem>>, vector<1x8xf32>
    %879 = arith.mulf %866, %877 : vector<1x8xf32>
    %880 = arith.subf %878, %879 : vector<1x8xf32>
    %c0_299 = arith.constant 0 : index
    %c0_300 = arith.constant 0 : index
    %881 = vector.load %arg11[%c0_299, %c0_300] : memref<8x512xf32, #tpu.memory_space<vmem>>, vector<8x512xf32>
    %cst_301 = arith.constant dense<0.000000e+00> : vector<1x512xf32>
    %882 = tpu.matmul %877, %881, %cst_301 {dimension_numbers = #tpu.dot_dimension_numbers<[1], [0], [0], [1], [0, 0, 1, 1], [], []>} : vector<1x8xf32>, vector<8x512xf32>, vector<1x512xf32> -> vector<1x512xf32>
    %c0_302 = arith.constant 0 : index
    %c0_303 = arith.constant 0 : index
    %883 = vector.load %arg11[%c0_302, %c0_303] : memref<8x512xf32, #tpu.memory_space<vmem>>, vector<8x512xf32>
    %cst_304 = arith.constant dense<0.000000e+00> : vector<1x512xf32>
    %884 = tpu.matmul %880, %883, %cst_304 {dimension_numbers = #tpu.dot_dimension_numbers<[1], [0], [0], [1], [0, 0, 1, 1], [], []>} : vector<1x8xf32>, vector<8x512xf32>, vector<1x512xf32> -> vector<1x512xf32>
    %885 = vector.broadcast %882 : vector<1x512xf32> to vector<13x512xf32>
    %886 = arith.mulf %859, %885 : vector<13x512xf32>
    %887 = vector.broadcast %884 : vector<1x512xf32> to vector<13x512xf32>
    %888 = arith.addf %886, %887 : vector<13x512xf32>
    %cst_305 = arith.constant 0.000000e+00 : f32
    %889 = vector.broadcast %cst_305 : f32 to vector<13x512xf32>
    %890 = arith.maximumf %888, %889 : vector<13x512xf32>
    %891 = vector.extract_strided_slice %890 {offsets = [0, 0], sizes = [13, 256], strides = [1, 1]} : vector<13x512xf32> to vector<13x256xf32>
    %892 = vector.extract_strided_slice %890 {offsets = [0, 256], sizes = [13, 256], strides = [1, 1]} : vector<13x512xf32> to vector<13x256xf32>
    %893 = arith.maximumf %891, %892 : vector<13x256xf32>
    %894 = tpu.concatenate %893, %893 in 1 : vector<13x256xf32>, vector<13x256xf32> -> vector<13x512xf32>
    %c0_306 = arith.constant 0 : index
    %c0_307 = arith.constant 0 : index
    %895 = vector.load %arg12[%c0_306, %c0_307] : memref<13x512xf32, #tpu.memory_space<vmem>>, vector<13x512xf32>
    %896 = arith.mulf %894, %895 : vector<13x512xf32>
    %cst_308 = arith.constant dense<0.000000e+00> : vector<512xf32>
    %897 = vector.multi_reduction <add>, %896, %cst_308 [0] : vector<13x512xf32> to vector<512xf32>
    %898 = vector.shape_cast %897 : vector<512xf32> to vector<1x512xf32>
    %c0_309 = arith.constant 0 : index
    %c0_310 = arith.constant 0 : index
    %899 = vector.load %arg13[%c0_309, %c0_310] : memref<512x2xf32, #tpu.memory_space<vmem>>, vector<512x2xf32>
    %cst_311 = arith.constant dense<0.000000e+00> : vector<1x2xf32>
    %900 = tpu.matmul %898, %899, %cst_311 {dimension_numbers = #tpu.dot_dimension_numbers<[1], [0], [0], [1], [0, 0, 1, 1], [], []>} : vector<1x512xf32>, vector<512x2xf32>, vector<1x2xf32> -> vector<1x2xf32>
    %c0_312 = arith.constant 0 : index
    %c0_313 = arith.constant 0 : index
    %901 = vector.load %arg14[%c0_312, %c0_313] : memref<1x2xf32, #tpu.memory_space<vmem>>, vector<1x2xf32>
    %902 = arith.addf %900, %901 : vector<1x2xf32>
    %903 = arith.negf %902 : vector<1x2xf32>
    %904 = math.exp %903 : vector<1x2xf32>
    %cst_314 = arith.constant 1.000000e+00 : f32
    %905 = vector.broadcast %cst_314 : f32 to vector<1x2xf32>
    %906 = arith.addf %905, %904 : vector<1x2xf32>
    %907 = arith.divf %905, %906 : vector<1x2xf32>
    %c0_315 = arith.constant 0 : index
    %c0_316 = arith.constant 0 : index
    %908 = vector.load %arg15[%c0_315, %c0_316] : memref<1x2xf32, #tpu.memory_space<vmem>>, vector<1x2xf32>
    tpu.vector_store %arg15[%c0_315, %c0_316], %907 {strides = array<i32>} : memref<1x2xf32, #tpu.memory_space<vmem>>, vector<1x2xf32>,
    return
  }
}

</mosaic_0001>

<bundles_post_ra>
// kernel: network_forward.1
= control target key start
LH: loop header
LB: loop body
LE: loop exit
PB: predicated region body
PF: predicated region fallthrough
CT: control target
= control target key end

     0   :  { %20 = vsyncpa [#allocation8], 0  ;;  %s54_s18 = sld [smem:[#allocation0]]   ;;  %s12610_s19 = smov [#allocation5]   ;;  %v12612_v0 = vmov 0   ;;  %v15352_v1 = vmov 0.0   ;;  %s15336_s0 = inlined_call_operand.vmem [shape: f32[31,108], index: 0, kind: input, shape index: {}]   ;;  %s15337_s1 = inlined_call_operand.vmem [shape: bf16[108,512], index: 1, kind: input, shape index: {}]   ;;  %s15338_s2 = inlined_call_operand.vmem [shape: f32[1,512], index: 2, kind: input, shape index: {}]   ;;  %s15339_s3 = inlined_call_operand.vmem [shape: f32[128,512], index: 3, kind: input, shape index: {}]   ;;  %s15340_s4 = inlined_call_operand.vmem [shape: bf16[128,384], index: 4, kind: input, shape index: {}]   ;;  %s15341_s5 = inlined_call_operand.vmem [shape: bf16[128,128], index: 5, kind: input, shape index: {}]   ;;  %s15342_s6 = inlined_call_operand.vmem [shape: f32[1,32], index: 6, kind: input, shape index: {}]   ;;  %s15343_s7 = inlined_call_operand.hbm [shape: bf16[768,512], index: 7, kind: input, shape index: {}]   ;;  %s15344_s8 = inlined_call_operand.vmem [shape: f32[1,8], index: 8, kind: input, shape index: {}]   ;;  %s15345_s9 = inlined_call_operand.vmem [shape: f32[1,8], index: 9, kind: input, shape index: {}]   ;;  %s15346_s10 = inlined_call_operand.vmem [shape: f32[512,8], index: 10, kind: input, shape index: {}]   ;;  %s15347_s11 = inlined_call_operand.vmem [shape: f32[8,512], index: 11, kind: input, shape index: {}]   ;;  %s15348_s12 = inlined_call_operand.vmem [shape: f32[13,512], index: 12, kind: input, shape index: {}]   ;;  %s15349_s13 = inlined_call_operand.vmem [shape: f32[512,2], index: 13, kind: input, shape index: {}]   ;;  %s15350_s14 = inlined_call_operand.vmem [shape: f32[1,2], index: 14, kind: input, shape index: {}]   ;;  %s15351_s15 = inlined_call_operand.hbm [shape: f32[1,2], index: 15, kind: output, shape index: {}]  }
   0x1   :  { %s62_s20 = sshll.u32 %s12610_s19, 4  ;;  %s12611_s21 = smov 512   ;;  %329 = vmatprep.mubr.bf16.mxu0 %v12612_v0  ;;  %382 = vmatprep.mubr.bf16.mxu1 %v12612_v0  ;;  %vm284_vm0 = vcmask 1045504   ;;  %vm277_vm1 = vcmask 883712   ;;  %vm677_vm2 = vcmask 516096   ;;  %vm679_vm3 = vcmask 1040896   ;;  %s63_s20 = int_to_ptr.vmem [resolvable:$true] %s62_s20 }
   0x2   :  { %66 = sst [smem:[#allocation10]] %s12611_s21  ;;  %s12613_s22 = smov 4   ;;  %vm6842_vm4 = vcmask 261120  }
   0x3   :  { %68 = sst [smem:[#allocation10 + $0x1]] %s12611_s21  ;;  %s12614_s23 = smov 64  }
   0x4   :  { %70 = sst [smem:[#allocation10 + $0x2]] %s12613_s22  ;;  %s12615_s25 = smov 128  }
   0x5   :  { %72 = sst [smem:[#allocation10 + $0x3]] %s12614_s23  ;;  %s12616_s27 = smov 2  }
   0x6   :  { %s9431_s24 = sshll.u32 %s54_s18, 26  ;;  %74 = sst [smem:[#allocation10 + $0x4]] %s12615_s25 }
   0x7   :  { %s9432_s26 = sadd.s32 134217728, %s9431_s24  ;;  %76 = sst [smem:[#allocation10 + $0x5]] %s12616_s27 }
   0x8   :  { %s12617_s28 = smov 256   ;;  %80 = sst [smem:[#allocation10 + $0x7]] %s12614_s23 }
   0x9   :  { %78 = sst [smem:[#allocation10 + $0x6]] %s12617_s28  ;;  %s12618_s29 = smov [#allocation6]  }
   0xa   :  { %82 = sst [smem:[#allocation10 + $0x8]] %s12613_s22  ;;  %s12619_s30 = smov [#allocation9]  }
   0xb   :  { %84 = dma.general %s15343_s7, 24576, %s63_s20, %s12618_s29, %s12619_s30, [#allocation10], %s9432_s26, 0  }
   0xc   :  { %483 = vst [vmem:[#allocation3 + $0x1f] sm:$0x1] %v15352_v1  ;;  %v12176_v2 = vld [vmem:[%s15337_s1 + $0x4] ss:$16 sps:$4 sm:$0xff]   ;;  %v12178_v3 = vld [vmem:[%s15337_s1 + $0xc] ss:$16 sps:$4 sm:$0xff]  }
   0xd   :  { %297 = vmatprep.subr.bf16.mxu0 %v12176_v2  ;;  %v12180_v4 = vld [vmem:[%s15337_s1] ss:$16 sps:$4 sm:$0xff]   ;;  %v12181_v5 = vld [vmem:[%s15337_s1 + $0x8] ss:$16 sps:$4 sm:$0xff]   ;;  %350 = vmatprep.subr.bf16.mxu1 %v12178_v3  ;;  %v12182_v6 = vld [vmem:[%s15337_s1 + $0x24] ss:$16 sps:$4 sm:$0xff]  }
   0xe   :  { %298 = vmatpush1.bf16.msra.mxu0 %v12180_v4  ;;  %351 = vmatpush1.bf16.msra.mxu1 %v12181_v5  ;;  %v12184_v7 = vld [vmem:[%s15337_s1 + $0x2c] ss:$16 sps:$4 sm:$0xff]   ;;  %v12186_v8 = vld [vmem:[%s15337_s1 + $0x20] ss:$16 sps:$4 sm:$0xff]   ;;  %v12187_v9 = vld [vmem:[%s15337_s1 + $0x28] ss:$16 sps:$4 sm:$0xff]  }
   0xf   :  { %299 = vmatprep.subr.bf16.mxu0 %v12182_v6  ;;  %352 = vmatprep.subr.bf16.mxu1 %v12184_v7  ;;  %v12188_v10 = vld [vmem:[%s15337_s1 + $0x44] ss:$16 sps:$4 sm:$0xff]   ;;  %v12190_v11 = vld [vmem:[%s15337_s1 + $0x4c] ss:$16 sps:$4 sm:$0xff]   ;;  %v12192_v12 = vld [vmem:[%s15337_s1 + $0x40] ss:$16 sps:$4 sm:$0xff]  }
  0x10   :  { %v12193_v13 = vld [vmem:[%s15337_s1 + $0x48] ss:$16 sps:$4 sm:$0xff]   ;;  %v12194_v14 = vld [vmem:[%s15337_s1 + $0x64] ss:$16 sps:$4 sm:$0xff]   ;;  %v12196_v15 = vld [vmem:[%s15337_s1 + $0x6c] ss:$16 sps:$4 sm:$0xff]  }
  0x11   :  { %v12198_v16 = vld [vmem:[%s15337_s1 + $0x60] ss:$16 sps:$4 sm:$0xff]   ;;  %v12199_v17 = vld [vmem:[%s15337_s1 + $0x68] ss:$16 sps:$4 sm:$0xff]   ;;  %v12200_v18 = vld [vmem:[%s15337_s1 + $0x84] ss:$16 sps:$4 sm:$0xff]  }
  0x12   :  { %300 = vmatpush1.bf16.msra.mxu0 %v12186_v8  ;;  %353 = vmatpush1.bf16.msra.mxu1 %v12187_v9  ;;  %v12202_v19 = vld [vmem:[%s15337_s1 + $0x8c] ss:$16 sps:$4 sm:$0xff]   ;;  %v12204_v20 = vld [vmem:[%s15337_s1 + $0x80] ss:$16 sps:$4 sm:$0xff]   ;;  %v12205_v21 = vld [vmem:[%s15337_s1 + $0x88] ss:$16 sps:$4 sm:$0xff]  }
  0x13   :  { %301 = vmatprep.subr.bf16.mxu0 %v12188_v10  ;;  %354 = vmatprep.subr.bf16.mxu1 %v12190_v11  ;;  %v12206_v22 = vld [vmem:[%s15337_s1 + $0xa4] ss:$16 sps:$4 sm:$0xff]   ;;  %v12208_v23 = vld [vmem:[%s15337_s1 + $0xac] ss:$16 sps:$4 sm:$0xff]   ;;  %v12210_v24 = vld [vmem:[%s15337_s1 + $0xa0] ss:$16 sps:$4 sm:$0xff]  }
  0x14   :  { %v12211_v25 = vld [vmem:[%s15337_s1 + $0xa8] ss:$16 sps:$4 sm:$0xff]   ;;  %v12212_v26 = vld [vmem:[%s15337_s1 + $0xc4] ss:$16 sps:$4 sm:$0x3f]   ;;  %s12623_s16 = smov 32  }
  0x15   :  { %v12214_v27 = vld [vmem:[%s15337_s1 + $0xcc] ss:$16 sps:$4 sm:$0x3f]   ;;  %v12216_v28 = vld [vmem:[%s15337_s1 + $0xc0] ss:$16 sps:$4 sm:$0x3f]  }
  0x16   :  { %302 = vmatpush1.bf16.msra.mxu0 %v12192_v12  ;;  %355 = vmatpush1.bf16.msra.mxu1 %v12193_v13  ;;  %v12217_v29 = vld [vmem:[%s15337_s1 + $0xc8] ss:$16 sps:$4 sm:$0x3f]   ;;  %v85_v34 = vld [vmem:[%s15336_s0] sm:$0xff]  ;;  %v286_v38 = vsel %vm284_vm0, %v12216_v28, 0  ;;  %v421_v42 = vld [vmem:[%s15339_s3 + $0x10] sm:$0xff] }
  0x17   :  { %303 = vmatprep.subr.bf16.mxu0 %v12194_v14  ;;  %356 = vmatprep.subr.bf16.mxu1 %v12196_v15  ;;  %v420_v30 = vld [vmem:[%s15339_s3 + $0x8] sm:$0xff]  ;;  %v422_v32 = vld [vmem:[%s15339_s3 + $0x18] sm:$0xff]  ;;  %v419_v36 = vld [vmem:[%s15339_s3] sm:$0xff]  ;;  %v292_v39 = vsel %vm284_vm0, %v12217_v29, 0 }
  0x18   :  { %v424_v31 = vld [vmem:[%s15339_s3 + $0x28] sm:$0xff]  ;;  %v426_v33 = vld [vmem:[%s15339_s3 + $0x38] sm:$0xff]  ;;  %v423_v37 = vld [vmem:[%s15339_s3 + $0x20] sm:$0xff] }
  0x19   :  { %v86_v35 = vld [vmem:[%s15336_s0 + $0x8] sm:$0xff]  ;;  %v12821_v40 = vpack.c.bf16 %v424_v31, %v420_v30  ;;  %v12823_v41 = vpack.c.bf16 %v426_v33, %v422_v32  ;;  %v425_v43 = vld [vmem:[%s15339_s3 + $0x30] sm:$0xff]  ;;  %v430_v46 = vld [vmem:[%s15339_s3 + $0x58] sm:$0xff]  ;;  %v12843_v49 = vpack.c.bf16 %v423_v37, %v419_v36 }
  0x1a   :  { %304 = vmatpush1.bf16.msra.mxu0 %v12198_v16  ;;  %357 = vmatpush1.bf16.msra.mxu1 %v12199_v17  ;;  %v428_v44 = vld [vmem:[%s15339_s3 + $0x48] sm:$0xff]  ;;  %v434_v47 = vld [vmem:[%s15339_s3 + $0x78] sm:$0xff]  ;;  %v89_v48 = vpack.c.bf16 %v86_v35, %v85_v34  ;;  %v12845_v50 = vpack.c.bf16 %v425_v43, %v421_v42  ;;  %v427_v51 = vld [vmem:[%s15339_s3 + $0x40] sm:$0xff] }
  0x1b   :  { %305 = vmatprep.subr.bf16.mxu0 %v12200_v18  ;;  %358 = vmatprep.subr.bf16.mxu1 %v12202_v19  ;;  %v432_v45 = vld [vmem:[%s15339_s3 + $0x68] sm:$0xff]  ;;  %v431_v52 = vld [vmem:[%s15339_s3 + $0x60] sm:$0xff]  ;;  %v12857_v54 = vpack.c.bf16 %v434_v47, %v430_v46  ;;  %v429_v55 = vld [vmem:[%s15339_s3 + $0x50] sm:$0xff] }
  0x1c   :  { %v12855_v53 = vpack.c.bf16 %v432_v45, %v428_v44  ;;  %v433_v56 = vld [vmem:[%s15339_s3 + $0x70] sm:$0xff]  ;;  %v436_v57 = vld [vmem:[%s15339_s3 + $0x88] sm:$0xff]  ;;  %v438_v59 = vld [vmem:[%s15339_s3 + $0x98] sm:$0xff]  ;;  %v12884_v62 = vpack.c.bf16 %v431_v52, %v427_v51 }
  0x1d   :  { %v440_v58 = vld [vmem:[%s15339_s3 + $0xa8] sm:$0xff]  ;;  %v442_v60 = vld [vmem:[%s15339_s3 + $0xb8] sm:$0xff]  ;;  %v435_v61 = vld [vmem:[%s15339_s3 + $0x80] sm:$0xff]  ;;  %v12886_v63 = vpack.c.bf16 %v433_v56, %v429_v55 }
  0x1e   :  { %306 = vmatpush1.bf16.msra.mxu0 %v12204_v20  ;;  %359 = vmatpush1.bf16.msra.mxu1 %v12205_v21  ;;  %v439_v2 = vld [vmem:[%s15339_s3 + $0xa0] sm:$0xff]  ;;  %v437_v3 = vld [vmem:[%s15339_s3 + $0x90] sm:$0xff]  ;;  %v12899_v5 = vpack.c.bf16 %v440_v58, %v436_v57  ;;  %v12901_v6 = vpack.c.bf16 %v442_v60, %v438_v59  ;;  %v444_v7 = vld [vmem:[%s15339_s3 + $0xc8] sm:$0xff] }
  0x1f   :  { %307 = vmatprep.subr.bf16.mxu0 %v12206_v22  ;;  %360 = vmatprep.subr.bf16.mxu1 %v12208_v23  ;;  %v441_v4 = vld [vmem:[%s15339_s3 + $0xb0] sm:$0xff]  ;;  %v448_v8 = vld [vmem:[%s15339_s3 + $0xe8] sm:$0xff]  ;;  %v446_v9 = vld [vmem:[%s15339_s3 + $0xd8] sm:$0xff]  ;;  %v12925_v14 = vpack.c.bf16 %v439_v2, %v435_v61 }
  0x20   :  { %v450_v10 = vld [vmem:[%s15339_s3 + $0xf8] sm:$0xff]  ;;  %v87_v11 = vld [vmem:[%s15336_s0 + $0x10] sm:$0xff]  ;;  %v12927_v15 = vpack.c.bf16 %v441_v4, %v437_v3  ;;  %v443_v16 = vld [vmem:[%s15339_s3 + $0xc0] sm:$0xff]  ;;  %v12937_v18 = vpack.c.bf16 %v448_v8, %v444_v7 }
  0x21   :  { %v88_v12 = vld [vmem:[%s15336_s0 + $0x18] sm:$0x7f]  ;;  %v447_v17 = vld [vmem:[%s15339_s3 + $0xe0] sm:$0xff]  ;;  %v12939_v19 = vpack.c.bf16 %v450_v10, %v446_v9  ;;  %v445_v20 = vld [vmem:[%s15339_s3 + $0xd0] sm:$0xff] }
  0x22   :  { %308 = vmatpush1.bf16.msra.mxu0 %v12210_v24  ;;  %361 = vmatpush1.bf16.msra.mxu1 %v12211_v25  ;;  %v90_v13 = vpack.c.bf16 %v88_v12, %v87_v11  ;;  %v449_v21 = vld [vmem:[%s15339_s3 + $0xf0] sm:$0xff]  ;;  %v452_v22 = vld [vmem:[%s15339_s3 + $0x108] sm:$0xff]  ;;  %v454_v24 = vld [vmem:[%s15339_s3 + $0x118] sm:$0xff]  ;;  %v12969_v28 = vpack.c.bf16 %v447_v17, %v443_v16 }
  0x23   :  { %9461 = vmatprep.subr.msk.bf16.mxu0 %vm284_vm0, %v12212_v26  ;;  %9464 = vmatprep.subr.msk.bf16.mxu1 %vm284_vm0, %v12214_v27  ;;  %v456_v23 = vld [vmem:[%s15339_s3 + $0x128] sm:$0xff]  ;;  %v458_v25 = vld [vmem:[%s15339_s3 + $0x138] sm:$0xff]  ;;  %v451_v26 = vld [vmem:[%s15339_s3 + $0x100] sm:$0xff]  ;;  %v12971_v29 = vpack.c.bf16 %v449_v21, %v445_v20 }
  0x24   :  { %v455_v27 = vld [vmem:[%s15339_s3 + $0x120] sm:$0xff]  ;;  %v453_v30 = vld [vmem:[%s15339_s3 + $0x110] sm:$0xff]  ;;  %v460_v32 = vld [vmem:[%s15339_s3 + $0x148] sm:$0xff]  ;;  %v12984_v33 = vpack.c.bf16 %v456_v23, %v452_v22  ;;  %v12986_v34 = vpack.c.bf16 %v458_v25, %v454_v24  ;;  %v121_v24 = vlaneseq }
  0x25   :  { %v457_v31 = vld [vmem:[%s15339_s3 + $0x130] sm:$0xff]  ;;  %v464_v35 = vld [vmem:[%s15339_s3 + $0x168] sm:$0xff]  ;;  %v462_v36 = vld [vmem:[%s15339_s3 + $0x158] sm:$0xff]  ;;  %v13013_v44 = vpack.c.bf16 %v455_v27, %v451_v26 }
  0x26   :  { %310 = vmatpush1.bf16.msra.mxu0 %v286_v38  ;;  %363 = vmatpush1.bf16.msra.mxu1 %v292_v39  ;;  %v466_v37 = vld [vmem:[%s15339_s3 + $0x178] sm:$0xff]  ;;  %v459_v38 = vld [vmem:[%s15339_s3 + $0x140] sm:$0xff]  ;;  %v461_v42 = vld [vmem:[%s15339_s3 + $0x150] sm:$0xff]  ;;  %v13015_v45 = vpack.c.bf16 %v457_v31, %v453_v30  ;;  %v13031_v52 = vpack.c.bf16 %v464_v35, %v460_v32  ;;  %v122_v25 = vshrl.u32 %v121_v24, 7 }
  0x27   :  { %9946 = vmatprep.subr.bf16.mxu0 %v12821_v40  ;;  %9978 = vmatprep.subr.bf16.mxu1 %v12823_v41  ;;  %v463_v39 = vld [vmem:[%s15339_s3 + $0x160] sm:$0xff]  ;;  %v465_v43 = vld [vmem:[%s15339_s3 + $0x170] sm:$0xff]  ;;  %v468_v46 = vld [vmem:[%s15339_s3 + $0x188] sm:$0xff]  ;;  %v13033_v55 = vpack.c.bf16 %v466_v37, %v462_v36 }
  0x28   :  { %v472_v47 = vld [vmem:[%s15339_s3 + $0x1a8] sm:$0xff]  ;;  %v474_v51 = vld [vmem:[%s15339_s3 + $0x1b8] sm:$0xff]  ;;  %v467_v56 = vld [vmem:[%s15339_s3 + $0x180] sm:$0xff]  ;;  %v13049_v60 = vpack.c.bf16 %v463_v39, %v459_v38  ;;  %v13051_v61 = vpack.c.bf16 %v465_v43, %v461_v42  ;;  %v13143_v26 = vsub.s32 0, %v122_v25  ;;  %v131_v27 = vsub.s32 2, %v122_v25 }
  0x29   :  { %9462 = vmatmul.mubr.msk.bf16.vlgmr.msra.gmra.mrb[0].mxu0 %vm277_vm1, %v89_v48  ;;  %9465 = vmatmul.mubr.msk.bf16.vlgmr.msra.gmra.mrb[0].mxu1 %vm277_vm1, %v89_v48  ;;  %v470_v48 = vld [vmem:[%s15339_s3 + $0x198] sm:$0xff]  ;;  %v471_v57 = vld [vmem:[%s15339_s3 + $0x1a0] sm:$0xff]  ;;  %v469_v58 = vld [vmem:[%s15339_s3 + $0x190] sm:$0xff]  ;;  %v13067_v8 = vpack.c.bf16 %v472_v47, %v468_v46  ;;  %v127_v31 = vsub.s32 1, %v122_v25  ;;  %v135_v32 = vsub.s32 3, %v122_v25 }
  0x2a   :  { %9948 = vmatpush1.bf16.msra.mxu0 %v12843_v49  ;;  %9980 = vmatpush1.bf16.msra.mxu1 %v12845_v50  ;;  %v473_v59 = vld [vmem:[%s15339_s3 + $0x1b0] sm:$0xff]  ;;  %v476_v2 = vld [vmem:[%s15339_s3 + $0x1c8] sm:$0xff]  ;;  %v478_v4 = vld [vmem:[%s15339_s3 + $0x1d8] sm:$0xff]  ;;  %v13069_v9 = vpack.c.bf16 %v474_v51, %v470_v48  ;;  %v13085_v16 = vpack.c.bf16 %v471_v57, %v467_v56 }
  0x2b   :  { %9950 = vmatprep.subr.bf16.mxu0 %v12855_v53  ;;  %9982 = vmatprep.subr.bf16.mxu1 %v12857_v54  ;;  %v480_v3 = vld [vmem:[%s15339_s3 + $0x1e8] sm:$0xff]  ;;  %v482_v7 = vld [vmem:[%s15339_s3 + $0x1f8] sm:$0xff]  ;;  %v475_v10 = vld [vmem:[%s15339_s3 + $0x1c0] sm:$0xff]  ;;  %v13087_v17 = vpack.c.bf16 %v473_v59, %v469_v58 }
  0x2c   :  { %339 = vmatprep.mubr.bf16.mxu0 %v12612_v0  ;;  %392 = vmatprep.mubr.bf16.mxu1 %v12612_v0  ;;  %v479_v11 = vld [vmem:[%s15339_s3 + $0x1e0] sm:$0xff]  ;;  %v477_v12 = vld [vmem:[%s15339_s3 + $0x1d0] sm:$0xff]  ;;  %v13091_v20 = vpack.c.bf16 %v480_v3, %v476_v2  ;;  %v13093_v21 = vpack.c.bf16 %v482_v7, %v478_v4 }
  0x2d   :  { %v13097_v22 = vpack.c.bf16 %v479_v11, %v475_v10  ;;  %v119_v30 = vld [vmem:[%s15338_s2] sm:$0xf] }
  0x2e   :  { %9952 = vmatpush1.bf16.msra.mxu0 %v12884_v62  ;;  %9984 = vmatpush1.bf16.msra.mxu1 %v12886_v63  ;;  %v124_v35 = vrot.slane %v119_v30, %v13143_v26  ;;  %v132_v36 = vrot.slane %v119_v30, %v131_v27  ;;  %v128_v37 = vrot.slane %v119_v30, %v127_v31 }
  0x2f   :  { %9954 = vmatprep.subr.bf16.mxu0 %v12899_v5  ;;  %9986 = vmatprep.subr.bf16.mxu1 %v12901_v6  ;;  %v136_v38 = vrot.slane %v119_v30, %v135_v32 }
  0x31   :  { %9463 = vmatmul.mubr.msk.bf16.gmra.mrb[4].mxu0 %vm277_vm1, %v90_v13  ;;  %9466 = vmatmul.mubr.msk.bf16.gmra.mrb[4].mxu1 %vm277_vm1, %v90_v13  ;;  %v481_v13 = vld [vmem:[%s15339_s3 + $0x1f0] sm:$0xff] }
  0x32   :  { %9956 = vmatpush1.bf16.msra.mxu0 %v12925_v14  ;;  %9988 = vmatpush1.bf16.msra.mxu1 %v12927_v15  ;;  %v13099_v23 = vpack.c.bf16 %v481_v13, %v477_v12 }
  0x33   :  { %9958 = vmatprep.subr.bf16.mxu0 %v12937_v18  ;;  %9990 = vmatprep.subr.bf16.mxu1 %v12939_v19 }
  0x34   :  { %549 = vmatprep.mubr.f32.mxu0 %v15352_v1  ;;  %620 = vmatprep.mubr.f32.mxu1 %v15352_v1 }
  0x36   :  { %9960 = vmatpush1.bf16.msra.mxu0 %v12969_v28  ;;  %9992 = vmatpush1.bf16.msra.mxu1 %v12971_v29 }
  0x37   :  { %9962 = vmatprep.subr.bf16.mxu0 %v12984_v33  ;;  %9994 = vmatprep.subr.bf16.mxu1 %v12986_v34 }
  0x3a   :  { %9964 = vmatpush1.bf16.msra.mxu0 %v13013_v44  ;;  %9996 = vmatpush1.bf16.msra.mxu1 %v13015_v45 }
  0x3b   :  { %9966 = vmatprep.subr.bf16.mxu0 %v13031_v52  ;;  %9998 = vmatprep.subr.bf16.mxu1 %v13033_v55 }
  0x3e   :  { %9968 = vmatpush1.bf16.msra.mxu0 %v13049_v60  ;;  %10000 = vmatpush1.bf16.msra.mxu1 %v13051_v61 }
  0x3f   :  { %9970 = vmatprep.subr.bf16.mxu0 %v13067_v8  ;;  %10002 = vmatprep.subr.bf16.mxu1 %v13069_v9 }
  0x42   :  { %9972 = vmatpush1.bf16.msra.mxu0 %v13085_v16  ;;  %10004 = vmatpush1.bf16.msra.mxu1 %v13087_v17 }
  0x43   :  { %9974 = vmatprep.subr.bf16.mxu0 %v13091_v20  ;;  %10006 = vmatprep.subr.bf16.mxu1 %v13093_v21 }
  0x46   :  { %9976 = vmatpush1.bf16.msra.mxu0 %v13097_v22  ;;  %10008 = vmatpush1.bf16.msra.mxu1 %v13099_v23 }
  0x47   :  { %10010 = vmatprep.subr.bf16.mxu0 %v12821_v40  ;;  %10042 = vmatprep.subr.bf16.mxu1 %v12823_v41 }
  0x49   :  { %550 = vmatmul.mubr.f32.vlgmr.msra.gmra.mrb[8].mxu0 %v15352_v1  ;;  %621 = vmatmul.mubr.f32.vlgmr.msra.gmra.mrb[8].mxu1 %v15352_v1 }
  0x4a   :  { %10012 = vmatpush1.bf16.msra.mxu0 %v12843_v49  ;;  %10044 = vmatpush1.bf16.msra.mxu1 %v12845_v50 }
  0x4b   :  { %10014 = vmatprep.subr.bf16.mxu0 %v12855_v53  ;;  %10046 = vmatprep.subr.bf16.mxu1 %v12857_v54 }
  0x4c   :  { %747 = vmatprep.mubr.f32.mxu0 %v15352_v1  ;;  %818 = vmatprep.mubr.f32.mxu1 %v15352_v1 }
  0x4e   :  { %10016 = vmatpush1.bf16.msra.mxu0 %v12884_v62  ;;  %10048 = vmatpush1.bf16.msra.mxu1 %v12886_v63 }
  0x4f   :  { %10018 = vmatprep.subr.bf16.mxu0 %v12899_v5  ;;  %10050 = vmatprep.subr.bf16.mxu1 %v12901_v6 }
  0x52   :  { %10020 = vmatpush1.bf16.msra.mxu0 %v12925_v14  ;;  %10052 = vmatpush1.bf16.msra.mxu1 %v12927_v15 }
  0x53   :  { %10022 = vmatprep.subr.bf16.mxu0 %v12937_v18  ;;  %10054 = vmatprep.subr.bf16.mxu1 %v12939_v19 }
  0x56   :  { %10024 = vmatpush1.bf16.msra.mxu0 %v12969_v28  ;;  %10056 = vmatpush1.bf16.msra.mxu1 %v12971_v29 }
  0x57   :  { %10026 = vmatprep.subr.bf16.mxu0 %v12984_v33  ;;  %10058 = vmatprep.subr.bf16.mxu1 %v12986_v34 }
  0x5a   :  { %10028 = vmatpush1.bf16.msra.mxu0 %v13013_v44  ;;  %10060 = vmatpush1.bf16.msra.mxu1 %v13015_v45 }
  0x5b   :  { %10030 = vmatprep.subr.bf16.mxu0 %v13031_v52  ;;  %10062 = vmatprep.subr.bf16.mxu1 %v13033_v55 }
  0x5e   :  { %10032 = vmatpush1.bf16.msra.mxu0 %v13049_v60  ;;  %10064 = vmatpush1.bf16.msra.mxu1 %v13051_v61 }
  0x5f   :  { %10034 = vmatprep.subr.bf16.mxu0 %v13067_v8  ;;  %10066 = vmatprep.subr.bf16.mxu1 %v13069_v9 }
  0x62   :  { %10036 = vmatpush1.bf16.msra.mxu0 %v13085_v16  ;;  %10068 = vmatpush1.bf16.msra.mxu1 %v13087_v17 }
  0x63   :  { %10038 = vmatprep.subr.bf16.mxu0 %v13091_v20  ;;  %10070 = vmatprep.subr.bf16.mxu1 %v13093_v21 }
  0x66   :  { %10040 = vmatpush1.bf16.msra.mxu0 %v13097_v22  ;;  %10072 = vmatpush1.bf16.msra.mxu1 %v13099_v23 }
  0x67   :  { %10074 = vmatprep.subr.bf16.mxu0 %v12821_v40  ;;  %10106 = vmatprep.subr.bf16.mxu1 %v12823_v41 }
  0xfc   :  { %v331_v39 = vpop.f32.mrb[0].mxu0  ;;  %v384_v42 = vpop.f32.mrb[0].mxu1 }
  0xfd   :  { %v332_v43 = vadd.f32 %v331_v39, %v124_v35  ;;  %v385_v46 = vadd.f32 %v384_v42, %v132_v36  ;;  %v333_v47 = vpop.f32.mrb[1].mxu0  ;;  %v386_v48 = vpop.f32.mrb[1].mxu1 }
  0xfe   :  { %v334_v51 = vadd.f32 %v333_v47, %v128_v37  ;;  %v387_v56 = vadd.f32 %v386_v48, %v136_v38  ;;  %v335_v57 = vpop.f32.mrb[2].mxu0  ;;  %v388_v58 = vpop.f32.mrb[2].mxu1 }
  0xff   :  { %403 = vst [vmem:[#allocation2] sm:$0xff] %v332_v43  ;;  %405 = vst [vmem:[#allocation2 + $0x10] sm:$0xff] %v385_v46  ;;  %v336_v59 = vadd.f32 %v335_v57, %v124_v35  ;;  %v389_v2 = vadd.f32 %v388_v58, %v132_v36  ;;  %v337_v3 = vpop.f32.mrb[3].mxu0  ;;  %v390_v4 = vpop.f32.mrb[3].mxu1  ;;  %v12621_v57 = vmov 1966171168  }
 0x100   :  { %404 = vst [vmem:[#allocation2 + $0x8] sm:$0xff] %v334_v51  ;;  %406 = vst [vmem:[#allocation2 + $0x18] sm:$0xff] %v387_v56  ;;  %v338_v7 = vadd.f32 %v337_v3, %v128_v37  ;;  %v391_v10 = vadd.f32 %v390_v4, %v136_v38  ;;  %v634_v58 = vunpack.c.l.s4 %v12621_v57 }
 0x101   :  { %407 = vst [vmem:[#allocation2 + $0x20] sm:$0xff] %v336_v59  ;;  %409 = vst [vmem:[#allocation2 + $0x30] sm:$0xff] %v389_v2 }
 0x102   :  { %408 = vst [vmem:[#allocation2 + $0x28] sm:$0xff] %v338_v7  ;;  %410 = vst [vmem:[#allocation2 + $0x38] sm:$0xff] %v391_v10  ;;  %v635_v59 = vunpack.c.0.s8 %v634_v58 }
 0x104   :  { %v341_v11 = vpop.f32.mrb[4].mxu0  ;;  %v394_v12 = vpop.f32.mrb[4].mxu1  ;;  %v13149_v2 = vsub.s32 %v635_v59, %v122_v25 }
 0x105   :  { %v342_v13 = vadd.f32 %v341_v11, %v124_v35  ;;  %v395_v24 = vadd.f32 %v394_v12, %v132_v36  ;;  %v343_v27 = vpop.f32.mrb[5].mxu0  ;;  %v396_v30 = vpop.f32.mrb[5].mxu1 }
 0x106   :  { %v344_v31 = vadd.f32 %v343_v27, %v128_v37  ;;  %v397_v32 = vadd.f32 %v396_v30, %v136_v38  ;;  %v345_v39 = vpop.f32.mrb[6].mxu0  ;;  %v398_v42 = vpop.f32.mrb[6].mxu1 }
 0x107   :  { %411 = vst [vmem:[#allocation2 + $0x40] sm:$0xff] %v342_v13  ;;  %413 = vst [vmem:[#allocation2 + $0x50] sm:$0xff] %v395_v24  ;;  %v346_v43 = vadd.f32 %v345_v39, %v124_v35  ;;  %v399_v46 = vadd.f32 %v398_v42, %v132_v36  ;;  %v347_v47 = vpop.f32.mrb[7].mxu0  ;;  %v400_v48 = vpop.f32.mrb[7].mxu1 }
 0x108   :  { %412 = vst [vmem:[#allocation2 + $0x48] sm:$0xff] %v344_v31  ;;  %414 = vst [vmem:[#allocation2 + $0x58] sm:$0xff] %v397_v32  ;;  %v348_v51 = vadd.f32 %v347_v47, %v128_v37  ;;  %v401_v56 = vadd.f32 %v400_v48, %v136_v38  ;;  %v484_v13 = vld [vmem:[#allocation2] ss:$8 sm:$0xf] }
 0x109   :  { %415 = vst [vmem:[#allocation2 + $0x60] sm:$0x7f] %v346_v43  ;;  %417 = vst [vmem:[#allocation2 + $0x70] sm:$0x7f] %v399_v46 }
 0x10a   :  { %416 = vst [vmem:[#allocation2 + $0x68] sm:$0x7f] %v348_v51  ;;  %418 = vst [vmem:[#allocation2 + $0x78] sm:$0x7f] %v401_v56 }
 0x11c   :  { %v551_v3 = vpop.f32.mrb[8].mxu0  ;;  %v622_v4 = vpop.f32.mrb[8].mxu1 }
 0x11d   :  { %v553_v7 = vpop.f32.mrb[9].mxu0  ;;  %v624_v35 = vpop.f32.mrb[9].mxu1 }
 0x11e   :  { %v631_v36 = vcombine.low %v551_v3, %v553_v7  ;;  %v632_v10 = vcombine.low %v622_v4, %v624_v35 }
 0x120   :  { %v639_v11 = vrot.slane %v631_v36, %v13149_v2  ;;  %v646_v37 = vrot.slane %v632_v10, %v13149_v2 }
 0x122   :  { %v647_v38 = vcombine.low %v639_v11, %v646_v37  ;;  %v682_v37 = vld [vmem:[#allocation2 + $0x1] ss:$8 sm:$0xf] }
 0x124   :  { %v654_v12 = vrot.slane %v647_v38, %v13149_v2 }
 0x126   :  { %v656_v24 = vadd.f32 %v654_v12, %v484_v13 }
 0x128   :  { %v9467_v27 = vmul.f32 -1.442695, %v656_v24  ;;  %v664_v31 = vrot.slane %v656_v24, 3 }
 0x12a   :  { %12258 = vpow2.f32 %v9467_v27 }
 0x134   :  { %v12259_v30 = vpop.eup %12258 }
 0x135   :  { %v660_v25 = vadd.f32 1.0, %v12259_v30 }
 0x137   :  { %12260 = vrcp.f32 %v660_v25 }
 0x138   :  { %12262 = vtanh.f32 %v664_v31 }
 0x141   :  { %v12261_v32 = vpop.eup %12260 }
 0x142   :  { %v668_v39 = vrot.slane %v12261_v32, 1  ;;  %v12263_v42 = vpop.eup %12262  ;;  %v674_v48 = vrot.slane %v12261_v32, 2 }
 0x143   :  { %v671_v43 = vmul.f32 %v12263_v42, %v12261_v32 }
 0x144   :  { %v670_v46 = vmul.f32 0.0, %v668_v39 }
 0x146   :  { %v13154_v47 = vadd.f32 %v671_v43, %v670_v46 }
 0x148   :  { %12264 = vtanh.f32 %v13154_v47 }
 0x152   :  { %v12265_v51 = vpop.eup %12264 }
 0x153   :  { %v676_v56 = vmul.f32 %v12265_v51, %v674_v48 }
 0x155   :  { %678 = vst.msk [vmem:[#allocation3] sm:$0x1] %vm677_vm2, %v676_v56  ;;  %748 = vmatmul.mubr.f32.vlgmr.msra.gmra.mrb[10].mxu0 %v676_v56  ;;  %819 = vmatmul.mubr.f32.vlgmr.msra.gmra.mrb[10].mxu1 %v676_v56 }
 0x156   :  { %680 = vst.msk [vmem:[#allocation3 + $0xf] sm:$0x1] %vm679_vm3, %v676_v56  ;;  %10076 = vmatpush1.bf16.msra.mxu0 %v12843_v49  ;;  %10108 = vmatpush1.bf16.msra.mxu1 %v12845_v50 }
 0x157   :  { %10078 = vmatprep.subr.bf16.mxu0 %v12855_v53  ;;  %10110 = vmatprep.subr.bf16.mxu1 %v12857_v54 }
 0x158   :  { %943 = vmatprep.mubr.f32.mxu0 %v15352_v1  ;;  %1014 = vmatprep.mubr.f32.mxu1 %v15352_v1 }
 0x15a   :  { %10080 = vmatpush1.bf16.msra.mxu0 %v12884_v62  ;;  %10112 = vmatpush1.bf16.msra.mxu1 %v12886_v63 }
 0x15b   :  { %10082 = vmatprep.subr.bf16.mxu0 %v12899_v5  ;;  %10114 = vmatprep.subr.bf16.mxu1 %v12901_v6 }
 0x15e   :  { %10084 = vmatpush1.bf16.msra.mxu0 %v12925_v14  ;;  %10116 = vmatpush1.bf16.msra.mxu1 %v12927_v15 }
 0x15f   :  { %10086 = vmatprep.subr.bf16.mxu0 %v12937_v18  ;;  %10118 = vmatprep.subr.bf16.mxu1 %v12939_v19 }
 0x162   :  { %10088 = vmatpush1.bf16.msra.mxu0 %v12969_v28  ;;  %10120 = vmatpush1.bf16.msra.mxu1 %v12971_v29 }
 0x163   :  { %10090 = vmatprep.subr.bf16.mxu0 %v12984_v33  ;;  %10122 = vmatprep.subr.bf16.mxu1 %v12986_v34 }
 0x166   :  { %10092 = vmatpush1.bf16.msra.mxu0 %v13013_v44  ;;  %10124 = vmatpush1.bf16.msra.mxu1 %v13015_v45 }
 0x167   :  { %10094 = vmatprep.subr.bf16.mxu0 %v13031_v52  ;;  %10126 = vmatprep.subr.bf16.mxu1 %v13033_v55 }
 0x16a   :  { %10096 = vmatpush1.bf16.msra.mxu0 %v13049_v60  ;;  %10128 = vmatpush1.bf16.msra.mxu1 %v13051_v61 }
 0x16b   :  { %10098 = vmatprep.subr.bf16.mxu0 %v13067_v8  ;;  %10130 = vmatprep.subr.bf16.mxu1 %v13069_v9 }
 0x16e   :  { %10100 = vmatpush1.bf16.msra.mxu0 %v13085_v16  ;;  %10132 = vmatpush1.bf16.msra.mxu1 %v13087_v17 }
 0x16f   :  { %10102 = vmatprep.subr.bf16.mxu0 %v13091_v20  ;;  %10134 = vmatprep.subr.bf16.mxu1 %v13093_v21 }
 0x172   :  { %10104 = vmatpush1.bf16.msra.mxu0 %v13097_v22  ;;  %10136 = vmatpush1.bf16.msra.mxu1 %v13099_v23 }
 0x173   :  { %10138 = vmatprep.subr.bf16.mxu0 %v12821_v40  ;;  %10170 = vmatprep.subr.bf16.mxu1 %v12823_v41 }
 0x228   :  { %v749_v57 = vpop.f32.mrb[10].mxu0  ;;  %v820_v58 = vpop.f32.mrb[10].mxu1 }
 0x229   :  { %v751_v59 = vpop.f32.mrb[11].mxu0  ;;  %v822_v3 = vpop.f32.mrb[11].mxu1 }
 0x22a   :  { %v829_v4 = vcombine.low %v749_v57, %v751_v59  ;;  %v830_v7 = vcombine.low %v820_v58, %v822_v3 }
 0x22c   :  { %v837_v35 = vrot.slane %v829_v4, %v13149_v2  ;;  %v844_v36 = vrot.slane %v830_v7, %v13149_v2 }
 0x22e   :  { %v845_v10 = vcombine.low %v837_v35, %v844_v36  ;;  %v878_v36 = vld [vmem:[#allocation2 + $0x2] ss:$8 sm:$0xf] }
 0x230   :  { %v852_v11 = vrot.slane %v845_v10, %v13149_v2 }
 0x232   :  { %v854_v38 = vadd.f32 %v852_v11, %v682_v37 }
 0x234   :  { %v9468_v12 = vmul.f32 -1.442695, %v854_v38  ;;  %v862_v27 = vrot.slane %v854_v38, 3 }
 0x236   :  { %12266 = vpow2.f32 %v9468_v12 }
 0x240   :  { %v12267_v13 = vpop.eup %12266 }
 0x241   :  { %v858_v24 = vadd.f32 1.0, %v12267_v13 }
 0x243   :  { %12268 = vrcp.f32 %v858_v24 }
 0x244   :  { %12270 = vtanh.f32 %v862_v27 }
 0x24d   :  { %v12269_v30 = vpop.eup %12268 }
 0x24e   :  { %v866_v25 = vrot.slane %v12269_v30, 1  ;;  %v12271_v31 = vpop.eup %12270  ;;  %v872_v43 = vrot.slane %v12269_v30, 2 }
 0x24f   :  { %v869_v32 = vmul.f32 %v12271_v31, %v12269_v30 }
 0x250   :  { %v868_v39 = vmul.f32 %v866_v25, %v13154_v47 }
 0x252   :  { %v13197_v42 = vadd.f32 %v869_v32, %v868_v39 }
 0x254   :  { %12272 = vtanh.f32 %v13197_v42 }
 0x25e   :  { %v12273_v46 = vpop.eup %12272 }
 0x25f   :  { %v874_v48 = vmul.f32 %v12273_v46, %v872_v43 }
 0x261   :  { %875 = vst.msk [vmem:[#allocation3 + $0x10] sm:$0x1] %vm677_vm2, %v874_v48  ;;  %944 = vmatmul.mubr.f32.vlgmr.msra.gmra.mrb[12].mxu0 %v874_v48  ;;  %1015 = vmatmul.mubr.f32.vlgmr.msra.gmra.mrb[12].mxu1 %v874_v48 }
 0x262   :  { %876 = vst.msk [vmem:[#allocation3 + $0x1e] sm:$0x1] %vm679_vm3, %v874_v48  ;;  %10140 = vmatpush1.bf16.msra.mxu0 %v12843_v49  ;;  %10172 = vmatpush1.bf16.msra.mxu1 %v12845_v50 }
 0x263   :  { %10142 = vmatprep.subr.bf16.mxu0 %v12855_v53  ;;  %10174 = vmatprep.subr.bf16.mxu1 %v12857_v54 }
 0x264   :  { %1139 = vmatprep.mubr.f32.mxu0 %v15352_v1  ;;  %1210 = vmatprep.mubr.f32.mxu1 %v15352_v1 }
 0x266   :  { %10144 = vmatpush1.bf16.msra.mxu0 %v12884_v62  ;;  %10176 = vmatpush1.bf16.msra.mxu1 %v12886_v63 }
 0x267   :  { %10146 = vmatprep.subr.bf16.mxu0 %v12899_v5  ;;  %10178 = vmatprep.subr.bf16.mxu1 %v12901_v6 }
 0x26a   :  { %10148 = vmatpush1.bf16.msra.mxu0 %v12925_v14  ;;  %10180 = vmatpush1.bf16.msra.mxu1 %v12927_v15 }
 0x26b   :  { %10150 = vmatprep.subr.bf16.mxu0 %v12937_v18  ;;  %10182 = vmatprep.subr.bf16.mxu1 %v12939_v19 }
 0x26e   :  { %10152 = vmatpush1.bf16.msra.mxu0 %v12969_v28  ;;  %10184 = vmatpush1.bf16.msra.mxu1 %v12971_v29 }
 0x26f   :  { %10154 = vmatprep.subr.bf16.mxu0 %v12984_v33  ;;  %10186 = vmatprep.subr.bf16.mxu1 %v12986_v34 }
 0x272   :  { %10156 = vmatpush1.bf16.msra.mxu0 %v13013_v44  ;;  %10188 = vmatpush1.bf16.msra.mxu1 %v13015_v45 }
 0x273   :  { %10158 = vmatprep.subr.bf16.mxu0 %v13031_v52  ;;  %10190 = vmatprep.subr.bf16.mxu1 %v13033_v55 }
 0x276   :  { %10160 = vmatpush1.bf16.msra.mxu0 %v13049_v60  ;;  %10192 = vmatpush1.bf16.msra.mxu1 %v13051_v61 }
 0x277   :  { %10162 = vmatprep.subr.bf16.mxu0 %v13067_v8  ;;  %10194 = vmatprep.subr.bf16.mxu1 %v13069_v9 }
 0x27a   :  { %10164 = vmatpush1.bf16.msra.mxu0 %v13085_v16  ;;  %10196 = vmatpush1.bf16.msra.mxu1 %v13087_v17 }
 0x27b   :  { %10166 = vmatprep.subr.bf16.mxu0 %v13091_v20  ;;  %10198 = vmatprep.subr.bf16.mxu1 %v13093_v21 }
 0x27e   :  { %10168 = vmatpush1.bf16.msra.mxu0 %v13097_v22  ;;  %10200 = vmatpush1.bf16.msra.mxu1 %v13099_v23 }
 0x27f   :  { %10202 = vmatprep.subr.bf16.mxu0 %v12821_v40  ;;  %10234 = vmatprep.subr.bf16.mxu1 %v12823_v41 }
 0x334   :  { %v945_v47 = vpop.f32.mrb[12].mxu0  ;;  %v1016_v51 = vpop.f32.mrb[12].mxu1 }
 0x335   :  { %v947_v56 = vpop.f32.mrb[13].mxu0  ;;  %v1018_v57 = vpop.f32.mrb[13].mxu1 }
 0x336   :  { %v1025_v58 = vcombine.low %v945_v47, %v947_v56  ;;  %v1026_v59 = vcombine.low %v1016_v51, %v1018_v57 }
 0x338   :  { %v1033_v3 = vrot.slane %v1025_v58, %v13149_v2  ;;  %v1040_v4 = vrot.slane %v1026_v59, %v13149_v2 }
 0x33a   :  { %v1041_v7 = vcombine.low %v1033_v3, %v1040_v4  ;;  %v1074_v4 = vld [vmem:[#allocation2 + $0x3] ss:$8 sm:$0xf] }
 0x33c   :  { %v1048_v35 = vrot.slane %v1041_v7, %v13149_v2 }
 0x33e   :  { %v1050_v10 = vadd.f32 %v1048_v35, %v878_v36 }
 0x340   :  { %v9469_v11 = vmul.f32 -1.442695, %v1050_v10  ;;  %v1058_v12 = vrot.slane %v1050_v10, 3 }
 0x342   :  { %12274 = vpow2.f32 %v9469_v11 }
 0x34c   :  { %v12275_v37 = vpop.eup %12274 }
 0x34d   :  { %v1054_v38 = vadd.f32 1.0, %v12275_v37 }
 0x34f   :  { %12276 = vrcp.f32 %v1054_v38 }
 0x350   :  { %12278 = vtanh.f32 %v1058_v12 }
 0x359   :  { %v12277_v13 = vpop.eup %12276 }
 0x35a   :  { %v1062_v24 = vrot.slane %v12277_v13, 1  ;;  %v12279_v27 = vpop.eup %12278  ;;  %v1068_v32 = vrot.slane %v12277_v13, 2 }
 0x35b   :  { %v1065_v30 = vmul.f32 %v12279_v27, %v12277_v13 }
 0x35c   :  { %v1064_v25 = vmul.f32 %v1062_v24, %v13197_v42 }
 0x35e   :  { %v13240_v31 = vadd.f32 %v1065_v30, %v1064_v25 }
 0x360   :  { %12280 = vtanh.f32 %v13240_v31 }
 0x36a   :  { %v12281_v39 = vpop.eup %12280 }
 0x36b   :  { %v1070_v43 = vmul.f32 %v12281_v39, %v1068_v32 }
 0x36d   :  { %1071 = vst.msk [vmem:[#allocation3 + $0x1] sm:$0x1] %vm677_vm2, %v1070_v43  ;;  %1140 = vmatmul.mubr.f32.vlgmr.msra.gmra.mrb[14].mxu0 %v1070_v43  ;;  %1211 = vmatmul.mubr.f32.vlgmr.msra.gmra.mrb[14].mxu1 %v1070_v43 }
 0x36e   :  { %1072 = vst.msk [vmem:[#allocation3 + $0xe] sm:$0x1] %vm679_vm3, %v1070_v43  ;;  %10204 = vmatpush1.bf16.msra.mxu0 %v12843_v49  ;;  %10236 = vmatpush1.bf16.msra.mxu1 %v12845_v50 }
 0x36f   :  { %10206 = vmatprep.subr.bf16.mxu0 %v12855_v53  ;;  %10238 = vmatprep.subr.bf16.mxu1 %v12857_v54 }
 0x370   :  { %1335 = vmatprep.mubr.f32.mxu0 %v15352_v1  ;;  %1406 = vmatprep.mubr.f32.mxu1 %v15352_v1 }
 0x372   :  { %10208 = vmatpush1.bf16.msra.mxu0 %v12884_v62  ;;  %10240 = vmatpush1.bf16.msra.mxu1 %v12886_v63 }
 0x373   :  { %10210 = vmatprep.subr.bf16.mxu0 %v12899_v5  ;;  %10242 = vmatprep.subr.bf16.mxu1 %v12901_v6 }
 0x376   :  { %10212 = vmatpush1.bf16.msra.mxu0 %v12925_v14  ;;  %10244 = vmatpush1.bf16.msra.mxu1 %v12927_v15 }
 0x377   :  { %10214 = vmatprep.subr.bf16.mxu0 %v12937_v18  ;;  %10246 = vmatprep.subr.bf16.mxu1 %v12939_v19 }
 0x37a   :  { %10216 = vmatpush1.bf16.msra.mxu0 %v12969_v28  ;;  %10248 = vmatpush1.bf16.msra.mxu1 %v12971_v29 }
 0x37b   :  { %10218 = vmatprep.subr.bf16.mxu0 %v12984_v33  ;;  %10250 = vmatprep.subr.bf16.mxu1 %v12986_v34 }
 0x37e   :  { %10220 = vmatpush1.bf16.msra.mxu0 %v13013_v44  ;;  %10252 = vmatpush1.bf16.msra.mxu1 %v13015_v45 }
 0x37f   :  { %10222 = vmatprep.subr.bf16.mxu0 %v13031_v52  ;;  %10254 = vmatprep.subr.bf16.mxu1 %v13033_v55 }
 0x382   :  { %10224 = vmatpush1.bf16.msra.mxu0 %v13049_v60  ;;  %10256 = vmatpush1.bf16.msra.mxu1 %v13051_v61 }
 0x383   :  { %10226 = vmatprep.subr.bf16.mxu0 %v13067_v8  ;;  %10258 = vmatprep.subr.bf16.mxu1 %v13069_v9 }
 0x386   :  { %10228 = vmatpush1.bf16.msra.mxu0 %v13085_v16  ;;  %10260 = vmatpush1.bf16.msra.mxu1 %v13087_v17 }
 0x387   :  { %10230 = vmatprep.subr.bf16.mxu0 %v13091_v20  ;;  %10262 = vmatprep.subr.bf16.mxu1 %v13093_v21 }
 0x38a   :  { %10232 = vmatpush1.bf16.msra.mxu0 %v13097_v22  ;;  %10264 = vmatpush1.bf16.msra.mxu1 %v13099_v23 }
 0x38b   :  { %10266 = vmatprep.subr.bf16.mxu0 %v12821_v40  ;;  %10298 = vmatprep.subr.bf16.mxu1 %v12823_v41 }
 0x440   :  { %v1141_v42 = vpop.f32.mrb[14].mxu0  ;;  %v1212_v46 = vpop.f32.mrb[14].mxu1 }
 0x441   :  { %v1143_v48 = vpop.f32.mrb[15].mxu0  ;;  %v1214_v47 = vpop.f32.mrb[15].mxu1 }
 0x442   :  { %v1221_v51 = vcombine.low %v1141_v42, %v1143_v48  ;;  %v1222_v56 = vcombine.low %v1212_v46, %v1214_v47 }
 0x444   :  { %v1229_v57 = vrot.slane %v1221_v51, %v13149_v2  ;;  %v1236_v58 = vrot.slane %v1222_v56, %v13149_v2 }
 0x446   :  { %v1237_v59 = vcombine.low %v1229_v57, %v1236_v58  ;;  %v1270_v58 = vld [vmem:[#allocation2 + $0x4] ss:$8 sm:$0xf] }
 0x448   :  { %v1244_v3 = vrot.slane %v1237_v59, %v13149_v2 }
 0x44a   :  { %v1246_v7 = vadd.f32 %v1244_v3, %v1074_v4 }
 0x44c   :  { %v9470_v35 = vmul.f32 -1.442695, %v1246_v7  ;;  %v1254_v11 = vrot.slane %v1246_v7, 3 }
 0x44e   :  { %12282 = vpow2.f32 %v9470_v35 }
 0x458   :  { %v12283_v36 = vpop.eup %12282 }
 0x459   :  { %v1250_v10 = vadd.f32 1.0, %v12283_v36 }
 0x45b   :  { %12284 = vrcp.f32 %v1250_v10 }
 0x45c   :  { %12286 = vtanh.f32 %v1254_v11 }
 0x465   :  { %v12285_v37 = vpop.eup %12284 }
 0x466   :  { %v1258_v38 = vrot.slane %v12285_v37, 1  ;;  %v12287_v12 = vpop.eup %12286  ;;  %v1264_v30 = vrot.slane %v12285_v37, 2 }
 0x467   :  { %v1261_v13 = vmul.f32 %v12287_v12, %v12285_v37 }
 0x468   :  { %v1260_v24 = vmul.f32 %v1258_v38, %v13240_v31 }
 0x46a   :  { %v13283_v27 = vadd.f32 %v1261_v13, %v1260_v24 }
 0x46c   :  { %12288 = vtanh.f32 %v13283_v27 }
 0x476   :  { %v12289_v25 = vpop.eup %12288 }
 0x477   :  { %v1266_v32 = vmul.f32 %v12289_v25, %v1264_v30 }
 0x479   :  { %1267 = vst.msk [vmem:[#allocation3 + $0x11] sm:$0x1] %vm677_vm2, %v1266_v32  ;;  %1336 = vmatmul.mubr.f32.vlgmr.msra.gmra.mrb[16].mxu0 %v1266_v32  ;;  %1407 = vmatmul.mubr.f32.vlgmr.msra.gmra.mrb[16].mxu1 %v1266_v32 }
 0x47a   :  { %1268 = vst.msk [vmem:[#allocation3 + $0x1d] sm:$0x1] %vm679_vm3, %v1266_v32  ;;  %10268 = vmatpush1.bf16.msra.mxu0 %v12843_v49  ;;  %10300 = vmatpush1.bf16.msra.mxu1 %v12845_v50 }
 0x47b   :  { %10270 = vmatprep.subr.bf16.mxu0 %v12855_v53  ;;  %10302 = vmatprep.subr.bf16.mxu1 %v12857_v54 }
 0x47c   :  { %1531 = vmatprep.mubr.f32.mxu0 %v15352_v1  ;;  %1602 = vmatprep.mubr.f32.mxu1 %v15352_v1 }
 0x47e   :  { %10272 = vmatpush1.bf16.msra.mxu0 %v12884_v62  ;;  %10304 = vmatpush1.bf16.msra.mxu1 %v12886_v63 }
 0x47f   :  { %10274 = vmatprep.subr.bf16.mxu0 %v12899_v5  ;;  %10306 = vmatprep.subr.bf16.mxu1 %v12901_v6 }
 0x482   :  { %10276 = vmatpush1.bf16.msra.mxu0 %v12925_v14  ;;  %10308 = vmatpush1.bf16.msra.mxu1 %v12927_v15 }
 0x483   :  { %10278 = vmatprep.subr.bf16.mxu0 %v12937_v18  ;;  %10310 = vmatprep.subr.bf16.mxu1 %v12939_v19 }
 0x486   :  { %10280 = vmatpush1.bf16.msra.mxu0 %v12969_v28  ;;  %10312 = vmatpush1.bf16.msra.mxu1 %v12971_v29 }
 0x487   :  { %10282 = vmatprep.subr.bf16.mxu0 %v12984_v33  ;;  %10314 = vmatprep.subr.bf16.mxu1 %v12986_v34 }
 0x48a   :  { %10284 = vmatpush1.bf16.msra.mxu0 %v13013_v44  ;;  %10316 = vmatpush1.bf16.msra.mxu1 %v13015_v45 }
 0x48b   :  { %10286 = vmatprep.subr.bf16.mxu0 %v13031_v52  ;;  %10318 = vmatprep.subr.bf16.mxu1 %v13033_v55 }
 0x48e   :  { %10288 = vmatpush1.bf16.msra.mxu0 %v13049_v60  ;;  %10320 = vmatpush1.bf16.msra.mxu1 %v13051_v61 }
 0x48f   :  { %10290 = vmatprep.subr.bf16.mxu0 %v13067_v8  ;;  %10322 = vmatprep.subr.bf16.mxu1 %v13069_v9 }
 0x492   :  { %10292 = vmatpush1.bf16.msra.mxu0 %v13085_v16  ;;  %10324 = vmatpush1.bf16.msra.mxu1 %v13087_v17 }
 0x493   :  { %10294 = vmatprep.subr.bf16.mxu0 %v13091_v20  ;;  %10326 = vmatprep.subr.bf16.mxu1 %v13093_v21 }
 0x496   :  { %10296 = vmatpush1.bf16.msra.mxu0 %v13097_v22  ;;  %10328 = vmatpush1.bf16.msra.mxu1 %v13099_v23 }
 0x497   :  { %10330 = vmatprep.subr.bf16.mxu0 %v12821_v40  ;;  %10362 = vmatprep.subr.bf16.mxu1 %v12823_v41 }
 0x54c   :  { %v1337_v31 = vpop.f32.mrb[16].mxu0  ;;  %v1408_v39 = vpop.f32.mrb[16].mxu1 }
 0x54d   :  { %v1339_v43 = vpop.f32.mrb[17].mxu0  ;;  %v1410_v42 = vpop.f32.mrb[17].mxu1 }
 0x54e   :  { %v1417_v46 = vcombine.low %v1337_v31, %v1339_v43  ;;  %v1418_v48 = vcombine.low %v1408_v39, %v1410_v42 }
 0x550   :  { %v1425_v47 = vrot.slane %v1417_v46, %v13149_v2  ;;  %v1432_v51 = vrot.slane %v1418_v48, %v13149_v2 }
 0x552   :  { %v1433_v56 = vcombine.low %v1425_v47, %v1432_v51  ;;  %v1466_v51 = vld [vmem:[#allocation2 + $0x5] ss:$8 sm:$0xf] }
 0x554   :  { %v1440_v57 = vrot.slane %v1433_v56, %v13149_v2 }
 0x556   :  { %v1442_v59 = vadd.f32 %v1440_v57, %v1270_v58 }
 0x558   :  { %v9471_v3 = vmul.f32 -1.442695, %v1442_v59  ;;  %v1450_v35 = vrot.slane %v1442_v59, 3 }
 0x55a   :  { %12290 = vpow2.f32 %v9471_v3 }
 0x564   :  { %v12291_v4 = vpop.eup %12290 }
 0x565   :  { %v1446_v7 = vadd.f32 1.0, %v12291_v4 }
 0x567   :  { %12292 = vrcp.f32 %v1446_v7 }
 0x568   :  { %12294 = vtanh.f32 %v1450_v35 }
 0x571   :  { %v12293_v36 = vpop.eup %12292 }
 0x572   :  { %v1454_v10 = vrot.slane %v12293_v36, 1  ;;  %v12295_v11 = vpop.eup %12294  ;;  %v1460_v13 = vrot.slane %v12293_v36, 2 }
 0x573   :  { %v1457_v37 = vmul.f32 %v12295_v11, %v12293_v36 }
 0x574   :  { %v1456_v38 = vmul.f32 %v1454_v10, %v13283_v27 }
 0x576   :  { %v13326_v12 = vadd.f32 %v1457_v37, %v1456_v38 }
 0x578   :  { %12296 = vtanh.f32 %v13326_v12 }
 0x582   :  { %v12297_v24 = vpop.eup %12296 }
 0x583   :  { %v1462_v30 = vmul.f32 %v12297_v24, %v1460_v13 }
 0x585   :  { %1463 = vst.msk [vmem:[#allocation3 + $0x2] sm:$0x1] %vm677_vm2, %v1462_v30  ;;  %1532 = vmatmul.mubr.f32.vlgmr.msra.gmra.mrb[18].mxu0 %v1462_v30  ;;  %1603 = vmatmul.mubr.f32.vlgmr.msra.gmra.mrb[18].mxu1 %v1462_v30 }
 0x586   :  { %1464 = vst.msk [vmem:[#allocation3 + $0xd] sm:$0x1] %vm679_vm3, %v1462_v30  ;;  %10332 = vmatpush1.bf16.msra.mxu0 %v12843_v49  ;;  %10364 = vmatpush1.bf16.msra.mxu1 %v12845_v50 }
 0x587   :  { %10334 = vmatprep.subr.bf16.mxu0 %v12855_v53  ;;  %10366 = vmatprep.subr.bf16.mxu1 %v12857_v54 }
 0x588   :  { %1727 = vmatprep.mubr.f32.mxu0 %v15352_v1  ;;  %1798 = vmatprep.mubr.f32.mxu1 %v15352_v1 }
 0x58a   :  { %10336 = vmatpush1.bf16.msra.mxu0 %v12884_v62  ;;  %10368 = vmatpush1.bf16.msra.mxu1 %v12886_v63 }
 0x58b   :  { %10338 = vmatprep.subr.bf16.mxu0 %v12899_v5  ;;  %10370 = vmatprep.subr.bf16.mxu1 %v12901_v6 }
 0x58e   :  { %10340 = vmatpush1.bf16.msra.mxu0 %v12925_v14  ;;  %10372 = vmatpush1.bf16.msra.mxu1 %v12927_v15 }
 0x58f   :  { %10342 = vmatprep.subr.bf16.mxu0 %v12937_v18  ;;  %10374 = vmatprep.subr.bf16.mxu1 %v12939_v19 }
 0x592   :  { %10344 = vmatpush1.bf16.msra.mxu0 %v12969_v28  ;;  %10376 = vmatpush1.bf16.msra.mxu1 %v12971_v29 }
 0x593   :  { %10346 = vmatprep.subr.bf16.mxu0 %v12984_v33  ;;  %10378 = vmatprep.subr.bf16.mxu1 %v12986_v34 }
 0x596   :  { %10348 = vmatpush1.bf16.msra.mxu0 %v13013_v44  ;;  %10380 = vmatpush1.bf16.msra.mxu1 %v13015_v45 }
 0x597   :  { %10350 = vmatprep.subr.bf16.mxu0 %v13031_v52  ;;  %10382 = vmatprep.subr.bf16.mxu1 %v13033_v55 }
 0x59a   :  { %10352 = vmatpush1.bf16.msra.mxu0 %v13049_v60  ;;  %10384 = vmatpush1.bf16.msra.mxu1 %v13051_v61 }
 0x59b   :  { %10354 = vmatprep.subr.bf16.mxu0 %v13067_v8  ;;  %10386 = vmatprep.subr.bf16.mxu1 %v13069_v9 }
 0x59e   :  { %10356 = vmatpush1.bf16.msra.mxu0 %v13085_v16  ;;  %10388 = vmatpush1.bf16.msra.mxu1 %v13087_v17 }
 0x59f   :  { %10358 = vmatprep.subr.bf16.mxu0 %v13091_v20  ;;  %10390 = vmatprep.subr.bf16.mxu1 %v13093_v21 }
 0x5a2   :  { %10360 = vmatpush1.bf16.msra.mxu0 %v13097_v22  ;;  %10392 = vmatpush1.bf16.msra.mxu1 %v13099_v23 }
 0x5a3   :  { %10394 = vmatprep.subr.bf16.mxu0 %v12821_v40  ;;  %10426 = vmatprep.subr.bf16.mxu1 %v12823_v41 }
 0x658   :  { %v1533_v27 = vpop.f32.mrb[18].mxu0  ;;  %v1604_v25 = vpop.f32.mrb[18].mxu1 }
 0x659   :  { %v1535_v32 = vpop.f32.mrb[19].mxu0  ;;  %v1606_v31 = vpop.f32.mrb[19].mxu1 }
 0x65a   :  { %v1613_v39 = vcombine.low %v1533_v27, %v1535_v32  ;;  %v1614_v43 = vcombine.low %v1604_v25, %v1606_v31 }
 0x65c   :  { %v1621_v42 = vrot.slane %v1613_v39, %v13149_v2  ;;  %v1628_v46 = vrot.slane %v1614_v43, %v13149_v2 }
 0x65e   :  { %v1629_v48 = vcombine.low %v1621_v42, %v1628_v46  ;;  %v1662_v46 = vld [vmem:[#allocation2 + $0x6] ss:$8 sm:$0xf] }
 0x660   :  { %v1636_v47 = vrot.slane %v1629_v48, %v13149_v2 }
 0x662   :  { %v1638_v56 = vadd.f32 %v1636_v47, %v1466_v51 }
 0x664   :  { %v9472_v57 = vmul.f32 -1.442695, %v1638_v56  ;;  %v1646_v3 = vrot.slane %v1638_v56, 3 }
 0x666   :  { %12298 = vpow2.f32 %v9472_v57 }
 0x670   :  { %v12299_v58 = vpop.eup %12298 }
 0x671   :  { %v1642_v59 = vadd.f32 1.0, %v12299_v58 }
 0x673   :  { %12300 = vrcp.f32 %v1642_v59 }
 0x674   :  { %12302 = vtanh.f32 %v1646_v3 }
 0x67d   :  { %v12301_v4 = vpop.eup %12300 }
 0x67e   :  { %v1650_v7 = vrot.slane %v12301_v4, 1  ;;  %v12303_v35 = vpop.eup %12302  ;;  %v1656_v37 = vrot.slane %v12301_v4, 2 }
 0x67f   :  { %v1653_v36 = vmul.f32 %v12303_v35, %v12301_v4 }
 0x680   :  { %v1652_v10 = vmul.f32 %v1650_v7, %v13326_v12 }
 0x682   :  { %v13369_v11 = vadd.f32 %v1653_v36, %v1652_v10 }
 0x684   :  { %12304 = vtanh.f32 %v13369_v11 }
 0x68e   :  { %v12305_v38 = vpop.eup %12304 }
 0x68f   :  { %v1658_v13 = vmul.f32 %v12305_v38, %v1656_v37 }
 0x691   :  { %1659 = vst.msk [vmem:[#allocation3 + $0x12] sm:$0x1] %vm677_vm2, %v1658_v13  ;;  %1728 = vmatmul.mubr.f32.vlgmr.msra.gmra.mrb[20].mxu0 %v1658_v13  ;;  %1799 = vmatmul.mubr.f32.vlgmr.msra.gmra.mrb[20].mxu1 %v1658_v13 }
 0x692   :  { %1660 = vst.msk [vmem:[#allocation3 + $0x1c] sm:$0x1] %vm679_vm3, %v1658_v13  ;;  %10396 = vmatpush1.bf16.msra.mxu0 %v12843_v49  ;;  %10428 = vmatpush1.bf16.msra.mxu1 %v12845_v50 }
 0x693   :  { %10398 = vmatprep.subr.bf16.mxu0 %v12855_v53  ;;  %10430 = vmatprep.subr.bf16.mxu1 %v12857_v54 }
 0x694   :  { %1923 = vmatprep.mubr.f32.mxu0 %v15352_v1  ;;  %1994 = vmatprep.mubr.f32.mxu1 %v15352_v1 }
 0x696   :  { %10400 = vmatpush1.bf16.msra.mxu0 %v12884_v62  ;;  %10432 = vmatpush1.bf16.msra.mxu1 %v12886_v63 }
 0x697   :  { %10402 = vmatprep.subr.bf16.mxu0 %v12899_v5  ;;  %10434 = vmatprep.subr.bf16.mxu1 %v12901_v6 }
 0x69a   :  { %10404 = vmatpush1.bf16.msra.mxu0 %v12925_v14  ;;  %10436 = vmatpush1.bf16.msra.mxu1 %v12927_v15 }
 0x69b   :  { %10406 = vmatprep.subr.bf16.mxu0 %v12937_v18  ;;  %10438 = vmatprep.subr.bf16.mxu1 %v12939_v19 }
 0x69e   :  { %10408 = vmatpush1.bf16.msra.mxu0 %v12969_v28  ;;  %10440 = vmatpush1.bf16.msra.mxu1 %v12971_v29 }
 0x69f   :  { %10410 = vmatprep.subr.bf16.mxu0 %v12984_v33  ;;  %10442 = vmatprep.subr.bf16.mxu1 %v12986_v34 }
 0x6a2   :  { %10412 = vmatpush1.bf16.msra.mxu0 %v13013_v44  ;;  %10444 = vmatpush1.bf16.msra.mxu1 %v13015_v45 }
 0x6a3   :  { %10414 = vmatprep.subr.bf16.mxu0 %v13031_v52  ;;  %10446 = vmatprep.subr.bf16.mxu1 %v13033_v55 }
 0x6a6   :  { %10416 = vmatpush1.bf16.msra.mxu0 %v13049_v60  ;;  %10448 = vmatpush1.bf16.msra.mxu1 %v13051_v61 }
 0x6a7   :  { %10418 = vmatprep.subr.bf16.mxu0 %v13067_v8  ;;  %10450 = vmatprep.subr.bf16.mxu1 %v13069_v9 }
 0x6aa   :  { %10420 = vmatpush1.bf16.msra.mxu0 %v13085_v16  ;;  %10452 = vmatpush1.bf16.msra.mxu1 %v13087_v17 }
 0x6ab   :  { %10422 = vmatprep.subr.bf16.mxu0 %v13091_v20  ;;  %10454 = vmatprep.subr.bf16.mxu1 %v13093_v21 }
 0x6ae   :  { %10424 = vmatpush1.bf16.msra.mxu0 %v13097_v22  ;;  %10456 = vmatpush1.bf16.msra.mxu1 %v13099_v23 }
 0x6af   :  { %10458 = vmatprep.subr.bf16.mxu0 %v12821_v40  ;;  %10490 = vmatprep.subr.bf16.mxu1 %v12823_v41 }
 0x764   :  { %v1729_v12 = vpop.f32.mrb[20].mxu0  ;;  %v1800_v24 = vpop.f32.mrb[20].mxu1 }
 0x765   :  { %v1731_v30 = vpop.f32.mrb[21].mxu0  ;;  %v1802_v27 = vpop.f32.mrb[21].mxu1 }
 0x766   :  { %v1809_v25 = vcombine.low %v1729_v12, %v1731_v30  ;;  %v1810_v32 = vcombine.low %v1800_v24, %v1802_v27 }
 0x768   :  { %v1817_v31 = vrot.slane %v1809_v25, %v13149_v2  ;;  %v1824_v39 = vrot.slane %v1810_v32, %v13149_v2 }
 0x76a   :  { %v1825_v43 = vcombine.low %v1817_v31, %v1824_v39  ;;  %v1858_v39 = vld [vmem:[#allocation2 + $0x7] ss:$8 sm:$0xf] }
 0x76c   :  { %v1832_v42 = vrot.slane %v1825_v43, %v13149_v2 }
 0x76e   :  { %v1834_v48 = vadd.f32 %v1832_v42, %v1662_v46 }
 0x770   :  { %v9473_v47 = vmul.f32 -1.442695, %v1834_v48  ;;  %v1842_v57 = vrot.slane %v1834_v48, 3 }
 0x772   :  { %12306 = vpow2.f32 %v9473_v47 }
 0x77c   :  { %v12307_v51 = vpop.eup %12306 }
 0x77d   :  { %v1838_v56 = vadd.f32 1.0, %v12307_v51 }
 0x77f   :  { %12308 = vrcp.f32 %v1838_v56 }
 0x780   :  { %12310 = vtanh.f32 %v1842_v57 }
 0x789   :  { %v12309_v58 = vpop.eup %12308 }
 0x78a   :  { %v1846_v59 = vrot.slane %v12309_v58, 1  ;;  %v12311_v3 = vpop.eup %12310  ;;  %v1852_v36 = vrot.slane %v12309_v58, 2 }
 0x78b   :  { %v1849_v4 = vmul.f32 %v12311_v3, %v12309_v58 }
 0x78c   :  { %v1848_v7 = vmul.f32 %v1846_v59, %v13369_v11 }
 0x78e   :  { %v13412_v35 = vadd.f32 %v1849_v4, %v1848_v7 }
 0x790   :  { %12312 = vtanh.f32 %v13412_v35 }
 0x79a   :  { %v12313_v10 = vpop.eup %12312 }
 0x79b   :  { %v1854_v37 = vmul.f32 %v12313_v10, %v1852_v36 }
 0x79d   :  { %1855 = vst.msk [vmem:[#allocation3 + $0x3] sm:$0x1] %vm677_vm2, %v1854_v37  ;;  %1924 = vmatmul.mubr.f32.vlgmr.msra.gmra.mrb[22].mxu0 %v1854_v37  ;;  %1995 = vmatmul.mubr.f32.vlgmr.msra.gmra.mrb[22].mxu1 %v1854_v37 }
 0x79e   :  { %1856 = vst.msk [vmem:[#allocation3 + $0xc] sm:$0x1] %vm679_vm3, %v1854_v37  ;;  %10460 = vmatpush1.bf16.msra.mxu0 %v12843_v49  ;;  %10492 = vmatpush1.bf16.msra.mxu1 %v12845_v50 }
 0x79f   :  { %10462 = vmatprep.subr.bf16.mxu0 %v12855_v53  ;;  %10494 = vmatprep.subr.bf16.mxu1 %v12857_v54 }
 0x7a0   :  { %2119 = vmatprep.mubr.f32.mxu0 %v15352_v1  ;;  %2190 = vmatprep.mubr.f32.mxu1 %v15352_v1 }
 0x7a2   :  { %10464 = vmatpush1.bf16.msra.mxu0 %v12884_v62  ;;  %10496 = vmatpush1.bf16.msra.mxu1 %v12886_v63 }
 0x7a3   :  { %10466 = vmatprep.subr.bf16.mxu0 %v12899_v5  ;;  %10498 = vmatprep.subr.bf16.mxu1 %v12901_v6 }
 0x7a6   :  { %10468 = vmatpush1.bf16.msra.mxu0 %v12925_v14  ;;  %10500 = vmatpush1.bf16.msra.mxu1 %v12927_v15 }
 0x7a7   :  { %10470 = vmatprep.subr.bf16.mxu0 %v12937_v18  ;;  %10502 = vmatprep.subr.bf16.mxu1 %v12939_v19 }
 0x7aa   :  { %10472 = vmatpush1.bf16.msra.mxu0 %v12969_v28  ;;  %10504 = vmatpush1.bf16.msra.mxu1 %v12971_v29 }
 0x7ab   :  { %10474 = vmatprep.subr.bf16.mxu0 %v12984_v33  ;;  %10506 = vmatprep.subr.bf16.mxu1 %v12986_v34 }
 0x7ae   :  { %10476 = vmatpush1.bf16.msra.mxu0 %v13013_v44  ;;  %10508 = vmatpush1.bf16.msra.mxu1 %v13015_v45 }
 0x7af   :  { %10478 = vmatprep.subr.bf16.mxu0 %v13031_v52  ;;  %10510 = vmatprep.subr.bf16.mxu1 %v13033_v55 }
 0x7b2   :  { %10480 = vmatpush1.bf16.msra.mxu0 %v13049_v60  ;;  %10512 = vmatpush1.bf16.msra.mxu1 %v13051_v61 }
 0x7b3   :  { %10482 = vmatprep.subr.bf16.mxu0 %v13067_v8  ;;  %10514 = vmatprep.subr.bf16.mxu1 %v13069_v9 }
 0x7b6   :  { %10484 = vmatpush1.bf16.msra.mxu0 %v13085_v16  ;;  %10516 = vmatpush1.bf16.msra.mxu1 %v13087_v17 }
 0x7b7   :  { %10486 = vmatprep.subr.bf16.mxu0 %v13091_v20  ;;  %10518 = vmatprep.subr.bf16.mxu1 %v13093_v21 }
 0x7ba   :  { %10488 = vmatpush1.bf16.msra.mxu0 %v13097_v22  ;;  %10520 = vmatpush1.bf16.msra.mxu1 %v13099_v23 }
 0x7bb   :  { %10522 = vmatprep.subr.bf16.mxu0 %v12821_v40  ;;  %10554 = vmatprep.subr.bf16.mxu1 %v12823_v41 }
 0x870   :  { %v1925_v11 = vpop.f32.mrb[22].mxu0  ;;  %v1996_v38 = vpop.f32.mrb[22].mxu1 }
 0x871   :  { %v1927_v13 = vpop.f32.mrb[23].mxu0  ;;  %v1998_v12 = vpop.f32.mrb[23].mxu1 }
 0x872   :  { %v2005_v24 = vcombine.low %v1925_v11, %v1927_v13  ;;  %v2006_v30 = vcombine.low %v1996_v38, %v1998_v12 }
 0x874   :  { %v2013_v27 = vrot.slane %v2005_v24, %v13149_v2  ;;  %v2020_v25 = vrot.slane %v2006_v30, %v13149_v2 }
 0x876   :  { %v2021_v32 = vcombine.low %v2013_v27, %v2020_v25  ;;  %v2054_v25 = vld [vmem:[#allocation2 + $0x20] ss:$8 sm:$0xf] }
 0x878   :  { %v2028_v31 = vrot.slane %v2021_v32, %v13149_v2 }
 0x87a   :  { %v2030_v43 = vadd.f32 %v2028_v31, %v1858_v39 }
 0x87c   :  { %v9474_v42 = vmul.f32 -1.442695, %v2030_v43  ;;  %v2038_v47 = vrot.slane %v2030_v43, 3 }
 0x87e   :  { %12314 = vpow2.f32 %v9474_v42 }
 0x888   :  { %v12315_v46 = vpop.eup %12314 }
 0x889   :  { %v2034_v48 = vadd.f32 1.0, %v12315_v46 }
 0x88b   :  { %12316 = vrcp.f32 %v2034_v48 }
 0x88c   :  { %12318 = vtanh.f32 %v2038_v47 }
 0x895   :  { %v12317_v51 = vpop.eup %12316 }
 0x896   :  { %v2042_v56 = vrot.slane %v12317_v51, 1  ;;  %v12319_v57 = vpop.eup %12318  ;;  %v2048_v4 = vrot.slane %v12317_v51, 2 }
 0x897   :  { %v2045_v58 = vmul.f32 %v12319_v57, %v12317_v51 }
 0x898   :  { %v2044_v59 = vmul.f32 %v2042_v56, %v13412_v35 }
 0x89a   :  { %v13455_v3 = vadd.f32 %v2045_v58, %v2044_v59 }
 0x89c   :  { %12320 = vtanh.f32 %v13455_v3 }
 0x8a6   :  { %v12321_v7 = vpop.eup %12320 }
 0x8a7   :  { %v2050_v36 = vmul.f32 %v12321_v7, %v2048_v4 }
 0x8a9   :  { %2051 = vst.msk [vmem:[#allocation3 + $0x13] sm:$0x1] %vm677_vm2, %v2050_v36  ;;  %2120 = vmatmul.mubr.f32.vlgmr.msra.gmra.mrb[24].mxu0 %v2050_v36  ;;  %2191 = vmatmul.mubr.f32.vlgmr.msra.gmra.mrb[24].mxu1 %v2050_v36 }
 0x8aa   :  { %2052 = vst.msk [vmem:[#allocation3 + $0x1b] sm:$0x1] %vm679_vm3, %v2050_v36  ;;  %10524 = vmatpush1.bf16.msra.mxu0 %v12843_v49  ;;  %10556 = vmatpush1.bf16.msra.mxu1 %v12845_v50 }
 0x8ab   :  { %10526 = vmatprep.subr.bf16.mxu0 %v12855_v53  ;;  %10558 = vmatprep.subr.bf16.mxu1 %v12857_v54 }
 0x8ac   :  { %2315 = vmatprep.mubr.f32.mxu0 %v15352_v1  ;;  %2386 = vmatprep.mubr.f32.mxu1 %v15352_v1 }
 0x8ae   :  { %10528 = vmatpush1.bf16.msra.mxu0 %v12884_v62  ;;  %10560 = vmatpush1.bf16.msra.mxu1 %v12886_v63 }
 0x8af   :  { %10530 = vmatprep.subr.bf16.mxu0 %v12899_v5  ;;  %10562 = vmatprep.subr.bf16.mxu1 %v12901_v6 }
 0x8b2   :  { %10532 = vmatpush1.bf16.msra.mxu0 %v12925_v14  ;;  %10564 = vmatpush1.bf16.msra.mxu1 %v12927_v15 }
 0x8b3   :  { %10534 = vmatprep.subr.bf16.mxu0 %v12937_v18  ;;  %10566 = vmatprep.subr.bf16.mxu1 %v12939_v19 }
 0x8b6   :  { %10536 = vmatpush1.bf16.msra.mxu0 %v12969_v28  ;;  %10568 = vmatpush1.bf16.msra.mxu1 %v12971_v29 }
 0x8b7   :  { %10538 = vmatprep.subr.bf16.mxu0 %v12984_v33  ;;  %10570 = vmatprep.subr.bf16.mxu1 %v12986_v34 }
 0x8ba   :  { %10540 = vmatpush1.bf16.msra.mxu0 %v13013_v44  ;;  %10572 = vmatpush1.bf16.msra.mxu1 %v13015_v45 }
 0x8bb   :  { %10542 = vmatprep.subr.bf16.mxu0 %v13031_v52  ;;  %10574 = vmatprep.subr.bf16.mxu1 %v13033_v55 }
 0x8be   :  { %10544 = vmatpush1.bf16.msra.mxu0 %v13049_v60  ;;  %10576 = vmatpush1.bf16.msra.mxu1 %v13051_v61 }
 0x8bf   :  { %10546 = vmatprep.subr.bf16.mxu0 %v13067_v8  ;;  %10578 = vmatprep.subr.bf16.mxu1 %v13069_v9 }
 0x8c2   :  { %10548 = vmatpush1.bf16.msra.mxu0 %v13085_v16  ;;  %10580 = vmatpush1.bf16.msra.mxu1 %v13087_v17 }
 0x8c3   :  { %10550 = vmatprep.subr.bf16.mxu0 %v13091_v20  ;;  %10582 = vmatprep.subr.bf16.mxu1 %v13093_v21 }
 0x8c6   :  { %10552 = vmatpush1.bf16.msra.mxu0 %v13097_v22  ;;  %10584 = vmatpush1.bf16.msra.mxu1 %v13099_v23 }
 0x8c7   :  { %10586 = vmatprep.subr.bf16.mxu0 %v12821_v40  ;;  %10618 = vmatprep.subr.bf16.mxu1 %v12823_v41 }
 0x97c   :  { %v2121_v35 = vpop.f32.mrb[24].mxu0  ;;  %v2192_v10 = vpop.f32.mrb[24].mxu1 }
 0x97d   :  { %v2123_v37 = vpop.f32.mrb[25].mxu0  ;;  %v2194_v11 = vpop.f32.mrb[25].mxu1 }
 0x97e   :  { %v2201_v38 = vcombine.low %v2121_v35, %v2123_v37  ;;  %v2202_v13 = vcombine.low %v2192_v10, %v2194_v11 }
 0x980   :  { %v2209_v12 = vrot.slane %v2201_v38, %v13149_v2  ;;  %v2216_v24 = vrot.slane %v2202_v13, %v13149_v2 }
 0x982   :  { %v2217_v30 = vcombine.low %v2209_v12, %v2216_v24  ;;  %v2250_v24 = vld [vmem:[#allocation2 + $0x21] ss:$8 sm:$0xf] }
 0x984   :  { %v2224_v27 = vrot.slane %v2217_v30, %v13149_v2 }
 0x986   :  { %v2226_v32 = vadd.f32 %v2224_v27, %v2054_v25 }
 0x988   :  { %v9475_v31 = vmul.f32 -1.442695, %v2226_v32  ;;  %v2234_v42 = vrot.slane %v2226_v32, 3 }
 0x98a   :  { %12322 = vpow2.f32 %v9475_v31 }
 0x994   :  { %v12323_v39 = vpop.eup %12322 }
 0x995   :  { %v2230_v43 = vadd.f32 1.0, %v12323_v39 }
 0x997   :  { %12324 = vrcp.f32 %v2230_v43 }
 0x998   :  { %12326 = vtanh.f32 %v2234_v42 }
 0x9a1   :  { %v12325_v46 = vpop.eup %12324 }
 0x9a2   :  { %v2238_v48 = vrot.slane %v12325_v46, 1  ;;  %v12327_v47 = vpop.eup %12326  ;;  %v2244_v58 = vrot.slane %v12325_v46, 2 }
 0x9a3   :  { %v2241_v51 = vmul.f32 %v12327_v47, %v12325_v46 }
 0x9a4   :  { %v2240_v56 = vmul.f32 %v2238_v48, %v13455_v3 }
 0x9a6   :  { %v13498_v57 = vadd.f32 %v2241_v51, %v2240_v56 }
 0x9a8   :  { %12328 = vtanh.f32 %v13498_v57 }
 0x9b2   :  { %v12329_v59 = vpop.eup %12328 }
 0x9b3   :  { %v2246_v4 = vmul.f32 %v12329_v59, %v2244_v58 }
 0x9b5   :  { %2247 = vst.msk [vmem:[#allocation3 + $0x4] sm:$0x1] %vm677_vm2, %v2246_v4  ;;  %2316 = vmatmul.mubr.f32.vlgmr.msra.gmra.mrb[26].mxu0 %v2246_v4  ;;  %2387 = vmatmul.mubr.f32.vlgmr.msra.gmra.mrb[26].mxu1 %v2246_v4 }
 0x9b6   :  { %2248 = vst.msk [vmem:[#allocation3 + $0xb] sm:$0x1] %vm679_vm3, %v2246_v4  ;;  %10588 = vmatpush1.bf16.msra.mxu0 %v12843_v49  ;;  %10620 = vmatpush1.bf16.msra.mxu1 %v12845_v50 }
 0x9b7   :  { %10590 = vmatprep.subr.bf16.mxu0 %v12855_v53  ;;  %10622 = vmatprep.subr.bf16.mxu1 %v12857_v54 }
 0x9b8   :  { %2511 = vmatprep.mubr.f32.mxu0 %v15352_v1  ;;  %2582 = vmatprep.mubr.f32.mxu1 %v15352_v1 }
 0x9ba   :  { %10592 = vmatpush1.bf16.msra.mxu0 %v12884_v62  ;;  %10624 = vmatpush1.bf16.msra.mxu1 %v12886_v63 }
 0x9bb   :  { %10594 = vmatprep.subr.bf16.mxu0 %v12899_v5  ;;  %10626 = vmatprep.subr.bf16.mxu1 %v12901_v6 }
 0x9be   :  { %10596 = vmatpush1.bf16.msra.mxu0 %v12925_v14  ;;  %10628 = vmatpush1.bf16.msra.mxu1 %v12927_v15 }
 0x9bf   :  { %10598 = vmatprep.subr.bf16.mxu0 %v12937_v18  ;;  %10630 = vmatprep.subr.bf16.mxu1 %v12939_v19 }
 0x9c2   :  { %10600 = vmatpush1.bf16.msra.mxu0 %v12969_v28  ;;  %10632 = vmatpush1.bf16.msra.mxu1 %v12971_v29 }
 0x9c3   :  { %10602 = vmatprep.subr.bf16.mxu0 %v12984_v33  ;;  %10634 = vmatprep.subr.bf16.mxu1 %v12986_v34 }
 0x9c6   :  { %10604 = vmatpush1.bf16.msra.mxu0 %v13013_v44  ;;  %10636 = vmatpush1.bf16.msra.mxu1 %v13015_v45 }
 0x9c7   :  { %10606 = vmatprep.subr.bf16.mxu0 %v13031_v52  ;;  %10638 = vmatprep.subr.bf16.mxu1 %v13033_v55 }
 0x9ca   :  { %10608 = vmatpush1.bf16.msra.mxu0 %v13049_v60  ;;  %10640 = vmatpush1.bf16.msra.mxu1 %v13051_v61 }
 0x9cb   :  { %10610 = vmatprep.subr.bf16.mxu0 %v13067_v8  ;;  %10642 = vmatprep.subr.bf16.mxu1 %v13069_v9 }
 0x9ce   :  { %10612 = vmatpush1.bf16.msra.mxu0 %v13085_v16  ;;  %10644 = vmatpush1.bf16.msra.mxu1 %v13087_v17 }
 0x9cf   :  { %10614 = vmatprep.subr.bf16.mxu0 %v13091_v20  ;;  %10646 = vmatprep.subr.bf16.mxu1 %v13093_v21 }
 0x9d2   :  { %10616 = vmatpush1.bf16.msra.mxu0 %v13097_v22  ;;  %10648 = vmatpush1.bf16.msra.mxu1 %v13099_v23 }
 0x9d3   :  { %10650 = vmatprep.subr.bf16.mxu0 %v12821_v40  ;;  %10682 = vmatprep.subr.bf16.mxu1 %v12823_v41 }
 0xa88   :  { %v2317_v3 = vpop.f32.mrb[26].mxu0  ;;  %v2388_v7 = vpop.f32.mrb[26].mxu1 }
 0xa89   :  { %v2319_v36 = vpop.f32.mrb[27].mxu0  ;;  %v2390_v35 = vpop.f32.mrb[27].mxu1 }
 0xa8a   :  { %v2397_v10 = vcombine.low %v2317_v3, %v2319_v36  ;;  %v2398_v37 = vcombine.low %v2388_v7, %v2390_v35 }
 0xa8c   :  { %v2405_v11 = vrot.slane %v2397_v10, %v13149_v2  ;;  %v2412_v38 = vrot.slane %v2398_v37, %v13149_v2 }
 0xa8e   :  { %v2413_v13 = vcombine.low %v2405_v11, %v2412_v38  ;;  %v2446_v38 = vld [vmem:[#allocation2 + $0x22] ss:$8 sm:$0xf] }
 0xa90   :  { %v2420_v12 = vrot.slane %v2413_v13, %v13149_v2 }
 0xa92   :  { %v2422_v30 = vadd.f32 %v2420_v12, %v2250_v24 }
 0xa94   :  { %v9476_v27 = vmul.f32 -1.442695, %v2422_v30  ;;  %v2430_v31 = vrot.slane %v2422_v30, 3 }
 0xa96   :  { %12330 = vpow2.f32 %v9476_v27 }
 0xaa0   :  { %v12331_v25 = vpop.eup %12330 }
 0xaa1   :  { %v2426_v32 = vadd.f32 1.0, %v12331_v25 }
 0xaa3   :  { %12332 = vrcp.f32 %v2426_v32 }
 0xaa4   :  { %12334 = vtanh.f32 %v2430_v31 }
 0xaad   :  { %v12333_v39 = vpop.eup %12332 }
 0xaae   :  { %v2434_v43 = vrot.slane %v12333_v39, 1  ;;  %v12335_v42 = vpop.eup %12334  ;;  %v2440_v51 = vrot.slane %v12333_v39, 2 }
 0xaaf   :  { %v2437_v46 = vmul.f32 %v12335_v42, %v12333_v39 }
 0xab0   :  { %v2436_v48 = vmul.f32 %v2434_v43, %v13498_v57 }
 0xab2   :  { %v13541_v47 = vadd.f32 %v2437_v46, %v2436_v48 }
 0xab4   :  { %12336 = vtanh.f32 %v13541_v47 }
 0xabe   :  { %v12337_v56 = vpop.eup %12336 }
 0xabf   :  { %v2442_v58 = vmul.f32 %v12337_v56, %v2440_v51 }
 0xac1   :  { %2443 = vst.msk [vmem:[#allocation3 + $0x14] sm:$0x1] %vm677_vm2, %v2442_v58  ;;  %2512 = vmatmul.mubr.f32.vlgmr.msra.gmra.mrb[28].mxu0 %v2442_v58  ;;  %2583 = vmatmul.mubr.f32.vlgmr.msra.gmra.mrb[28].mxu1 %v2442_v58 }
 0xac2   :  { %2444 = vst.msk [vmem:[#allocation3 + $0x1a] sm:$0x1] %vm679_vm3, %v2442_v58  ;;  %10652 = vmatpush1.bf16.msra.mxu0 %v12843_v49  ;;  %10684 = vmatpush1.bf16.msra.mxu1 %v12845_v50 }
 0xac3   :  { %10654 = vmatprep.subr.bf16.mxu0 %v12855_v53  ;;  %10686 = vmatprep.subr.bf16.mxu1 %v12857_v54 }
 0xac4   :  { %2707 = vmatprep.mubr.f32.mxu0 %v15352_v1  ;;  %2778 = vmatprep.mubr.f32.mxu1 %v15352_v1 }
 0xac6   :  { %10656 = vmatpush1.bf16.msra.mxu0 %v12884_v62  ;;  %10688 = vmatpush1.bf16.msra.mxu1 %v12886_v63 }
 0xac7   :  { %10658 = vmatprep.subr.bf16.mxu0 %v12899_v5  ;;  %10690 = vmatprep.subr.bf16.mxu1 %v12901_v6 }
 0xaca   :  { %10660 = vmatpush1.bf16.msra.mxu0 %v12925_v14  ;;  %10692 = vmatpush1.bf16.msra.mxu1 %v12927_v15 }
 0xacb   :  { %10662 = vmatprep.subr.bf16.mxu0 %v12937_v18  ;;  %10694 = vmatprep.subr.bf16.mxu1 %v12939_v19 }
 0xace   :  { %10664 = vmatpush1.bf16.msra.mxu0 %v12969_v28  ;;  %10696 = vmatpush1.bf16.msra.mxu1 %v12971_v29 }
 0xacf   :  { %10666 = vmatprep.subr.bf16.mxu0 %v12984_v33  ;;  %10698 = vmatprep.subr.bf16.mxu1 %v12986_v34 }
 0xad2   :  { %10668 = vmatpush1.bf16.msra.mxu0 %v13013_v44  ;;  %10700 = vmatpush1.bf16.msra.mxu1 %v13015_v45 }
 0xad3   :  { %10670 = vmatprep.subr.bf16.mxu0 %v13031_v52  ;;  %10702 = vmatprep.subr.bf16.mxu1 %v13033_v55 }
 0xad6   :  { %10672 = vmatpush1.bf16.msra.mxu0 %v13049_v60  ;;  %10704 = vmatpush1.bf16.msra.mxu1 %v13051_v61 }
 0xad7   :  { %10674 = vmatprep.subr.bf16.mxu0 %v13067_v8  ;;  %10706 = vmatprep.subr.bf16.mxu1 %v13069_v9 }
 0xada   :  { %10676 = vmatpush1.bf16.msra.mxu0 %v13085_v16  ;;  %10708 = vmatpush1.bf16.msra.mxu1 %v13087_v17 }
 0xadb   :  { %10678 = vmatprep.subr.bf16.mxu0 %v13091_v20  ;;  %10710 = vmatprep.subr.bf16.mxu1 %v13093_v21 }
 0xade   :  { %10680 = vmatpush1.bf16.msra.mxu0 %v13097_v22  ;;  %10712 = vmatpush1.bf16.msra.mxu1 %v13099_v23 }
 0xadf   :  { %10714 = vmatprep.subr.bf16.mxu0 %v12821_v40  ;;  %10746 = vmatprep.subr.bf16.mxu1 %v12823_v41 }
 0xb94   :  { %v2513_v57 = vpop.f32.mrb[28].mxu0  ;;  %v2584_v59 = vpop.f32.mrb[28].mxu1 }
 0xb95   :  { %v2515_v4 = vpop.f32.mrb[29].mxu0  ;;  %v2586_v3 = vpop.f32.mrb[29].mxu1 }
 0xb96   :  { %v2593_v7 = vcombine.low %v2513_v57, %v2515_v4  ;;  %v2594_v36 = vcombine.low %v2584_v59, %v2586_v3 }
 0xb98   :  { %v2601_v35 = vrot.slane %v2593_v7, %v13149_v2  ;;  %v2608_v10 = vrot.slane %v2594_v36, %v13149_v2 }
 0xb9a   :  { %v2609_v37 = vcombine.low %v2601_v35, %v2608_v10  ;;  %v2642_v10 = vld [vmem:[#allocation2 + $0x23] ss:$8 sm:$0xf] }
 0xb9c   :  { %v2616_v11 = vrot.slane %v2609_v37, %v13149_v2 }
 0xb9e   :  { %v2618_v13 = vadd.f32 %v2616_v11, %v2446_v38 }
 0xba0   :  { %v9477_v12 = vmul.f32 -1.442695, %v2618_v13  ;;  %v2626_v27 = vrot.slane %v2618_v13, 3 }
 0xba2   :  { %12338 = vpow2.f32 %v9477_v12 }
 0xbac   :  { %v12339_v24 = vpop.eup %12338 }
 0xbad   :  { %v2622_v30 = vadd.f32 1.0, %v12339_v24 }
 0xbaf   :  { %12340 = vrcp.f32 %v2622_v30 }
 0xbb0   :  { %12342 = vtanh.f32 %v2626_v27 }
 0xbb9   :  { %v12341_v25 = vpop.eup %12340 }
 0xbba   :  { %v2630_v32 = vrot.slane %v12341_v25, 1  ;;  %v12343_v31 = vpop.eup %12342  ;;  %v2636_v46 = vrot.slane %v12341_v25, 2 }
 0xbbb   :  { %v2633_v39 = vmul.f32 %v12343_v31, %v12341_v25 }
 0xbbc   :  { %v2632_v43 = vmul.f32 %v2630_v32, %v13541_v47 }
 0xbbe   :  { %v13584_v42 = vadd.f32 %v2633_v39, %v2632_v43 }
 0xbc0   :  { %12344 = vtanh.f32 %v13584_v42 }
 0xbca   :  { %v12345_v48 = vpop.eup %12344 }
 0xbcb   :  { %v2638_v51 = vmul.f32 %v12345_v48, %v2636_v46 }
 0xbcd   :  { %2639 = vst.msk [vmem:[#allocation3 + $0x5] sm:$0x1] %vm677_vm2, %v2638_v51  ;;  %2708 = vmatmul.mubr.f32.vlgmr.msra.gmra.mrb[30].mxu0 %v2638_v51  ;;  %2779 = vmatmul.mubr.f32.vlgmr.msra.gmra.mrb[30].mxu1 %v2638_v51 }
 0xbce   :  { %2640 = vst.msk [vmem:[#allocation3 + $0xa] sm:$0x1] %vm679_vm3, %v2638_v51  ;;  %10716 = vmatpush1.bf16.msra.mxu0 %v12843_v49  ;;  %10748 = vmatpush1.bf16.msra.mxu1 %v12845_v50 }
 0xbcf   :  { %10718 = vmatprep.subr.bf16.mxu0 %v12855_v53  ;;  %10750 = vmatprep.subr.bf16.mxu1 %v12857_v54 }
 0xbd0   :  { %2903 = vmatprep.mubr.f32.mxu0 %v15352_v1  ;;  %2974 = vmatprep.mubr.f32.mxu1 %v15352_v1 }
 0xbd2   :  { %10720 = vmatpush1.bf16.msra.mxu0 %v12884_v62  ;;  %10752 = vmatpush1.bf16.msra.mxu1 %v12886_v63 }
 0xbd3   :  { %10722 = vmatprep.subr.bf16.mxu0 %v12899_v5  ;;  %10754 = vmatprep.subr.bf16.mxu1 %v12901_v6 }
 0xbd6   :  { %10724 = vmatpush1.bf16.msra.mxu0 %v12925_v14  ;;  %10756 = vmatpush1.bf16.msra.mxu1 %v12927_v15 }
 0xbd7   :  { %10726 = vmatprep.subr.bf16.mxu0 %v12937_v18  ;;  %10758 = vmatprep.subr.bf16.mxu1 %v12939_v19 }
 0xbda   :  { %10728 = vmatpush1.bf16.msra.mxu0 %v12969_v28  ;;  %10760 = vmatpush1.bf16.msra.mxu1 %v12971_v29 }
 0xbdb   :  { %10730 = vmatprep.subr.bf16.mxu0 %v12984_v33  ;;  %10762 = vmatprep.subr.bf16.mxu1 %v12986_v34 }
 0xbde   :  { %10732 = vmatpush1.bf16.msra.mxu0 %v13013_v44  ;;  %10764 = vmatpush1.bf16.msra.mxu1 %v13015_v45 }
 0xbdf   :  { %10734 = vmatprep.subr.bf16.mxu0 %v13031_v52  ;;  %10766 = vmatprep.subr.bf16.mxu1 %v13033_v55 }
 0xbe2   :  { %10736 = vmatpush1.bf16.msra.mxu0 %v13049_v60  ;;  %10768 = vmatpush1.bf16.msra.mxu1 %v13051_v61 }
 0xbe3   :  { %10738 = vmatprep.subr.bf16.mxu0 %v13067_v8  ;;  %10770 = vmatprep.subr.bf16.mxu1 %v13069_v9 }
 0xbe6   :  { %10740 = vmatpush1.bf16.msra.mxu0 %v13085_v16  ;;  %10772 = vmatpush1.bf16.msra.mxu1 %v13087_v17 }
 0xbe7   :  { %10742 = vmatprep.subr.bf16.mxu0 %v13091_v20  ;;  %10774 = vmatprep.subr.bf16.mxu1 %v13093_v21 }
 0xbea   :  { %10744 = vmatpush1.bf16.msra.mxu0 %v13097_v22  ;;  %10776 = vmatpush1.bf16.msra.mxu1 %v13099_v23 }
 0xbeb   :  { %10778 = vmatprep.subr.bf16.mxu0 %v12821_v40  ;;  %10810 = vmatprep.subr.bf16.mxu1 %v12823_v41 }
 0xca0   :  { %v2709_v47 = vpop.f32.mrb[30].mxu0  ;;  %v2780_v56 = vpop.f32.mrb[30].mxu1 }
 0xca1   :  { %v2711_v58 = vpop.f32.mrb[31].mxu0  ;;  %v2782_v57 = vpop.f32.mrb[31].mxu1 }
 0xca2   :  { %v2789_v59 = vcombine.low %v2709_v47, %v2711_v58  ;;  %v2790_v4 = vcombine.low %v2780_v56, %v2782_v57 }
 0xca4   :  { %v2797_v3 = vrot.slane %v2789_v59, %v13149_v2  ;;  %v2804_v7 = vrot.slane %v2790_v4, %v13149_v2 }
 0xca6   :  { %v2805_v36 = vcombine.low %v2797_v3, %v2804_v7  ;;  %v2838_v7 = vld [vmem:[#allocation2 + $0x24] ss:$8 sm:$0xf] }
 0xca8   :  { %v2812_v35 = vrot.slane %v2805_v36, %v13149_v2 }
 0xcaa   :  { %v2814_v37 = vadd.f32 %v2812_v35, %v2642_v10 }
 0xcac   :  { %v9478_v11 = vmul.f32 -1.442695, %v2814_v37  ;;  %v2822_v12 = vrot.slane %v2814_v37, 3 }
 0xcae   :  { %12346 = vpow2.f32 %v9478_v11 }
 0xcb8   :  { %v12347_v38 = vpop.eup %12346 }
 0xcb9   :  { %v2818_v13 = vadd.f32 1.0, %v12347_v38 }
 0xcbb   :  { %12348 = vrcp.f32 %v2818_v13 }
 0xcbc   :  { %12350 = vtanh.f32 %v2822_v12 }
 0xcc5   :  { %v12349_v24 = vpop.eup %12348 }
 0xcc6   :  { %v2826_v30 = vrot.slane %v12349_v24, 1  ;;  %v12351_v27 = vpop.eup %12350  ;;  %v2832_v39 = vrot.slane %v12349_v24, 2 }
 0xcc7   :  { %v2829_v25 = vmul.f32 %v12351_v27, %v12349_v24 }
 0xcc8   :  { %v2828_v32 = vmul.f32 %v2826_v30, %v13584_v42 }
 0xcca   :  { %v13627_v31 = vadd.f32 %v2829_v25, %v2828_v32 }
 0xccc   :  { %12352 = vtanh.f32 %v13627_v31 }
 0xcd6   :  { %v12353_v43 = vpop.eup %12352 }
 0xcd7   :  { %v2834_v46 = vmul.f32 %v12353_v43, %v2832_v39 }
 0xcd9   :  { %2835 = vst.msk [vmem:[#allocation3 + $0x15] sm:$0x1] %vm677_vm2, %v2834_v46  ;;  %2904 = vmatmul.mubr.f32.vlgmr.msra.gmra.mrb[32].mxu0 %v2834_v46  ;;  %2975 = vmatmul.mubr.f32.vlgmr.msra.gmra.mrb[32].mxu1 %v2834_v46 }
 0xcda   :  { %2836 = vst.msk [vmem:[#allocation3 + $0x19] sm:$0x1] %vm679_vm3, %v2834_v46  ;;  %10780 = vmatpush1.bf16.msra.mxu0 %v12843_v49  ;;  %10812 = vmatpush1.bf16.msra.mxu1 %v12845_v50 }
 0xcdb   :  { %10782 = vmatprep.subr.bf16.mxu0 %v12855_v53  ;;  %10814 = vmatprep.subr.bf16.mxu1 %v12857_v54 }
 0xcdc   :  { %3099 = vmatprep.mubr.f32.mxu0 %v15352_v1  ;;  %3170 = vmatprep.mubr.f32.mxu1 %v15352_v1 }
 0xcde   :  { %10784 = vmatpush1.bf16.msra.mxu0 %v12884_v62  ;;  %10816 = vmatpush1.bf16.msra.mxu1 %v12886_v63 }
 0xcdf   :  { %10786 = vmatprep.subr.bf16.mxu0 %v12899_v5  ;;  %10818 = vmatprep.subr.bf16.mxu1 %v12901_v6 }
 0xce2   :  { %10788 = vmatpush1.bf16.msra.mxu0 %v12925_v14  ;;  %10820 = vmatpush1.bf16.msra.mxu1 %v12927_v15 }
 0xce3   :  { %10790 = vmatprep.subr.bf16.mxu0 %v12937_v18  ;;  %10822 = vmatprep.subr.bf16.mxu1 %v12939_v19 }
 0xce6   :  { %10792 = vmatpush1.bf16.msra.mxu0 %v12969_v28  ;;  %10824 = vmatpush1.bf16.msra.mxu1 %v12971_v29 }
 0xce7   :  { %10794 = vmatprep.subr.bf16.mxu0 %v12984_v33  ;;  %10826 = vmatprep.subr.bf16.mxu1 %v12986_v34 }
 0xcea   :  { %10796 = vmatpush1.bf16.msra.mxu0 %v13013_v44  ;;  %10828 = vmatpush1.bf16.msra.mxu1 %v13015_v45 }
 0xceb   :  { %10798 = vmatprep.subr.bf16.mxu0 %v13031_v52  ;;  %10830 = vmatprep.subr.bf16.mxu1 %v13033_v55 }
 0xcee   :  { %10800 = vmatpush1.bf16.msra.mxu0 %v13049_v60  ;;  %10832 = vmatpush1.bf16.msra.mxu1 %v13051_v61 }
 0xcef   :  { %10802 = vmatprep.subr.bf16.mxu0 %v13067_v8  ;;  %10834 = vmatprep.subr.bf16.mxu1 %v13069_v9 }
 0xcf2   :  { %10804 = vmatpush1.bf16.msra.mxu0 %v13085_v16  ;;  %10836 = vmatpush1.bf16.msra.mxu1 %v13087_v17 }
 0xcf3   :  { %10806 = vmatprep.subr.bf16.mxu0 %v13091_v20  ;;  %10838 = vmatprep.subr.bf16.mxu1 %v13093_v21 }
 0xcf6   :  { %10808 = vmatpush1.bf16.msra.mxu0 %v13097_v22  ;;  %10840 = vmatpush1.bf16.msra.mxu1 %v13099_v23 }
 0xcf7   :  { %10842 = vmatprep.subr.bf16.mxu0 %v12821_v40  ;;  %10874 = vmatprep.subr.bf16.mxu1 %v12823_v41 }
 0xdac   :  { %v2905_v42 = vpop.f32.mrb[32].mxu0  ;;  %v2976_v48 = vpop.f32.mrb[32].mxu1 }
 0xdad   :  { %v2907_v51 = vpop.f32.mrb[33].mxu0  ;;  %v2978_v47 = vpop.f32.mrb[33].mxu1 }
 0xdae   :  { %v2985_v56 = vcombine.low %v2905_v42, %v2907_v51  ;;  %v2986_v58 = vcombine.low %v2976_v48, %v2978_v47 }
 0xdb0   :  { %v2993_v57 = vrot.slane %v2985_v56, %v13149_v2  ;;  %v3000_v59 = vrot.slane %v2986_v58, %v13149_v2 }
 0xdb2   :  { %v3001_v4 = vcombine.low %v2993_v57, %v3000_v59  ;;  %v3034_v59 = vld [vmem:[#allocation2 + $0x25] ss:$8 sm:$0xf] }
 0xdb4   :  { %v3008_v3 = vrot.slane %v3001_v4, %v13149_v2 }
 0xdb6   :  { %v3010_v36 = vadd.f32 %v3008_v3, %v2838_v7 }
 0xdb8   :  { %v9479_v35 = vmul.f32 -1.442695, %v3010_v36  ;;  %v3018_v11 = vrot.slane %v3010_v36, 3 }
 0xdba   :  { %12354 = vpow2.f32 %v9479_v35 }
 0xdc4   :  { %v12355_v10 = vpop.eup %12354 }
 0xdc5   :  { %v3014_v37 = vadd.f32 1.0, %v12355_v10 }
 0xdc7   :  { %12356 = vrcp.f32 %v3014_v37 }
 0xdc8   :  { %12358 = vtanh.f32 %v3018_v11 }
 0xdd1   :  { %v12357_v38 = vpop.eup %12356 }
 0xdd2   :  { %v3022_v13 = vrot.slane %v12357_v38, 1  ;;  %v12359_v12 = vpop.eup %12358  ;;  %v3028_v25 = vrot.slane %v12357_v38, 2 }
 0xdd3   :  { %v3025_v24 = vmul.f32 %v12359_v12, %v12357_v38 }
 0xdd4   :  { %v3024_v30 = vmul.f32 %v3022_v13, %v13627_v31 }
 0xdd6   :  { %v13670_v27 = vadd.f32 %v3025_v24, %v3024_v30 }
 0xdd8   :  { %12360 = vtanh.f32 %v13670_v27 }
 0xde2   :  { %v12361_v32 = vpop.eup %12360 }
 0xde3   :  { %v3030_v39 = vmul.f32 %v12361_v32, %v3028_v25 }
 0xde5   :  { %3031 = vst.msk [vmem:[#allocation3 + $0x6] sm:$0x1] %vm677_vm2, %v3030_v39  ;;  %3100 = vmatmul.mubr.f32.vlgmr.msra.gmra.mrb[34].mxu0 %v3030_v39  ;;  %3171 = vmatmul.mubr.f32.vlgmr.msra.gmra.mrb[34].mxu1 %v3030_v39 }
 0xde6   :  { %3032 = vst.msk [vmem:[#allocation3 + $0x9] sm:$0x1] %vm679_vm3, %v3030_v39  ;;  %10844 = vmatpush1.bf16.msra.mxu0 %v12843_v49  ;;  %10876 = vmatpush1.bf16.msra.mxu1 %v12845_v50 }
 0xde7   :  { %10846 = vmatprep.subr.bf16.mxu0 %v12855_v53  ;;  %10878 = vmatprep.subr.bf16.mxu1 %v12857_v54 }
 0xde8   :  { %3295 = vmatprep.mubr.f32.mxu0 %v15352_v1  ;;  %3366 = vmatprep.mubr.f32.mxu1 %v15352_v1 }
 0xdea   :  { %10848 = vmatpush1.bf16.msra.mxu0 %v12884_v62  ;;  %10880 = vmatpush1.bf16.msra.mxu1 %v12886_v63 }
 0xdeb   :  { %10850 = vmatprep.subr.bf16.mxu0 %v12899_v5  ;;  %10882 = vmatprep.subr.bf16.mxu1 %v12901_v6 }
 0xdee   :  { %10852 = vmatpush1.bf16.msra.mxu0 %v12925_v14  ;;  %10884 = vmatpush1.bf16.msra.mxu1 %v12927_v15 }
 0xdef   :  { %10854 = vmatprep.subr.bf16.mxu0 %v12937_v18  ;;  %10886 = vmatprep.subr.bf16.mxu1 %v12939_v19 }
 0xdf2   :  { %10856 = vmatpush1.bf16.msra.mxu0 %v12969_v28  ;;  %10888 = vmatpush1.bf16.msra.mxu1 %v12971_v29 }
 0xdf3   :  { %10858 = vmatprep.subr.bf16.mxu0 %v12984_v33  ;;  %10890 = vmatprep.subr.bf16.mxu1 %v12986_v34 }
 0xdf6   :  { %10860 = vmatpush1.bf16.msra.mxu0 %v13013_v44  ;;  %10892 = vmatpush1.bf16.msra.mxu1 %v13015_v45 }
 0xdf7   :  { %10862 = vmatprep.subr.bf16.mxu0 %v13031_v52  ;;  %10894 = vmatprep.subr.bf16.mxu1 %v13033_v55 }
 0xdfa   :  { %10864 = vmatpush1.bf16.msra.mxu0 %v13049_v60  ;;  %10896 = vmatpush1.bf16.msra.mxu1 %v13051_v61 }
 0xdfb   :  { %10866 = vmatprep.subr.bf16.mxu0 %v13067_v8  ;;  %10898 = vmatprep.subr.bf16.mxu1 %v13069_v9 }
 0xdfe   :  { %10868 = vmatpush1.bf16.msra.mxu0 %v13085_v16  ;;  %10900 = vmatpush1.bf16.msra.mxu1 %v13087_v17 }
 0xdff   :  { %10870 = vmatprep.subr.bf16.mxu0 %v13091_v20  ;;  %10902 = vmatprep.subr.bf16.mxu1 %v13093_v21 }
 0xe02   :  { %10872 = vmatpush1.bf16.msra.mxu0 %v13097_v22  ;;  %10904 = vmatpush1.bf16.msra.mxu1 %v13099_v23 }
 0xe03   :  { %10906 = vmatprep.subr.bf16.mxu0 %v12821_v40  ;;  %10938 = vmatprep.subr.bf16.mxu1 %v12823_v41 }
 0xeb8   :  { %v3101_v31 = vpop.f32.mrb[34].mxu0  ;;  %v3172_v43 = vpop.f32.mrb[34].mxu1 }
 0xeb9   :  { %v3103_v46 = vpop.f32.mrb[35].mxu0  ;;  %v3174_v42 = vpop.f32.mrb[35].mxu1 }
 0xeba   :  { %v3181_v48 = vcombine.low %v3101_v31, %v3103_v46  ;;  %v3182_v51 = vcombine.low %v3172_v43, %v3174_v42 }
 0xebc   :  { %v3189_v47 = vrot.slane %v3181_v48, %v13149_v2  ;;  %v3196_v56 = vrot.slane %v3182_v51, %v13149_v2 }
 0xebe   :  { %v3197_v58 = vcombine.low %v3189_v47, %v3196_v56  ;;  %v3230_v56 = vld [vmem:[#allocation2 + $0x26] ss:$8 sm:$0xf] }
 0xec0   :  { %v3204_v57 = vrot.slane %v3197_v58, %v13149_v2 }
 0xec2   :  { %v3206_v4 = vadd.f32 %v3204_v57, %v3034_v59 }
 0xec4   :  { %v9480_v3 = vmul.f32 -1.442695, %v3206_v4  ;;  %v3214_v35 = vrot.slane %v3206_v4, 3 }
 0xec6   :  { %12362 = vpow2.f32 %v9480_v3 }
 0xed0   :  { %v12363_v7 = vpop.eup %12362 }
 0xed1   :  { %v3210_v36 = vadd.f32 1.0, %v12363_v7 }
 0xed3   :  { %12364 = vrcp.f32 %v3210_v36 }
 0xed4   :  { %12366 = vtanh.f32 %v3214_v35 }
 0xedd   :  { %v12365_v10 = vpop.eup %12364 }
 0xede   :  { %v3218_v37 = vrot.slane %v12365_v10, 1  ;;  %v12367_v11 = vpop.eup %12366  ;;  %v3224_v24 = vrot.slane %v12365_v10, 2 }
 0xedf   :  { %v3221_v38 = vmul.f32 %v12367_v11, %v12365_v10 }
 0xee0   :  { %v3220_v13 = vmul.f32 %v3218_v37, %v13670_v27 }
 0xee2   :  { %v13713_v12 = vadd.f32 %v3221_v38, %v3220_v13 }
 0xee4   :  { %12368 = vtanh.f32 %v13713_v12 }
 0xeee   :  { %v12369_v30 = vpop.eup %12368 }
 0xeef   :  { %v3226_v25 = vmul.f32 %v12369_v30, %v3224_v24 }
 0xef1   :  { %3227 = vst.msk [vmem:[#allocation3 + $0x16] sm:$0x1] %vm677_vm2, %v3226_v25  ;;  %3296 = vmatmul.mubr.f32.vlgmr.msra.gmra.mrb[36].mxu0 %v3226_v25  ;;  %3367 = vmatmul.mubr.f32.vlgmr.msra.gmra.mrb[36].mxu1 %v3226_v25 }
 0xef2   :  { %3228 = vst.msk [vmem:[#allocation3 + $0x18] sm:$0x1] %vm679_vm3, %v3226_v25  ;;  %10908 = vmatpush1.bf16.msra.mxu0 %v12843_v49  ;;  %10940 = vmatpush1.bf16.msra.mxu1 %v12845_v50 }
 0xef3   :  { %10910 = vmatprep.subr.bf16.mxu0 %v12855_v53  ;;  %10942 = vmatprep.subr.bf16.mxu1 %v12857_v54 }
 0xef4   :  { %3491 = vmatprep.mubr.f32.mxu0 %v15352_v1  ;;  %3562 = vmatprep.mubr.f32.mxu1 %v15352_v1 }
 0xef6   :  { %10912 = vmatpush1.bf16.msra.mxu0 %v12884_v62  ;;  %10944 = vmatpush1.bf16.msra.mxu1 %v12886_v63 }
 0xef7   :  { %10914 = vmatprep.subr.bf16.mxu0 %v12899_v5  ;;  %10946 = vmatprep.subr.bf16.mxu1 %v12901_v6 }
 0xefa   :  { %10916 = vmatpush1.bf16.msra.mxu0 %v12925_v14  ;;  %10948 = vmatpush1.bf16.msra.mxu1 %v12927_v15 }
 0xefb   :  { %10918 = vmatprep.subr.bf16.mxu0 %v12937_v18  ;;  %10950 = vmatprep.subr.bf16.mxu1 %v12939_v19 }
 0xefe   :  { %10920 = vmatpush1.bf16.msra.mxu0 %v12969_v28  ;;  %10952 = vmatpush1.bf16.msra.mxu1 %v12971_v29 }
 0xeff   :  { %10922 = vmatprep.subr.bf16.mxu0 %v12984_v33  ;;  %10954 = vmatprep.subr.bf16.mxu1 %v12986_v34 }
 0xf02   :  { %10924 = vmatpush1.bf16.msra.mxu0 %v13013_v44  ;;  %10956 = vmatpush1.bf16.msra.mxu1 %v13015_v45 }
 0xf03   :  { %10926 = vmatprep.subr.bf16.mxu0 %v13031_v52  ;;  %10958 = vmatprep.subr.bf16.mxu1 %v13033_v55 }
 0xf06   :  { %10928 = vmatpush1.bf16.msra.mxu0 %v13049_v60  ;;  %10960 = vmatpush1.bf16.msra.mxu1 %v13051_v61 }
 0xf07   :  { %10930 = vmatprep.subr.bf16.mxu0 %v13067_v8  ;;  %10962 = vmatprep.subr.bf16.mxu1 %v13069_v9 }
 0xf0a   :  { %10932 = vmatpush1.bf16.msra.mxu0 %v13085_v16  ;;  %10964 = vmatpush1.bf16.msra.mxu1 %v13087_v17 }
 0xf0b   :  { %10934 = vmatprep.subr.bf16.mxu0 %v13091_v20  ;;  %10966 = vmatprep.subr.bf16.mxu1 %v13093_v21 }
 0xf0e   :  { %10936 = vmatpush1.bf16.msra.mxu0 %v13097_v22  ;;  %10968 = vmatpush1.bf16.msra.mxu1 %v13099_v23 }
 0xf0f   :  { %10970 = vmatprep.subr.bf16.mxu0 %v12821_v40  ;;  %11002 = vmatprep.subr.bf16.mxu1 %v12823_v41 }
 0xfc4   :  { %v3297_v27 = vpop.f32.mrb[36].mxu0  ;;  %v3368_v32 = vpop.f32.mrb[36].mxu1 }
 0xfc5   :  { %v3299_v39 = vpop.f32.mrb[37].mxu0  ;;  %v3370_v31 = vpop.f32.mrb[37].mxu1 }
 0xfc6   :  { %v3377_v43 = vcombine.low %v3297_v27, %v3299_v39  ;;  %v3378_v46 = vcombine.low %v3368_v32, %v3370_v31 }
 0xfc8   :  { %v3385_v42 = vrot.slane %v3377_v43, %v13149_v2  ;;  %v3392_v48 = vrot.slane %v3378_v46, %v13149_v2 }
 0xfca   :  { %v3393_v51 = vcombine.low %v3385_v42, %v3392_v48  ;;  %v3426_v48 = vld [vmem:[#allocation2 + $0x27] ss:$8 sm:$0xf] }
 0xfcc   :  { %v3400_v47 = vrot.slane %v3393_v51, %v13149_v2 }
 0xfce   :  { %v3402_v58 = vadd.f32 %v3400_v47, %v3230_v56 }
 0xfd0   :  { %v9481_v57 = vmul.f32 -1.442695, %v3402_v58  ;;  %v3410_v3 = vrot.slane %v3402_v58, 3 }
 0xfd2   :  { %12370 = vpow2.f32 %v9481_v57 }
 0xfdc   :  { %v12371_v59 = vpop.eup %12370 }
 0xfdd   :  { %v3406_v4 = vadd.f32 1.0, %v12371_v59 }
 0xfdf   :  { %12372 = vrcp.f32 %v3406_v4 }
 0xfe0   :  { %12374 = vtanh.f32 %v3410_v3 }
 0xfe9   :  { %v12373_v7 = vpop.eup %12372 }
 0xfea   :  { %v3414_v36 = vrot.slane %v12373_v7, 1  ;;  %v12375_v35 = vpop.eup %12374  ;;  %v3420_v38 = vrot.slane %v12373_v7, 2 }
 0xfeb   :  { %v3417_v10 = vmul.f32 %v12375_v35, %v12373_v7 }
 0xfec   :  { %v3416_v37 = vmul.f32 %v3414_v36, %v13713_v12 }
 0xfee   :  { %v13756_v11 = vadd.f32 %v3417_v10, %v3416_v37 }
 0xff0   :  { %12376 = vtanh.f32 %v13756_v11 }
 0xffa   :  { %v12377_v13 = vpop.eup %12376 }
 0xffb   :  { %v3422_v24 = vmul.f32 %v12377_v13, %v3420_v38 }
 0xffd   :  { %3423 = vst.msk [vmem:[#allocation3 + $0x7] sm:$0x1] %vm677_vm2, %v3422_v24  ;;  %3492 = vmatmul.mubr.f32.vlgmr.msra.gmra.mrb[38].mxu0 %v3422_v24  ;;  %3563 = vmatmul.mubr.f32.vlgmr.msra.gmra.mrb[38].mxu1 %v3422_v24 }
 0xffe   :  { %3424 = vst.msk [vmem:[#allocation3 + $0x8] sm:$0x1] %vm679_vm3, %v3422_v24  ;;  %10972 = vmatpush1.bf16.msra.mxu0 %v12843_v49  ;;  %11004 = vmatpush1.bf16.msra.mxu1 %v12845_v50 }
 0xfff   :  { %10974 = vmatprep.subr.bf16.mxu0 %v12855_v53  ;;  %11006 = vmatprep.subr.bf16.mxu1 %v12857_v54 }
0x1000   :  { %3687 = vmatprep.mubr.f32.mxu0 %v15352_v1  ;;  %3758 = vmatprep.mubr.f32.mxu1 %v15352_v1 }
0x1002   :  { %10976 = vmatpush1.bf16.msra.mxu0 %v12884_v62  ;;  %11008 = vmatpush1.bf16.msra.mxu1 %v12886_v63 }
0x1003   :  { %10978 = vmatprep.subr.bf16.mxu0 %v12899_v5  ;;  %11010 = vmatprep.subr.bf16.mxu1 %v12901_v6 }
0x1006   :  { %10980 = vmatpush1.bf16.msra.mxu0 %v12925_v14  ;;  %11012 = vmatpush1.bf16.msra.mxu1 %v12927_v15 }
0x1007   :  { %10982 = vmatprep.subr.bf16.mxu0 %v12937_v18  ;;  %11014 = vmatprep.subr.bf16.mxu1 %v12939_v19 }
0x100a   :  { %10984 = vmatpush1.bf16.msra.mxu0 %v12969_v28  ;;  %11016 = vmatpush1.bf16.msra.mxu1 %v12971_v29 }
0x100b   :  { %10986 = vmatprep.subr.bf16.mxu0 %v12984_v33  ;;  %11018 = vmatprep.subr.bf16.mxu1 %v12986_v34 }
0x100e   :  { %10988 = vmatpush1.bf16.msra.mxu0 %v13013_v44  ;;  %11020 = vmatpush1.bf16.msra.mxu1 %v13015_v45 }
0x100f   :  { %10990 = vmatprep.subr.bf16.mxu0 %v13031_v52  ;;  %11022 = vmatprep.subr.bf16.mxu1 %v13033_v55 }
0x1012   :  { %10992 = vmatpush1.bf16.msra.mxu0 %v13049_v60  ;;  %11024 = vmatpush1.bf16.msra.mxu1 %v13051_v61 }
0x1013   :  { %10994 = vmatprep.subr.bf16.mxu0 %v13067_v8  ;;  %11026 = vmatprep.subr.bf16.mxu1 %v13069_v9 }
0x1016   :  { %10996 = vmatpush1.bf16.msra.mxu0 %v13085_v16  ;;  %11028 = vmatpush1.bf16.msra.mxu1 %v13087_v17 }
0x1017   :  { %10998 = vmatprep.subr.bf16.mxu0 %v13091_v20  ;;  %11030 = vmatprep.subr.bf16.mxu1 %v13093_v21 }
0x101a   :  { %11000 = vmatpush1.bf16.msra.mxu0 %v13097_v22  ;;  %11032 = vmatpush1.bf16.msra.mxu1 %v13099_v23 }
0x101b   :  { %11034 = vmatprep.subr.bf16.mxu0 %v12821_v40  ;;  %11066 = vmatprep.subr.bf16.mxu1 %v12823_v41 }
0x10d0   :  { %v3493_v12 = vpop.f32.mrb[38].mxu0  ;;  %v3564_v30 = vpop.f32.mrb[38].mxu1 }
0x10d1   :  { %v3495_v25 = vpop.f32.mrb[39].mxu0  ;;  %v3566_v27 = vpop.f32.mrb[39].mxu1 }
0x10d2   :  { %v3573_v32 = vcombine.low %v3493_v12, %v3495_v25  ;;  %v3574_v39 = vcombine.low %v3564_v30, %v3566_v27 }
0x10d4   :  { %v3581_v31 = vrot.slane %v3573_v32, %v13149_v2  ;;  %v3588_v43 = vrot.slane %v3574_v39, %v13149_v2 }
0x10d6   :  { %v3589_v46 = vcombine.low %v3581_v31, %v3588_v43  ;;  %v3622_v43 = vld [vmem:[#allocation2 + $0x40] ss:$8 sm:$0xf] }
0x10d8   :  { %v3596_v42 = vrot.slane %v3589_v46, %v13149_v2 }
0x10da   :  { %v3598_v51 = vadd.f32 %v3596_v42, %v3426_v48 }
0x10dc   :  { %v9482_v47 = vmul.f32 -1.442695, %v3598_v51  ;;  %v3606_v57 = vrot.slane %v3598_v51, 3 }
0x10de   :  { %12378 = vpow2.f32 %v9482_v47 }
0x10e8   :  { %v12379_v56 = vpop.eup %12378 }
0x10e9   :  { %v3602_v58 = vadd.f32 1.0, %v12379_v56 }
0x10eb   :  { %12380 = vrcp.f32 %v3602_v58 }
0x10ec   :  { %12382 = vtanh.f32 %v3606_v57 }
0x10f5   :  { %v12381_v59 = vpop.eup %12380 }
0x10f6   :  { %v3610_v4 = vrot.slane %v12381_v59, 1  ;;  %v12383_v3 = vpop.eup %12382  ;;  %v3616_v10 = vrot.slane %v12381_v59, 2 }
0x10f7   :  { %v3613_v7 = vmul.f32 %v12383_v3, %v12381_v59 }
0x10f8   :  { %v3612_v36 = vmul.f32 %v3610_v4, %v13756_v11 }
0x10fa   :  { %v13799_v35 = vadd.f32 %v3613_v7, %v3612_v36 }
0x10fc   :  { %12384 = vtanh.f32 %v13799_v35 }
0x1106   :  { %v12385_v37 = vpop.eup %12384 }
0x1107   :  { %v3618_v38 = vmul.f32 %v12385_v37, %v3616_v10 }
0x1109   :  { %3619 = vst.msk [vmem:[#allocation3 + $0x17] sm:$0x1] %vm677_vm2, %v3618_v38  ;;  %3688 = vmatmul.mubr.f32.vlgmr.msra.gmra.mrb[40].mxu0 %v3618_v38  ;;  %3759 = vmatmul.mubr.f32.vlgmr.msra.gmra.mrb[40].mxu1 %v3618_v38 }
0x110a   :  { %3620 = vst.msk [vmem:[#allocation3 + $0x17] sm:$0x1] %vm679_vm3, %v3618_v38  ;;  %11036 = vmatpush1.bf16.msra.mxu0 %v12843_v49  ;;  %11068 = vmatpush1.bf16.msra.mxu1 %v12845_v50 }
0x110b   :  { %11038 = vmatprep.subr.bf16.mxu0 %v12855_v53  ;;  %11070 = vmatprep.subr.bf16.mxu1 %v12857_v54 }
0x110c   :  { %3883 = vmatprep.mubr.f32.mxu0 %v15352_v1  ;;  %3954 = vmatprep.mubr.f32.mxu1 %v15352_v1 }
0x110e   :  { %11040 = vmatpush1.bf16.msra.mxu0 %v12884_v62  ;;  %11072 = vmatpush1.bf16.msra.mxu1 %v12886_v63 }
0x110f   :  { %11042 = vmatprep.subr.bf16.mxu0 %v12899_v5  ;;  %11074 = vmatprep.subr.bf16.mxu1 %v12901_v6 }
0x1112   :  { %11044 = vmatpush1.bf16.msra.mxu0 %v12925_v14  ;;  %11076 = vmatpush1.bf16.msra.mxu1 %v12927_v15 }
0x1113   :  { %11046 = vmatprep.subr.bf16.mxu0 %v12937_v18  ;;  %11078 = vmatprep.subr.bf16.mxu1 %v12939_v19 }
0x1116   :  { %11048 = vmatpush1.bf16.msra.mxu0 %v12969_v28  ;;  %11080 = vmatpush1.bf16.msra.mxu1 %v12971_v29 }
0x1117   :  { %11050 = vmatprep.subr.bf16.mxu0 %v12984_v33  ;;  %11082 = vmatprep.subr.bf16.mxu1 %v12986_v34 }
0x111a   :  { %11052 = vmatpush1.bf16.msra.mxu0 %v13013_v44  ;;  %11084 = vmatpush1.bf16.msra.mxu1 %v13015_v45 }
0x111b   :  { %11054 = vmatprep.subr.bf16.mxu0 %v13031_v52  ;;  %11086 = vmatprep.subr.bf16.mxu1 %v13033_v55 }
0x111e   :  { %11056 = vmatpush1.bf16.msra.mxu0 %v13049_v60  ;;  %11088 = vmatpush1.bf16.msra.mxu1 %v13051_v61 }
0x111f   :  { %11058 = vmatprep.subr.bf16.mxu0 %v13067_v8  ;;  %11090 = vmatprep.subr.bf16.mxu1 %v13069_v9 }
0x1122   :  { %11060 = vmatpush1.bf16.msra.mxu0 %v13085_v16  ;;  %11092 = vmatpush1.bf16.msra.mxu1 %v13087_v17 }
0x1123   :  { %11062 = vmatprep.subr.bf16.mxu0 %v13091_v20  ;;  %11094 = vmatprep.subr.bf16.mxu1 %v13093_v21 }
0x1126   :  { %11064 = vmatpush1.bf16.msra.mxu0 %v13097_v22  ;;  %11096 = vmatpush1.bf16.msra.mxu1 %v13099_v23 }
0x1127   :  { %11098 = vmatprep.subr.bf16.mxu0 %v12821_v40  ;;  %11130 = vmatprep.subr.bf16.mxu1 %v12823_v41 }
0x11dc   :  { %v3689_v11 = vpop.f32.mrb[40].mxu0  ;;  %v3760_v13 = vpop.f32.mrb[40].mxu1 }
0x11dd   :  { %v3691_v24 = vpop.f32.mrb[41].mxu0  ;;  %v3762_v12 = vpop.f32.mrb[41].mxu1 }
0x11de   :  { %v3769_v30 = vcombine.low %v3689_v11, %v3691_v24  ;;  %v3770_v25 = vcombine.low %v3760_v13, %v3762_v12 }
0x11e0   :  { %v3777_v27 = vrot.slane %v3769_v30, %v13149_v2  ;;  %v3784_v32 = vrot.slane %v3770_v25, %v13149_v2 }
0x11e2   :  { %v3785_v39 = vcombine.low %v3777_v27, %v3784_v32  ;;  %v3818_v32 = vld [vmem:[#allocation2 + $0x41] ss:$8 sm:$0xf] }
0x11e4   :  { %v3792_v31 = vrot.slane %v3785_v39, %v13149_v2 }
0x11e6   :  { %v3794_v46 = vadd.f32 %v3792_v31, %v3622_v43 }
0x11e8   :  { %v9483_v42 = vmul.f32 -1.442695, %v3794_v46  ;;  %v3802_v47 = vrot.slane %v3794_v46, 3 }
0x11ea   :  { %12386 = vpow2.f32 %v9483_v42 }
0x11f4   :  { %v12387_v48 = vpop.eup %12386 }
0x11f5   :  { %v3798_v51 = vadd.f32 1.0, %v12387_v48 }
0x11f7   :  { %12388 = vrcp.f32 %v3798_v51 }
0x11f8   :  { %12390 = vtanh.f32 %v3802_v47 }
0x1201   :  { %v12389_v56 = vpop.eup %12388 }
0x1202   :  { %v3806_v58 = vrot.slane %v12389_v56, 1  ;;  %v12391_v57 = vpop.eup %12390  ;;  %v3812_v7 = vrot.slane %v12389_v56, 2 }
0x1203   :  { %v3809_v59 = vmul.f32 %v12391_v57, %v12389_v56 }
0x1204   :  { %v3808_v4 = vmul.f32 %v3806_v58, %v13799_v35 }
0x1206   :  { %v13842_v3 = vadd.f32 %v3809_v59, %v3808_v4 }
0x1208   :  { %12392 = vtanh.f32 %v13842_v3 }
0x1212   :  { %v12393_v36 = vpop.eup %12392 }
0x1213   :  { %v3814_v10 = vmul.f32 %v12393_v36, %v3812_v7 }
0x1215   :  { %3815 = vst.msk [vmem:[#allocation3 + $0x8] sm:$0x1] %vm677_vm2, %v3814_v10  ;;  %3884 = vmatmul.mubr.f32.vlgmr.msra.gmra.mrb[42].mxu0 %v3814_v10  ;;  %3955 = vmatmul.mubr.f32.vlgmr.msra.gmra.mrb[42].mxu1 %v3814_v10 }
0x1216   :  { %3816 = vst.msk [vmem:[#allocation3 + $0x7] sm:$0x1] %vm679_vm3, %v3814_v10  ;;  %11100 = vmatpush1.bf16.msra.mxu0 %v12843_v49  ;;  %11132 = vmatpush1.bf16.msra.mxu1 %v12845_v50 }
0x1217   :  { %11102 = vmatprep.subr.bf16.mxu0 %v12855_v53  ;;  %11134 = vmatprep.subr.bf16.mxu1 %v12857_v54 }
0x1218   :  { %4079 = vmatprep.mubr.f32.mxu0 %v15352_v1  ;;  %4150 = vmatprep.mubr.f32.mxu1 %v15352_v1 }
0x121a   :  { %11104 = vmatpush1.bf16.msra.mxu0 %v12884_v62  ;;  %11136 = vmatpush1.bf16.msra.mxu1 %v12886_v63 }
0x121b   :  { %11106 = vmatprep.subr.bf16.mxu0 %v12899_v5  ;;  %11138 = vmatprep.subr.bf16.mxu1 %v12901_v6 }
0x121e   :  { %11108 = vmatpush1.bf16.msra.mxu0 %v12925_v14  ;;  %11140 = vmatpush1.bf16.msra.mxu1 %v12927_v15 }
0x121f   :  { %11110 = vmatprep.subr.bf16.mxu0 %v12937_v18  ;;  %11142 = vmatprep.subr.bf16.mxu1 %v12939_v19 }
0x1222   :  { %11112 = vmatpush1.bf16.msra.mxu0 %v12969_v28  ;;  %11144 = vmatpush1.bf16.msra.mxu1 %v12971_v29 }
0x1223   :  { %11114 = vmatprep.subr.bf16.mxu0 %v12984_v33  ;;  %11146 = vmatprep.subr.bf16.mxu1 %v12986_v34 }
0x1226   :  { %11116 = vmatpush1.bf16.msra.mxu0 %v13013_v44  ;;  %11148 = vmatpush1.bf16.msra.mxu1 %v13015_v45 }
0x1227   :  { %11118 = vmatprep.subr.bf16.mxu0 %v13031_v52  ;;  %11150 = vmatprep.subr.bf16.mxu1 %v13033_v55 }
0x122a   :  { %11120 = vmatpush1.bf16.msra.mxu0 %v13049_v60  ;;  %11152 = vmatpush1.bf16.msra.mxu1 %v13051_v61 }
0x122b   :  { %11122 = vmatprep.subr.bf16.mxu0 %v13067_v8  ;;  %11154 = vmatprep.subr.bf16.mxu1 %v13069_v9 }
0x122e   :  { %11124 = vmatpush1.bf16.msra.mxu0 %v13085_v16  ;;  %11156 = vmatpush1.bf16.msra.mxu1 %v13087_v17 }
0x122f   :  { %11126 = vmatprep.subr.bf16.mxu0 %v13091_v20  ;;  %11158 = vmatprep.subr.bf16.mxu1 %v13093_v21 }
0x1232   :  { %11128 = vmatpush1.bf16.msra.mxu0 %v13097_v22  ;;  %11160 = vmatpush1.bf16.msra.mxu1 %v13099_v23 }
0x1233   :  { %11162 = vmatprep.subr.bf16.mxu0 %v12821_v40  ;;  %11194 = vmatprep.subr.bf16.mxu1 %v12823_v41 }
0x12e8   :  { %v3885_v35 = vpop.f32.mrb[42].mxu0  ;;  %v3956_v37 = vpop.f32.mrb[42].mxu1 }
0x12e9   :  { %v3887_v38 = vpop.f32.mrb[43].mxu0  ;;  %v3958_v11 = vpop.f32.mrb[43].mxu1 }
0x12ea   :  { %v3965_v13 = vcombine.low %v3885_v35, %v3887_v38  ;;  %v3966_v24 = vcombine.low %v3956_v37, %v3958_v11 }
0x12ec   :  { %v3973_v12 = vrot.slane %v3965_v13, %v13149_v2  ;;  %v3980_v30 = vrot.slane %v3966_v24, %v13149_v2 }
0x12ee   :  { %v3981_v25 = vcombine.low %v3973_v12, %v3980_v30  ;;  %v4014_v30 = vld [vmem:[#allocation2 + $0x42] ss:$8 sm:$0xf] }
0x12f0   :  { %v3988_v27 = vrot.slane %v3981_v25, %v13149_v2 }
0x12f2   :  { %v3990_v39 = vadd.f32 %v3988_v27, %v3818_v32 }
0x12f4   :  { %v9484_v31 = vmul.f32 -1.442695, %v3990_v39  ;;  %v3998_v42 = vrot.slane %v3990_v39, 3 }
0x12f6   :  { %12394 = vpow2.f32 %v9484_v31 }
0x1300   :  { %v12395_v43 = vpop.eup %12394 }
0x1301   :  { %v3994_v46 = vadd.f32 1.0, %v12395_v43 }
0x1303   :  { %12396 = vrcp.f32 %v3994_v46 }
0x1304   :  { %12398 = vtanh.f32 %v3998_v42 }
0x130d   :  { %v12397_v48 = vpop.eup %12396 }
0x130e   :  { %v4002_v51 = vrot.slane %v12397_v48, 1  ;;  %v12399_v47 = vpop.eup %12398  ;;  %v4008_v59 = vrot.slane %v12397_v48, 2 }
0x130f   :  { %v4005_v56 = vmul.f32 %v12399_v47, %v12397_v48 }
0x1310   :  { %v4004_v58 = vmul.f32 %v4002_v51, %v13842_v3 }
0x1312   :  { %v13885_v57 = vadd.f32 %v4005_v56, %v4004_v58 }
0x1314   :  { %12400 = vtanh.f32 %v13885_v57 }
0x131e   :  { %v12401_v4 = vpop.eup %12400 }
0x131f   :  { %v4010_v7 = vmul.f32 %v12401_v4, %v4008_v59 }
0x1321   :  { %4011 = vst.msk [vmem:[#allocation3 + $0x18] sm:$0x1] %vm677_vm2, %v4010_v7  ;;  %4080 = vmatmul.mubr.f32.vlgmr.msra.gmra.mrb[44].mxu0 %v4010_v7  ;;  %4151 = vmatmul.mubr.f32.vlgmr.msra.gmra.mrb[44].mxu1 %v4010_v7 }
0x1322   :  { %4012 = vst.msk [vmem:[#allocation3 + $0x16] sm:$0x1] %vm679_vm3, %v4010_v7  ;;  %11164 = vmatpush1.bf16.msra.mxu0 %v12843_v49  ;;  %11196 = vmatpush1.bf16.msra.mxu1 %v12845_v50 }
0x1323   :  { %11166 = vmatprep.subr.bf16.mxu0 %v12855_v53  ;;  %11198 = vmatprep.subr.bf16.mxu1 %v12857_v54 }
0x1324   :  { %4275 = vmatprep.mubr.f32.mxu0 %v15352_v1  ;;  %4346 = vmatprep.mubr.f32.mxu1 %v15352_v1 }
0x1326   :  { %11168 = vmatpush1.bf16.msra.mxu0 %v12884_v62  ;;  %11200 = vmatpush1.bf16.msra.mxu1 %v12886_v63 }
0x1327   :  { %11170 = vmatprep.subr.bf16.mxu0 %v12899_v5  ;;  %11202 = vmatprep.subr.bf16.mxu1 %v12901_v6 }
0x132a   :  { %11172 = vmatpush1.bf16.msra.mxu0 %v12925_v14  ;;  %11204 = vmatpush1.bf16.msra.mxu1 %v12927_v15 }
0x132b   :  { %11174 = vmatprep.subr.bf16.mxu0 %v12937_v18  ;;  %11206 = vmatprep.subr.bf16.mxu1 %v12939_v19 }
0x132e   :  { %11176 = vmatpush1.bf16.msra.mxu0 %v12969_v28  ;;  %11208 = vmatpush1.bf16.msra.mxu1 %v12971_v29 }
0x132f   :  { %11178 = vmatprep.subr.bf16.mxu0 %v12984_v33  ;;  %11210 = vmatprep.subr.bf16.mxu1 %v12986_v34 }
0x1332   :  { %11180 = vmatpush1.bf16.msra.mxu0 %v13013_v44  ;;  %11212 = vmatpush1.bf16.msra.mxu1 %v13015_v45 }
0x1333   :  { %11182 = vmatprep.subr.bf16.mxu0 %v13031_v52  ;;  %11214 = vmatprep.subr.bf16.mxu1 %v13033_v55 }
0x1336   :  { %11184 = vmatpush1.bf16.msra.mxu0 %v13049_v60  ;;  %11216 = vmatpush1.bf16.msra.mxu1 %v13051_v61 }
0x1337   :  { %11186 = vmatprep.subr.bf16.mxu0 %v13067_v8  ;;  %11218 = vmatprep.subr.bf16.mxu1 %v13069_v9 }
0x133a   :  { %11188 = vmatpush1.bf16.msra.mxu0 %v13085_v16  ;;  %11220 = vmatpush1.bf16.msra.mxu1 %v13087_v17 }
0x133b   :  { %11190 = vmatprep.subr.bf16.mxu0 %v13091_v20  ;;  %11222 = vmatprep.subr.bf16.mxu1 %v13093_v21 }
0x133e   :  { %11192 = vmatpush1.bf16.msra.mxu0 %v13097_v22  ;;  %11224 = vmatpush1.bf16.msra.mxu1 %v13099_v23 }
0x133f   :  { %11226 = vmatprep.subr.bf16.mxu0 %v12821_v40  ;;  %11258 = vmatprep.subr.bf16.mxu1 %v12823_v41 }
0x13f4   :  { %v4081_v3 = vpop.f32.mrb[44].mxu0  ;;  %v4152_v36 = vpop.f32.mrb[44].mxu1 }
0x13f5   :  { %v4083_v10 = vpop.f32.mrb[45].mxu0  ;;  %v4154_v35 = vpop.f32.mrb[45].mxu1 }
0x13f6   :  { %v4161_v37 = vcombine.low %v4081_v3, %v4083_v10  ;;  %v4162_v38 = vcombine.low %v4152_v36, %v4154_v35 }
0x13f8   :  { %v4169_v11 = vrot.slane %v4161_v37, %v13149_v2  ;;  %v4176_v13 = vrot.slane %v4162_v38, %v13149_v2 }
0x13fa   :  { %v4177_v24 = vcombine.low %v4169_v11, %v4176_v13  ;;  %v4210_v13 = vld [vmem:[#allocation2 + $0x43] ss:$8 sm:$0xf] }
0x13fc   :  { %v4184_v12 = vrot.slane %v4177_v24, %v13149_v2 }
0x13fe   :  { %v4186_v25 = vadd.f32 %v4184_v12, %v4014_v30 }
0x1400   :  { %v9485_v27 = vmul.f32 -1.442695, %v4186_v25  ;;  %v4194_v31 = vrot.slane %v4186_v25, 3 }
0x1402   :  { %12402 = vpow2.f32 %v9485_v27 }
0x140c   :  { %v12403_v32 = vpop.eup %12402 }
0x140d   :  { %v4190_v39 = vadd.f32 1.0, %v12403_v32 }
0x140f   :  { %12404 = vrcp.f32 %v4190_v39 }
0x1410   :  { %12406 = vtanh.f32 %v4194_v31 }
0x1419   :  { %v12405_v43 = vpop.eup %12404 }
0x141a   :  { %v4198_v46 = vrot.slane %v12405_v43, 1  ;;  %v12407_v42 = vpop.eup %12406  ;;  %v4204_v56 = vrot.slane %v12405_v43, 2 }
0x141b   :  { %v4201_v48 = vmul.f32 %v12407_v42, %v12405_v43 }
0x141c   :  { %v4200_v51 = vmul.f32 %v4198_v46, %v13885_v57 }
0x141e   :  { %v13928_v47 = vadd.f32 %v4201_v48, %v4200_v51 }
0x1420   :  { %12408 = vtanh.f32 %v13928_v47 }
0x142a   :  { %v12409_v58 = vpop.eup %12408 }
0x142b   :  { %v4206_v59 = vmul.f32 %v12409_v58, %v4204_v56 }
0x142d   :  { %4207 = vst.msk [vmem:[#allocation3 + $0x9] sm:$0x1] %vm677_vm2, %v4206_v59  ;;  %4276 = vmatmul.mubr.f32.vlgmr.msra.gmra.mrb[46].mxu0 %v4206_v59  ;;  %4347 = vmatmul.mubr.f32.vlgmr.msra.gmra.mrb[46].mxu1 %v4206_v59 }
0x142e   :  { %4208 = vst.msk [vmem:[#allocation3 + $0x6] sm:$0x1] %vm679_vm3, %v4206_v59  ;;  %11228 = vmatpush1.bf16.msra.mxu0 %v12843_v49  ;;  %11260 = vmatpush1.bf16.msra.mxu1 %v12845_v50 }
0x142f   :  { %11230 = vmatprep.subr.bf16.mxu0 %v12855_v53  ;;  %11262 = vmatprep.subr.bf16.mxu1 %v12857_v54 }
0x1430   :  { %4471 = vmatprep.mubr.f32.mxu0 %v15352_v1  ;;  %4542 = vmatprep.mubr.f32.mxu1 %v15352_v1 }
0x1432   :  { %11232 = vmatpush1.bf16.msra.mxu0 %v12884_v62  ;;  %11264 = vmatpush1.bf16.msra.mxu1 %v12886_v63 }
0x1433   :  { %11234 = vmatprep.subr.bf16.mxu0 %v12899_v5  ;;  %11266 = vmatprep.subr.bf16.mxu1 %v12901_v6 }
0x1436   :  { %11236 = vmatpush1.bf16.msra.mxu0 %v12925_v14  ;;  %11268 = vmatpush1.bf16.msra.mxu1 %v12927_v15 }
0x1437   :  { %11238 = vmatprep.subr.bf16.mxu0 %v12937_v18  ;;  %11270 = vmatprep.subr.bf16.mxu1 %v12939_v19 }
0x143a   :  { %11240 = vmatpush1.bf16.msra.mxu0 %v12969_v28  ;;  %11272 = vmatpush1.bf16.msra.mxu1 %v12971_v29 }
0x143b   :  { %11242 = vmatprep.subr.bf16.mxu0 %v12984_v33  ;;  %11274 = vmatprep.subr.bf16.mxu1 %v12986_v34 }
0x143e   :  { %11244 = vmatpush1.bf16.msra.mxu0 %v13013_v44  ;;  %11276 = vmatpush1.bf16.msra.mxu1 %v13015_v45 }
0x143f   :  { %11246 = vmatprep.subr.bf16.mxu0 %v13031_v52  ;;  %11278 = vmatprep.subr.bf16.mxu1 %v13033_v55 }
0x1442   :  { %11248 = vmatpush1.bf16.msra.mxu0 %v13049_v60  ;;  %11280 = vmatpush1.bf16.msra.mxu1 %v13051_v61 }
0x1443   :  { %11250 = vmatprep.subr.bf16.mxu0 %v13067_v8  ;;  %11282 = vmatprep.subr.bf16.mxu1 %v13069_v9 }
0x1446   :  { %11252 = vmatpush1.bf16.msra.mxu0 %v13085_v16  ;;  %11284 = vmatpush1.bf16.msra.mxu1 %v13087_v17 }
0x1447   :  { %11254 = vmatprep.subr.bf16.mxu0 %v13091_v20  ;;  %11286 = vmatprep.subr.bf16.mxu1 %v13093_v21 }
0x144a   :  { %11256 = vmatpush1.bf16.msra.mxu0 %v13097_v22  ;;  %11288 = vmatpush1.bf16.msra.mxu1 %v13099_v23 }
0x144b   :  { %11290 = vmatprep.subr.bf16.mxu0 %v12821_v40  ;;  %11322 = vmatprep.subr.bf16.mxu1 %v12823_v41 }
0x1500   :  { %v4277_v57 = vpop.f32.mrb[46].mxu0  ;;  %v4348_v4 = vpop.f32.mrb[46].mxu1 }
0x1501   :  { %v4279_v7 = vpop.f32.mrb[47].mxu0  ;;  %v4350_v3 = vpop.f32.mrb[47].mxu1 }
0x1502   :  { %v4357_v36 = vcombine.low %v4277_v57, %v4279_v7  ;;  %v4358_v10 = vcombine.low %v4348_v4, %v4350_v3 }
0x1504   :  { %v4365_v35 = vrot.slane %v4357_v36, %v13149_v2  ;;  %v4372_v37 = vrot.slane %v4358_v10, %v13149_v2 }
0x1506   :  { %v4373_v38 = vcombine.low %v4365_v35, %v4372_v37  ;;  %v4406_v37 = vld [vmem:[#allocation2 + $0x44] ss:$8 sm:$0xf] }
0x1508   :  { %v4380_v11 = vrot.slane %v4373_v38, %v13149_v2 }
0x150a   :  { %v4382_v24 = vadd.f32 %v4380_v11, %v4210_v13 }
0x150c   :  { %v9486_v12 = vmul.f32 -1.442695, %v4382_v24  ;;  %v4390_v27 = vrot.slane %v4382_v24, 3 }
0x150e   :  { %12410 = vpow2.f32 %v9486_v12 }
0x1518   :  { %v12411_v30 = vpop.eup %12410 }
0x1519   :  { %v4386_v25 = vadd.f32 1.0, %v12411_v30 }
0x151b   :  { %12412 = vrcp.f32 %v4386_v25 }
0x151c   :  { %12414 = vtanh.f32 %v4390_v27 }
0x1525   :  { %v12413_v32 = vpop.eup %12412 }
0x1526   :  { %v4394_v39 = vrot.slane %v12413_v32, 1  ;;  %v12415_v31 = vpop.eup %12414  ;;  %v4400_v48 = vrot.slane %v12413_v32, 2 }
0x1527   :  { %v4397_v43 = vmul.f32 %v12415_v31, %v12413_v32 }
0x1528   :  { %v4396_v46 = vmul.f32 %v4394_v39, %v13928_v47 }
0x152a   :  { %v13971_v42 = vadd.f32 %v4397_v43, %v4396_v46 }
0x152c   :  { %12416 = vtanh.f32 %v13971_v42 }
0x1536   :  { %v12417_v51 = vpop.eup %12416 }
0x1537   :  { %v4402_v56 = vmul.f32 %v12417_v51, %v4400_v48 }
0x1539   :  { %4403 = vst.msk [vmem:[#allocation3 + $0x19] sm:$0x1] %vm677_vm2, %v4402_v56  ;;  %4472 = vmatmul.mubr.f32.vlgmr.msra.gmra.mrb[48].mxu0 %v4402_v56  ;;  %4543 = vmatmul.mubr.f32.vlgmr.msra.gmra.mrb[48].mxu1 %v4402_v56 }
0x153a   :  { %4404 = vst.msk [vmem:[#allocation3 + $0x15] sm:$0x1] %vm679_vm3, %v4402_v56  ;;  %11292 = vmatpush1.bf16.msra.mxu0 %v12843_v49  ;;  %11324 = vmatpush1.bf16.msra.mxu1 %v12845_v50 }
0x153b   :  { %11294 = vmatprep.subr.bf16.mxu0 %v12855_v53  ;;  %11326 = vmatprep.subr.bf16.mxu1 %v12857_v54 }
0x153c   :  { %4667 = vmatprep.mubr.f32.mxu0 %v15352_v1  ;;  %4738 = vmatprep.mubr.f32.mxu1 %v15352_v1 }
0x153e   :  { %11296 = vmatpush1.bf16.msra.mxu0 %v12884_v62  ;;  %11328 = vmatpush1.bf16.msra.mxu1 %v12886_v63 }
0x153f   :  { %11298 = vmatprep.subr.bf16.mxu0 %v12899_v5  ;;  %11330 = vmatprep.subr.bf16.mxu1 %v12901_v6 }
0x1542   :  { %11300 = vmatpush1.bf16.msra.mxu0 %v12925_v14  ;;  %11332 = vmatpush1.bf16.msra.mxu1 %v12927_v15 }
0x1543   :  { %11302 = vmatprep.subr.bf16.mxu0 %v12937_v18  ;;  %11334 = vmatprep.subr.bf16.mxu1 %v12939_v19 }
0x1546   :  { %11304 = vmatpush1.bf16.msra.mxu0 %v12969_v28  ;;  %11336 = vmatpush1.bf16.msra.mxu1 %v12971_v29 }
0x1547   :  { %11306 = vmatprep.subr.bf16.mxu0 %v12984_v33  ;;  %11338 = vmatprep.subr.bf16.mxu1 %v12986_v34 }
0x154a   :  { %11308 = vmatpush1.bf16.msra.mxu0 %v13013_v44  ;;  %11340 = vmatpush1.bf16.msra.mxu1 %v13015_v45 }
0x154b   :  { %11310 = vmatprep.subr.bf16.mxu0 %v13031_v52  ;;  %11342 = vmatprep.subr.bf16.mxu1 %v13033_v55 }
0x154e   :  { %11312 = vmatpush1.bf16.msra.mxu0 %v13049_v60  ;;  %11344 = vmatpush1.bf16.msra.mxu1 %v13051_v61 }
0x154f   :  { %11314 = vmatprep.subr.bf16.mxu0 %v13067_v8  ;;  %11346 = vmatprep.subr.bf16.mxu1 %v13069_v9 }
0x1552   :  { %11316 = vmatpush1.bf16.msra.mxu0 %v13085_v16  ;;  %11348 = vmatpush1.bf16.msra.mxu1 %v13087_v17 }
0x1553   :  { %11318 = vmatprep.subr.bf16.mxu0 %v13091_v20  ;;  %11350 = vmatprep.subr.bf16.mxu1 %v13093_v21 }
0x1556   :  { %11320 = vmatpush1.bf16.msra.mxu0 %v13097_v22  ;;  %11352 = vmatpush1.bf16.msra.mxu1 %v13099_v23 }
0x1557   :  { %11354 = vmatprep.subr.bf16.mxu0 %v12821_v40  ;;  %11386 = vmatprep.subr.bf16.mxu1 %v12823_v41 }
0x160c   :  { %v4473_v47 = vpop.f32.mrb[48].mxu0  ;;  %v4544_v58 = vpop.f32.mrb[48].mxu1 }
0x160d   :  { %v4475_v59 = vpop.f32.mrb[49].mxu0  ;;  %v4546_v57 = vpop.f32.mrb[49].mxu1 }
0x160e   :  { %v4553_v4 = vcombine.low %v4473_v47, %v4475_v59  ;;  %v4554_v7 = vcombine.low %v4544_v58, %v4546_v57 }
0x1610   :  { %v4561_v3 = vrot.slane %v4553_v4, %v13149_v2  ;;  %v4568_v36 = vrot.slane %v4554_v7, %v13149_v2 }
0x1612   :  { %v4569_v10 = vcombine.low %v4561_v3, %v4568_v36  ;;  %v4602_v36 = vld [vmem:[#allocation2 + $0x45] ss:$8 sm:$0xf] }
0x1614   :  { %v4576_v35 = vrot.slane %v4569_v10, %v13149_v2 }
0x1616   :  { %v4578_v38 = vadd.f32 %v4576_v35, %v4406_v37 }
0x1618   :  { %v9487_v11 = vmul.f32 -1.442695, %v4578_v38  ;;  %v4586_v12 = vrot.slane %v4578_v38, 3 }
0x161a   :  { %12418 = vpow2.f32 %v9487_v11 }
0x1624   :  { %v12419_v13 = vpop.eup %12418 }
0x1625   :  { %v4582_v24 = vadd.f32 1.0, %v12419_v13 }
0x1627   :  { %12420 = vrcp.f32 %v4582_v24 }
0x1628   :  { %12422 = vtanh.f32 %v4586_v12 }
0x1631   :  { %v12421_v30 = vpop.eup %12420 }
0x1632   :  { %v4590_v25 = vrot.slane %v12421_v30, 1  ;;  %v12423_v27 = vpop.eup %12422  ;;  %v4596_v43 = vrot.slane %v12421_v30, 2 }
0x1633   :  { %v4593_v32 = vmul.f32 %v12423_v27, %v12421_v30 }
0x1634   :  { %v4592_v39 = vmul.f32 %v4590_v25, %v13971_v42 }
0x1636   :  { %v14014_v31 = vadd.f32 %v4593_v32, %v4592_v39 }
0x1638   :  { %12424 = vtanh.f32 %v14014_v31 }
0x1642   :  { %v12425_v46 = vpop.eup %12424 }
0x1643   :  { %v4598_v48 = vmul.f32 %v12425_v46, %v4596_v43 }
0x1645   :  { %4599 = vst.msk [vmem:[#allocation3 + $0xa] sm:$0x1] %vm677_vm2, %v4598_v48  ;;  %4668 = vmatmul.mubr.f32.vlgmr.msra.gmra.mrb[50].mxu0 %v4598_v48  ;;  %4739 = vmatmul.mubr.f32.vlgmr.msra.gmra.mrb[50].mxu1 %v4598_v48 }
0x1646   :  { %4600 = vst.msk [vmem:[#allocation3 + $0x5] sm:$0x1] %vm679_vm3, %v4598_v48  ;;  %11356 = vmatpush1.bf16.msra.mxu0 %v12843_v49  ;;  %11388 = vmatpush1.bf16.msra.mxu1 %v12845_v50 }
0x1647   :  { %11358 = vmatprep.subr.bf16.mxu0 %v12855_v53  ;;  %11390 = vmatprep.subr.bf16.mxu1 %v12857_v54 }
0x1648   :  { %4863 = vmatprep.mubr.f32.mxu0 %v15352_v1  ;;  %4934 = vmatprep.mubr.f32.mxu1 %v15352_v1 }
0x164a   :  { %11360 = vmatpush1.bf16.msra.mxu0 %v12884_v62  ;;  %11392 = vmatpush1.bf16.msra.mxu1 %v12886_v63 }
0x164b   :  { %11362 = vmatprep.subr.bf16.mxu0 %v12899_v5  ;;  %11394 = vmatprep.subr.bf16.mxu1 %v12901_v6 }
0x164e   :  { %11364 = vmatpush1.bf16.msra.mxu0 %v12925_v14  ;;  %11396 = vmatpush1.bf16.msra.mxu1 %v12927_v15 }
0x164f   :  { %11366 = vmatprep.subr.bf16.mxu0 %v12937_v18  ;;  %11398 = vmatprep.subr.bf16.mxu1 %v12939_v19 }
0x1652   :  { %11368 = vmatpush1.bf16.msra.mxu0 %v12969_v28  ;;  %11400 = vmatpush1.bf16.msra.mxu1 %v12971_v29 }
0x1653   :  { %11370 = vmatprep.subr.bf16.mxu0 %v12984_v33  ;;  %11402 = vmatprep.subr.bf16.mxu1 %v12986_v34 }
0x1656   :  { %11372 = vmatpush1.bf16.msra.mxu0 %v13013_v44  ;;  %11404 = vmatpush1.bf16.msra.mxu1 %v13015_v45 }
0x1657   :  { %11374 = vmatprep.subr.bf16.mxu0 %v13031_v52  ;;  %11406 = vmatprep.subr.bf16.mxu1 %v13033_v55 }
0x165a   :  { %11376 = vmatpush1.bf16.msra.mxu0 %v13049_v60  ;;  %11408 = vmatpush1.bf16.msra.mxu1 %v13051_v61 }
0x165b   :  { %11378 = vmatprep.subr.bf16.mxu0 %v13067_v8  ;;  %11410 = vmatprep.subr.bf16.mxu1 %v13069_v9 }
0x165e   :  { %11380 = vmatpush1.bf16.msra.mxu0 %v13085_v16  ;;  %11412 = vmatpush1.bf16.msra.mxu1 %v13087_v17 }
0x165f   :  { %11382 = vmatprep.subr.bf16.mxu0 %v13091_v20  ;;  %11414 = vmatprep.subr.bf16.mxu1 %v13093_v21 }
0x1662   :  { %11384 = vmatpush1.bf16.msra.mxu0 %v13097_v22  ;;  %11416 = vmatpush1.bf16.msra.mxu1 %v13099_v23 }
0x1663   :  { %11418 = vmatprep.subr.bf16.mxu0 %v12821_v40  ;;  %11450 = vmatprep.subr.bf16.mxu1 %v12823_v41 }
0x1718   :  { %v4669_v42 = vpop.f32.mrb[50].mxu0  ;;  %v4740_v51 = vpop.f32.mrb[50].mxu1 }
0x1719   :  { %v4671_v56 = vpop.f32.mrb[51].mxu0  ;;  %v4742_v47 = vpop.f32.mrb[51].mxu1 }
0x171a   :  { %v4749_v58 = vcombine.low %v4669_v42, %v4671_v56  ;;  %v4750_v59 = vcombine.low %v4740_v51, %v4742_v47 }
0x171c   :  { %v4757_v57 = vrot.slane %v4749_v58, %v13149_v2  ;;  %v4764_v4 = vrot.slane %v4750_v59, %v13149_v2 }
0x171e   :  { %v4765_v7 = vcombine.low %v4757_v57, %v4764_v4  ;;  %v4798_v4 = vld [vmem:[#allocation2 + $0x46] ss:$8 sm:$0xf] }
0x1720   :  { %v4772_v3 = vrot.slane %v4765_v7, %v13149_v2 }
0x1722   :  { %v4774_v10 = vadd.f32 %v4772_v3, %v4602_v36 }
0x1724   :  { %v9488_v35 = vmul.f32 -1.442695, %v4774_v10  ;;  %v4782_v11 = vrot.slane %v4774_v10, 3 }
0x1726   :  { %12426 = vpow2.f32 %v9488_v35 }
0x1730   :  { %v12427_v37 = vpop.eup %12426 }
0x1731   :  { %v4778_v38 = vadd.f32 1.0, %v12427_v37 }
0x1733   :  { %12428 = vrcp.f32 %v4778_v38 }
0x1734   :  { %12430 = vtanh.f32 %v4782_v11 }
0x173d   :  { %v12429_v13 = vpop.eup %12428 }
0x173e   :  { %v4786_v24 = vrot.slane %v12429_v13, 1  ;;  %v12431_v12 = vpop.eup %12430  ;;  %v4792_v32 = vrot.slane %v12429_v13, 2 }
0x173f   :  { %v4789_v30 = vmul.f32 %v12431_v12, %v12429_v13 }
0x1740   :  { %v4788_v25 = vmul.f32 %v4786_v24, %v14014_v31 }
0x1742   :  { %v14057_v27 = vadd.f32 %v4789_v30, %v4788_v25 }
0x1744   :  { %12432 = vtanh.f32 %v14057_v27 }
0x174e   :  { %v12433_v39 = vpop.eup %12432 }
0x174f   :  { %v4794_v43 = vmul.f32 %v12433_v39, %v4792_v32 }
0x1751   :  { %4795 = vst.msk [vmem:[#allocation3 + $0x1a] sm:$0x1] %vm677_vm2, %v4794_v43  ;;  %4864 = vmatmul.mubr.f32.vlgmr.msra.gmra.mrb[52].mxu0 %v4794_v43  ;;  %4935 = vmatmul.mubr.f32.vlgmr.msra.gmra.mrb[52].mxu1 %v4794_v43 }
0x1752   :  { %4796 = vst.msk [vmem:[#allocation3 + $0x14] sm:$0x1] %vm679_vm3, %v4794_v43  ;;  %11420 = vmatpush1.bf16.msra.mxu0 %v12843_v49  ;;  %11452 = vmatpush1.bf16.msra.mxu1 %v12845_v50 }
0x1753   :  { %11422 = vmatprep.subr.bf16.mxu0 %v12855_v53  ;;  %11454 = vmatprep.subr.bf16.mxu1 %v12857_v54 }
0x1754   :  { %5059 = vmatprep.mubr.f32.mxu0 %v15352_v1  ;;  %5130 = vmatprep.mubr.f32.mxu1 %v15352_v1 }
0x1756   :  { %11424 = vmatpush1.bf16.msra.mxu0 %v12884_v62  ;;  %11456 = vmatpush1.bf16.msra.mxu1 %v12886_v63 }
0x1757   :  { %11426 = vmatprep.subr.bf16.mxu0 %v12899_v5  ;;  %11458 = vmatprep.subr.bf16.mxu1 %v12901_v6 }
0x175a   :  { %11428 = vmatpush1.bf16.msra.mxu0 %v12925_v14  ;;  %11460 = vmatpush1.bf16.msra.mxu1 %v12927_v15 }
0x175b   :  { %11430 = vmatprep.subr.bf16.mxu0 %v12937_v18  ;;  %11462 = vmatprep.subr.bf16.mxu1 %v12939_v19 }
0x175e   :  { %11432 = vmatpush1.bf16.msra.mxu0 %v12969_v28  ;;  %11464 = vmatpush1.bf16.msra.mxu1 %v12971_v29 }
0x175f   :  { %11434 = vmatprep.subr.bf16.mxu0 %v12984_v33  ;;  %11466 = vmatprep.subr.bf16.mxu1 %v12986_v34 }
0x1762   :  { %11436 = vmatpush1.bf16.msra.mxu0 %v13013_v44  ;;  %11468 = vmatpush1.bf16.msra.mxu1 %v13015_v45 }
0x1763   :  { %11438 = vmatprep.subr.bf16.mxu0 %v13031_v52  ;;  %11470 = vmatprep.subr.bf16.mxu1 %v13033_v55 }
0x1766   :  { %11440 = vmatpush1.bf16.msra.mxu0 %v13049_v60  ;;  %11472 = vmatpush1.bf16.msra.mxu1 %v13051_v61 }
0x1767   :  { %11442 = vmatprep.subr.bf16.mxu0 %v13067_v8  ;;  %11474 = vmatprep.subr.bf16.mxu1 %v13069_v9 }
0x176a   :  { %11444 = vmatpush1.bf16.msra.mxu0 %v13085_v16  ;;  %11476 = vmatpush1.bf16.msra.mxu1 %v13087_v17 }
0x176b   :  { %11446 = vmatprep.subr.bf16.mxu0 %v13091_v20  ;;  %11478 = vmatprep.subr.bf16.mxu1 %v13093_v21 }
0x176e   :  { %11448 = vmatpush1.bf16.msra.mxu0 %v13097_v22  ;;  %11480 = vmatpush1.bf16.msra.mxu1 %v13099_v23 }
0x176f   :  { %11482 = vmatprep.subr.bf16.mxu0 %v12821_v40  ;;  %11514 = vmatprep.subr.bf16.mxu1 %v12823_v41 }
0x1824   :  { %v4865_v31 = vpop.f32.mrb[52].mxu0  ;;  %v4936_v46 = vpop.f32.mrb[52].mxu1 }
0x1825   :  { %v4867_v48 = vpop.f32.mrb[53].mxu0  ;;  %v4938_v42 = vpop.f32.mrb[53].mxu1 }
0x1826   :  { %v4945_v51 = vcombine.low %v4865_v31, %v4867_v48  ;;  %v4946_v56 = vcombine.low %v4936_v46, %v4938_v42 }
0x1828   :  { %v4953_v47 = vrot.slane %v4945_v51, %v13149_v2  ;;  %v4960_v58 = vrot.slane %v4946_v56, %v13149_v2 }
0x182a   :  { %v4961_v59 = vcombine.low %v4953_v47, %v4960_v58  ;;  %v4994_v58 = vld [vmem:[#allocation2 + $0x47] ss:$8 sm:$0xf] }
0x182c   :  { %v4968_v57 = vrot.slane %v4961_v59, %v13149_v2 }
0x182e   :  { %v4970_v7 = vadd.f32 %v4968_v57, %v4798_v4 }
0x1830   :  { %v9489_v3 = vmul.f32 -1.442695, %v4970_v7  ;;  %v4978_v35 = vrot.slane %v4970_v7, 3 }
0x1832   :  { %12434 = vpow2.f32 %v9489_v3 }
0x183c   :  { %v12435_v36 = vpop.eup %12434 }
0x183d   :  { %v4974_v10 = vadd.f32 1.0, %v12435_v36 }
0x183f   :  { %12436 = vrcp.f32 %v4974_v10 }
0x1840   :  { %12438 = vtanh.f32 %v4978_v35 }
0x1849   :  { %v12437_v37 = vpop.eup %12436 }
0x184a   :  { %v4982_v38 = vrot.slane %v12437_v37, 1  ;;  %v12439_v11 = vpop.eup %12438  ;;  %v4988_v30 = vrot.slane %v12437_v37, 2 }
0x184b   :  { %v4985_v13 = vmul.f32 %v12439_v11, %v12437_v37 }
0x184c   :  { %v4984_v24 = vmul.f32 %v4982_v38, %v14057_v27 }
0x184e   :  { %v14100_v12 = vadd.f32 %v4985_v13, %v4984_v24 }
0x1850   :  { %12440 = vtanh.f32 %v14100_v12 }
0x185a   :  { %v12441_v25 = vpop.eup %12440 }
0x185b   :  { %v4990_v32 = vmul.f32 %v12441_v25, %v4988_v30 }
0x185d   :  { %4991 = vst.msk [vmem:[#allocation3 + $0xb] sm:$0x1] %vm677_vm2, %v4990_v32  ;;  %5060 = vmatmul.mubr.f32.vlgmr.msra.gmra.mrb[54].mxu0 %v4990_v32  ;;  %5131 = vmatmul.mubr.f32.vlgmr.msra.gmra.mrb[54].mxu1 %v4990_v32 }
0x185e   :  { %4992 = vst.msk [vmem:[#allocation3 + $0x4] sm:$0x1] %vm679_vm3, %v4990_v32  ;;  %11484 = vmatpush1.bf16.msra.mxu0 %v12843_v49  ;;  %11516 = vmatpush1.bf16.msra.mxu1 %v12845_v50 }
0x185f   :  { %11486 = vmatprep.subr.bf16.mxu0 %v12855_v53  ;;  %11518 = vmatprep.subr.bf16.mxu1 %v12857_v54 }
0x1860   :  { %5255 = vmatprep.mubr.f32.mxu0 %v15352_v1  ;;  %5326 = vmatprep.mubr.f32.mxu1 %v15352_v1 }
0x1862   :  { %11488 = vmatpush1.bf16.msra.mxu0 %v12884_v62  ;;  %11520 = vmatpush1.bf16.msra.mxu1 %v12886_v63 }
0x1863   :  { %11490 = vmatprep.subr.bf16.mxu0 %v12899_v5  ;;  %11522 = vmatprep.subr.bf16.mxu1 %v12901_v6 }
0x1866   :  { %11492 = vmatpush1.bf16.msra.mxu0 %v12925_v14  ;;  %11524 = vmatpush1.bf16.msra.mxu1 %v12927_v15 }
0x1867   :  { %11494 = vmatprep.subr.bf16.mxu0 %v12937_v18  ;;  %11526 = vmatprep.subr.bf16.mxu1 %v12939_v19 }
0x186a   :  { %11496 = vmatpush1.bf16.msra.mxu0 %v12969_v28  ;;  %11528 = vmatpush1.bf16.msra.mxu1 %v12971_v29 }
0x186b   :  { %11498 = vmatprep.subr.bf16.mxu0 %v12984_v33  ;;  %11530 = vmatprep.subr.bf16.mxu1 %v12986_v34 }
0x186e   :  { %11500 = vmatpush1.bf16.msra.mxu0 %v13013_v44  ;;  %11532 = vmatpush1.bf16.msra.mxu1 %v13015_v45 }
0x186f   :  { %11502 = vmatprep.subr.bf16.mxu0 %v13031_v52  ;;  %11534 = vmatprep.subr.bf16.mxu1 %v13033_v55 }
0x1872   :  { %11504 = vmatpush1.bf16.msra.mxu0 %v13049_v60  ;;  %11536 = vmatpush1.bf16.msra.mxu1 %v13051_v61 }
0x1873   :  { %11506 = vmatprep.subr.bf16.mxu0 %v13067_v8  ;;  %11538 = vmatprep.subr.bf16.mxu1 %v13069_v9 }
0x1876   :  { %11508 = vmatpush1.bf16.msra.mxu0 %v13085_v16  ;;  %11540 = vmatpush1.bf16.msra.mxu1 %v13087_v17 }
0x1877   :  { %11510 = vmatprep.subr.bf16.mxu0 %v13091_v20  ;;  %11542 = vmatprep.subr.bf16.mxu1 %v13093_v21 }
0x187a   :  { %11512 = vmatpush1.bf16.msra.mxu0 %v13097_v22  ;;  %11544 = vmatpush1.bf16.msra.mxu1 %v13099_v23 }
0x187b   :  { %11546 = vmatprep.subr.bf16.mxu0 %v12821_v40  ;;  %11578 = vmatprep.subr.bf16.mxu1 %v12823_v41 }
0x1930   :  { %v5061_v27 = vpop.f32.mrb[54].mxu0  ;;  %v5132_v39 = vpop.f32.mrb[54].mxu1 }
0x1931   :  { %v5063_v43 = vpop.f32.mrb[55].mxu0  ;;  %v5134_v31 = vpop.f32.mrb[55].mxu1 }
0x1932   :  { %v5141_v46 = vcombine.low %v5061_v27, %v5063_v43  ;;  %v5142_v48 = vcombine.low %v5132_v39, %v5134_v31 }
0x1934   :  { %v5149_v42 = vrot.slane %v5141_v46, %v13149_v2  ;;  %v5156_v51 = vrot.slane %v5142_v48, %v13149_v2 }
0x1936   :  { %v5157_v56 = vcombine.low %v5149_v42, %v5156_v51  ;;  %v5190_v51 = vld [vmem:[#allocation2 + $0x60] ss:$8 sm:$0xf] }
0x1938   :  { %v5164_v47 = vrot.slane %v5157_v56, %v13149_v2 }
0x193a   :  { %v5166_v59 = vadd.f32 %v5164_v47, %v4994_v58 }
0x193c   :  { %v9490_v57 = vmul.f32 -1.442695, %v5166_v59  ;;  %v5174_v3 = vrot.slane %v5166_v59, 3 }
0x193e   :  { %12442 = vpow2.f32 %v9490_v57 }
0x1948   :  { %v12443_v4 = vpop.eup %12442 }
0x1949   :  { %v5170_v7 = vadd.f32 1.0, %v12443_v4 }
0x194b   :  { %12444 = vrcp.f32 %v5170_v7 }
0x194c   :  { %12446 = vtanh.f32 %v5174_v3 }
0x1955   :  { %v12445_v36 = vpop.eup %12444 }
0x1956   :  { %v5178_v10 = vrot.slane %v12445_v36, 1  ;;  %v12447_v35 = vpop.eup %12446  ;;  %v5184_v13 = vrot.slane %v12445_v36, 2 }
0x1957   :  { %v5181_v37 = vmul.f32 %v12447_v35, %v12445_v36 }
0x1958   :  { %v5180_v38 = vmul.f32 %v5178_v10, %v14100_v12 }
0x195a   :  { %v14143_v11 = vadd.f32 %v5181_v37, %v5180_v38 }
0x195c   :  { %12448 = vtanh.f32 %v14143_v11 }
0x1966   :  { %v12449_v24 = vpop.eup %12448 }
0x1967   :  { %v5186_v30 = vmul.f32 %v12449_v24, %v5184_v13 }
0x1969   :  { %5187 = vst.msk [vmem:[#allocation3 + $0x1b] sm:$0x1] %vm677_vm2, %v5186_v30  ;;  %5256 = vmatmul.mubr.f32.vlgmr.msra.gmra.mrb[56].mxu0 %v5186_v30  ;;  %5327 = vmatmul.mubr.f32.vlgmr.msra.gmra.mrb[56].mxu1 %v5186_v30 }
0x196a   :  { %5188 = vst.msk [vmem:[#allocation3 + $0x13] sm:$0x1] %vm679_vm3, %v5186_v30  ;;  %11548 = vmatpush1.bf16.msra.mxu0 %v12843_v49  ;;  %11580 = vmatpush1.bf16.msra.mxu1 %v12845_v50 }
0x196b   :  { %11550 = vmatprep.subr.bf16.mxu0 %v12855_v53  ;;  %11582 = vmatprep.subr.bf16.mxu1 %v12857_v54 }
0x196c   :  { %5451 = vmatprep.mubr.f32.mxu0 %v15352_v1  ;;  %5522 = vmatprep.mubr.f32.mxu1 %v15352_v1 }
0x196e   :  { %11552 = vmatpush1.bf16.msra.mxu0 %v12884_v62  ;;  %11584 = vmatpush1.bf16.msra.mxu1 %v12886_v63 }
0x196f   :  { %11554 = vmatprep.subr.bf16.mxu0 %v12899_v5  ;;  %11586 = vmatprep.subr.bf16.mxu1 %v12901_v6 }
0x1972   :  { %11556 = vmatpush1.bf16.msra.mxu0 %v12925_v14  ;;  %11588 = vmatpush1.bf16.msra.mxu1 %v12927_v15 }
0x1973   :  { %11558 = vmatprep.subr.bf16.mxu0 %v12937_v18  ;;  %11590 = vmatprep.subr.bf16.mxu1 %v12939_v19 }
0x1976   :  { %11560 = vmatpush1.bf16.msra.mxu0 %v12969_v28  ;;  %11592 = vmatpush1.bf16.msra.mxu1 %v12971_v29 }
0x1977   :  { %11562 = vmatprep.subr.bf16.mxu0 %v12984_v33  ;;  %11594 = vmatprep.subr.bf16.mxu1 %v12986_v34 }
0x197a   :  { %11564 = vmatpush1.bf16.msra.mxu0 %v13013_v44  ;;  %11596 = vmatpush1.bf16.msra.mxu1 %v13015_v45 }
0x197b   :  { %11566 = vmatprep.subr.bf16.mxu0 %v13031_v52  ;;  %11598 = vmatprep.subr.bf16.mxu1 %v13033_v55 }
0x197e   :  { %11568 = vmatpush1.bf16.msra.mxu0 %v13049_v60  ;;  %11600 = vmatpush1.bf16.msra.mxu1 %v13051_v61 }
0x197f   :  { %11570 = vmatprep.subr.bf16.mxu0 %v13067_v8  ;;  %11602 = vmatprep.subr.bf16.mxu1 %v13069_v9 }
0x1982   :  { %11572 = vmatpush1.bf16.msra.mxu0 %v13085_v16  ;;  %11604 = vmatpush1.bf16.msra.mxu1 %v13087_v17 }
0x1983   :  { %11574 = vmatprep.subr.bf16.mxu0 %v13091_v20  ;;  %11606 = vmatprep.subr.bf16.mxu1 %v13093_v21 }
0x1986   :  { %11576 = vmatpush1.bf16.msra.mxu0 %v13097_v22  ;;  %11608 = vmatpush1.bf16.msra.mxu1 %v13099_v23 }
0x1987   :  { %11610 = vmatprep.subr.bf16.mxu0 %v12821_v40  ;;  %11642 = vmatprep.subr.bf16.mxu1 %v12823_v41 }
0x1a3c   :  { %v5257_v12 = vpop.f32.mrb[56].mxu0  ;;  %v5328_v25 = vpop.f32.mrb[56].mxu1 }
0x1a3d   :  { %v5259_v32 = vpop.f32.mrb[57].mxu0  ;;  %v5330_v27 = vpop.f32.mrb[57].mxu1 }
0x1a3e   :  { %v5337_v39 = vcombine.low %v5257_v12, %v5259_v32  ;;  %v5338_v43 = vcombine.low %v5328_v25, %v5330_v27 }
0x1a40   :  { %v5345_v31 = vrot.slane %v5337_v39, %v13149_v2  ;;  %v5352_v46 = vrot.slane %v5338_v43, %v13149_v2 }
0x1a42   :  { %v5353_v48 = vcombine.low %v5345_v31, %v5352_v46  ;;  %v5386_v46 = vld [vmem:[#allocation2 + $0x61] ss:$8 sm:$0xf] }
0x1a44   :  { %v5360_v42 = vrot.slane %v5353_v48, %v13149_v2 }
0x1a46   :  { %v5362_v56 = vadd.f32 %v5360_v42, %v5190_v51 }
0x1a48   :  { %v9491_v47 = vmul.f32 -1.442695, %v5362_v56  ;;  %v5370_v57 = vrot.slane %v5362_v56, 3 }
0x1a4a   :  { %12450 = vpow2.f32 %v9491_v47 }
0x1a54   :  { %v12451_v58 = vpop.eup %12450 }
0x1a55   :  { %v5366_v59 = vadd.f32 1.0, %v12451_v58 }
0x1a57   :  { %12452 = vrcp.f32 %v5366_v59 }
0x1a58   :  { %12454 = vtanh.f32 %v5370_v57 }
0x1a61   :  { %v12453_v4 = vpop.eup %12452 }
0x1a62   :  { %v5374_v7 = vrot.slane %v12453_v4, 1  ;;  %v12455_v3 = vpop.eup %12454  ;;  %v5380_v37 = vrot.slane %v12453_v4, 2 }
0x1a63   :  { %v5377_v36 = vmul.f32 %v12455_v3, %v12453_v4 }
0x1a64   :  { %v5376_v10 = vmul.f32 %v5374_v7, %v14143_v11 }
0x1a66   :  { %v14186_v35 = vadd.f32 %v5377_v36, %v5376_v10 }
0x1a68   :  { %12456 = vtanh.f32 %v14186_v35 }
0x1a72   :  { %v12457_v38 = vpop.eup %12456 }
0x1a73   :  { %v5382_v13 = vmul.f32 %v12457_v38, %v5380_v37 }
0x1a75   :  { %5383 = vst.msk [vmem:[#allocation3 + $0xc] sm:$0x1] %vm677_vm2, %v5382_v13  ;;  %5452 = vmatmul.mubr.f32.vlgmr.msra.gmra.mrb[58].mxu0 %v5382_v13  ;;  %5523 = vmatmul.mubr.f32.vlgmr.msra.gmra.mrb[58].mxu1 %v5382_v13 }
0x1a76   :  { %5384 = vst.msk [vmem:[#allocation3 + $0x3] sm:$0x1] %vm679_vm3, %v5382_v13  ;;  %11612 = vmatpush1.bf16.msra.mxu0 %v12843_v49  ;;  %11644 = vmatpush1.bf16.msra.mxu1 %v12845_v50 }
0x1a77   :  { %11614 = vmatprep.subr.bf16.mxu0 %v12855_v53  ;;  %11646 = vmatprep.subr.bf16.mxu1 %v12857_v54 }
0x1a78   :  { %5647 = vmatprep.mubr.f32.mxu0 %v15352_v1  ;;  %5718 = vmatprep.mubr.f32.mxu1 %v15352_v1 }
0x1a7a   :  { %11616 = vmatpush1.bf16.msra.mxu0 %v12884_v62  ;;  %11648 = vmatpush1.bf16.msra.mxu1 %v12886_v63 }
0x1a7b   :  { %11618 = vmatprep.subr.bf16.mxu0 %v12899_v5  ;;  %11650 = vmatprep.subr.bf16.mxu1 %v12901_v6 }
0x1a7e   :  { %11620 = vmatpush1.bf16.msra.mxu0 %v12925_v14  ;;  %11652 = vmatpush1.bf16.msra.mxu1 %v12927_v15 }
0x1a7f   :  { %11622 = vmatprep.subr.bf16.mxu0 %v12937_v18  ;;  %11654 = vmatprep.subr.bf16.mxu1 %v12939_v19 }
0x1a82   :  { %11624 = vmatpush1.bf16.msra.mxu0 %v12969_v28  ;;  %11656 = vmatpush1.bf16.msra.mxu1 %v12971_v29 }
0x1a83   :  { %11626 = vmatprep.subr.bf16.mxu0 %v12984_v33  ;;  %11658 = vmatprep.subr.bf16.mxu1 %v12986_v34 }
0x1a86   :  { %11628 = vmatpush1.bf16.msra.mxu0 %v13013_v44  ;;  %11660 = vmatpush1.bf16.msra.mxu1 %v13015_v45 }
0x1a87   :  { %11630 = vmatprep.subr.bf16.mxu0 %v13031_v52  ;;  %11662 = vmatprep.subr.bf16.mxu1 %v13033_v55 }
0x1a8a   :  { %11632 = vmatpush1.bf16.msra.mxu0 %v13049_v60  ;;  %11664 = vmatpush1.bf16.msra.mxu1 %v13051_v61 }
0x1a8b   :  { %11634 = vmatprep.subr.bf16.mxu0 %v13067_v8  ;;  %11666 = vmatprep.subr.bf16.mxu1 %v13069_v9 }
0x1a8e   :  { %11636 = vmatpush1.bf16.msra.mxu0 %v13085_v16  ;;  %11668 = vmatpush1.bf16.msra.mxu1 %v13087_v17 }
0x1a8f   :  { %11638 = vmatprep.subr.bf16.mxu0 %v13091_v20  ;;  %11670 = vmatprep.subr.bf16.mxu1 %v13093_v21 }
0x1a92   :  { %11640 = vmatpush1.bf16.msra.mxu0 %v13097_v22  ;;  %11672 = vmatpush1.bf16.msra.mxu1 %v13099_v23 }
0x1a93   :  { %11674 = vmatprep.subr.bf16.mxu0 %v12821_v40  ;;  %11706 = vmatprep.subr.bf16.mxu1 %v12823_v41 }
0x1b48   :  { %v5453_v11 = vpop.f32.mrb[58].mxu0  ;;  %v5524_v24 = vpop.f32.mrb[58].mxu1 }
0x1b49   :  { %v5455_v30 = vpop.f32.mrb[59].mxu0  ;;  %v5526_v12 = vpop.f32.mrb[59].mxu1 }
0x1b4a   :  { %v5533_v25 = vcombine.low %v5453_v11, %v5455_v30  ;;  %v5534_v32 = vcombine.low %v5524_v24, %v5526_v12 }
0x1b4c   :  { %v5541_v27 = vrot.slane %v5533_v25, %v13149_v2  ;;  %v5548_v39 = vrot.slane %v5534_v32, %v13149_v2 }
0x1b4e   :  { %v5549_v43 = vcombine.low %v5541_v27, %v5548_v39  ;;  %v5582_v39 = vld [vmem:[#allocation2 + $0x62] ss:$8 sm:$0xf] }
0x1b50   :  { %v5556_v31 = vrot.slane %v5549_v43, %v13149_v2 }
0x1b52   :  { %v5558_v48 = vadd.f32 %v5556_v31, %v5386_v46 }
0x1b54   :  { %v9492_v42 = vmul.f32 -1.442695, %v5558_v48  ;;  %v5566_v47 = vrot.slane %v5558_v48, 3 }
0x1b56   :  { %12458 = vpow2.f32 %v9492_v42 }
0x1b60   :  { %v12459_v51 = vpop.eup %12458 }
0x1b61   :  { %v5562_v56 = vadd.f32 1.0, %v12459_v51 }
0x1b63   :  { %12460 = vrcp.f32 %v5562_v56 }
0x1b64   :  { %12462 = vtanh.f32 %v5566_v47 }
0x1b6d   :  { %v12461_v58 = vpop.eup %12460 }
0x1b6e   :  { %v5570_v59 = vrot.slane %v12461_v58, 1  ;;  %v12463_v57 = vpop.eup %12462  ;;  %v5576_v36 = vrot.slane %v12461_v58, 2 }
0x1b6f   :  { %v5573_v4 = vmul.f32 %v12463_v57, %v12461_v58 }
0x1b70   :  { %v5572_v7 = vmul.f32 %v5570_v59, %v14186_v35 }
0x1b72   :  { %v14229_v3 = vadd.f32 %v5573_v4, %v5572_v7 }
0x1b74   :  { %12464 = vtanh.f32 %v14229_v3 }
0x1b7e   :  { %v12465_v10 = vpop.eup %12464 }
0x1b7f   :  { %v5578_v37 = vmul.f32 %v12465_v10, %v5576_v36 }
0x1b81   :  { %5579 = vst.msk [vmem:[#allocation3 + $0x1c] sm:$0x1] %vm677_vm2, %v5578_v37  ;;  %5648 = vmatmul.mubr.f32.vlgmr.msra.gmra.mrb[60].mxu0 %v5578_v37  ;;  %5719 = vmatmul.mubr.f32.vlgmr.msra.gmra.mrb[60].mxu1 %v5578_v37 }
0x1b82   :  { %5580 = vst.msk [vmem:[#allocation3 + $0x12] sm:$0x1] %vm679_vm3, %v5578_v37  ;;  %11676 = vmatpush1.bf16.msra.mxu0 %v12843_v49  ;;  %11708 = vmatpush1.bf16.msra.mxu1 %v12845_v50 }
0x1b83   :  { %11678 = vmatprep.subr.bf16.mxu0 %v12855_v53  ;;  %11710 = vmatprep.subr.bf16.mxu1 %v12857_v54 }
0x1b84   :  { %5843 = vmatprep.mubr.f32.mxu0 %v15352_v1  ;;  %5914 = vmatprep.mubr.f32.mxu1 %v15352_v1 }
0x1b86   :  { %11680 = vmatpush1.bf16.msra.mxu0 %v12884_v62  ;;  %11712 = vmatpush1.bf16.msra.mxu1 %v12886_v63 }
0x1b87   :  { %11682 = vmatprep.subr.bf16.mxu0 %v12899_v5  ;;  %11714 = vmatprep.subr.bf16.mxu1 %v12901_v6 }
0x1b8a   :  { %11684 = vmatpush1.bf16.msra.mxu0 %v12925_v14  ;;  %11716 = vmatpush1.bf16.msra.mxu1 %v12927_v15 }
0x1b8b   :  { %11686 = vmatprep.subr.bf16.mxu0 %v12937_v18  ;;  %11718 = vmatprep.subr.bf16.mxu1 %v12939_v19 }
0x1b8e   :  { %11688 = vmatpush1.bf16.msra.mxu0 %v12969_v28  ;;  %11720 = vmatpush1.bf16.msra.mxu1 %v12971_v29 }
0x1b8f   :  { %11690 = vmatprep.subr.bf16.mxu0 %v12984_v33  ;;  %11722 = vmatprep.subr.bf16.mxu1 %v12986_v34 }
0x1b92   :  { %11692 = vmatpush1.bf16.msra.mxu0 %v13013_v44  ;;  %11724 = vmatpush1.bf16.msra.mxu1 %v13015_v45 }
0x1b93   :  { %11694 = vmatprep.subr.bf16.mxu0 %v13031_v52  ;;  %11726 = vmatprep.subr.bf16.mxu1 %v13033_v55 }
0x1b96   :  { %11696 = vmatpush1.bf16.msra.mxu0 %v13049_v60  ;;  %11728 = vmatpush1.bf16.msra.mxu1 %v13051_v61 }
0x1b97   :  { %11698 = vmatprep.subr.bf16.mxu0 %v13067_v8  ;;  %11730 = vmatprep.subr.bf16.mxu1 %v13069_v9 }
0x1b9a   :  { %11700 = vmatpush1.bf16.msra.mxu0 %v13085_v16  ;;  %11732 = vmatpush1.bf16.msra.mxu1 %v13087_v17 }
0x1b9b   :  { %11702 = vmatprep.subr.bf16.mxu0 %v13091_v20  ;;  %11734 = vmatprep.subr.bf16.mxu1 %v13093_v21 }
0x1b9e   :  { %11704 = vmatpush1.bf16.msra.mxu0 %v13097_v22  ;;  %11736 = vmatpush1.bf16.msra.mxu1 %v13099_v23 }
0x1b9f   :  { %11738 = vmatprep.subr.bf16.mxu0 %v12821_v40  ;;  %11770 = vmatprep.subr.bf16.mxu1 %v12823_v41 }
0x1c54   :  { %v5649_v35 = vpop.f32.mrb[60].mxu0  ;;  %v5720_v38 = vpop.f32.mrb[60].mxu1 }
0x1c55   :  { %v5651_v13 = vpop.f32.mrb[61].mxu0  ;;  %v5722_v11 = vpop.f32.mrb[61].mxu1 }
0x1c56   :  { %v5729_v24 = vcombine.low %v5649_v35, %v5651_v13  ;;  %v5730_v30 = vcombine.low %v5720_v38, %v5722_v11 }
0x1c58   :  { %v5737_v12 = vrot.slane %v5729_v24, %v13149_v2  ;;  %v5744_v25 = vrot.slane %v5730_v30, %v13149_v2 }
0x1c5a   :  { %v5745_v32 = vcombine.low %v5737_v12, %v5744_v25  ;;  %v5778_v25 = vld [vmem:[#allocation2 + $0x63] ss:$8 sm:$0xf] }
0x1c5c   :  { %v5752_v27 = vrot.slane %v5745_v32, %v13149_v2 }
0x1c5e   :  { %v5754_v43 = vadd.f32 %v5752_v27, %v5582_v39 }
0x1c60   :  { %v9493_v31 = vmul.f32 -1.442695, %v5754_v43  ;;  %v5762_v42 = vrot.slane %v5754_v43, 3 }
0x1c62   :  { %12466 = vpow2.f32 %v9493_v31 }
0x1c6c   :  { %v12467_v46 = vpop.eup %12466 }
0x1c6d   :  { %v5758_v48 = vadd.f32 1.0, %v12467_v46 }
0x1c6f   :  { %12468 = vrcp.f32 %v5758_v48 }
0x1c70   :  { %12470 = vtanh.f32 %v5762_v42 }
0x1c79   :  { %v12469_v51 = vpop.eup %12468 }
0x1c7a   :  { %v5766_v56 = vrot.slane %v12469_v51, 1  ;;  %v12471_v47 = vpop.eup %12470  ;;  %v5772_v4 = vrot.slane %v12469_v51, 2 }
0x1c7b   :  { %v5769_v58 = vmul.f32 %v12471_v47, %v12469_v51 }
0x1c7c   :  { %v5768_v59 = vmul.f32 %v5766_v56, %v14229_v3 }
0x1c7e   :  { %v14272_v57 = vadd.f32 %v5769_v58, %v5768_v59 }
0x1c80   :  { %12472 = vtanh.f32 %v14272_v57 }
0x1c8a   :  { %v12473_v7 = vpop.eup %12472 }
0x1c8b   :  { %v5774_v36 = vmul.f32 %v12473_v7, %v5772_v4 }
0x1c8d   :  { %5775 = vst.msk [vmem:[#allocation3 + $0xd] sm:$0x1] %vm677_vm2, %v5774_v36  ;;  %5844 = vmatmul.mubr.f32.vlgmr.msra.gmra.mrb[62].mxu0 %v5774_v36  ;;  %5915 = vmatmul.mubr.f32.vlgmr.msra.gmra.mrb[62].mxu1 %v5774_v36 }
0x1c8e   :  { %5776 = vst.msk [vmem:[#allocation3 + $0x2] sm:$0x1] %vm679_vm3, %v5774_v36  ;;  %11740 = vmatpush1.bf16.msra.mxu0 %v12843_v49  ;;  %11772 = vmatpush1.bf16.msra.mxu1 %v12845_v50 }
0x1c8f   :  { %11742 = vmatprep.subr.bf16.mxu0 %v12855_v53  ;;  %11774 = vmatprep.subr.bf16.mxu1 %v12857_v54 }
0x1c90   :  { %6039 = vmatprep.mubr.f32.mxu0 %v15352_v1  ;;  %6110 = vmatprep.mubr.f32.mxu1 %v15352_v1 }
0x1c92   :  { %11744 = vmatpush1.bf16.msra.mxu0 %v12884_v62  ;;  %11776 = vmatpush1.bf16.msra.mxu1 %v12886_v63 }
0x1c93   :  { %11746 = vmatprep.subr.bf16.mxu0 %v12899_v5  ;;  %11778 = vmatprep.subr.bf16.mxu1 %v12901_v6 }
0x1c96   :  { %11748 = vmatpush1.bf16.msra.mxu0 %v12925_v14  ;;  %11780 = vmatpush1.bf16.msra.mxu1 %v12927_v15 }
0x1c97   :  { %11750 = vmatprep.subr.bf16.mxu0 %v12937_v18  ;;  %11782 = vmatprep.subr.bf16.mxu1 %v12939_v19 }
0x1c9a   :  { %11752 = vmatpush1.bf16.msra.mxu0 %v12969_v28  ;;  %11784 = vmatpush1.bf16.msra.mxu1 %v12971_v29 }
0x1c9b   :  { %11754 = vmatprep.subr.bf16.mxu0 %v12984_v33  ;;  %11786 = vmatprep.subr.bf16.mxu1 %v12986_v34 }
0x1c9e   :  { %11756 = vmatpush1.bf16.msra.mxu0 %v13013_v44  ;;  %11788 = vmatpush1.bf16.msra.mxu1 %v13015_v45 }
0x1c9f   :  { %11758 = vmatprep.subr.bf16.mxu0 %v13031_v52  ;;  %11790 = vmatprep.subr.bf16.mxu1 %v13033_v55 }
0x1ca2   :  { %11760 = vmatpush1.bf16.msra.mxu0 %v13049_v60  ;;  %11792 = vmatpush1.bf16.msra.mxu1 %v13051_v61 }
0x1ca3   :  { %11762 = vmatprep.subr.bf16.mxu0 %v13067_v8  ;;  %11794 = vmatprep.subr.bf16.mxu1 %v13069_v9 }
0x1ca6   :  { %11764 = vmatpush1.bf16.msra.mxu0 %v13085_v16  ;;  %11796 = vmatpush1.bf16.msra.mxu1 %v13087_v17 }
0x1ca7   :  { %11766 = vmatprep.subr.bf16.mxu0 %v13091_v20  ;;  %11798 = vmatprep.subr.bf16.mxu1 %v13093_v21 }
0x1caa   :  { %11768 = vmatpush1.bf16.msra.mxu0 %v13097_v22  ;;  %11800 = vmatpush1.bf16.msra.mxu1 %v13099_v23 }
0x1cab   :  { %11802 = vmatprep.subr.bf16.mxu0 %v12821_v40  ;;  %11834 = vmatprep.subr.bf16.mxu1 %v12823_v41 }
0x1d60   :  { %v5845_v3 = vpop.f32.mrb[62].mxu0  ;;  %v5916_v10 = vpop.f32.mrb[62].mxu1 }
0x1d61   :  { %v5847_v37 = vpop.f32.mrb[63].mxu0  ;;  %v5918_v35 = vpop.f32.mrb[63].mxu1 }
0x1d62   :  { %v5925_v38 = vcombine.low %v5845_v3, %v5847_v37  ;;  %v5926_v13 = vcombine.low %v5916_v10, %v5918_v35 }
0x1d64   :  { %v5933_v11 = vrot.slane %v5925_v38, %v13149_v2  ;;  %v5940_v24 = vrot.slane %v5926_v13, %v13149_v2 }
0x1d66   :  { %v5941_v30 = vcombine.low %v5933_v11, %v5940_v24  ;;  %v5974_v24 = vld [vmem:[#allocation2 + $0x64] ss:$8 sm:$0xf] }
0x1d68   :  { %v5948_v12 = vrot.slane %v5941_v30, %v13149_v2 }
0x1d6a   :  { %v5950_v32 = vadd.f32 %v5948_v12, %v5778_v25 }
0x1d6c   :  { %v9494_v27 = vmul.f32 -1.442695, %v5950_v32  ;;  %v5958_v31 = vrot.slane %v5950_v32, 3 }
0x1d6e   :  { %12474 = vpow2.f32 %v9494_v27 }
0x1d78   :  { %v12475_v39 = vpop.eup %12474 }
0x1d79   :  { %v5954_v43 = vadd.f32 1.0, %v12475_v39 }
0x1d7b   :  { %12476 = vrcp.f32 %v5954_v43 }
0x1d7c   :  { %12478 = vtanh.f32 %v5958_v31 }
0x1d85   :  { %v12477_v46 = vpop.eup %12476 }
0x1d86   :  { %v5962_v48 = vrot.slane %v12477_v46, 1  ;;  %v12479_v42 = vpop.eup %12478  ;;  %v5968_v58 = vrot.slane %v12477_v46, 2 }
0x1d87   :  { %v5965_v51 = vmul.f32 %v12479_v42, %v12477_v46 }
0x1d88   :  { %v5964_v56 = vmul.f32 %v5962_v48, %v14272_v57 }
0x1d8a   :  { %v14315_v47 = vadd.f32 %v5965_v51, %v5964_v56  ;;  %v12225_v56 = vld [vmem:[%s15340_s4 + $0x20] ss:$12 sps:$4 sm:$0xff]  }
0x1d8c   :  { %12480 = vtanh.f32 %v14315_v47 }
0x1d96   :  { %v12481_v59 = vpop.eup %12480 }
0x1d97   :  { %v5970_v4 = vmul.f32 %v12481_v59, %v5968_v58  ;;  %v12226_v58 = vld [vmem:[%s15340_s4 + $0x30] ss:$12 sps:$4 sm:$0xff]   ;;  %v12229_v59 = vld [vmem:[%s15340_s4 + $0x38] ss:$12 sps:$4 sm:$0xff]  }
0x1d99   :  { %5971 = vst.msk [vmem:[#allocation3 + $0x1d] sm:$0x1] %vm677_vm2, %v5970_v4  ;;  %6040 = vmatmul.mubr.f32.vlgmr.msra.gmra.mrb[64].mxu0 %v5970_v4  ;;  %6111 = vmatmul.mubr.f32.vlgmr.msra.gmra.mrb[64].mxu1 %v5970_v4 }
0x1d9a   :  { %5972 = vst.msk [vmem:[#allocation3 + $0x11] sm:$0x1] %vm679_vm3, %v5970_v4  ;;  %11804 = vmatpush1.bf16.msra.mxu0 %v12843_v49  ;;  %11836 = vmatpush1.bf16.msra.mxu1 %v12845_v50  ;;  %v12232_v4 = vld [vmem:[%s15340_s4 + $0x4c] ss:$12 sps:$4 sm:$0xff]  }
0x1d9b   :  { %11806 = vmatprep.subr.bf16.mxu0 %v12855_v53  ;;  %11838 = vmatprep.subr.bf16.mxu1 %v12857_v54 }
0x1d9c   :  { %6235 = vmatprep.mubr.f32.mxu0 %v15352_v1  ;;  %6306 = vmatprep.mubr.f32.mxu1 %v15352_v1 }
0x1d9e   :  { %11808 = vmatpush1.bf16.msra.mxu0 %v12884_v62  ;;  %11840 = vmatpush1.bf16.msra.mxu1 %v12886_v63 }
0x1d9f   :  { %11810 = vmatprep.subr.bf16.mxu0 %v12899_v5  ;;  %11842 = vmatprep.subr.bf16.mxu1 %v12901_v6 }
0x1da2   :  { %11812 = vmatpush1.bf16.msra.mxu0 %v12925_v14  ;;  %11844 = vmatpush1.bf16.msra.mxu1 %v12927_v15 }
0x1da3   :  { %11814 = vmatprep.subr.bf16.mxu0 %v12937_v18  ;;  %11846 = vmatprep.subr.bf16.mxu1 %v12939_v19 }
0x1da6   :  { %11816 = vmatpush1.bf16.msra.mxu0 %v12969_v28  ;;  %11848 = vmatpush1.bf16.msra.mxu1 %v12971_v29 }
0x1da7   :  { %11818 = vmatprep.subr.bf16.mxu0 %v12984_v33  ;;  %11850 = vmatprep.subr.bf16.mxu1 %v12986_v34 }
0x1daa   :  { %11820 = vmatpush1.bf16.msra.mxu0 %v13013_v44  ;;  %11852 = vmatpush1.bf16.msra.mxu1 %v13015_v45 }
0x1dab   :  { %11822 = vmatprep.subr.bf16.mxu0 %v13031_v52  ;;  %11854 = vmatprep.subr.bf16.mxu1 %v13033_v55 }
0x1dae   :  { %11824 = vmatpush1.bf16.msra.mxu0 %v13049_v60  ;;  %11856 = vmatpush1.bf16.msra.mxu1 %v13051_v61 }
0x1daf   :  { %11826 = vmatprep.subr.bf16.mxu0 %v13067_v8  ;;  %11858 = vmatprep.subr.bf16.mxu1 %v13069_v9 }
0x1db2   :  { %11828 = vmatpush1.bf16.msra.mxu0 %v13085_v16  ;;  %11860 = vmatpush1.bf16.msra.mxu1 %v13087_v17 }
0x1db3   :  { %11830 = vmatprep.subr.bf16.mxu0 %v13091_v20  ;;  %11862 = vmatprep.subr.bf16.mxu1 %v13093_v21 }
0x1db6   :  { %11832 = vmatpush1.bf16.msra.mxu0 %v13097_v22  ;;  %11864 = vmatpush1.bf16.msra.mxu1 %v13099_v23 }
0x1db7   :  { %11866 = vmatprep.subr.bf16.mxu0 %v12821_v40  ;;  %11898 = vmatprep.subr.bf16.mxu1 %v12823_v41 }
0x1e6c   :  { %v6041_v57 = vpop.f32.mrb[64].mxu0  ;;  %v6112_v7 = vpop.f32.mrb[64].mxu1 }
0x1e6d   :  { %v6043_v36 = vpop.f32.mrb[65].mxu0  ;;  %v6114_v3 = vpop.f32.mrb[65].mxu1 }
0x1e6e   :  { %v6121_v10 = vcombine.low %v6041_v57, %v6043_v36  ;;  %v6122_v37 = vcombine.low %v6112_v7, %v6114_v3  ;;  %v12230_v57 = vld [vmem:[%s15340_s4 + $0x48] ss:$12 sps:$4 sm:$0xff]   ;;  %v12233_v7 = vld [vmem:[%s15340_s4 + $0x50] ss:$12 sps:$4 sm:$0xff]   ;;  %v12234_v3 = vld [vmem:[%s15340_s4 + $0x60] ss:$12 sps:$4 sm:$0xff]  }
0x1e6f   :  { %v12236_v36 = vld [vmem:[%s15340_s4 + $0x64] ss:$12 sps:$4 sm:$0xff]  }
0x1e70   :  { %v6129_v35 = vrot.slane %v6121_v10, %v13149_v2  ;;  %v6136_v38 = vrot.slane %v6122_v37, %v13149_v2  ;;  %v12237_v10 = vld [vmem:[%s15340_s4 + $0x68] ss:$12 sps:$4 sm:$0xff]  }
0x1e71   :  { %v12240_v37 = vld [vmem:[%s15340_s4 + $0x7c] ss:$12 sps:$4 sm:$0xff]  }
0x1e72   :  { %v6137_v13 = vcombine.low %v6129_v35, %v6136_v38  ;;  %v12241_v35 = vld [vmem:[%s15340_s4 + $0x80] ss:$12 sps:$4 sm:$0xff]   ;;  %v12238_v38 = vld [vmem:[%s15340_s4 + $0x78] ss:$12 sps:$4 sm:$0xff]  }
0x1e74   :  { %v6144_v11 = vrot.slane %v6137_v13, %v13149_v2  ;;  %v12244_v13 = vld [vmem:[%s15340_s4 + $0x94] ss:$12 sps:$4 sm:$0xff]  }
0x1e76   :  { %v6146_v30 = vadd.f32 %v6144_v11, %v5974_v24  ;;  %v12245_v11 = vld [vmem:[%s15340_s4 + $0x98] ss:$12 sps:$4 sm:$0xff]   ;;  %v12242_v24 = vld [vmem:[%s15340_s4 + $0x90] ss:$12 sps:$4 sm:$0xff]  }
0x1e78   :  { %v9495_v12 = vmul.f32 -1.442695, %v6146_v30  ;;  %v6154_v41 = vrot.slane %v6146_v30, 3  ;;  %v12248_v30 = vld [vmem:[%s15340_s4 + $0xac] ss:$12 sps:$4 sm:$0xff]  }
0x1e7a   :  { %12482 = vpow2.f32 %v9495_v12  ;;  %v12249_v12 = vld [vmem:[%s15340_s4 + $0xb0] ss:$12 sps:$4 sm:$0xff]  }
0x1e84   :  { %v12483_v40 = vpop.eup %12482 }
0x1e85   :  { %v6150_v25 = vadd.f32 1.0, %v12483_v40  ;;  %v12246_v40 = vld [vmem:[%s15340_s4 + $0xa8] ss:$12 sps:$4 sm:$0xff]  }
0x1e87   :  { %12484 = vrcp.f32 %v6150_v25 }
0x1e88   :  { %12486 = vtanh.f32 %v6154_v41 }
0x1e91   :  { %v12485_v32 = vpop.eup %12484 }
0x1e92   :  { %v6158_v27 = vrot.slane %v12485_v32, 1  ;;  %v12487_v39 = vpop.eup %12486  ;;  %v6164_v48 = vrot.slane %v12485_v32, 2 }
0x1e93   :  { %v6161_v43 = vmul.f32 %v12487_v39, %v12485_v32 }
0x1e94   :  { %v6160_v31 = vmul.f32 %v6158_v27, %v14315_v47  ;;  %v12228_v47 = vld [vmem:[%s15340_s4 + $0x34] ss:$12 sps:$4 sm:$0xff]  }
0x1e96   :  { %v14358_v46 = vadd.f32 %v6161_v43, %v6160_v31 }
0x1e98   :  { %12488 = vtanh.f32 %v14358_v46 }
0x1ea2   :  { %v12489_v42 = vpop.eup %12488 }
0x1ea3   :  { %v6166_v51 = vmul.f32 %v12489_v42, %v6164_v48 }
0x1ea5   :  { %6167 = vst.msk [vmem:[#allocation3 + $0xe] sm:$0x1] %vm677_vm2, %v6166_v51  ;;  %6236 = vmatmul.mubr.f32.vlgmr.msra.gmra.mrb[66].mxu0 %v6166_v51  ;;  %6307 = vmatmul.mubr.f32.vlgmr.msra.gmra.mrb[66].mxu1 %v6166_v51 }
0x1ea6   :  { %6168 = vst.msk [vmem:[#allocation3 + $0x1] sm:$0x1] %vm679_vm3, %v6166_v51  ;;  %11868 = vmatpush1.bf16.msra.mxu0 %v12843_v49  ;;  %11900 = vmatpush1.bf16.msra.mxu1 %v12845_v50  ;;  %v6366_v51 = vld [vmem:[#allocation2 + $0x66] ss:$8 sm:$0xf] }
0x1ea7   :  { %11870 = vmatprep.subr.bf16.mxu0 %v12855_v53  ;;  %11902 = vmatprep.subr.bf16.mxu1 %v12857_v54 }
0x1ea8   :  { %6431 = vmatprep.mubr.f32.mxu0 %v15352_v1  ;;  %6502 = vmatprep.mubr.f32.mxu1 %v15352_v1 }
0x1eaa   :  { %11872 = vmatpush1.bf16.msra.mxu0 %v12884_v62  ;;  %11904 = vmatpush1.bf16.msra.mxu1 %v12886_v63 }
0x1eab   :  { %11874 = vmatprep.subr.bf16.mxu0 %v12899_v5  ;;  %11906 = vmatprep.subr.bf16.mxu1 %v12901_v6 }
0x1eae   :  { %11876 = vmatpush1.bf16.msra.mxu0 %v12925_v14  ;;  %11908 = vmatpush1.bf16.msra.mxu1 %v12927_v15 }
0x1eaf   :  { %11878 = vmatprep.subr.bf16.mxu0 %v12937_v18  ;;  %11910 = vmatprep.subr.bf16.mxu1 %v12939_v19  ;;  %v6170_v18 = vld [vmem:[#allocation2 + $0x65] ss:$8 sm:$0xf] }
0x1eb2   :  { %11880 = vmatpush1.bf16.msra.mxu0 %v12969_v28  ;;  %11912 = vmatpush1.bf16.msra.mxu1 %v12971_v29 }
0x1eb3   :  { %11882 = vmatprep.subr.bf16.mxu0 %v12984_v33  ;;  %11914 = vmatprep.subr.bf16.mxu1 %v12986_v34 }
0x1eb6   :  { %11884 = vmatpush1.bf16.msra.mxu0 %v13013_v44  ;;  %11916 = vmatpush1.bf16.msra.mxu1 %v13015_v45 }
0x1eb7   :  { %11886 = vmatprep.subr.bf16.mxu0 %v13031_v52  ;;  %11918 = vmatprep.subr.bf16.mxu1 %v13033_v55 }
0x1eba   :  { %11888 = vmatpush1.bf16.msra.mxu0 %v13049_v60  ;;  %11920 = vmatpush1.bf16.msra.mxu1 %v13051_v61 }
0x1ebb   :  { %11890 = vmatprep.subr.bf16.mxu0 %v13067_v8  ;;  %11922 = vmatprep.subr.bf16.mxu1 %v13069_v9 }
0x1ebe   :  { %11892 = vmatpush1.bf16.msra.mxu0 %v13085_v16  ;;  %11924 = vmatpush1.bf16.msra.mxu1 %v13087_v17  ;;  %v12220_v17 = vld [vmem:[%s15340_s4 + $0x4] ss:$12 sps:$4 sm:$0xff]  }
0x1ebf   :  { %11894 = vmatprep.subr.bf16.mxu0 %v13091_v20  ;;  %11926 = vmatprep.subr.bf16.mxu1 %v13093_v21  ;;  %v12218_v20 = vld [vmem:[%s15340_s4] ss:$12 sps:$4 sm:$0xff]   ;;  %v12221_v21 = vld [vmem:[%s15340_s4 + $0x8] ss:$12 sps:$4 sm:$0xff]  }
0x1ec2   :  { %11896 = vmatpush1.bf16.msra.mxu0 %v13097_v22  ;;  %11928 = vmatpush1.bf16.msra.mxu1 %v13099_v23  ;;  %v12224_v22 = vld [vmem:[%s15340_s4 + $0x1c] ss:$12 sps:$4 sm:$0xff]   ;;  %v12222_v23 = vld [vmem:[%s15340_s4 + $0x18] ss:$12 sps:$4 sm:$0xff]   ;;  %s12622_s4 = smov 96  }
0x1ec3   :  { %6727 = vmatprep.subr.bf16.mxu0 %v12220_v17  ;;  %9829 = vmatprep.subr.bf16.mxu1 %v12221_v21 }
0x1f78   :  { %v6237_v49 = vpop.f32.mrb[66].mxu0  ;;  %v6308_v50 = vpop.f32.mrb[66].mxu1 }
0x1f79   :  { %v6239_v53 = vpop.f32.mrb[67].mxu0  ;;  %v6310_v54 = vpop.f32.mrb[67].mxu1 }
0x1f7a   :  { %v6317_v62 = vcombine.low %v6237_v49, %v6239_v53  ;;  %v6318_v63 = vcombine.low %v6308_v50, %v6310_v54 }
0x1f7c   :  { %v6325_v5 = vrot.slane %v6317_v62, %v13149_v2  ;;  %v6332_v6 = vrot.slane %v6318_v63, %v13149_v2 }
0x1f7e   :  { %v6333_v14 = vcombine.low %v6325_v5, %v6332_v6 }
0x1f80   :  { %v6340_v15 = vrot.slane %v6333_v14, %v13149_v2 }
0x1f82   :  { %v6342_v19 = vadd.f32 %v6340_v15, %v6170_v18 }
0x1f84   :  { %v9496_v28 = vmul.f32 -1.442695, %v6342_v19  ;;  %v6350_v34 = vrot.slane %v6342_v19, 3 }
0x1f86   :  { %12490 = vpow2.f32 %v9496_v28 }
0x1f90   :  { %v12491_v29 = vpop.eup %12490 }
0x1f91   :  { %v6346_v33 = vadd.f32 1.0, %v12491_v29 }
0x1f93   :  { %12492 = vrcp.f32 %v6346_v33 }
0x1f94   :  { %12494 = vtanh.f32 %v6350_v34 }
0x1f9d   :  { %v12493_v44 = vpop.eup %12492 }
0x1f9e   :  { %v6354_v45 = vrot.slane %v12493_v44, 1  ;;  %v12495_v52 = vpop.eup %12494  ;;  %v6360_v8 = vrot.slane %v12493_v44, 2 }
0x1f9f   :  { %v6357_v55 = vmul.f32 %v12495_v52, %v12493_v44 }
0x1fa0   :  { %v6356_v60 = vmul.f32 %v6354_v45, %v14358_v46 }
0x1fa2   :  { %v14399_v61 = vadd.f32 %v6357_v55, %v6356_v60 }
0x1fa4   :  { %12496 = vtanh.f32 %v14399_v61 }
0x1fae   :  { %v12497_v9 = vpop.eup %12496 }
0x1faf   :  { %v6362_v16 = vmul.f32 %v12497_v9, %v6360_v8 }
0x1fb1   :  { %6363 = vst.msk [vmem:[#allocation3 + $0x1e] sm:$0x1] %vm677_vm2, %v6362_v16  ;;  %6432 = vmatmul.mubr.f32.vlgmr.msra.gmra.mrb[68].mxu0 %v6362_v16  ;;  %6503 = vmatmul.mubr.f32.vlgmr.msra.gmra.mrb[68].mxu1 %v6362_v16 }
0x1fb2   :  { %6364 = vst.msk [vmem:[#allocation3 + $0x10] sm:$0x1] %vm679_vm3, %v6362_v16  ;;  %6759 = vmatprep.mubr.bf16.mxu0 %v12612_v0  ;;  %6728 = vmatpush1.bf16.msra.mxu0 %v12218_v20 }
0x1fb3   :  { %9830 = vmatpush3.bf16.msra.mxu1 %v12221_v21  ;;  %6729 = vmatprep.subr.bf16.mxu0 %v12224_v22 }
0x1fb4   :  { %9831 = vmatprep.subr.bf16.mxu1 %v12225_v56 }
0x1fb6   :  { %6730 = vmatpush1.bf16.msra.mxu0 %v12222_v23 }
0x1fb7   :  { %9832 = vmatpush3.bf16.msra.mxu1 %v12225_v56  ;;  %6731 = vmatprep.subr.bf16.mxu0 %v12228_v47 }
0x1fb8   :  { %9833 = vmatprep.subr.bf16.mxu1 %v12229_v59  ;;  %v14485_v33 = vld [vmem:[#allocation3 + $0x18] sm:$0xff] }
0x1fb9   :  { %v14483_v29 = vld [vmem:[#allocation3 + $0x10] sm:$0xff] }
0x1fba   :  { %6732 = vmatpush1.bf16.msra.mxu0 %v12226_v58  ;;  %v6566_v52 = vpack.c.bf16 %v14485_v33, %v14483_v29 }
0x1fbb   :  { %9834 = vmatpush3.bf16.msra.mxu1 %v12229_v59  ;;  %6733 = vmatprep.subr.bf16.mxu0 %v12232_v4 }
0x1fbc   :  { %9835 = vmatprep.subr.bf16.mxu1 %v12233_v7 }
0x1fbe   :  { %6734 = vmatpush1.bf16.msra.mxu0 %v12230_v57 }
0x1fbf   :  { %9836 = vmatpush3.bf16.msra.mxu1 %v12233_v7  ;;  %6735 = vmatprep.subr.bf16.mxu0 %v12236_v36 }
0x1fc0   :  { %9837 = vmatprep.subr.bf16.mxu1 %v12237_v10 }
0x1fc2   :  { %6736 = vmatpush1.bf16.msra.mxu0 %v12234_v3 }
0x1fc3   :  { %9838 = vmatpush3.bf16.msra.mxu1 %v12237_v10  ;;  %6737 = vmatprep.subr.bf16.mxu0 %v12240_v37 }
0x1fc4   :  { %9839 = vmatprep.subr.bf16.mxu1 %v12241_v35 }
0x1fc6   :  { %6738 = vmatpush1.bf16.msra.mxu0 %v12238_v38 }
0x1fc7   :  { %9840 = vmatpush3.bf16.msra.mxu1 %v12241_v35  ;;  %6739 = vmatprep.subr.bf16.mxu0 %v12244_v13 }
0x1fc8   :  { %9841 = vmatprep.subr.bf16.mxu1 %v12245_v11 }
0x1fca   :  { %6740 = vmatpush1.bf16.msra.mxu0 %v12242_v24 }
0x1fcb   :  { %9842 = vmatpush3.bf16.msra.mxu1 %v12245_v11  ;;  %6741 = vmatprep.subr.bf16.mxu0 %v12248_v30  ;;  %v14541_v11 = vld [vmem:[%s15342_s6] ss:$0 sm:$0xff] }
0x1fcc   :  { %9843 = vmatprep.subr.bf16.mxu1 %v12249_v12 }
0x1fce   :  { %6742 = vmatpush1.bf16.msra.mxu0 %v12246_v40 }
0x1fcf   :  { %9844 = vmatpush3.bf16.msra.mxu1 %v12249_v12 }
0x2084   :  { %v6433_v25 = vpop.f32.mrb[68].mxu0  ;;  %v6504_v41 = vpop.f32.mrb[68].mxu1 }
0x2085   :  { %v6435_v32 = vpop.f32.mrb[69].mxu0  ;;  %v6506_v27 = vpop.f32.mrb[69].mxu1 }
0x2086   :  { %v6513_v39 = vcombine.low %v6433_v25, %v6435_v32  ;;  %v6514_v43 = vcombine.low %v6504_v41, %v6506_v27 }
0x2088   :  { %v6521_v31 = vrot.slane %v6513_v39, %v13149_v2  ;;  %v6528_v46 = vrot.slane %v6514_v43, %v13149_v2 }
0x208a   :  { %v6529_v48 = vcombine.low %v6521_v31, %v6528_v46 }
0x208c   :  { %v6536_v42 = vrot.slane %v6529_v48, %v13149_v2 }
0x208e   :  { %v6538_v49 = vadd.f32 %v6536_v42, %v6366_v51 }
0x2090   :  { %v9497_v50 = vmul.f32 -1.442695, %v6538_v49  ;;  %v6546_v62 = vrot.slane %v6538_v49, 3 }
0x2092   :  { %12498 = vpow2.f32 %v9497_v50 }
0x209c   :  { %v12499_v53 = vpop.eup %12498 }
0x209d   :  { %v6542_v54 = vadd.f32 1.0, %v12499_v53 }
0x209f   :  { %12500 = vrcp.f32 %v6542_v54 }
0x20a0   :  { %12502 = vtanh.f32 %v6546_v62 }
0x20a9   :  { %v12501_v63 = vpop.eup %12500 }
0x20aa   :  { %v6550_v5 = vrot.slane %v12501_v63, 1  ;;  %v12503_v6 = vpop.eup %12502  ;;  %v6556_v19 = vrot.slane %v12501_v63, 2 }
0x20ab   :  { %v6553_v15 = vmul.f32 %v12503_v6, %v12501_v63 }
0x20ac   :  { %v6552_v14 = vmul.f32 %v6550_v5, %v14399_v61 }
0x20ae   :  { %v6554_v18 = vadd.f32 %v6553_v15, %v6552_v14 }
0x20b0   :  { %12504 = vtanh.f32 %v6554_v18 }
0x20ba   :  { %v12505_v28 = vpop.eup %12504 }
0x20bb   :  { %v6558_v2 = vmul.f32 %v12505_v28, %v6556_v19 }
0x20bd   :  { %6559 = vst.msk [vmem:[#allocation3 + $0xf] sm:$0x1] %vm677_vm2, %v6558_v2 }
0x20be   :  { %6560 = vst.msk [vmem:[#allocation3] sm:$0x1] %vm679_vm3, %v6558_v2 }
0x20c4   :  { %v14489_v44 = vld [vmem:[#allocation3 + $0x8] sm:$0xff] }
0x20c5   :  { %v14487_v34 = vld [vmem:[#allocation3] sm:$0xff] }
0x20c6   :  { %v6565_v45 = vpack.c.bf16 %v14489_v44, %v14487_v34 }
0x20c8   :  { %6760 = vmatmul.mubr.bf16.vlgmr.msra.gmra.mrb[72].mxu0 %v6565_v45  ;;  %9845 = vmatprep.mubr.bf16.mxu1 %v6565_v45 }
0x20c9   :  { %9846 = vmatmul.mubr.bf16.vlgmr.msra.gmra.mrb[72].mxu1 %v6566_v52  ;;  %6769 = vmatprep.mubr.bf16.mxu0 %v12612_v0 }
0x20d0   :  { %6770 = vmatmul.mubr.bf16.gmra.mrb[76].mxu0 %v6566_v52 }
0x219b   :  { %v6761_v55 = vpop.f32.mrb[72].mxu0 }
0x219c   :  { %v6763_v60 = vpop.f32.mrb[73].mxu0  ;;  %v9847_v61 = vpop.f32.mrb[72].mxu1 }
0x219d   :  { %v6765_v8 = vpop.f32.mrb[74].mxu0  ;;  %v6814_v9 = vpop.f32.mrb[73].mxu1 }
0x219e   :  { %v14496_v16 = vpack.c.bf16 %v6765_v8, %v6761_v55  ;;  %v6767_v17 = vpop.f32.mrb[75].mxu0  ;;  %v9848_v20 = vpop.f32.mrb[74].mxu1 }
0x219f   :  { %v14498_v21 = vpack.c.bf16 %v6767_v17, %v6763_v60  ;;  %v14500_v22 = vpack.c.bf16 %v9848_v20, %v9847_v61  ;;  %v6817_v23 = vpop.f32.mrb[75].mxu1 }
0x21a0   :  { %v14502_v56 = vpack.c.bf16 %v6817_v23, %v6814_v9  ;;  %7084 = vrot.lane.b32.xlu1 %v14496_v16, %s12622_s4  ;;  %9853 = vmatprep.mubr.msk.bf16.mxu0 %vm6842_vm4, %v14496_v16 }
0x21a1   :  { %7090 = vrot.lane.b32.xlu0 %v14498_v21, %s12622_s4  ;;  %12153 = vmatprep.subr.msk.bf16.mxu0 %vm6842_vm4, %v14498_v21  ;;  %v6850_v0 = vsel %vm6842_vm4, %v14498_v21, 0 }
0x21a2   :  { %9850 = vmatpush3.bf16.xpose.msra.mxu0 %v6850_v0  ;;  %9857 = vmatprep.subr.bf16.mxu1 %v14502_v56 }
0x21a3   :  { %v6771_v47 = vpop.f32.mrb[76].mxu0  ;;  %9858 = vmatpush3.bf16.msra.mxu1 %v14502_v56 }
0x21a4   :  { %v6773_v58 = vpop.f32.mrb[77].mxu0  ;;  %9859 = vmatprep.subr.bf16.mxu1 %v14500_v22 }
0x21a5   :  { %v6775_v59 = vpop.f32.mrb[78].mxu0 }
0x21a6   :  { %v14517_v4 = vpack.c.bf16 %v6775_v59, %v6771_v47  ;;  %v6777_v57 = vpop.f32.mrb[79].mxu0 }
0x21a7   :  { %v14519_v7 = vpack.c.bf16 %v6777_v57, %v6773_v58  ;;  %9860 = vmatpush3.bf16.msra.mxu1 %v14500_v22 }
0x21a8   :  { %7086 = vrot.lane.b32.xlu1 %v14517_v4, %s12622_s4 }
0x21a9   :  { %7092 = vrot.lane.b32.xlu0 %v14519_v7, %s12622_s4  ;;  %12154 = vmatprep.subr.msk.bf16.mxu0 %vm6842_vm4, %v14519_v7  ;;  %v6853_v36 = vsel %vm6842_vm4, %v14519_v7, 0 }
0x21aa   :  { %9852 = vmatpush3.bf16.xpose.msra.mxu0 %v6853_v36 }
0x21b1   :  { %9854 = vmatmul.mubr.msk.bf16.vlgmr.msra.gmra.mrb[80].mxu0 %vm6842_vm4, %v14517_v4 }
0x2212   :  { %v7085_v3 = vpop.permute.xlu1 %7084 }
0x2213   :  { %v7091_v10 = vpop.permute.xlu0 %7090  ;;  %9877 = vmatprep.mubr.msk.bf16.mxu0 %vm6842_vm4, %v7085_v3 }
0x2214   :  { %v7101_v37 = vsel %vm6842_vm4, %v7091_v10, 0  ;;  %12155 = vmatprep.subr.msk.bf16.mxu0 %vm6842_vm4, %v7091_v10 }
0x2215   :  { %9874 = vmatpush3.bf16.xpose.msra.mxu0 %v7101_v37 }
0x221a   :  { %v7087_v13 = vpop.permute.xlu1 %7086 }
0x221b   :  { %v7093_v35 = vpop.permute.xlu0 %7092 }
0x221c   :  { %v7104_v38 = vsel %vm6842_vm4, %v7093_v35, 0  ;;  %12156 = vmatprep.subr.msk.bf16.mxu0 %vm6842_vm4, %v7093_v35 }
0x221d   :  { %9876 = vmatpush3.bf16.xpose.msra.mxu0 %v7104_v38 }
0x2224   :  { %9878 = vmatmul.mubr.msk.bf16.vlgmr.msra.gmra.mrb[84].mxu0 %vm6842_vm4, %v7087_v13 }
0x2284   :  { %v9855_v24 = vpop.f32.mrb[80].mxu0 }
0x2285   :  { %v6889_v30 = vpop.f32.mrb[81].mxu0  ;;  %v6898_v41 = vadd.f32 %v9855_v24, %v14541_v11 }
0x2286   :  { %v6890_v12 = vadd.f32 %v14541_v11, %v6889_v30  ;;  %v9856_v40 = vpop.f32.mrb[82].mxu0 }
0x2287   :  { %v6892_v25 = vpop.f32.mrb[83].mxu0  ;;  %v6901_v43 = vadd.f32 %v9856_v40, %v14541_v11  ;;  %v6910_v31 = vsel %vm6842_vm4, %v6898_v41, -inf }
0x2288   :  { %v6893_v32 = vadd.f32 %v14541_v11, %v6892_v25  ;;  %v6904_v27 = vsel %vm6842_vm4, %v6890_v12, -inf }
0x2289   :  { %6905 = vmax.xlane.f32.xlu0 %v6904_v27  ;;  %v6913_v46 = vsel %vm6842_vm4, %v6901_v43, -inf }
0x228a   :  { %v6907_v39 = vsel %vm6842_vm4, %v6893_v32, -inf }
0x228b   :  { %6908 = vmax.xlane.f32.xlu1 %v6907_v39 }
0x228d   :  { %6911 = vmax.xlane.f32.xlu0 %v6910_v31 }
0x2291   :  { %6914 = vmax.xlane.f32.xlu0 %v6913_v46 }
0x22f7   :  { %v9879_v48 = vpop.f32.mrb[84].mxu0 }
0x22f8   :  { %v7140_v42 = vpop.f32.mrb[85].mxu0  ;;  %v7149_v20 = vadd.f32 %v9879_v48, %v14541_v11 }
0x22f9   :  { %v9880_v51 = vpop.f32.mrb[86].mxu0  ;;  %v7141_v17 = vadd.f32 %v14541_v11, %v7140_v42 }
0x22fa   :  { %v7143_v49 = vpop.f32.mrb[87].mxu0  ;;  %v7152_v47 = vadd.f32 %v9880_v51, %v14541_v11  ;;  %v7161_v59 = vsel %vm6842_vm4, %v7149_v20, -inf }
0x22fb   :  { %v7144_v23 = vadd.f32 %v14541_v11, %v7143_v49  ;;  %v7155_v0 = vsel %vm6842_vm4, %v7141_v17, -inf }
0x22fc   :  { %v7164_v57 = vsel %vm6842_vm4, %v7152_v47, -inf }
0x22fd   :  { %v7158_v58 = vsel %vm6842_vm4, %v7144_v23, -inf }
0x2316   :  { %v6906_v50 = vpop.xlane.xlu0 %6905 }
0x2317   :  { %v6916_v53 = vsub.f32 %v6890_v12, %v6906_v50 }
0x2318   :  { %v6909_v54 = vpop.xlane.xlu1 %6908 }
0x2319   :  { %v6920_v62 = vmul.f32 1.442695, %v6916_v53  ;;  %v6917_v63 = vsub.f32 %v6893_v32, %v6909_v54 }
0x231a   :  { %v6912_v5 = vpop.xlane.xlu0 %6911 }
0x231b   :  { %12506 = vpow2.f32 %v6920_v62  ;;  %v6922_v6 = vmul.f32 1.442695, %v6917_v63  ;;  %v6918_v14 = vsub.f32 %v6898_v41, %v6912_v5 }
0x231d   :  { %12508 = vpow2.f32 %v6922_v6  ;;  %v6924_v15 = vmul.f32 1.442695, %v6918_v14 }
0x231e   :  { %v6915_v18 = vpop.xlane.xlu0 %6914 }
0x231f   :  { %12510 = vpow2.f32 %v6924_v15  ;;  %v6919_v19 = vsub.f32 %v6901_v43, %v6915_v18 }
0x2321   :  { %v6926_v28 = vmul.f32 1.442695, %v6919_v19 }
0x2323   :  { %12512 = vpow2.f32 %v6926_v28 }
0x2325   :  { %v12507_v2 = vpop.eup %12506 }
0x2326   :  { %v6928_v45 = vsel %vm6842_vm4, %v12507_v2, 0.0 }
0x2327   :  { %v12509_v52 = vpop.eup %12508  ;;  %6929 = vadd.xlane.f32.xlu1 %v6928_v45 }
0x2328   :  { %v6931_v55 = vsel %vm6842_vm4, %v12509_v52, 0.0 }
0x2329   :  { %v12511_v60 = vpop.eup %12510  ;;  %6932 = vadd.xlane.f32.xlu0 %v6931_v55 }
0x232a   :  { %v6934_v61 = vsel %vm6842_vm4, %v12511_v60, 0.0 }
0x232b   :  { %6935 = vadd.xlane.f32.xlu1 %v6934_v61  ;;  %v12250_v61 = vld [vmem:[%s15341_s5] sm:$0xff]  }
0x232c   :  { %9865 = vmatprep.subr.bf16.mxu1 %v12250_v61 }
0x232d   :  { %v12513_v8 = vpop.eup %12512 }
0x232e   :  { %v6937_v9 = vsel %vm6842_vm4, %v12513_v8, 0.0 }
0x232f   :  { %6938 = vadd.xlane.f32.xlu0 %v6937_v9 }
0x233c   :  { %7345 = vrot.lane.b32.xlu1 %v14498_v21, %s12614_s23 }
0x2340   :  { %7341 = vrot.lane.b32.xlu1 %v14496_v16, %s12614_s23 }
0x2344   :  { %7343 = vrot.lane.b32.xlu1 %v14517_v4, %s12614_s23 }
0x2345   :  { %7347 = vrot.lane.b32.xlu0 %v14519_v7, %s12614_s23 }
0x2364   :  { %7156 = vmax.xlane.f32.xlu0 %v7155_v0 }
0x2368   :  { %7159 = vmax.xlane.f32.xlu1 %v7158_v58  ;;  %7162 = vmax.xlane.f32.xlu0 %v7161_v59 }
0x236c   :  { %7165 = vmax.xlane.f32.xlu0 %v7164_v57 }
0x23b4   :  { %v6930_v36 = vpop.xlane.xlu1 %6929 }
0x23b5   :  { %12514 = vrcp.f32 %v6930_v36 }
0x23b6   :  { %v6933_v3 = vpop.xlane.xlu0 %6932 }
0x23b7   :  { %12516 = vrcp.f32 %v6933_v3 }
0x23b8   :  { %v6936_v10 = vpop.xlane.xlu1 %6935 }
0x23b9   :  { %12518 = vrcp.f32 %v6936_v10 }
0x23bc   :  { %v7346_v37 = vpop.permute.xlu1 %7345  ;;  %v6939_v35 = vpop.xlane.xlu0 %6938 }
0x23bd   :  { %v7356_v38 = vsel %vm6842_vm4, %v7346_v37, 0  ;;  %12520 = vrcp.f32 %v6939_v35  ;;  %12157 = vmatprep.subr.msk.bf16.mxu0 %vm6842_vm4, %v7346_v37 }
0x23be   :  { %9898 = vmatpush3.bf16.xpose.msra.mxu0 %v7356_v38 }
0x23bf   :  { %v12515_v13 = vpop.eup %12514 }
0x23c0   :  { %v7342_v24 = vpop.permute.xlu1 %7341  ;;  %v7348_v30 = vpop.permute.xlu0 %7347  ;;  %v6944_v40 = vmul.f32 %v12515_v13, %v12507_v2 }
0x23c1   :  { %v12517_v12 = vpop.eup %12516  ;;  %12158 = vmatprep.subr.msk.bf16.mxu0 %vm6842_vm4, %v7348_v30  ;;  %9901 = vmatprep.mubr.msk.bf16.mxu0 %vm6842_vm4, %v7342_v24  ;;  %v7359_v27 = vsel %vm6842_vm4, %v7348_v30, 0 }
0x23c2   :  { %v6945_v25 = vmul.f32 %v12517_v12, %v12509_v52 }
0x23c3   :  { %v12519_v32 = vpop.eup %12518 }
0x23c4   :  { %v6948_v41 = vpack.c.bf16 %v6945_v25, %v6944_v40  ;;  %v6946_v43 = vmul.f32 %v12519_v32, %v12511_v60  ;;  %v7344_v48 = vpop.permute.xlu1 %7343 }
0x23c6   :  { %9861 = vmatprep.mubr.msk.bf16.mxu1 %vm6842_vm4, %v6948_v41  ;;  %9900 = vmatpush3.bf16.xpose.msra.mxu0 %v7359_v27 }
0x23c7   :  { %v12521_v39 = vpop.eup %12520 }
0x23c8   :  { %v6947_v31 = vmul.f32 %v12521_v39, %v12513_v8  ;;  %v12251_v8 = vld [vmem:[%s15341_s5 + $0x8] sm:$0xff]  }
0x23ca   :  { %v6949_v46 = vpack.c.bf16 %v6947_v31, %v6946_v43 }
0x23cc   :  { %9862 = vmatmul.mubr.msk.bf16.vlgmr.msra.gmra.mrb[76].mxu1 %vm6842_vm4, %v6949_v46 }
0x23cd   :  { %9902 = vmatmul.mubr.msk.bf16.vlgmr.msra.gmra.mrb[88].mxu0 %vm6842_vm4, %v7344_v48  ;;  %9866 = vmatpush3.bf16.msra.mxu1 %v12250_v61 }
0x23ce   :  { %9867 = vmatprep.subr.bf16.mxu1 %v12251_v8 }
0x23d1   :  { %9868 = vmatpush3.bf16.msra.mxu1 %v12251_v8 }
0x23f1   :  { %v7157_v42 = vpop.xlane.xlu0 %7156 }
0x23f2   :  { %v7167_v51 = vsub.f32 %v7141_v17, %v7157_v42 }
0x23f4   :  { %v7171_v63 = vmul.f32 1.442695, %v7167_v51 }
0x23f5   :  { %v7160_v49 = vpop.xlane.xlu1 %7159  ;;  %v7163_v50 = vpop.xlane.xlu0 %7162 }
0x23f6   :  { %v7169_v53 = vsub.f32 %v7149_v20, %v7163_v50  ;;  %v7168_v54 = vsub.f32 %v7144_v23, %v7160_v49 }
0x23f8   :  { %v7175_v62 = vmul.f32 1.442695, %v7169_v53  ;;  %v7173_v14 = vmul.f32 1.442695, %v7168_v54 }
0x23f9   :  { %v7166_v5 = vpop.xlane.xlu0 %7165 }
0x23fa   :  { %v7170_v6 = vsub.f32 %v7152_v47, %v7166_v5  ;;  %12522 = vpow2.f32 %v7175_v62  ;;  %v12253_v5 = vld [vmem:[%s15341_s5 + $0x18] sm:$0xff]  }
0x23fb   :  { %12524 = vpow2.f32 %v7171_v63  ;;  %v12252_v63 = vld [vmem:[%s15341_s5 + $0x10] sm:$0xff]  }
0x23fc   :  { %v7177_v15 = vmul.f32 1.442695, %v7170_v6 }
0x23fe   :  { %12526 = vpow2.f32 %v7177_v15 }
0x23ff   :  { %12528 = vpow2.f32 %v7173_v14 }
0x2404   :  { %v14579_v18 = vpop.eup %12522 }
0x2405   :  { %v7185_v19 = vsel %vm6842_vm4, %v14579_v18, 0.0  ;;  %v14583_v28 = vpop.eup %12524 }
0x2406   :  { %7186 = vadd.xlane.f32.xlu1 %v7185_v19  ;;  %v7179_v55 = vsel %vm6842_vm4, %v14583_v28, 0.0 }
0x2408   :  { %v14585_v2 = vpop.eup %12526 }
0x2409   :  { %v7188_v45 = vsel %vm6842_vm4, %v14585_v2, 0.0  ;;  %v12529_v52 = vpop.eup %12528 }
0x240a   :  { %7189 = vadd.xlane.f32.xlu0 %v7188_v45  ;;  %7180 = vadd.xlane.f32.xlu1 %v7179_v55  ;;  %v7182_v60 = vsel %vm6842_vm4, %v12529_v52, 0.0 }
0x240e   :  { %7183 = vadd.xlane.f32.xlu0 %v7182_v60 }
0x241b   :  { %7203 = vrot.lane.b32.xlu1 %v14502_v56, %s12622_s4 }
0x241f   :  { %7598 = vrot.lane.b32.xlu1 %v14498_v21, %s12623_s16 }
0x2423   :  { %7600 = vrot.lane.b32.xlu1 %v14519_v7, %s12623_s16 }
0x2424   :  { %7205 = vrot.lane.b32.xlu0 %v14500_v22, %s12622_s4 }
0x2427   :  { %7596 = vrot.lane.b32.xlu1 %v14517_v4, %s12623_s16 }
0x2428   :  { %7594 = vrot.lane.b32.xlu0 %v14496_v16, %s12623_s16 }
0x2493   :  { %v7187_v9 = vpop.xlane.xlu1 %7186 }
0x2497   :  { %v7190_v17 = vpop.xlane.xlu0 %7189  ;;  %v7181_v20 = vpop.xlane.xlu1 %7180 }
0x2498   :  { %12530 = vrcp.f32 %v7181_v20 }
0x2499   :  { %12532 = vrcp.f32 %v7190_v17 }
0x249b   :  { %v7184_v21 = vpop.xlane.xlu0 %7183  ;;  %v7204_v23 = vpop.permute.xlu1 %7203 }
0x249c   :  { %12534 = vrcp.f32 %v7184_v21  ;;  %9881 = vmatprep.subr.bf16.mxu1 %v7204_v23 }
0x249d   :  { %12536 = vrcp.f32 %v7187_v9 }
0x249f   :  { %v9863_v7 = vpop.f32.mrb[76].mxu1  ;;  %v7206_v0 = vpop.permute.xlu0 %7205 }
0x24a0   :  { %v7599_v47 = vpop.permute.xlu1 %7598  ;;  %v6990_v58 = vpop.f32.mrb[77].mxu1 }
0x24a1   :  { %v7609_v59 = vsel %vm6842_vm4, %v7599_v47, 0  ;;  %v9903_v4 = vpop.f32.mrb[88].mxu0  ;;  %12159 = vmatprep.subr.msk.bf16.mxu0 %vm6842_vm4, %v7599_v47  ;;  %v9864_v16 = vpop.f32.mrb[78].mxu1 }
0x24a2   :  { %v7006_v57 = vpack.c.bf16 %v9864_v16, %v9863_v7  ;;  %v7395_v36 = vpop.f32.mrb[89].mxu0  ;;  %9922 = vmatpush3.bf16.xpose.msra.mxu0 %v7609_v59  ;;  %v6993_v3 = vpop.f32.mrb[79].mxu1  ;;  %v7404_v40 = vadd.f32 %v9903_v4, %v14541_v11 }
0x24a3   :  { %v7396_v10 = vadd.f32 %v14541_v11, %v7395_v36  ;;  %v7005_v37 = vpack.c.bf16 %v6993_v3, %v6990_v58  ;;  %v9904_v35 = vpop.f32.mrb[90].mxu0  ;;  %v7595_v38 = vpop.permute.xlu0 %7594 }
0x24a4   :  { %v12531_v13 = vpop.eup %12530  ;;  %v7398_v24 = vpop.f32.mrb[91].mxu0  ;;  %9925 = vmatprep.mubr.msk.bf16.mxu0 %vm6842_vm4, %v7595_v38  ;;  %v7407_v48 = vadd.f32 %v9904_v35, %v14541_v11  ;;  %v7416_v51 = vsel %vm6842_vm4, %v7404_v40, -inf }
0x24a5   :  { %v7601_v30 = vpop.permute.xlu1 %7600  ;;  %v12533_v12 = vpop.eup %12532  ;;  %v7399_v25 = vadd.f32 %v14541_v11, %v7398_v24  ;;  %9869 = vmatprep.mubr.msk.bf16.mxu1 %vm6842_vm4, %v7005_v37  ;;  %v7410_v41 = vsel %vm6842_vm4, %v7396_v10, -inf  ;;  %v7195_v43 = vmul.f32 %v12531_v13, %v14583_v28 }
0x24a6   :  { %12160 = vmatprep.subr.msk.bf16.mxu0 %vm6842_vm4, %v7601_v30  ;;  %v12535_v32 = vpop.eup %12534  ;;  %7411 = vmax.xlane.f32.xlu0 %v7410_v41  ;;  %v7198_v46 = vmul.f32 %v12533_v12, %v14585_v2  ;;  %v7612_v42 = vsel %vm6842_vm4, %v7601_v30, 0  ;;  %v7419_v54 = vsel %vm6842_vm4, %v7407_v48, -inf }
0x24a7   :  { %9870 = vmatmul.mubr.msk.bf16.vlgmr.msra.gmra.mrb[80].mxu1 %vm6842_vm4, %v7006_v57  ;;  %v12537_v27 = vpop.eup %12536  ;;  %v7413_v39 = vsel %vm6842_vm4, %v7399_v25, -inf  ;;  %v7196_v31 = vmul.f32 %v12535_v32, %v12529_v52 }
0x24a8   :  { %9882 = vmatpush3.bf16.msra.mxu1 %v7204_v23  ;;  %7414 = vmax.xlane.f32.xlu1 %v7413_v39  ;;  %v7197_v50 = vmul.f32 %v12537_v27, %v14579_v18 }
0x24a9   :  { %9883 = vmatprep.subr.bf16.mxu1 %v7206_v0  ;;  %v7199_v49 = vpack.c.bf16 %v7196_v31, %v7195_v43  ;;  %v7597_v62 = vpop.permute.xlu1 %7596 }
0x24aa   :  { %9924 = vmatpush3.bf16.xpose.msra.mxu0 %v7612_v42  ;;  %7417 = vmax.xlane.f32.xlu0 %v7416_v51  ;;  %v7200_v53 = vpack.c.bf16 %v7198_v46, %v7197_v50 }
0x24ab   :  { %9885 = vmatprep.mubr.msk.bf16.mxu1 %vm6842_vm4, %v7199_v49 }
0x24ac   :  { %9884 = vmatpush3.bf16.msra.mxu1 %v7206_v0 }
0x24ad   :  { %9889 = vmatprep.subr.bf16.mxu1 %v12252_v63 }
0x24ae   :  { %7420 = vmax.xlane.f32.xlu0 %v7419_v54 }
0x24af   :  { %9886 = vmatmul.mubr.msk.bf16.vlgmr.msra.gmra.mrb[84].mxu1 %vm6842_vm4, %v7200_v53 }
0x24b0   :  { %9890 = vmatpush3.bf16.msra.mxu1 %v12252_v63 }
0x24b1   :  { %9926 = vmatmul.mubr.msk.bf16.vlgmr.msra.gmra.mrb[92].mxu0 %vm6842_vm4, %v7597_v62  ;;  %9891 = vmatprep.subr.bf16.mxu1 %v12253_v5 }
0x24b4   :  { %9892 = vmatpush3.bf16.msra.mxu1 %v12253_v5 }
0x2533   :  { %v7412_v6 = vpop.xlane.xlu0 %7411 }
0x2534   :  { %v7422_v14 = vsub.f32 %v7396_v10, %v7412_v6 }
0x2535   :  { %v7415_v15 = vpop.xlane.xlu1 %7414 }
0x2536   :  { %v7426_v28 = vmul.f32 1.442695, %v7422_v14  ;;  %v7423_v2 = vsub.f32 %v7399_v25, %v7415_v15 }
0x2537   :  { %v7418_v18 = vpop.xlane.xlu0 %7417 }
0x2538   :  { %v7424_v19 = vsub.f32 %v7404_v40, %v7418_v18  ;;  %v7428_v60 = vmul.f32 1.442695, %v7423_v2 }
0x253a   :  { %v7430_v45 = vmul.f32 1.442695, %v7424_v19 }
0x253b   :  { %v7421_v52 = vpop.xlane.xlu0 %7420 }
0x253c   :  { %12538 = vpow2.f32 %v7430_v45  ;;  %v7425_v55 = vsub.f32 %v7407_v48, %v7421_v52 }
0x253d   :  { %12540 = vpow2.f32 %v7426_v28 }
0x253e   :  { %v7432_v61 = vmul.f32 1.442695, %v7425_v55 }
0x2540   :  { %12542 = vpow2.f32 %v7432_v61 }
0x2541   :  { %12544 = vpow2.f32 %v7428_v60 }
0x2546   :  { %v12539_v8 = vpop.eup %12538 }
0x2547   :  { %v7440_v9 = vsel %vm6842_vm4, %v12539_v8, 0.0  ;;  %v12541_v17 = vpop.eup %12540 }
0x2548   :  { %7441 = vadd.xlane.f32.xlu1 %v7440_v9  ;;  %v7434_v21 = vsel %vm6842_vm4, %v12541_v17, 0.0 }
0x254a   :  { %v12543_v20 = vpop.eup %12542 }
0x254b   :  { %v7443_v23 = vsel %vm6842_vm4, %v12543_v20, 0.0  ;;  %v12545_v7 = vpop.eup %12544 }
0x254c   :  { %7435 = vadd.xlane.f32.xlu1 %v7434_v21  ;;  %7444 = vadd.xlane.f32.xlu0 %v7443_v23  ;;  %v7437_v0 = vsel %vm6842_vm4, %v12545_v7, 0.0 }
0x2550   :  { %7438 = vadd.xlane.f32.xlu0 %v7437_v0  ;;  %v12255_v0 = vld [vmem:[%s15341_s5 + $0x28] sm:$0xff]  }
0x255d   :  { %7456 = vrot.lane.b32.xlu1 %v14502_v56, %s12614_s23 }
0x2566   :  { %7458 = vrot.lane.b32.xlu0 %v14500_v22, %s12614_s23 }
0x2582   :  { %v9887_v47 = vpop.f32.mrb[84].mxu1 }
0x2583   :  { %v7249_v58 = vpop.f32.mrb[85].mxu1 }
0x2584   :  { %v9888_v59 = vpop.f32.mrb[86].mxu1  ;;  %v9927_v16 = vpop.f32.mrb[92].mxu0 }
0x2585   :  { %v7265_v4 = vpack.c.bf16 %v9888_v59, %v9887_v47  ;;  %v7252_v57 = vpop.f32.mrb[87].mxu1  ;;  %v7648_v3 = vpop.f32.mrb[93].mxu0  ;;  %v7657_v38 = vadd.f32 %v9927_v16, %v14541_v11 }
0x2586   :  { %v7264_v36 = vpack.c.bf16 %v7252_v57, %v7249_v58  ;;  %v7649_v10 = vadd.f32 %v14541_v11, %v7648_v3  ;;  %v9928_v37 = vpop.f32.mrb[94].mxu0 }
0x2587   :  { %v7651_v35 = vpop.f32.mrb[95].mxu0  ;;  %v7660_v30 = vadd.f32 %v9928_v37, %v14541_v11  ;;  %v7669_v40 = vsel %vm6842_vm4, %v7657_v38, -inf }
0x2588   :  { %9893 = vmatprep.mubr.msk.bf16.mxu1 %vm6842_vm4, %v7264_v36  ;;  %v7652_v13 = vadd.f32 %v14541_v11, %v7651_v35  ;;  %v7663_v24 = vsel %vm6842_vm4, %v7649_v10, -inf }
0x2589   :  { %9894 = vmatmul.mubr.msk.bf16.vlgmr.msra.gmra.mrb[80].mxu1 %vm6842_vm4, %v7265_v4  ;;  %7664 = vmax.xlane.f32.xlu1 %v7663_v24  ;;  %v7672_v25 = vsel %vm6842_vm4, %v7660_v30, -inf }
0x258a   :  { %v7666_v12 = vsel %vm6842_vm4, %v7652_v13, -inf }
0x258b   :  { %7667 = vmax.xlane.f32.xlu0 %v7666_v12 }
0x258d   :  { %7670 = vmax.xlane.f32.xlu1 %v7669_v40 }
0x258f   :  { %7673 = vmax.xlane.f32.xlu0 %v7672_v25  ;;  %v12256_v25 = vld [vmem:[%s15341_s5 + $0x30] sm:$0xff]  }
0x25d5   :  { %v7442_v41 = vpop.xlane.xlu1 %7441 }
0x25d9   :  { %v7436_v32 = vpop.xlane.xlu1 %7435  ;;  %v7445_v27 = vpop.xlane.xlu0 %7444 }
0x25da   :  { %12546 = vrcp.f32 %v7445_v27 }
0x25db   :  { %12548 = vrcp.f32 %v7436_v32 }
0x25dc   :  { %12550 = vrcp.f32 %v7442_v41 }
0x25dd   :  { %v7457_v39 = vpop.permute.xlu1 %7456  ;;  %v7439_v43 = vpop.xlane.xlu0 %7438 }
0x25de   :  { %12552 = vrcp.f32 %v7439_v43  ;;  %9905 = vmatprep.subr.bf16.mxu1 %v7457_v39 }
0x25df   :  { %9906 = vmatpush3.bf16.msra.mxu1 %v7457_v39  ;;  %v12257_v39 = vld [vmem:[%s15341_s5 + $0x38] sm:$0xff]  }
0x25e1   :  { %v7459_v11 = vpop.permute.xlu0 %7458 }
0x25e2   :  { %9907 = vmatprep.subr.bf16.mxu1 %v7459_v11 }
0x25e3   :  { %9908 = vmatpush3.bf16.msra.mxu1 %v7459_v11 }
0x25e4   :  { %v12547_v31 = vpop.eup %12546 }
0x25e5   :  { %v12549_v46 = vpop.eup %12548  ;;  %v7453_v51 = vmul.f32 %v12547_v31, %v12543_v20 }
0x25e6   :  { %v12551_v48 = vpop.eup %12550  ;;  %v7450_v49 = vmul.f32 %v12549_v46, %v12541_v17 }
0x25e7   :  { %v7452_v53 = vmul.f32 %v12551_v48, %v12539_v8 }
0x25e8   :  { %v12553_v42 = vpop.eup %12552 }
0x25e9   :  { %v7451_v50 = vmul.f32 %v12553_v42, %v12545_v7  ;;  %v7455_v62 = vpack.c.bf16 %v7453_v51, %v7452_v53  ;;  %v12254_v7 = vld [vmem:[%s15341_s5 + $0x20] sm:$0xff]  }
0x25ea   :  { %9913 = vmatprep.subr.bf16.mxu1 %v12254_v7 }
0x25eb   :  { %v7454_v54 = vpack.c.bf16 %v7451_v50, %v7450_v49 }
0x25ed   :  { %9909 = vmatprep.mubr.msk.bf16.mxu1 %vm6842_vm4, %v7454_v54 }
0x25ee   :  { %9910 = vmatmul.mubr.msk.bf16.vlgmr.msra.gmra.mrb[88].mxu1 %vm6842_vm4, %v7455_v62 }
0x25ef   :  { %9914 = vmatpush3.bf16.msra.mxu1 %v12254_v7 }
0x25f0   :  { %9915 = vmatprep.subr.bf16.mxu1 %v12255_v0 }
0x25f3   :  { %9916 = vmatpush3.bf16.msra.mxu1 %v12255_v0 }
0x2616   :  { %v7665_v63 = vpop.xlane.xlu1 %7664 }
0x2617   :  { %v7675_v5 = vsub.f32 %v7649_v10, %v7665_v63 }
0x2618   :  { %v7668_v6 = vpop.xlane.xlu0 %7667 }
0x2619   :  { %v7676_v15 = vsub.f32 %v7652_v13, %v7668_v6  ;;  %v7679_v19 = vmul.f32 1.442695, %v7675_v5 }
0x261a   :  { %v7671_v14 = vpop.xlane.xlu1 %7670 }
0x261b   :  { %v7677_v18 = vsub.f32 %v7657_v38, %v7671_v14  ;;  %v7681_v52 = vmul.f32 1.442695, %v7676_v15 }
0x261c   :  { %v7674_v28 = vpop.xlane.xlu0 %7673 }
0x261d   :  { %v7683_v2 = vmul.f32 1.442695, %v7677_v18  ;;  %v7678_v45 = vsub.f32 %v7660_v30, %v7674_v28 }
0x261f   :  { %12554 = vpow2.f32 %v7683_v2  ;;  %v7685_v55 = vmul.f32 1.442695, %v7678_v45 }
0x2620   :  { %12556 = vpow2.f32 %v7679_v19 }
0x2621   :  { %12558 = vpow2.f32 %v7685_v55 }
0x2622   :  { %12560 = vpow2.f32 %v7681_v52 }
0x2629   :  { %v12555_v60 = vpop.eup %12554 }
0x262a   :  { %v12557_v61 = vpop.eup %12556  ;;  %v7693_v8 = vsel %vm6842_vm4, %v12555_v60, 0.0 }
0x262b   :  { %v12559_v9 = vpop.eup %12558  ;;  %7694 = vadd.xlane.f32.xlu1 %v7693_v8  ;;  %v7687_v21 = vsel %vm6842_vm4, %v12557_v61, 0.0 }
0x262c   :  { %v7696_v17 = vsel %vm6842_vm4, %v12559_v9, 0.0  ;;  %v12561_v20 = vpop.eup %12560 }
0x262d   :  { %7697 = vadd.xlane.f32.xlu0 %v7696_v17  ;;  %v7690_v23 = vsel %vm6842_vm4, %v12561_v20, 0.0 }
0x262f   :  { %7688 = vadd.xlane.f32.xlu1 %v7687_v21 }
0x2631   :  { %7691 = vadd.xlane.f32.xlu0 %v7690_v23 }
0x2640   :  { %7709 = vrot.lane.b32.xlu1 %v14502_v56, %s12623_s16 }
0x2647   :  { %7711 = vrot.lane.b32.xlu0 %v14500_v22, %s12623_s16 }
0x26b8   :  { %v7695_v47 = vpop.xlane.xlu1 %7694 }
0x26ba   :  { %v7698_v58 = vpop.xlane.xlu0 %7697 }
0x26bb   :  { %12562 = vrcp.f32 %v7698_v58 }
0x26bc   :  { %v7689_v59 = vpop.xlane.xlu1 %7688 }
0x26bd   :  { %12564 = vrcp.f32 %v7689_v59 }
0x26be   :  { %12566 = vrcp.f32 %v7695_v47  ;;  %v7692_v4 = vpop.xlane.xlu0 %7691 }
0x26bf   :  { %12568 = vrcp.f32 %v7692_v4 }
0x26c0   :  { %v7710_v56 = vpop.permute.xlu1 %7709 }
0x26c1   :  { %v9911_v16 = vpop.f32.mrb[88].mxu1  ;;  %9929 = vmatprep.subr.bf16.mxu1 %v7710_v56 }
0x26c2   :  { %v7502_v57 = vpop.f32.mrb[89].mxu1  ;;  %v7712_v24 = vpop.permute.xlu0 %7711 }
0x26c3   :  { %v9912_v36 = vpop.f32.mrb[90].mxu1 }
0x26c4   :  { %v7518_v3 = vpack.c.bf16 %v9912_v36, %v9911_v16  ;;  %v7505_v10 = vpop.f32.mrb[91].mxu1 }
0x26c5   :  { %v7517_v37 = vpack.c.bf16 %v7505_v10, %v7502_v57  ;;  %v12563_v35 = vpop.eup %12562 }
0x26c6   :  { %v7706_v30 = vmul.f32 %v12563_v35, %v12559_v9 }
0x26c7   :  { %v12565_v38 = vpop.eup %12564  ;;  %9917 = vmatprep.mubr.msk.bf16.mxu1 %vm6842_vm4, %v7517_v37 }
0x26c8   :  { %v12567_v22 = vpop.eup %12566  ;;  %9918 = vmatmul.mubr.msk.bf16.vlgmr.msra.gmra.mrb[80].mxu1 %vm6842_vm4, %v7518_v3  ;;  %v7703_v12 = vmul.f32 %v12565_v38, %v12557_v61 }
0x26c9   :  { %v12569_v13 = vpop.eup %12568  ;;  %9930 = vmatpush3.bf16.msra.mxu1 %v7710_v56  ;;  %v7705_v41 = vmul.f32 %v12567_v22, %v12555_v60 }
0x26ca   :  { %9931 = vmatprep.subr.bf16.mxu1 %v7712_v24  ;;  %v7704_v40 = vmul.f32 %v12569_v13, %v12561_v20 }
0x26cb   :  { %v7708_v27 = vpack.c.bf16 %v7706_v30, %v7705_v41 }
0x26cc   :  { %v7707_v32 = vpack.c.bf16 %v7704_v40, %v7703_v12 }
0x26cd   :  { %9932 = vmatpush3.bf16.msra.mxu1 %v7712_v24 }
0x26ce   :  { %9933 = vmatprep.mubr.msk.bf16.mxu1 %vm6842_vm4, %v7707_v32  ;;  %9937 = vmatprep.subr.bf16.mxu1 %v12256_v25 }
0x26d0   :  { %9934 = vmatmul.mubr.msk.bf16.vlgmr.msra.gmra.mrb[92].mxu1 %vm6842_vm4, %v7708_v27 }
0x26d1   :  { %9938 = vmatpush3.bf16.msra.mxu1 %v12256_v25 }
0x26d2   :  { %9939 = vmatprep.subr.bf16.mxu1 %v12257_v39 }
0x26d5   :  { %9940 = vmatpush3.bf16.msra.mxu1 %v12257_v39 }
0x27a3   :  { %v9935_v43 = vpop.f32.mrb[92].mxu1 }
0x27a4   :  { %v7755_v11 = vpop.f32.mrb[93].mxu1 }
0x27a5   :  { %v9936_v31 = vpop.f32.mrb[94].mxu1 }
0x27a6   :  { %v7771_v46 = vpack.c.bf16 %v9936_v31, %v9935_v43  ;;  %v7758_v48 = vpop.f32.mrb[95].mxu1 }
0x27a7   :  { %v7770_v42 = vpack.c.bf16 %v7758_v48, %v7755_v11 }
0x27a9   :  { %9941 = vmatprep.mubr.msk.bf16.mxu1 %vm6842_vm4, %v7770_v42 }
0x27aa   :  { %9942 = vmatmul.mubr.msk.bf16.vlgmr.msra.gmra.mrb[80].mxu1 %vm6842_vm4, %v7771_v46 }
0x287d   :  { %v9943_v51 = vpop.f32.mrb[80].mxu1 }
0x287e   :  { %v7828_v49 = vpop.f32.mrb[81].mxu1  ;;  %v12121_v63 = vadd.f32 %v9943_v51, %v14483_v29 }
0x287f   :  { %v12122_v50 = vadd.f32 %v7828_v49, %v14487_v34  ;;  %v9944_v53 = vpop.f32.mrb[82].mxu1 }
0x2880   :  { %v7831_v54 = vpop.f32.mrb[83].mxu1  ;;  %v12123_v5 = vadd.f32 %v9944_v53, %v14485_v33 }
0x2881   :  { %v12124_v62 = vadd.f32 %v7831_v54, %v14489_v44  ;;  %7847 = vadd.xlane.f32.xlu1 %v12122_v50 }
0x2883   :  { %7849 = vadd.xlane.f32.xlu0 %v12124_v62 }
0x2885   :  { %7851 = vadd.xlane.f32.xlu1 %v12121_v63 }
0x2887   :  { %7853 = vadd.xlane.f32.xlu0 %v12123_v5 }
0x290e   :  { %v7848_v6 = vpop.xlane.xlu1 %7847 }
0x290f   :  { %v7856_v14 = vmul.f32 0.0078125, %v7848_v6 }
0x2910   :  { %v7850_v15 = vpop.xlane.xlu0 %7849 }
0x2911   :  { %v7860_v18 = vsub.f32 %v12122_v50, %v7856_v14  ;;  %v7857_v19 = vmul.f32 0.0078125, %v7850_v15 }
0x2912   :  { %v7852_v28 = vpop.xlane.xlu1 %7851 }
0x2913   :  { %v7861_v2 = vsub.f32 %v12124_v62, %v7857_v19  ;;  %v7858_v34 = vmul.f32 0.0078125, %v7852_v28  ;;  %v7864_v45 = vmul.f32 %v7860_v18, %v7860_v18 }
0x2914   :  { %v7854_v52 = vpop.xlane.xlu0 %7853 }
0x2915   :  { %v7862_v55 = vsub.f32 %v12121_v63, %v7858_v34  ;;  %v7859_v44 = vmul.f32 0.0078125, %v7854_v52  ;;  %7868 = vadd.xlane.f32.xlu1 %v7864_v45  ;;  %v7865_v60 = vmul.f32 %v7861_v2, %v7861_v2 }
0x2917   :  { %v7863_v29 = vsub.f32 %v12123_v5, %v7859_v44  ;;  %7870 = vadd.xlane.f32.xlu0 %v7865_v60  ;;  %v7866_v61 = vmul.f32 %v7862_v55, %v7862_v55 }
0x2919   :  { %7872 = vadd.xlane.f32.xlu1 %v7866_v61  ;;  %v7867_v33 = vmul.f32 %v7863_v29, %v7863_v29 }
0x291b   :  { %7874 = vadd.xlane.f32.xlu0 %v7867_v33 }
0x29a2   :  { %v7869_v8 = vpop.xlane.xlu1 %7868 }
0x29a3   :  { %v7876_v9 = vmul.f32 0.0078125, %v7869_v8 }
0x29a4   :  { %v7871_v17 = vpop.xlane.xlu0 %7870 }
0x29a5   :  { %v7880_v20 = vadd.f32 1e-05, %v7876_v9  ;;  %v7877_v21 = vmul.f32 0.0078125, %v7871_v17 }
0x29a6   :  { %v7873_v23 = vpop.xlane.xlu1 %7872 }
0x29a7   :  { %12570 = vrsqrt.f32 %v7880_v20  ;;  %v7881_v7 = vadd.f32 1e-05, %v7877_v21  ;;  %v7878_v0 = vmul.f32 0.0078125, %v7873_v23 }
0x29a8   :  { %v7875_v47 = vpop.xlane.xlu0 %7874 }
0x29a9   :  { %12572 = vrsqrt.f32 %v7881_v7  ;;  %v7882_v58 = vadd.f32 1e-05, %v7878_v0  ;;  %v7879_v59 = vmul.f32 0.0078125, %v7875_v47 }
0x29ab   :  { %12574 = vrsqrt.f32 %v7882_v58  ;;  %v7883_v4 = vadd.f32 1e-05, %v7879_v59 }
0x29ad   :  { %12576 = vrsqrt.f32 %v7883_v4 }
0x29b1   :  { %v12571_v56 = vpop.eup %12570 }
0x29b2   :  { %v7888_v16 = vmul.f32 %v12571_v56, %v7860_v18 }
0x29b3   :  { %v12573_v57 = vpop.eup %12572 }
0x29b4   :  { %7892 = vst [vmem:[#allocation4] sm:$0xff] %v7888_v16  ;;  %v7889_v36 = vmul.f32 %v12573_v57, %v7861_v2 }
0x29b5   :  { %v12575_v3 = vpop.eup %12574 }
0x29b6   :  { %7893 = vst [vmem:[#allocation4 + $0x8] sm:$0xff] %v7889_v36  ;;  %v7890_v10 = vmul.f32 %v12575_v3, %v7862_v55 }
0x29b7   :  { %v12577_v37 = vpop.eup %12576 }
0x29b8   :  { %7894 = vst [vmem:[#allocation4 + $0x10] sm:$0xff] %v7890_v10  ;;  %v7891_v35 = vmul.f32 %v12577_v37, %v7863_v29 }
0x29ba   :  { %7895 = vst [vmem:[#allocation4 + $0x18] sm:$0xff] %v7891_v35 }
0x29bb   :  { %12606 = dma.done.wait [#allocation6], 24576 }
0x29bc   :  { %12607 = vsyncadd [#allocation6], 4294942720  ;;  %v7919_v38 = vld [vmem:[#allocation5 + $0x8] sm:$0xff]  ;;  %v7921_v22 = vld [vmem:[#allocation5 + $0x18] sm:$0xff]  ;;  %vm8368_vm5 = vcmask 1044480   ;;  %vm8799_vm6 = vcmask 64512  }
0x29bd   :  { %v7918_v13 = vld [vmem:[#allocation5] sm:$0xff]  ;;  %8110 = vmatprep.subr.bf16.mxu0 %v7919_v38  ;;  %8239 = vmatprep.subr.bf16.mxu1 %v7921_v22  ;;  %v7920_v24 = vld [vmem:[#allocation5 + $0x10] sm:$0xff]  ;;  %v7923_v30 = vld [vmem:[#allocation5 + $0x28] sm:$0xff]  ;;  %s12624_s26 = smov [#allocation7]   ;;  %vm9409_vm7 = vcmask 8192  }
0x29be   :  { %v7925_v12 = vld [vmem:[#allocation5 + $0x38] sm:$0xff]  ;;  %8111 = vmatpush1.bf16.msra.mxu0 %v7918_v13  ;;  %8240 = vmatpush1.bf16.msra.mxu1 %v7920_v24  ;;  %v7922_v40 = vld [vmem:[#allocation5 + $0x20] sm:$0xff]  ;;  %v7924_v25 = vld [vmem:[#allocation5 + $0x30] sm:$0xff]  ;;  %s9417_s29 = sshll.u32 %s12624_s26, 4  ;;  %s9418_s29 = int_to_ptr.vmem [resolvable:$true] %s9417_s29 }
0x29bf   :  { %8112 = vmatprep.subr.bf16.mxu0 %v7923_v30  ;;  %8241 = vmatprep.subr.bf16.mxu1 %v7925_v12  ;;  %v7927_v41 = vld [vmem:[#allocation5 + $0x48] sm:$0xff]  ;;  %v7929_v32 = vld [vmem:[#allocation5 + $0x58] sm:$0xff]  ;;  %v7926_v27 = vld [vmem:[#allocation5 + $0x40] sm:$0xff]  ;;  %s12584_s30 = scalar_lea.vmem %s9418_s29, 16  ;;  %p12589_p1 = scmp.lt.s32.totalorder %s9418_s29, %s9418_s29 }
0x29c0   :  { %v7928_v39 = vld [vmem:[#allocation5 + $0x50] sm:$0xff]  ;;  %v7931_v43 = vld [vmem:[#allocation5 + $0x68] sm:$0xff]  ;;  %v7933_v11 = vld [vmem:[#allocation5 + $0x78] sm:$0xff]  ;;  %p12585_p0 = scmp.ne.s32.totalorder %s9418_s29, %s12584_s30 }
0x29c1   :  { %v7930_v31 = vld [vmem:[#allocation5 + $0x60] sm:$0xff]  ;;  %v7932_v46 = vld [vmem:[#allocation5 + $0x70] sm:$0xff]  ;;  %v7935_v48 = vld [vmem:[#allocation5 + $0x88] sm:$0xff] }
0x29c2   :  { %8113 = vmatpush1.bf16.msra.mxu0 %v7922_v40  ;;  %8242 = vmatpush1.bf16.msra.mxu1 %v7924_v25  ;;  %v7937_v42 = vld [vmem:[#allocation5 + $0x98] sm:$0xff]  ;;  %v7934_v51 = vld [vmem:[#allocation5 + $0x80] sm:$0xff]  ;;  %v7936_v49 = vld [vmem:[#allocation5 + $0x90] sm:$0xff] }
0x29c3   :  { %8114 = vmatprep.subr.bf16.mxu0 %v7927_v41  ;;  %8243 = vmatprep.subr.bf16.mxu1 %v7929_v32  ;;  %v7939_v50 = vld [vmem:[#allocation5 + $0xa8] sm:$0xff]  ;;  %v7941_v53 = vld [vmem:[#allocation5 + $0xb8] sm:$0xff]  ;;  %v7938_v54 = vld [vmem:[#allocation5 + $0xa0] sm:$0xff] }
0x29c4   :  { %v7940_v62 = vld [vmem:[#allocation5 + $0xb0] sm:$0xff]  ;;  %v7943_v63 = vld [vmem:[#allocation5 + $0xc8] sm:$0xff]  ;;  %v7945_v5 = vld [vmem:[#allocation5 + $0xd8] sm:$0xff] }
0x29c5   :  { %v7902_v6 = vld [vmem:[#allocation4 + $0x10] sm:$0xff]  ;;  %v7903_v14 = vld [vmem:[#allocation4 + $0x18] sm:$0x1f]  ;;  %v7942_v18 = vld [vmem:[#allocation5 + $0xc0] sm:$0xff] }
0x29c6   :  { %8115 = vmatpush1.bf16.msra.mxu0 %v7926_v27  ;;  %8244 = vmatpush1.bf16.msra.mxu1 %v7928_v39  ;;  %v7913_v15 = vpack.c.bf16 %v7903_v14, %v7902_v6  ;;  %v7944_v19 = vld [vmem:[#allocation5 + $0xd0] sm:$0xff]  ;;  %v7947_v28 = vld [vmem:[#allocation5 + $0xe8] sm:$0xff]  ;;  %v7949_v2 = vld [vmem:[#allocation5 + $0xf8] sm:$0xff] }
0x29c7   :  { %8116 = vmatprep.subr.bf16.mxu0 %v7931_v43  ;;  %8245 = vmatprep.subr.bf16.mxu1 %v7933_v11  ;;  %v7946_v34 = vld [vmem:[#allocation5 + $0xe0] sm:$0xff]  ;;  %v7948_v45 = vld [vmem:[#allocation5 + $0xf0] sm:$0xff]  ;;  %v7951_v52 = vld [vmem:[#allocation5 + $0x108] sm:$0xff] }
0x29c8   :  { %8142 = vmatprep.mubr.bf16.mxu0 %v7913_v15  ;;  %8271 = vmatprep.mubr.bf16.mxu1 %v7913_v15  ;;  %v7953_v55 = vld [vmem:[#allocation5 + $0x118] sm:$0xff]  ;;  %v7950_v44 = vld [vmem:[#allocation5 + $0x100] sm:$0xff]  ;;  %v7952_v60 = vld [vmem:[#allocation5 + $0x110] sm:$0xff] }
0x29c9   :  { %v7955_v29 = vld [vmem:[#allocation5 + $0x128] sm:$0xff]  ;;  %v7957_v61 = vld [vmem:[#allocation5 + $0x138] sm:$0xff]  ;;  %v7954_v33 = vld [vmem:[#allocation5 + $0x120] sm:$0xff] }
0x29ca   :  { %8117 = vmatpush1.bf16.msra.mxu0 %v7930_v31  ;;  %8246 = vmatpush1.bf16.msra.mxu1 %v7932_v46  ;;  %v7956_v8 = vld [vmem:[#allocation5 + $0x130] sm:$0xff]  ;;  %v7959_v9 = vld [vmem:[#allocation5 + $0x148] sm:$0xff]  ;;  %v7961_v17 = vld [vmem:[#allocation5 + $0x158] sm:$0xff] }
0x29cb   :  { %8118 = vmatprep.subr.bf16.mxu0 %v7935_v48  ;;  %8247 = vmatprep.subr.bf16.mxu1 %v7937_v42  ;;  %v7958_v20 = vld [vmem:[#allocation5 + $0x140] sm:$0xff]  ;;  %v7960_v21 = vld [vmem:[#allocation5 + $0x150] sm:$0xff]  ;;  %v7963_v23 = vld [vmem:[#allocation5 + $0x168] sm:$0xff] }
0x29cc   :  { %v7965_v7 = vld [vmem:[#allocation5 + $0x178] sm:$0xff]  ;;  %v7962_v0 = vld [vmem:[#allocation5 + $0x160] sm:$0xff]  ;;  %v7964_v47 = vld [vmem:[#allocation5 + $0x170] sm:$0xff] }
0x29cd   :  { %v7967_v58 = vld [vmem:[#allocation5 + $0x188] sm:$0xff]  ;;  %v7969_v59 = vld [vmem:[#allocation5 + $0x198] sm:$0xff]  ;;  %v7966_v4 = vld [vmem:[#allocation5 + $0x180] sm:$0xff] }
0x29ce   :  { %8119 = vmatpush1.bf16.msra.mxu0 %v7934_v51  ;;  %8248 = vmatpush1.bf16.msra.mxu1 %v7936_v49  ;;  %v7968_v56 = vld [vmem:[#allocation5 + $0x190] sm:$0xff]  ;;  %v7971_v16 = vld [vmem:[#allocation5 + $0x1a8] sm:$0xff]  ;;  %v7973_v57 = vld [vmem:[#allocation5 + $0x1b8] sm:$0xff] }
0x29cf   :  { %8120 = vmatprep.subr.bf16.mxu0 %v7939_v50  ;;  %8249 = vmatprep.subr.bf16.mxu1 %v7941_v53  ;;  %v7970_v36 = vld [vmem:[#allocation5 + $0x1a0] sm:$0xff]  ;;  %v7972_v3 = vld [vmem:[#allocation5 + $0x1b0] sm:$0xff]  ;;  %v7975_v10 = vld [vmem:[#allocation5 + $0x1c8] sm:$0xff] }
0x29d0   :  { %v7977_v37 = vld [vmem:[#allocation5 + $0x1d8] sm:$0xff]  ;;  %v7974_v35 = vld [vmem:[#allocation5 + $0x1c0] sm:$0xff]  ;;  %v7976_v38 = vld [vmem:[#allocation5 + $0x1d0] sm:$0xff] }
0x29d1   :  { %v7979_v22 = vld [vmem:[#allocation5 + $0x1e8] sm:$0xff]  ;;  %v7981_v13 = vld [vmem:[#allocation5 + $0x1f8] sm:$0xff]  ;;  %v7900_v24 = vld [vmem:[#allocation4] sm:$0xff] }
0x29d2   :  { %8121 = vmatpush1.bf16.msra.mxu0 %v7938_v54  ;;  %8250 = vmatpush1.bf16.msra.mxu1 %v7940_v62  ;;  %v7901_v30 = vld [vmem:[#allocation4 + $0x8] sm:$0x1f]  ;;  %v7978_v12 = vld [vmem:[#allocation5 + $0x1e0] sm:$0xff]  ;;  %v7980_v40 = vld [vmem:[#allocation5 + $0x1f0] sm:$0xff] }
0x29d3   :  { %8122 = vmatprep.subr.bf16.mxu0 %v7943_v63  ;;  %8251 = vmatprep.subr.bf16.mxu1 %v7945_v5  ;;  %v7983_v25 = vld [vmem:[#allocation5 + $0x208] sm:$0xff]  ;;  %v7985_v41 = vld [vmem:[#allocation5 + $0x218] sm:$0xff]  ;;  %v7912_v32 = vpack.c.bf16 %v7901_v30, %v7900_v24  ;;  %v7982_v43 = vld [vmem:[#allocation5 + $0x200] sm:$0xff] }
0x29d4   :  { %v7906_v27 = vld [vmem:[#allocation4 + $0x11] sm:$0xff]  ;;  %v7907_v39 = vld [vmem:[#allocation4 + $0x19] sm:$0x1f]  ;;  %v7987_v31 = vld [vmem:[#allocation5 + $0x228] sm:$0xff] }
0x29d5   :  { %v7984_v11 = vld [vmem:[#allocation5 + $0x210] sm:$0xff]  ;;  %v7989_v46 = vld [vmem:[#allocation5 + $0x238] sm:$0xff]  ;;  %v7915_v48 = vpack.c.bf16 %v7907_v39, %v7906_v27  ;;  %v7986_v42 = vld [vmem:[#allocation5 + $0x220] sm:$0xff] }
0x29d6   :  { %8123 = vmatpush1.bf16.msra.mxu0 %v7942_v18  ;;  %8252 = vmatpush1.bf16.msra.mxu1 %v7944_v19  ;;  %v7988_v51 = vld [vmem:[#allocation5 + $0x230] sm:$0xff]  ;;  %v7991_v49 = vld [vmem:[#allocation5 + $0x248] sm:$0xff]  ;;  %v7993_v50 = vld [vmem:[#allocation5 + $0x258] sm:$0xff] }
0x29d7   :  { %8124 = vmatprep.subr.bf16.mxu0 %v7947_v28  ;;  %8253 = vmatprep.subr.bf16.mxu1 %v7949_v2  ;;  %v7990_v53 = vld [vmem:[#allocation5 + $0x240] sm:$0xff]  ;;  %v7992_v54 = vld [vmem:[#allocation5 + $0x250] sm:$0xff]  ;;  %v7995_v62 = vld [vmem:[#allocation5 + $0x268] sm:$0xff] }
0x29d8   :  { %v7997_v63 = vld [vmem:[#allocation5 + $0x278] sm:$0xff]  ;;  %v7994_v5 = vld [vmem:[#allocation5 + $0x260] sm:$0xff]  ;;  %v7996_v6 = vld [vmem:[#allocation5 + $0x270] sm:$0xff] }
0x29d9   :  { %v7999_v14 = vld [vmem:[#allocation5 + $0x288] sm:$0xff]  ;;  %v8001_v15 = vld [vmem:[#allocation5 + $0x298] sm:$0xff]  ;;  %v7998_v18 = vld [vmem:[#allocation5 + $0x280] sm:$0xff] }
0x29da   :  { %8125 = vmatpush1.bf16.msra.mxu0 %v7946_v34  ;;  %8254 = vmatpush1.bf16.msra.mxu1 %v7948_v45  ;;  %v8000_v19 = vld [vmem:[#allocation5 + $0x290] sm:$0xff]  ;;  %v8003_v28 = vld [vmem:[#allocation5 + $0x2a8] sm:$0xff]  ;;  %v8005_v2 = vld [vmem:[#allocation5 + $0x2b8] sm:$0xff] }
0x29db   :  { %8126 = vmatprep.subr.bf16.mxu0 %v7951_v52  ;;  %8255 = vmatprep.subr.bf16.mxu1 %v7953_v55  ;;  %v8002_v34 = vld [vmem:[#allocation5 + $0x2a0] sm:$0xff]  ;;  %v8004_v45 = vld [vmem:[#allocation5 + $0x2b0] sm:$0xff]  ;;  %v8007_v52 = vld [vmem:[#allocation5 + $0x2c8] sm:$0xff] }
0x29dc   :  { %v8009_v55 = vld [vmem:[#allocation5 + $0x2d8] sm:$0xff]  ;;  %v8034_v24 = vld [vmem:[#allocation5 + $0x3a0] sm:$0xff]  ;;  %v8036_v30 = vld [vmem:[#allocation5 + $0x3b0] sm:$0xff] }
0x29dd   :  { %v8045_v27 = vld [vmem:[#allocation5 + $0x3f8] sm:$0xff]  ;;  %v7904_v39 = vld [vmem:[#allocation4 + $0x1] sm:$0xff] }
0x29de   :  { %8127 = vmatpush1.bf16.msra.mxu0 %v7950_v44  ;;  %8256 = vmatpush1.bf16.msra.mxu1 %v7952_v60  ;;  %v8006_v44 = vld [vmem:[#allocation5 + $0x2c0] sm:$0xff]  ;;  %v8008_v60 = vld [vmem:[#allocation5 + $0x2d0] sm:$0xff] }
0x29df   :  { %8128 = vmatprep.subr.bf16.mxu0 %v7955_v29  ;;  %8257 = vmatprep.subr.bf16.mxu1 %v7957_v61  ;;  %v8011_v29 = vld [vmem:[#allocation5 + $0x2e8] sm:$0xff]  ;;  %v8013_v61 = vld [vmem:[#allocation5 + $0x2f8] sm:$0xff] }
0x29e2   :  { %8129 = vmatpush1.bf16.msra.mxu0 %v7954_v33  ;;  %8258 = vmatpush1.bf16.msra.mxu1 %v7956_v8  ;;  %v8010_v33 = vld [vmem:[#allocation5 + $0x2e0] sm:$0xff]  ;;  %v8012_v8 = vld [vmem:[#allocation5 + $0x2f0] sm:$0xff] }
0x29e3   :  { %8130 = vmatprep.subr.bf16.mxu0 %v7959_v9  ;;  %8259 = vmatprep.subr.bf16.mxu1 %v7961_v17  ;;  %v8015_v9 = vld [vmem:[#allocation5 + $0x308] sm:$0xff]  ;;  %v8017_v17 = vld [vmem:[#allocation5 + $0x318] sm:$0xff] }
0x29e6   :  { %8131 = vmatpush1.bf16.msra.mxu0 %v7958_v20  ;;  %8260 = vmatpush1.bf16.msra.mxu1 %v7960_v21  ;;  %v8014_v20 = vld [vmem:[#allocation5 + $0x300] sm:$0xff]  ;;  %v8016_v21 = vld [vmem:[#allocation5 + $0x310] sm:$0xff] }
0x29e7   :  { %8132 = vmatprep.subr.bf16.mxu0 %v7963_v23  ;;  %8261 = vmatprep.subr.bf16.mxu1 %v7965_v7  ;;  %v8019_v23 = vld [vmem:[#allocation5 + $0x328] sm:$0xff]  ;;  %v8021_v7 = vld [vmem:[#allocation5 + $0x338] sm:$0xff] }
0x29ea   :  { %8133 = vmatpush1.bf16.msra.mxu0 %v7962_v0  ;;  %8262 = vmatpush1.bf16.msra.mxu1 %v7964_v47  ;;  %v8018_v0 = vld [vmem:[#allocation5 + $0x320] sm:$0xff]  ;;  %v8020_v47 = vld [vmem:[#allocation5 + $0x330] sm:$0xff] }
0x29eb   :  { %8134 = vmatprep.subr.bf16.mxu0 %v7967_v58  ;;  %8263 = vmatprep.subr.bf16.mxu1 %v7969_v59  ;;  %v8023_v58 = vld [vmem:[#allocation5 + $0x348] sm:$0xff]  ;;  %v8025_v59 = vld [vmem:[#allocation5 + $0x358] sm:$0xff] }
0x29ee   :  { %8135 = vmatpush1.bf16.msra.mxu0 %v7966_v4  ;;  %8264 = vmatpush1.bf16.msra.mxu1 %v7968_v56  ;;  %v8022_v4 = vld [vmem:[#allocation5 + $0x340] sm:$0xff]  ;;  %v8024_v56 = vld [vmem:[#allocation5 + $0x350] sm:$0xff] }
0x29ef   :  { %8136 = vmatprep.subr.bf16.mxu0 %v7971_v16  ;;  %8265 = vmatprep.subr.bf16.mxu1 %v7973_v57  ;;  %v8027_v16 = vld [vmem:[#allocation5 + $0x368] sm:$0xff]  ;;  %v8029_v57 = vld [vmem:[#allocation5 + $0x378] sm:$0xff] }
0x29f2   :  { %8137 = vmatpush1.bf16.msra.mxu0 %v7970_v36  ;;  %8266 = vmatpush1.bf16.msra.mxu1 %v7972_v3  ;;  %v8026_v36 = vld [vmem:[#allocation5 + $0x360] sm:$0xff]  ;;  %v8028_v3 = vld [vmem:[#allocation5 + $0x370] sm:$0xff] }
0x29f3   :  { %8138 = vmatprep.subr.bf16.mxu0 %v7975_v10  ;;  %8267 = vmatprep.subr.bf16.mxu1 %v7977_v37  ;;  %v8031_v10 = vld [vmem:[#allocation5 + $0x388] sm:$0xff]  ;;  %v8033_v37 = vld [vmem:[#allocation5 + $0x398] sm:$0xff] }
0x29f6   :  { %8139 = vmatpush1.bf16.msra.mxu0 %v7974_v35  ;;  %8268 = vmatpush1.bf16.msra.mxu1 %v7976_v38  ;;  %v8030_v35 = vld [vmem:[#allocation5 + $0x380] sm:$0xff]  ;;  %v8032_v38 = vld [vmem:[#allocation5 + $0x390] sm:$0xff] }
0x29f7   :  { %8140 = vmatprep.subr.bf16.mxu0 %v7979_v22  ;;  %8269 = vmatprep.subr.bf16.mxu1 %v7981_v13  ;;  %v8035_v22 = vld [vmem:[#allocation5 + $0x3a8] sm:$0xff]  ;;  %v8037_v13 = vld [vmem:[#allocation5 + $0x3b8] sm:$0xff] }
0x29fa   :  { %8141 = vmatpush1.bf16.msra.mxu0 %v7978_v12  ;;  %8270 = vmatpush1.bf16.msra.mxu1 %v7980_v40  ;;  %v8039_v12 = vld [vmem:[#allocation5 + $0x3c8] sm:$0xff]  ;;  %v8041_v40 = vld [vmem:[#allocation5 + $0x3d8] sm:$0xff] }
0x29fb   :  { %8153 = vmatprep.subr.bf16.mxu0 %v7983_v25  ;;  %8282 = vmatprep.subr.bf16.mxu1 %v7985_v41  ;;  %v8038_v25 = vld [vmem:[#allocation5 + $0x3c0] sm:$0xff]  ;;  %v8040_v41 = vld [vmem:[#allocation5 + $0x3d0] sm:$0xff] }
0x29fd   :  { %8143 = vmatmul.mubr.bf16.vlgmr.msra.gmra.mrb[96].mxu0 %v7912_v32  ;;  %8272 = vmatmul.mubr.bf16.vlgmr.msra.gmra.mrb[96].mxu1 %v7912_v32  ;;  %v8043_v32 = vld [vmem:[#allocation5 + $0x3e8] sm:$0xff] }
0x29fe   :  { %8154 = vmatpush1.bf16.msra.mxu0 %v7982_v43  ;;  %8283 = vmatpush1.bf16.msra.mxu1 %v7984_v11  ;;  %v7905_v43 = vld [vmem:[#allocation4 + $0x9] sm:$0x1f]  ;;  %v8042_v11 = vld [vmem:[#allocation5 + $0x3e0] sm:$0xff] }
0x29ff   :  { %8155 = vmatprep.subr.bf16.mxu0 %v7987_v31  ;;  %8284 = vmatprep.subr.bf16.mxu1 %v7989_v46  ;;  %v8044_v31 = vld [vmem:[#allocation5 + $0x3f0] sm:$0xff]  ;;  %v8047_v46 = vld [vmem:[#allocation5 + $0x408] sm:$0xff] }
0x2a00   :  { %8185 = vmatprep.mubr.bf16.mxu0 %v7915_v48  ;;  %8314 = vmatprep.mubr.bf16.mxu1 %v7915_v48  ;;  %v8049_v48 = vld [vmem:[#allocation5 + $0x418] sm:$0xff] }
0x2a02   :  { %8156 = vmatpush1.bf16.msra.mxu0 %v7986_v42  ;;  %8285 = vmatpush1.bf16.msra.mxu1 %v7988_v51  ;;  %v7914_v42 = vpack.c.bf16 %v7905_v43, %v7904_v39  ;;  %v7910_v51 = vld [vmem:[#allocation4 + $0x12] sm:$0xff]  ;;  %v8098_v39 = vld [vmem:[#allocation5 + $0x5a0] sm:$0xff] }
0x2a03   :  { %8157 = vmatprep.subr.bf16.mxu0 %v7991_v49  ;;  %8286 = vmatprep.subr.bf16.mxu1 %v7993_v50  ;;  %v7911_v49 = vld [vmem:[#allocation4 + $0x1a] sm:$0x1f]  ;;  %v8046_v50 = vld [vmem:[#allocation5 + $0x400] sm:$0xff]  ;;  %v8100_v43 = vld [vmem:[#allocation5 + $0x5b0] sm:$0xff] }
0x2a06   :  { %8158 = vmatpush1.bf16.msra.mxu0 %v7990_v53  ;;  %8287 = vmatpush1.bf16.msra.mxu1 %v7992_v54  ;;  %v8048_v53 = vld [vmem:[#allocation5 + $0x410] sm:$0xff]  ;;  %v8051_v54 = vld [vmem:[#allocation5 + $0x428] sm:$0xff] }
0x2a07   :  { %8159 = vmatprep.subr.bf16.mxu0 %v7995_v62  ;;  %8288 = vmatprep.subr.bf16.mxu1 %v7997_v63  ;;  %v8053_v62 = vld [vmem:[#allocation5 + $0x438] sm:$0xff]  ;;  %v7917_v63 = vpack.c.bf16 %v7911_v49, %v7910_v51  ;;  %v8457_v49 = vld [vmem:[%s15346_s10 + $0x80] sm:$0xff] }
0x2a08   :  { %v8109_v51 = vld [vmem:[#allocation5 + $0x5f8] sm:$0xff] }
0x2a0a   :  { %8160 = vmatpush1.bf16.msra.mxu0 %v7994_v5  ;;  %8289 = vmatpush1.bf16.msra.mxu1 %v7996_v6  ;;  %v8050_v5 = vld [vmem:[#allocation5 + $0x420] sm:$0xff]  ;;  %v8052_v6 = vld [vmem:[#allocation5 + $0x430] sm:$0xff] }
0x2a0b   :  { %8161 = vmatprep.subr.bf16.mxu0 %v7999_v14  ;;  %8290 = vmatprep.subr.bf16.mxu1 %v8001_v15  ;;  %v8055_v14 = vld [vmem:[#allocation5 + $0x448] sm:$0xff]  ;;  %v8057_v15 = vld [vmem:[#allocation5 + $0x458] sm:$0xff] }
0x2a0e   :  { %8162 = vmatpush1.bf16.msra.mxu0 %v7998_v18  ;;  %8291 = vmatpush1.bf16.msra.mxu1 %v8000_v19  ;;  %v8054_v18 = vld [vmem:[#allocation5 + $0x440] sm:$0xff]  ;;  %v8056_v19 = vld [vmem:[#allocation5 + $0x450] sm:$0xff] }
0x2a0f   :  { %8163 = vmatprep.subr.bf16.mxu0 %v8003_v28  ;;  %8292 = vmatprep.subr.bf16.mxu1 %v8005_v2  ;;  %v8059_v28 = vld [vmem:[#allocation5 + $0x468] sm:$0xff]  ;;  %v8061_v2 = vld [vmem:[#allocation5 + $0x478] sm:$0xff] }
0x2a12   :  { %8164 = vmatpush1.bf16.msra.mxu0 %v8002_v34  ;;  %8293 = vmatpush1.bf16.msra.mxu1 %v8004_v45  ;;  %v8058_v34 = vld [vmem:[#allocation5 + $0x460] sm:$0xff]  ;;  %v8060_v45 = vld [vmem:[#allocation5 + $0x470] sm:$0xff] }
0x2a13   :  { %8165 = vmatprep.subr.bf16.mxu0 %v8007_v52  ;;  %8294 = vmatprep.subr.bf16.mxu1 %v8009_v55  ;;  %v8063_v52 = vld [vmem:[#allocation5 + $0x488] sm:$0xff]  ;;  %v8065_v55 = vld [vmem:[#allocation5 + $0x498] sm:$0xff] }
0x2a16   :  { %8166 = vmatpush1.bf16.msra.mxu0 %v8006_v44  ;;  %8295 = vmatpush1.bf16.msra.mxu1 %v8008_v60  ;;  %v8062_v44 = vld [vmem:[#allocation5 + $0x480] sm:$0xff]  ;;  %v8064_v60 = vld [vmem:[#allocation5 + $0x490] sm:$0xff] }
0x2a17   :  { %8167 = vmatprep.subr.bf16.mxu0 %v8011_v29  ;;  %8296 = vmatprep.subr.bf16.mxu1 %v8013_v61  ;;  %v8067_v29 = vld [vmem:[#allocation5 + $0x4a8] sm:$0xff]  ;;  %v8069_v61 = vld [vmem:[#allocation5 + $0x4b8] sm:$0xff] }
0x2a1a   :  { %8168 = vmatpush1.bf16.msra.mxu0 %v8010_v33  ;;  %8297 = vmatpush1.bf16.msra.mxu1 %v8012_v8  ;;  %v8066_v33 = vld [vmem:[#allocation5 + $0x4a0] sm:$0xff]  ;;  %v8068_v8 = vld [vmem:[#allocation5 + $0x4b0] sm:$0xff] }
0x2a1b   :  { %8169 = vmatprep.subr.bf16.mxu0 %v8015_v9  ;;  %8298 = vmatprep.subr.bf16.mxu1 %v8017_v17  ;;  %v8071_v9 = vld [vmem:[#allocation5 + $0x4c8] sm:$0xff]  ;;  %v8073_v17 = vld [vmem:[#allocation5 + $0x4d8] sm:$0xff] }
0x2a1e   :  { %8170 = vmatpush1.bf16.msra.mxu0 %v8014_v20  ;;  %8299 = vmatpush1.bf16.msra.mxu1 %v8016_v21  ;;  %v8070_v20 = vld [vmem:[#allocation5 + $0x4c0] sm:$0xff]  ;;  %v8072_v21 = vld [vmem:[#allocation5 + $0x4d0] sm:$0xff] }
0x2a1f   :  { %8171 = vmatprep.subr.bf16.mxu0 %v8019_v23  ;;  %8300 = vmatprep.subr.bf16.mxu1 %v8021_v7  ;;  %v8075_v23 = vld [vmem:[#allocation5 + $0x4e8] sm:$0xff]  ;;  %v8077_v7 = vld [vmem:[#allocation5 + $0x4f8] sm:$0xff] }
0x2a22   :  { %8172 = vmatpush1.bf16.msra.mxu0 %v8018_v0  ;;  %8301 = vmatpush1.bf16.msra.mxu1 %v8020_v47  ;;  %v8074_v0 = vld [vmem:[#allocation5 + $0x4e0] sm:$0xff]  ;;  %v8076_v47 = vld [vmem:[#allocation5 + $0x4f0] sm:$0xff] }
0x2a23   :  { %8173 = vmatprep.subr.bf16.mxu0 %v8023_v58  ;;  %8302 = vmatprep.subr.bf16.mxu1 %v8025_v59  ;;  %v8079_v58 = vld [vmem:[#allocation5 + $0x508] sm:$0xff]  ;;  %v8081_v59 = vld [vmem:[#allocation5 + $0x518] sm:$0xff] }
0x2a26   :  { %8174 = vmatpush1.bf16.msra.mxu0 %v8022_v4  ;;  %8303 = vmatpush1.bf16.msra.mxu1 %v8024_v56  ;;  %v8078_v4 = vld [vmem:[#allocation5 + $0x500] sm:$0xff]  ;;  %v8080_v56 = vld [vmem:[#allocation5 + $0x510] sm:$0xff] }
0x2a27   :  { %8175 = vmatprep.subr.bf16.mxu0 %v8027_v16  ;;  %8304 = vmatprep.subr.bf16.mxu1 %v8029_v57  ;;  %v8083_v16 = vld [vmem:[#allocation5 + $0x528] sm:$0xff]  ;;  %v8085_v57 = vld [vmem:[#allocation5 + $0x538] sm:$0xff] }
0x2a2a   :  { %8176 = vmatpush1.bf16.msra.mxu0 %v8026_v36  ;;  %8305 = vmatpush1.bf16.msra.mxu1 %v8028_v3  ;;  %v8082_v36 = vld [vmem:[#allocation5 + $0x520] sm:$0xff]  ;;  %v8084_v3 = vld [vmem:[#allocation5 + $0x530] sm:$0xff] }
0x2a2b   :  { %8177 = vmatprep.subr.bf16.mxu0 %v8031_v10  ;;  %8306 = vmatprep.subr.bf16.mxu1 %v8033_v37  ;;  %v8087_v10 = vld [vmem:[#allocation5 + $0x548] sm:$0xff]  ;;  %v8089_v37 = vld [vmem:[#allocation5 + $0x558] sm:$0xff] }
0x2a2e   :  { %8178 = vmatpush1.bf16.msra.mxu0 %v8030_v35  ;;  %8307 = vmatpush1.bf16.msra.mxu1 %v8032_v38  ;;  %v8086_v35 = vld [vmem:[#allocation5 + $0x540] sm:$0xff]  ;;  %v8088_v38 = vld [vmem:[#allocation5 + $0x550] sm:$0xff] }
0x2a2f   :  { %8179 = vmatprep.subr.bf16.mxu0 %v8035_v22  ;;  %8308 = vmatprep.subr.bf16.mxu1 %v8037_v13  ;;  %v8091_v22 = vld [vmem:[#allocation5 + $0x568] sm:$0xff]  ;;  %v8093_v13 = vld [vmem:[#allocation5 + $0x578] sm:$0xff] }
0x2a32   :  { %8180 = vmatpush1.bf16.msra.mxu0 %v8034_v24  ;;  %8309 = vmatpush1.bf16.msra.mxu1 %v8036_v30  ;;  %v8090_v24 = vld [vmem:[#allocation5 + $0x560] sm:$0xff]  ;;  %v8092_v30 = vld [vmem:[#allocation5 + $0x570] sm:$0xff] }
0x2a33   :  { %8181 = vmatprep.subr.bf16.mxu0 %v8039_v12  ;;  %8310 = vmatprep.subr.bf16.mxu1 %v8041_v40  ;;  %v8095_v12 = vld [vmem:[#allocation5 + $0x588] sm:$0xff]  ;;  %v8097_v40 = vld [vmem:[#allocation5 + $0x598] sm:$0xff] }
0x2a36   :  { %8182 = vmatpush1.bf16.msra.mxu0 %v8038_v25  ;;  %8311 = vmatpush1.bf16.msra.mxu1 %v8040_v41  ;;  %v8094_v25 = vld [vmem:[#allocation5 + $0x580] sm:$0xff]  ;;  %v8096_v41 = vld [vmem:[#allocation5 + $0x590] sm:$0xff] }
0x2a37   :  { %8183 = vmatprep.subr.bf16.mxu0 %v8043_v32  ;;  %8312 = vmatprep.subr.bf16.mxu1 %v8045_v27  ;;  %v8099_v32 = vld [vmem:[#allocation5 + $0x5a8] sm:$0xff]  ;;  %v8101_v27 = vld [vmem:[#allocation5 + $0x5b8] sm:$0xff] }
0x2a3a   :  { %8184 = vmatpush1.bf16.msra.mxu0 %v8042_v11  ;;  %8313 = vmatpush1.bf16.msra.mxu1 %v8044_v31  ;;  %v8103_v11 = vld [vmem:[#allocation5 + $0x5c8] sm:$0xff]  ;;  %v8105_v31 = vld [vmem:[#allocation5 + $0x5d8] sm:$0xff] }
0x2a3b   :  { %8196 = vmatprep.subr.bf16.mxu0 %v8047_v46  ;;  %8325 = vmatprep.subr.bf16.mxu1 %v8049_v48  ;;  %v8102_v46 = vld [vmem:[#allocation5 + $0x5c0] sm:$0xff]  ;;  %v8104_v48 = vld [vmem:[#allocation5 + $0x5d0] sm:$0xff] }
0x2a3d   :  { %8186 = vmatmul.mubr.bf16.vlgmr.msra.gmra.mrb[96].mxu0 %v7914_v42  ;;  %8315 = vmatmul.mubr.bf16.vlgmr.msra.gmra.mrb[96].mxu1 %v7914_v42  ;;  %v8107_v42 = vld [vmem:[#allocation5 + $0x5e8] sm:$0xff] }
0x2a3e   :  { %8197 = vmatpush1.bf16.msra.mxu0 %v8046_v50  ;;  %8326 = vmatpush1.bf16.msra.mxu1 %v8048_v53  ;;  %v8458_v50 = vld [vmem:[%s15346_s10 + $0x88] sm:$0xff]  ;;  %v8489_v53 = vld [vmem:[%s15346_s10 + $0x180] sm:$0xff] }
0x2a3f   :  { %8198 = vmatprep.subr.bf16.mxu0 %v8051_v54  ;;  %8327 = vmatprep.subr.bf16.mxu1 %v8053_v62  ;;  %v8490_v54 = vld [vmem:[%s15346_s10 + $0x188] sm:$0xff]  ;;  %v8106_v62 = vld [vmem:[#allocation5 + $0x5e0] sm:$0xff] }
0x2a40   :  { %8228 = vmatprep.mubr.bf16.mxu0 %v7917_v63  ;;  %8357 = vmatprep.mubr.bf16.mxu1 %v7917_v63  ;;  %v8108_v63 = vld [vmem:[#allocation5 + $0x5f0] sm:$0xff] }
0x2a42   :  { %8199 = vmatpush1.bf16.msra.mxu0 %v8050_v5  ;;  %8328 = vmatpush1.bf16.msra.mxu1 %v8052_v6  ;;  %v7908_v5 = vld [vmem:[#allocation4 + $0x2] sm:$0xff]  ;;  %v7909_v6 = vld [vmem:[#allocation4 + $0xa] sm:$0x1f] }
0x2a43   :  { %8200 = vmatprep.subr.bf16.mxu0 %v8055_v14  ;;  %8329 = vmatprep.subr.bf16.mxu1 %v8057_v15  ;;  %v8441_v14 = vld [vmem:[%s15346_s10] sm:$0xff]  ;;  %v8442_v15 = vld [vmem:[%s15346_s10 + $0x8] sm:$0xff] }
0x2a46   :  { %8201 = vmatpush1.bf16.msra.mxu0 %v8054_v18  ;;  %8330 = vmatpush1.bf16.msra.mxu1 %v8056_v19  ;;  %v14705_v18 = vpack.c.bf16 %v8458_v50, %v8457_v49  ;;  %v14707_v19 = vpack.c.bf16 %v8490_v54, %v8489_v53  ;;  %v8481_v49 = vld [vmem:[%s15346_s10 + $0x140] sm:$0xff]  ;;  %v8482_v50 = vld [vmem:[%s15346_s10 + $0x148] sm:$0xff]  ;;  %v8467_v54 = vld [vmem:[%s15346_s10 + $0xd0] sm:$0xff] }
0x2a47   :  { %8202 = vmatprep.subr.bf16.mxu0 %v8059_v28  ;;  %8331 = vmatprep.subr.bf16.mxu1 %v8061_v2  ;;  %v8473_v28 = vld [vmem:[%s15346_s10 + $0x100] sm:$0xff]  ;;  %v8474_v2 = vld [vmem:[%s15346_s10 + $0x108] sm:$0xff]  ;;  %v14862_v53 = vpack.c.bf16 %v8482_v50, %v8481_v49 }
0x2a4a   :  { %8203 = vmatpush1.bf16.msra.mxu0 %v8058_v34  ;;  %8332 = vmatpush1.bf16.msra.mxu1 %v8060_v45  ;;  %v8459_v34 = vld [vmem:[%s15346_s10 + $0x90] sm:$0xff]  ;;  %v8460_v45 = vld [vmem:[%s15346_s10 + $0x98] sm:$0xff] }
0x2a4b   :  { %8204 = vmatprep.subr.bf16.mxu0 %v8063_v52  ;;  %8333 = vmatprep.subr.bf16.mxu1 %v8065_v55  ;;  %v8491_v52 = vld [vmem:[%s15346_s10 + $0x190] sm:$0xff]  ;;  %v8492_v55 = vld [vmem:[%s15346_s10 + $0x198] sm:$0xff] }
0x2a4e   :  { %8205 = vmatpush1.bf16.msra.mxu0 %v8062_v44  ;;  %8334 = vmatpush1.bf16.msra.mxu1 %v8064_v60  ;;  %v7916_v44 = vpack.c.bf16 %v7909_v6, %v7908_v5  ;;  %v14727_v60 = vpack.c.bf16 %v8442_v15, %v8441_v14  ;;  %v8500_v6 = vld [vmem:[%s15346_s10 + $0x1d8] sm:$0xff]  ;;  %v8451_v14 = vld [vmem:[%s15346_s10 + $0x50] sm:$0xff] }
0x2a4f   :  { %8206 = vmatprep.subr.bf16.mxu0 %v8067_v29  ;;  %8335 = vmatprep.subr.bf16.mxu1 %v8069_v61  ;;  %v14729_v29 = vpack.c.bf16 %v8474_v2, %v8473_v28  ;;  %v8443_v61 = vld [vmem:[%s15346_s10 + $0x10] sm:$0xff]  ;;  %v8452_v15 = vld [vmem:[%s15346_s10 + $0x58] sm:$0xff] }
0x2a50   :  { %v14889_v2 = vpack.c.bf16 %v8452_v15, %v8451_v14 }
0x2a52   :  { %8207 = vmatpush1.bf16.msra.mxu0 %v8066_v33  ;;  %8336 = vmatpush1.bf16.msra.mxu1 %v8068_v8  ;;  %v8444_v33 = vld [vmem:[%s15346_s10 + $0x18] sm:$0xff]  ;;  %v14739_v8 = vpack.c.bf16 %v8460_v45, %v8459_v34  ;;  %v8483_v34 = vld [vmem:[%s15346_s10 + $0x150] sm:$0xff] }
0x2a53   :  { %8208 = vmatprep.subr.bf16.mxu0 %v8071_v9  ;;  %8337 = vmatprep.subr.bf16.mxu1 %v8073_v17  ;;  %v14741_v9 = vpack.c.bf16 %v8492_v55, %v8491_v52  ;;  %v8475_v17 = vld [vmem:[%s15346_s10 + $0x110] sm:$0xff]  ;;  %v8484_v45 = vld [vmem:[%s15346_s10 + $0x158] sm:$0xff]  ;;  %v8469_v55 = vld [vmem:[%s15346_s10 + $0xe0] sm:$0xff] }
0x2a54   :  { %v14898_v52 = vpack.c.bf16 %v8484_v45, %v8483_v34 }
0x2a56   :  { %8209 = vmatpush1.bf16.msra.mxu0 %v8070_v20  ;;  %8338 = vmatpush1.bf16.msra.mxu1 %v8072_v21  ;;  %v8476_v20 = vld [vmem:[%s15346_s10 + $0x118] sm:$0xff]  ;;  %v8461_v21 = vld [vmem:[%s15346_s10 + $0xa0] sm:$0xff] }
0x2a57   :  { %8210 = vmatprep.subr.bf16.mxu0 %v8075_v23  ;;  %8339 = vmatprep.subr.bf16.mxu1 %v8077_v7  ;;  %v8462_v23 = vld [vmem:[%s15346_s10 + $0xa8] sm:$0xff]  ;;  %v8493_v7 = vld [vmem:[%s15346_s10 + $0x1a0] sm:$0xff] }
0x2a5a   :  { %8211 = vmatpush1.bf16.msra.mxu0 %v8074_v0  ;;  %8340 = vmatpush1.bf16.msra.mxu1 %v8076_v47  ;;  %v8494_v0 = vld [vmem:[%s15346_s10 + $0x1a8] sm:$0xff]  ;;  %v14763_v47 = vpack.c.bf16 %v8444_v33, %v8443_v61  ;;  %v8501_v61 = vld [vmem:[%s15346_s10 + $0x1e0] sm:$0xff] }
0x2a5b   :  { %8212 = vmatprep.subr.bf16.mxu0 %v8079_v58  ;;  %8341 = vmatprep.subr.bf16.mxu1 %v8081_v59  ;;  %v14765_v58 = vpack.c.bf16 %v8476_v20, %v8475_v17  ;;  %v8445_v59 = vld [vmem:[%s15346_s10 + $0x20] sm:$0xff]  ;;  %v8502_v17 = vld [vmem:[%s15346_s10 + $0x1e8] sm:$0xff] }
0x2a5c   :  { %v8453_v20 = vld [vmem:[%s15346_s10 + $0x60] sm:$0xff] }
0x2a5e   :  { %8213 = vmatpush1.bf16.msra.mxu0 %v8078_v4  ;;  %8342 = vmatpush1.bf16.msra.mxu1 %v8080_v56  ;;  %v8446_v4 = vld [vmem:[%s15346_s10 + $0x28] sm:$0xff]  ;;  %v14775_v56 = vpack.c.bf16 %v8462_v23, %v8461_v21  ;;  %v14923_v23 = vpack.c.bf16 %v8502_v17, %v8501_v61 }
0x2a5f   :  { %8214 = vmatprep.subr.bf16.mxu0 %v8083_v16  ;;  %8343 = vmatprep.subr.bf16.mxu1 %v8085_v57  ;;  %v14777_v16 = vpack.c.bf16 %v8494_v0, %v8493_v7  ;;  %v8477_v57 = vld [vmem:[%s15346_s10 + $0x120] sm:$0xff]  ;;  %v8454_v21 = vld [vmem:[%s15346_s10 + $0x68] sm:$0xff] }
0x2a60   :  { %v14925_v7 = vpack.c.bf16 %v8454_v21, %v8453_v20  ;;  %v8485_v0 = vld [vmem:[%s15346_s10 + $0x160] sm:$0xff] }
0x2a62   :  { %8215 = vmatpush1.bf16.msra.mxu0 %v8082_v36  ;;  %8344 = vmatpush1.bf16.msra.mxu1 %v8084_v3  ;;  %v8478_v36 = vld [vmem:[%s15346_s10 + $0x128] sm:$0xff]  ;;  %v8463_v3 = vld [vmem:[%s15346_s10 + $0xb0] sm:$0xff] }
0x2a63   :  { %8216 = vmatprep.subr.bf16.mxu0 %v8087_v10  ;;  %8345 = vmatprep.subr.bf16.mxu1 %v8089_v37  ;;  %v8464_v10 = vld [vmem:[%s15346_s10 + $0xb8] sm:$0xff]  ;;  %v8495_v37 = vld [vmem:[%s15346_s10 + $0x1b0] sm:$0xff] }
0x2a66   :  { %8217 = vmatpush1.bf16.msra.mxu0 %v8086_v35  ;;  %8346 = vmatpush1.bf16.msra.mxu1 %v8088_v38  ;;  %v8496_v35 = vld [vmem:[%s15346_s10 + $0x1b8] sm:$0xff]  ;;  %v14799_v38 = vpack.c.bf16 %v8446_v4, %v8445_v59  ;;  %v8486_v59 = vld [vmem:[%s15346_s10 + $0x168] sm:$0xff]  ;;  %v8471_v4 = vld [vmem:[%s15346_s10 + $0xf0] sm:$0xff] }
0x2a67   :  { %8218 = vmatprep.subr.bf16.mxu0 %v8091_v22  ;;  %8347 = vmatprep.subr.bf16.mxu1 %v8093_v13  ;;  %v14801_v22 = vpack.c.bf16 %v8478_v36, %v8477_v57  ;;  %v14805_v13 = vpack.c.bf16 %v8464_v10, %v8463_v3  ;;  %v14937_v57 = vpack.c.bf16 %v8486_v59, %v8485_v0  ;;  %v8472_v36 = vld [vmem:[%s15346_s10 + $0xf8] sm:$0xff]  ;;  %v8503_v3 = vld [vmem:[%s15346_s10 + $0x1f0] sm:$0xff] }
0x2a68   :  { %v8504_v10 = vld [vmem:[%s15346_s10 + $0x1f8] sm:$0xff] }
0x2a6a   :  { %8219 = vmatpush1.bf16.msra.mxu0 %v8090_v24  ;;  %8348 = vmatpush1.bf16.msra.mxu1 %v8092_v30  ;;  %v14807_v24 = vpack.c.bf16 %v8496_v35, %v8495_v37  ;;  %v8447_v30 = vld [vmem:[%s15346_s10 + $0x30] sm:$0xff]  ;;  %v14950_v37 = vpack.c.bf16 %v8472_v36, %v8471_v4  ;;  %v14952_v35 = vpack.c.bf16 %v8504_v10, %v8503_v3 }
0x2a6b   :  { %8220 = vmatprep.subr.bf16.mxu0 %v8095_v12  ;;  %8349 = vmatprep.subr.bf16.mxu1 %v8097_v40  ;;  %v8448_v12 = vld [vmem:[%s15346_s10 + $0x38] sm:$0xff]  ;;  %v8479_v40 = vld [vmem:[%s15346_s10 + $0x130] sm:$0xff] }
0x2a6e   :  { %8221 = vmatpush1.bf16.msra.mxu0 %v8094_v25  ;;  %8350 = vmatpush1.bf16.msra.mxu1 %v8096_v41  ;;  %v14822_v25 = vpack.c.bf16 %v8448_v12, %v8447_v30  ;;  %v8480_v41 = vld [vmem:[%s15346_s10 + $0x138] sm:$0xff]  ;;  %v8455_v30 = vld [vmem:[%s15346_s10 + $0x70] sm:$0xff] }
0x2a6f   :  { %8222 = vmatprep.subr.bf16.mxu0 %v8099_v32  ;;  %8351 = vmatprep.subr.bf16.mxu1 %v8101_v27  ;;  %v14827_v32 = vpack.c.bf16 %v8480_v41, %v8479_v40  ;;  %v8465_v27 = vld [vmem:[%s15346_s10 + $0xc0] sm:$0xff]  ;;  %v8456_v12 = vld [vmem:[%s15346_s10 + $0x78] sm:$0xff]  ;;  %v8487_v40 = vld [vmem:[%s15346_s10 + $0x170] sm:$0xff] }
0x2a70   :  { %v14964_v41 = vpack.c.bf16 %v8456_v12, %v8455_v30 }
0x2a72   :  { %8223 = vmatpush1.bf16.msra.mxu0 %v8098_v39  ;;  %8352 = vmatpush1.bf16.msra.mxu1 %v8100_v43  ;;  %v8466_v39 = vld [vmem:[%s15346_s10 + $0xc8] sm:$0xff]  ;;  %v8497_v43 = vld [vmem:[%s15346_s10 + $0x1c0] sm:$0xff] }
0x2a73   :  { %8224 = vmatprep.subr.bf16.mxu0 %v8103_v11  ;;  %8353 = vmatprep.subr.bf16.mxu1 %v8105_v31  ;;  %v14840_v11 = vpack.c.bf16 %v8466_v39, %v8465_v27  ;;  %v8498_v31 = vld [vmem:[%s15346_s10 + $0x1c8] sm:$0xff]  ;;  %v8488_v27 = vld [vmem:[%s15346_s10 + $0x178] sm:$0xff] }
0x2a74   :  { %v14971_v39 = vpack.c.bf16 %v8488_v27, %v8487_v40 }
0x2a76   :  { %8225 = vmatpush1.bf16.msra.mxu0 %v8102_v46  ;;  %8354 = vmatpush1.bf16.msra.mxu1 %v8104_v48  ;;  %v8449_v46 = vld [vmem:[%s15346_s10 + $0x40] sm:$0xff]  ;;  %v8450_v48 = vld [vmem:[%s15346_s10 + $0x48] sm:$0xff] }
0x2a77   :  { %8226 = vmatprep.subr.bf16.mxu0 %v8107_v42  ;;  %8355 = vmatprep.subr.bf16.mxu1 %v8109_v51  ;;  %v14851_v42 = vpack.c.bf16 %v8498_v31, %v8497_v43  ;;  %v14853_v51 = vpack.c.bf16 %v8450_v48, %v8449_v46 }
0x2a7a   :  { %8227 = vmatpush1.bf16.msra.mxu0 %v8106_v62  ;;  %8356 = vmatpush1.bf16.msra.mxu1 %v8108_v63  ;;  %v8468_v62 = vld [vmem:[%s15346_s10 + $0xd8] sm:$0xff]  ;;  %v8499_v63 = vld [vmem:[%s15346_s10 + $0x1d0] sm:$0xff] }
0x2a7b   :  { %11930 = vmatprep.subr.bf16.mxu0 %v14705_v18  ;;  %11962 = vmatprep.subr.bf16.mxu1 %v14707_v19  ;;  %v14876_v5 = vpack.c.bf16 %v8468_v62, %v8467_v54  ;;  %v14887_v28 = vpack.c.bf16 %v8500_v6, %v8499_v63 }
0x2a7d   :  { %8229 = vmatmul.mubr.bf16.vlgmr.msra.gmra.mrb[96].mxu0 %v7916_v44  ;;  %8358 = vmatmul.mubr.bf16.vlgmr.msra.gmra.mrb[96].mxu1 %v7916_v44  ;;  %v8470_v44 = vld [vmem:[%s15346_s10 + $0xe8] sm:$0xff] }
0x2a7e   :  { %11932 = vmatpush3.bf16.msra.mxu0 %v14727_v60  ;;  %11964 = vmatpush3.bf16.msra.mxu1 %v14729_v29  ;;  %v14912_v33 = vpack.c.bf16 %v8470_v44, %v8469_v55 }
0x2a7f   :  { %11934 = vmatprep.subr.bf16.mxu0 %v14739_v8  ;;  %11966 = vmatprep.subr.bf16.mxu1 %v14741_v9 }
0x2a82   :  { %11936 = vmatpush3.bf16.msra.mxu0 %v14763_v47  ;;  %11968 = vmatpush3.bf16.msra.mxu1 %v14765_v58 }
0x2a83   :  { %11938 = vmatprep.subr.bf16.mxu0 %v14775_v56  ;;  %11970 = vmatprep.subr.bf16.mxu1 %v14777_v16 }
0x2a86   :  { %11940 = vmatpush3.bf16.msra.mxu0 %v14799_v38  ;;  %11972 = vmatpush3.bf16.msra.mxu1 %v14801_v22 }
0x2a87   :  { %11942 = vmatprep.subr.bf16.mxu0 %v14805_v13  ;;  %11974 = vmatprep.subr.bf16.mxu1 %v14807_v24 }
0x2a8a   :  { %11944 = vmatpush3.bf16.msra.mxu0 %v14822_v25  ;;  %11976 = vmatpush3.bf16.msra.mxu1 %v14827_v32 }
0x2a8b   :  { %11946 = vmatprep.subr.bf16.mxu0 %v14840_v11  ;;  %11978 = vmatprep.subr.bf16.mxu1 %v14851_v42 }
0x2a8e   :  { %11948 = vmatpush3.bf16.msra.mxu0 %v14853_v51  ;;  %11980 = vmatpush3.bf16.msra.mxu1 %v14862_v53 }
0x2a8f   :  { %11950 = vmatprep.subr.bf16.mxu0 %v14876_v5  ;;  %11982 = vmatprep.subr.bf16.mxu1 %v14887_v28 }
0x2a92   :  { %11952 = vmatpush3.bf16.msra.mxu0 %v14889_v2  ;;  %11984 = vmatpush3.bf16.msra.mxu1 %v14898_v52 }
0x2a93   :  { %11954 = vmatprep.subr.bf16.mxu0 %v14912_v33  ;;  %11986 = vmatprep.subr.bf16.mxu1 %v14923_v23 }
0x2a96   :  { %11956 = vmatpush3.bf16.msra.mxu0 %v14925_v7  ;;  %11988 = vmatpush3.bf16.msra.mxu1 %v14937_v57 }
0x2a97   :  { %11958 = vmatprep.subr.bf16.mxu0 %v14950_v37  ;;  %11990 = vmatprep.subr.bf16.mxu1 %v14952_v35 }
0x2a9a   :  { %11960 = vmatpush3.bf16.msra.mxu0 %v14964_v41  ;;  %11992 = vmatpush3.bf16.msra.mxu1 %v14971_v39 }
0x2a9b   :  { %11994 = vmatprep.subr.bf16.mxu0 %v14705_v18  ;;  %12026 = vmatprep.subr.bf16.mxu1 %v14707_v19 }
0x2b50   :  { %v14977_v43 = vpop.f32.mrb[96].mxu0  ;;  %v14979_v31 = vpop.f32.mrb[96].mxu1 }
0x2b51   :  { %15362 = vst [vmem:[#allocation13_spill] sm:$0xff] %v14977_v43  ;;  %15363 = vst [vmem:[#allocation14_spill] sm:$0xff] %v14979_v31  ;;  %v14981_v46 = vpop.f32.mrb[97].mxu0  ;;  %v14983_v48 = vpop.f32.mrb[97].mxu1  ;;  %v8401_v49 = vmul.f32 %v14977_v43, %v14977_v43  ;;  %v8403_v50 = vmul.f32 %v14979_v31, %v14979_v31 }
0x2b52   :  { %15364 = vst [vmem:[#allocation15_spill] sm:$0xff] %v14981_v46  ;;  %15365 = vst [vmem:[#allocation16_spill] sm:$0xff] %v14983_v48  ;;  %v8402_v18 = vmul.f32 %v14981_v46, %v14981_v46  ;;  %v14991_v54 = vpop.f32.mrb[98].mxu0  ;;  %v14993_v19 = vpop.f32.mrb[98].mxu1  ;;  %v8404_v27 = vmul.f32 %v14983_v48, %v14983_v48 }
0x2b53   :  { %15366 = vst [vmem:[#allocation17_spill] sm:$0xff] %v14991_v54  ;;  %15367 = vst [vmem:[#allocation18_spill] sm:$0xff] %v14993_v19  ;;  %v8369_v62 = vsel %vm8368_vm5, %v14991_v54, 0.0  ;;  %v8405_v63 = vmul.f32 %v14991_v54, %v14991_v54  ;;  %v8385_v6 = vsel %vm8368_vm5, %v14993_v19, 0.0  ;;  %v8407_v14 = vmul.f32 %v14993_v19, %v14993_v19  ;;  %v15003_v15 = vpop.f32.mrb[99].mxu0  ;;  %v15005_v34 = vpop.f32.mrb[99].mxu1 }
0x2b54   :  { %15368 = vst [vmem:[#allocation19_spill] sm:$0xff] %v15003_v15  ;;  %15369 = vst [vmem:[#allocation20_spill] sm:$0xff] %v15005_v34  ;;  %v8370_v45 = vadd.f32 %v8369_v62, %v14977_v43  ;;  %v8386_v55 = vadd.f32 %v8385_v6, %v14979_v31  ;;  %v8377_v44 = vsel %vm8368_vm5, %v15003_v15, 0.0  ;;  %v8406_v61 = vmul.f32 %v15003_v15, %v15003_v15 }
0x2b55   :  { %v8409_v17 = vsel %vm8368_vm5, %v8405_v63, 0.0  ;;  %v8425_v20 = vsel %vm8368_vm5, %v8407_v14, 0.0  ;;  %v8378_v21 = vadd.f32 %v8377_v44, %v14981_v46  ;;  %v8393_v0 = vsel %vm8368_vm5, %v15005_v34, 0.0 }
0x2b56   :  { %v8371_v59 = vrot.slane %v8370_v45, 4  ;;  %v15018_v4 = vadd.f32 %v8409_v17, %v8401_v49  ;;  %v8387_v36 = vrot.slane %v8386_v55, 4  ;;  %v15020_v3 = vadd.f32 %v8425_v20, %v8403_v50 }
0x2b57   :  { %v8379_v10 = vrot.slane %v8378_v21, 4  ;;  %v8417_v30 = vsel %vm8368_vm5, %v8406_v61, 0.0  ;;  %v8394_v12 = vadd.f32 %v8393_v0, %v14983_v48  ;;  %v8408_v40 = vmul.f32 %v15005_v34, %v15005_v34 }
0x2b58   :  { %v8372_v62 = vadd.f32 %v8371_v59, %v8370_v45  ;;  %v8388_v63 = vadd.f32 %v8387_v36, %v8386_v55  ;;  %v8418_v14 = vadd.f32 %v8417_v30, %v8402_v18 }
0x2b59   :  { %v8380_v6 = vadd.f32 %v8379_v10, %v8378_v21  ;;  %v8395_v49 = vrot.slane %v8394_v12, 4  ;;  %v8433_v44 = vsel %vm8368_vm5, %v8408_v40, 0.0 }
0x2b5a   :  { %v8373_v50 = vrot.slane %v8372_v62, 2  ;;  %v8389_v17 = vrot.slane %v8388_v63, 2  ;;  %v8419_v20 = vrot.slane %v8418_v14, 4  ;;  %v8434_v61 = vadd.f32 %v8433_v44, %v8404_v27  ;;  %v9214_v44 = vld [vmem:[%s15349_s13 + $0x80] sm:$0xff] }
0x2b5b   :  { %v8396_v1 = vadd.f32 %v8395_v49, %v8394_v12  ;;  %v8381_v15 = vrot.slane %v8380_v6, 2 }
0x2b5c   :  { %v8374_v0 = vadd.f32 %v8373_v50, %v8372_v62  ;;  %v8390_v46 = vadd.f32 %v8389_v17, %v8388_v63  ;;  %v8435_v19 = vrot.slane %v8434_v61, 4  ;;  %v8420_v54 = vadd.f32 %v8419_v20, %v8418_v14  ;;  %v9215_v50 = vld [vmem:[%s15349_s13 + $0x88] sm:$0xff]  ;;  %v9246_v17 = vld [vmem:[%s15349_s13 + $0x180] sm:$0xff] }
0x2b5d   :  { %v8382_v34 = vadd.f32 %v8381_v15, %v8380_v6  ;;  %v8397_v31 = vrot.slane %v8396_v1, 2  ;;  %v12057_v20 = vpack.c.bf16 %v9215_v50, %v9214_v44  ;;  %v9257_v50 = vld [vmem:[%s15349_s13 + $0x1d8] sm:$0xff] }
0x2b5e   :  { %v8375_v48 = vrot.slane %v8374_v0, 1  ;;  %v8421_v21 = vrot.slane %v8420_v54, 2  ;;  %v8436_v18 = vadd.f32 %v8435_v19, %v8434_v61  ;;  %v8391_v59 = vrot.slane %v8390_v46, 1  ;;  %v8790_v19 = vld [vmem:[%s15344_s8] sm:$0x1]  ;;  %v9247_v61 = vld [vmem:[%s15349_s13 + $0x188] sm:$0xff] }
0x2b5f   :  { %v8383_v45 = vrot.slane %v8382_v34, 1  ;;  %v8398_v55 = vadd.f32 %v8397_v31, %v8396_v1 }
0x2b60   :  { %v8422_v30 = vadd.f32 %v8421_v21, %v8420_v54  ;;  %v8437_v40 = vrot.slane %v8436_v18, 2  ;;  %v8376_v43 = vadd.f32 %v8375_v48, %v8374_v0  ;;  %v8392_v63 = vadd.f32 %v8391_v59, %v8390_v46  ;;  %v9198_v0 = vld [vmem:[%s15349_s13] sm:$0xff]  ;;  %v9231_v59 = vld [vmem:[%s15349_s13 + $0x108] sm:$0xff] }
0x2b61   :  { %v8384_v36 = vadd.f32 %v8383_v45, %v8382_v34  ;;  %v8399_v10 = vrot.slane %v8398_v55, 1  ;;  %v9199_v45 = vld [vmem:[%s15349_s13 + $0x8] sm:$0xff] }
0x2b62   :  { %v8423_v27 = vrot.slane %v8422_v30, 1  ;;  %v8438_v62 = vadd.f32 %v8437_v40, %v8436_v18  ;;  %v12059_v21 = vpack.c.bf16 %v9199_v45, %v9198_v0  ;;  %v9230_v18 = vld [vmem:[%s15349_s13 + $0x100] sm:$0xff]  ;;  %v9248_v40 = vld [vmem:[%s15349_s13 + $0x190] sm:$0xff] }
0x2b63   :  { %8569 = vmatprep.mubr.f32.mxu0 %v8384_v36  ;;  %v8400_v12 = vadd.f32 %v8399_v10, %v8398_v55  ;;  %v12089_v55 = vpack.c.bf16 %v9247_v61, %v9246_v17  ;;  %v12091_v36 = vpack.c.bf16 %v9231_v59, %v9230_v18  ;;  %v9216_v10 = vld [vmem:[%s15349_s13 + $0x90] sm:$0xff]  ;;  %v9227_v59 = vld [vmem:[%s15349_s13 + $0xe8] sm:$0xff] }
0x2b64   :  { %8570 = vmatmul.mubr.f32.vlgmr.msra.gmra.mrb[70].mxu0 %v8376_v43  ;;  %v8424_v15 = vadd.f32 %v8423_v27, %v8422_v30  ;;  %v8439_v6 = vrot.slane %v8438_v62, 1  ;;  %v9217_v30 = vld [vmem:[%s15349_s13 + $0x98] sm:$0xff]  ;;  %v9208_v17 = vld [vmem:[%s15349_s13 + $0x50] sm:$0xff] }
0x2b65   :  { %8639 = vmatprep.mubr.f32.mxu1 %v8400_v12  ;;  %11996 = vmatpush3.bf16.msra.mxu0 %v14727_v60  ;;  %v8411_v60 = vrot.slane %v15018_v4, 4  ;;  %v12061_v12 = vpack.c.bf16 %v9217_v30, %v9216_v10  ;;  %v9249_v27 = vld [vmem:[%s15349_s13 + $0x198] sm:$0xff]  ;;  %v9240_v45 = vld [vmem:[%s15349_s13 + $0x150] sm:$0xff]  ;;  %v9259_v10 = vld [vmem:[%s15349_s13 + $0x1e8] sm:$0xff] }
0x2b66   :  { %8640 = vmatmul.mubr.f32.vlgmr.msra.gmra.mrb[70].mxu1 %v8392_v63  ;;  %11998 = vmatprep.subr.bf16.mxu0 %v14739_v8  ;;  %v8440_v1 = vadd.f32 %v8439_v6, %v8438_v62  ;;  %v9200_v62 = vld [vmem:[%s15349_s13 + $0x10] sm:$0xff]  ;;  %v9201_v63 = vld [vmem:[%s15349_s13 + $0x18] sm:$0xff] }
0x2b67   :  { %12028 = vmatpush3.bf16.msra.mxu1 %v14729_v29  ;;  %8709 = vmatprep.mubr.f32.mxu0 %v8424_v15  ;;  %v8427_v29 = vrot.slane %v15020_v3, 4  ;;  %v8412_v8 = vadd.f32 %v8411_v60, %v15018_v4  ;;  %v12093_v15 = vpack.c.bf16 %v9249_v27, %v9248_v40  ;;  %v12063_v6 = vpack.c.bf16 %v9201_v63, %v9200_v62  ;;  %v9233_v60 = vld [vmem:[%s15349_s13 + $0x118] sm:$0xff]  ;;  %v9211_v27 = vld [vmem:[%s15349_s13 + $0x68] sm:$0xff]  ;;  %v9242_v62 = vld [vmem:[%s15349_s13 + $0x160] sm:$0xff] }
0x2b68   :  { %12030 = vmatprep.subr.bf16.mxu1 %v14741_v9  ;;  %8779 = vmatprep.mubr.f32.mxu1 %v8440_v1  ;;  %v9232_v1 = vld [vmem:[%s15349_s13 + $0x110] sm:$0xff]  ;;  %v9243_v63 = vld [vmem:[%s15349_s13 + $0x168] sm:$0xff] }
0x2b69   :  { %12000 = vmatpush3.bf16.msra.mxu0 %v14763_v47  ;;  %v8428_v9 = vadd.f32 %v8427_v29, %v15020_v3  ;;  %v8413_v47 = vrot.slane %v8412_v8, 2  ;;  %v8792_v3 = vld [vmem:[%s15345_s9] sm:$0x1]  ;;  %v12095_v29 = vpack.c.bf16 %v9233_v60, %v9232_v1  ;;  %v12115_v60 = vpack.c.bf16 %v9243_v63, %v9242_v62 }
0x2b6a   :  { %12002 = vmatprep.subr.bf16.mxu0 %v14775_v56 }
0x2b6b   :  { %12032 = vmatpush3.bf16.msra.mxu1 %v14765_v58  ;;  %v8429_v58 = vrot.slane %v8428_v9, 2  ;;  %v8414_v56 = vadd.f32 %v8413_v47, %v8412_v8  ;;  %v9218_v8 = vld [vmem:[%s15349_s13 + $0xa0] sm:$0xff] }
0x2b6c   :  { %12034 = vmatprep.subr.bf16.mxu1 %v14777_v16  ;;  %v9250_v47 = vld [vmem:[%s15349_s13 + $0x1a0] sm:$0xff] }
0x2b6d   :  { %12004 = vmatpush3.bf16.msra.mxu0 %v14799_v38  ;;  %v8430_v16 = vadd.f32 %v8429_v58, %v8428_v9  ;;  %v8415_v38 = vrot.slane %v8414_v56, 1  ;;  %v9219_v9 = vld [vmem:[%s15349_s13 + $0xa8] sm:$0xff] }
0x2b6e   :  { %12006 = vmatprep.subr.bf16.mxu0 %v14805_v13  ;;  %v12065_v58 = vpack.c.bf16 %v9219_v9, %v9218_v8  ;;  %v9261_v8 = vld [vmem:[%s15349_s13 + $0x1f8] sm:$0xff]  ;;  %v9212_v9 = vld [vmem:[%s15349_s13 + $0x70] sm:$0xff] }
0x2b6f   :  { %12036 = vmatpush3.bf16.msra.mxu1 %v14801_v22  ;;  %v8431_v22 = vrot.slane %v8430_v16, 1  ;;  %v8416_v13 = vadd.f32 %v8415_v38, %v8414_v56  ;;  %v9251_v56 = vld [vmem:[%s15349_s13 + $0x1a8] sm:$0xff] }
0x2b70   :  { %12038 = vmatprep.subr.bf16.mxu1 %v14807_v24  ;;  %v9203_v38 = vld [vmem:[%s15349_s13 + $0x28] sm:$0xff] }
0x2b71   :  { %12008 = vmatpush3.bf16.msra.mxu0 %v14822_v25  ;;  %v8432_v24 = vadd.f32 %v8431_v22, %v8430_v16  ;;  %v15370_v25 = vmov 0.0   ;;  %v9202_v16 = vld [vmem:[%s15349_s13 + $0x20] sm:$0xff]  ;;  %v12097_v22 = vpack.c.bf16 %v9251_v56, %v9250_v47  ;;  %v9213_v56 = vld [vmem:[%s15349_s13 + $0x78] sm:$0xff] }
0x2b72   :  { %12010 = vmatprep.subr.bf16.mxu0 %v14840_v11  ;;  %v8798_v11 = vld [vmem:[%s15347_s11 + $0x18] sm:$0xff] }
0x2b73   :  { %12040 = vmatpush3.bf16.msra.mxu1 %v14827_v32  ;;  %v8796_v32 = vld [vmem:[%s15347_s11 + $0x8] sm:$0xff] }
0x2b74   :  { %12042 = vmatprep.subr.bf16.mxu1 %v14851_v42  ;;  %v8795_v42 = vld [vmem:[%s15347_s11] sm:$0xff] }
0x2b75   :  { %12012 = vmatpush3.bf16.msra.mxu0 %v14853_v51  ;;  %v8797_v51 = vld [vmem:[%s15347_s11 + $0x10] sm:$0xff] }
0x2b76   :  { %12014 = vmatprep.subr.bf16.mxu0 %v14876_v5 }
0x2b77   :  { %12044 = vmatpush3.bf16.msra.mxu1 %v14862_v53 }
0x2b78   :  { %12046 = vmatprep.subr.bf16.mxu1 %v14887_v28 }
0x2b79   :  { %12016 = vmatpush3.bf16.msra.mxu0 %v14889_v2 }
0x2b7a   :  { %12018 = vmatprep.subr.bf16.mxu0 %v14912_v33 }
0x2b7b   :  { %12048 = vmatpush3.bf16.msra.mxu1 %v14898_v52 }
0x2b7c   :  { %12050 = vmatprep.subr.bf16.mxu1 %v14923_v23 }
0x2b7d   :  { %12020 = vmatpush3.bf16.msra.mxu0 %v14925_v7 }
0x2b7e   :  { %12022 = vmatprep.subr.bf16.mxu0 %v14950_v37 }
0x2b7f   :  { %12052 = vmatpush3.bf16.msra.mxu1 %v14937_v57 }
0x2b80   :  { %12054 = vmatprep.subr.bf16.mxu1 %v14952_v35 }
0x2b81   :  { %12024 = vmatpush3.bf16.msra.mxu0 %v14964_v41 }
0x2b82   :  { %8803 = vmatprep.subr.mxu0 %v8796_v32 }
0x2b83   :  { %12056 = vmatpush3.bf16.msra.mxu1 %v14971_v39 }
0x2b84   :  { %8710 = vmatmul.mubr.f32.vlgmr.msra.gmra.mrb[100].mxu0 %v8416_v13  ;;  %8874 = vmatprep.subr.mxu1 %v8798_v11  ;;  %v12067_v13 = vpack.c.bf16 %v9203_v38, %v9202_v16  ;;  %v9244_v16 = vld [vmem:[%s15349_s13 + $0x170] sm:$0xff]  ;;  %v9245_v38 = vld [vmem:[%s15349_s13 + $0x178] sm:$0xff] }
0x2b85   :  { %8867 = vmatprep.mubr.f32.mxu0 %v15370_v25  ;;  %8804 = vmatpush1.msra.mxu0 %v8795_v42 }
0x2b86   :  { %8780 = vmatmul.mubr.f32.vlgmr.msra.gmra.mrb[100].mxu1 %v8432_v24  ;;  %8948 = vmatprep.subr.mxu0 %v8796_v32  ;;  %v9234_v24 = vld [vmem:[%s15349_s13 + $0x120] sm:$0xff] }
0x2b87   :  { %8938 = vmatprep.mubr.f32.mxu1 %v15370_v25  ;;  %8875 = vmatpush1.msra.mxu1 %v8797_v51 }
0x2b88   :  { %9019 = vmatprep.subr.mxu1 %v8798_v11  ;;  %v9220_v11 = vld [vmem:[%s15349_s13 + $0xb0] sm:$0xff] }
0x2c37   :  { %v9651_v53 = vpop.f32.mrb[70].mxu0 }
0x2c38   :  { %v9652_v5 = vpop.f32.mrb[71].mxu0 }
0x2c39   :  { %v9686_v28 = vpop.f32.mrb[70].mxu1  ;;  %v9653_v2 = vadd.f32 %v9652_v5, %v9651_v53  ;;  %v9253_v5 = vld [vmem:[%s15349_s13 + $0x1b8] sm:$0xff] }
0x2c3a   :  { %v9687_v52 = vpop.f32.mrb[71].mxu1 }
0x2c3b   :  { %v9688_v33 = vadd.f32 %v9687_v52, %v9686_v28  ;;  %v9204_v28 = vld [vmem:[%s15349_s13 + $0x30] sm:$0xff]  ;;  %v9205_v52 = vld [vmem:[%s15349_s13 + $0x38] sm:$0xff] }
0x2c3d   :  { %v8642_v23 = vadd.f32 %v9688_v33, %v9653_v2  ;;  %v9236_v33 = vld [vmem:[%s15349_s13 + $0x130] sm:$0xff] }
0x2c3f   :  { %v8785_v43 = vmul.f32 %v8642_v23, %v8642_v23 }
0x2c57   :  { %v9721_v7 = vpop.f32.mrb[100].mxu0 }
0x2c58   :  { %v9722_v57 = vpop.f32.mrb[101].mxu0 }
0x2c59   :  { %v9756_v37 = vpop.f32.mrb[100].mxu1  ;;  %v9723_v35 = vadd.f32 %v9722_v57, %v9721_v7  ;;  %v12071_v7 = vpack.c.bf16 %v9205_v52, %v9204_v28  ;;  %v15371_v28 = vld [vmem:[#allocation13_spill] sm:$0xff] }
0x2c5a   :  { %v9757_v41 = vpop.f32.mrb[101].mxu1  ;;  %v15372_v52 = vld [vmem:[#allocation17_spill] sm:$0xff] }
0x2c5b   :  { %v9758_v39 = vadd.f32 %v9757_v41, %v9756_v37  ;;  %v9222_v37 = vld [vmem:[%s15349_s13 + $0xc0] sm:$0xff] }
0x2c5d   :  { %v8782_v31 = vadd.f32 %v9758_v39, %v9723_v35  ;;  %v9223_v35 = vld [vmem:[%s15349_s13 + $0xc8] sm:$0xff]  ;;  %v9254_v39 = vld [vmem:[%s15349_s13 + $0x1c0] sm:$0xff] }
0x2c5e   :  { %v12073_v41 = vpack.c.bf16 %v9223_v35, %v9222_v37  ;;  %v15375_v35 = vld [vmem:[#allocation15_spill] sm:$0xff] }
0x2c5f   :  { %v8786_v46 = vsub.f32 %v8782_v31, %v8785_v43  ;;  %v9255_v43 = vld [vmem:[%s15349_s13 + $0x1c8] sm:$0xff]  ;;  %v9206_v31 = vld [vmem:[%s15349_s13 + $0x40] sm:$0xff] }
0x2c61   :  { %v8787_v48 = vmax.f32 %v8786_v46, 0.0  ;;  %v12105_v46 = vpack.c.bf16 %v9255_v43, %v9254_v39  ;;  %v15376_v39 = vld [vmem:[#allocation19_spill] sm:$0xff] }
0x2c63   :  { %v8788_v54 = vadd.f32 1e-05, %v8787_v48  ;;  %v9207_v48 = vld [vmem:[%s15349_s13 + $0x48] sm:$0xff] }
0x2c65   :  { %12578 = vrsqrt.f32 %v8788_v54  ;;  %v9238_v54 = vld [vmem:[%s15349_s13 + $0x140] sm:$0xff] }
0x2c6f   :  { %v12579_v34 = vpop.eup %12578 }
0x2c70   :  { %v8791_v4 = vmul.f32 %v12579_v34, %v8790_v19  ;;  %v9239_v19 = vld [vmem:[%s15349_s13 + $0x148] sm:$0xff]  ;;  %v12075_v34 = vpack.c.bf16 %v9207_v48, %v9206_v31  ;;  %v15377_v31 = vld [vmem:[#allocation16_spill] sm:$0xff] }
0x2c71   :  { %v15378_v48 = vld [vmem:[#allocation20_spill] sm:$0xff] }
0x2c72   :  { %9555 = vmatmul.mubr.msk.f32.vlgmr.msra.gmra.mrb[102].mxu0 %vm8799_vm6, %v8791_v4  ;;  %9556 = vmatmul.mubr.msk.f32.vlgmr.msra.gmra.mrb[102].mxu1 %vm8799_vm6, %v8791_v4  ;;  %v8793_v14 = vmul.f32 %v8791_v4, %v8642_v23  ;;  %v9237_v23 = vld [vmem:[%s15349_s13 + $0x138] sm:$0xff]  ;;  %v12107_v4 = vpack.c.bf16 %v9239_v19, %v9238_v54 }
0x2c73   :  { %8949 = vmatpush1.msra.mxu0 %v8795_v42  ;;  %9020 = vmatpush1.msra.mxu1 %v8797_v51  ;;  %v9221_v42 = vld [vmem:[%s15349_s13 + $0xb8] sm:$0xff]  ;;  %v9252_v51 = vld [vmem:[%s15349_s13 + $0x1b0] sm:$0xff]  ;;  %v12103_v57 = vpack.c.bf16 %v9237_v23, %v9236_v33 }
0x2c74   :  { %9012 = vmatprep.mubr.f32.mxu0 %v15370_v25  ;;  %9083 = vmatprep.mubr.f32.mxu1 %v15370_v25  ;;  %v8794_v49 = vsub.f32 %v8792_v3, %v8793_v14  ;;  %v9235_v25 = vld [vmem:[%s15349_s13 + $0x128] sm:$0xff]  ;;  %v12069_v53 = vpack.c.bf16 %v9221_v42, %v9220_v11  ;;  %v12101_v2 = vpack.c.bf16 %v9253_v5, %v9252_v51  ;;  %v9224_v3 = vld [vmem:[%s15349_s13 + $0xd0] sm:$0xff]  ;;  %v9225_v14 = vld [vmem:[%s15349_s13 + $0xd8] sm:$0xff] }
0x2c75   :  { %12058 = vmatprep.subr.bf16.mxu0 %v12057_v20  ;;  %12090 = vmatprep.subr.bf16.mxu1 %v12089_v55  ;;  %v12099_v32 = vpack.c.bf16 %v9235_v25, %v9234_v24  ;;  %v12077_v44 = vpack.c.bf16 %v9225_v14, %v9224_v3  ;;  %v9209_v20 = vld [vmem:[%s15349_s13 + $0x58] sm:$0xff]  ;;  %v15373_v23 = vld [vmem:[#allocation14_spill] sm:$0xff] }
0x2c76   :  { %9557 = vmatmul.mubr.msk.f32.vlgmr.msra.gmra.mrb[104].mxu0 %vm8799_vm6, %v8794_v49  ;;  %9558 = vmatmul.mubr.msk.f32.vlgmr.msra.gmra.mrb[104].mxu1 %vm8799_vm6, %v8794_v49  ;;  %v9256_v49 = vld [vmem:[%s15349_s13 + $0x1d0] sm:$0xff]  ;;  %v12079_v0 = vpack.c.bf16 %v9209_v20, %v9208_v17  ;;  %v9241_v55 = vld [vmem:[%s15349_s13 + $0x158] sm:$0xff] }
0x2c77   :  { %12060 = vmatpush3.bf16.msra.mxu0 %v12059_v21  ;;  %12092 = vmatpush3.bf16.msra.mxu1 %v12091_v36  ;;  %v12109_v61 = vpack.c.bf16 %v9257_v50, %v9256_v49  ;;  %v9226_v21 = vld [vmem:[%s15349_s13 + $0xe0] sm:$0xff]  ;;  %v12111_v18 = vpack.c.bf16 %v9241_v55, %v9240_v45 }
0x2c78   :  { %12062 = vmatprep.subr.bf16.mxu0 %v12061_v12  ;;  %12094 = vmatprep.subr.bf16.mxu1 %v12093_v15  ;;  %v9258_v36 = vld [vmem:[%s15349_s13 + $0x1e0] sm:$0xff]  ;;  %v12081_v30 = vpack.c.bf16 %v9227_v59, %v9226_v21  ;;  %v9228_v15 = vld [vmem:[%s15349_s13 + $0xf0] sm:$0xff] }
0x2c79   :  { %v12113_v40 = vpack.c.bf16 %v9259_v10, %v9258_v36  ;;  %v9210_v12 = vld [vmem:[%s15349_s13 + $0x60] sm:$0xff] }
0x2c7a   :  { %v12083_v1 = vpack.c.bf16 %v9211_v27, %v9210_v12  ;;  %v9150_v45 = vld [vmem:[%s15348_s12] sm:$0xff]  ;;  %v9156_v12 = vld [vmem:[%s15348_s12 + $0x30] sm:$0x1f] }
0x2c7b   :  { %12064 = vmatpush3.bf16.msra.mxu0 %v12063_v6  ;;  %12096 = vmatpush3.bf16.msra.mxu1 %v12095_v29  ;;  %v9229_v6 = vld [vmem:[%s15349_s13 + $0xf8] sm:$0xff]  ;;  %v9260_v29 = vld [vmem:[%s15349_s13 + $0x1f0] sm:$0xff]  ;;  %v9154_v55 = vld [vmem:[%s15348_s12 + $0x20] sm:$0x1f] }
0x2c7c   :  { %12066 = vmatprep.subr.bf16.mxu0 %v12065_v58  ;;  %12098 = vmatprep.subr.bf16.mxu1 %v12097_v22  ;;  %v12085_v47 = vpack.c.bf16 %v9229_v6, %v9228_v15  ;;  %v12117_v58 = vpack.c.bf16 %v9261_v8, %v9260_v29  ;;  %v12087_v22 = vpack.c.bf16 %v9213_v56, %v9212_v9  ;;  %v9152_v27 = vld [vmem:[%s15348_s12 + $0x10] sm:$0xff]  ;;  %v9153_v8 = vld [vmem:[%s15348_s12 + $0x18] sm:$0xff]  ;;  %v9155_v9 = vld [vmem:[%s15348_s12 + $0x28] sm:$0x1f] }
0x2c7f   :  { %12068 = vmatpush3.bf16.msra.mxu0 %v12067_v13  ;;  %12100 = vmatpush3.bf16.msra.mxu1 %v12099_v32  ;;  %v12119_v13 = vpack.c.bf16 %v9245_v38, %v9244_v16 }
0x2c80   :  { %12070 = vmatprep.subr.bf16.mxu0 %v12069_v53  ;;  %12102 = vmatprep.subr.bf16.mxu1 %v12101_v2 }
0x2c83   :  { %12072 = vmatpush3.bf16.msra.mxu0 %v12071_v7  ;;  %12104 = vmatpush3.bf16.msra.mxu1 %v12103_v57  ;;  %v15374_v57 = vld [vmem:[#allocation18_spill] sm:$0xff] }
0x2c84   :  { %12074 = vmatprep.subr.bf16.mxu0 %v12073_v41  ;;  %12106 = vmatprep.subr.bf16.mxu1 %v12105_v46 }
0x2c87   :  { %12076 = vmatpush3.bf16.msra.mxu0 %v12075_v34  ;;  %12108 = vmatpush3.bf16.msra.mxu1 %v12107_v4 }
0x2c88   :  { %12078 = vmatprep.subr.bf16.mxu0 %v12077_v44  ;;  %12110 = vmatprep.subr.bf16.mxu1 %v12109_v61 }
0x2c8b   :  { %12080 = vmatpush3.bf16.msra.mxu0 %v12079_v0  ;;  %12112 = vmatpush3.bf16.msra.mxu1 %v12111_v18 }
0x2c8c   :  { %12082 = vmatprep.subr.bf16.mxu0 %v12081_v30  ;;  %12114 = vmatprep.subr.bf16.mxu1 %v12113_v40 }
0x2c8f   :  { %12084 = vmatpush3.bf16.msra.mxu0 %v12083_v1  ;;  %12116 = vmatpush3.bf16.msra.mxu1 %v12115_v60  ;;  %v9151_v1 = vld [vmem:[%s15348_s12 + $0x8] sm:$0xff] }
0x2c90   :  { %12086 = vmatprep.subr.bf16.mxu0 %v12085_v47  ;;  %12118 = vmatprep.subr.bf16.mxu1 %v12117_v58  ;;  %v9157_v47 = vld [vmem:[%s15348_s12 + $0x38] sm:$0x1f] }
0x2c93   :  { %12088 = vmatpush3.bf16.msra.mxu0 %v12087_v22  ;;  %12120 = vmatpush3.bf16.msra.mxu1 %v12119_v13 }
0x2d45   :  { %v8869_v24 = vpop.f32.mrb[102].mxu0  ;;  %v8940_v25 = vpop.f32.mrb[102].mxu1 }
0x2d46   :  { %v9093_v32 = vrot.slane %v8869_v24, %v13143_v26  ;;  %v9101_v11 = vrot.slane %v8940_v25, %v13143_v26  ;;  %v8871_v42 = vpop.f32.mrb[103].mxu0  ;;  %v8942_v51 = vpop.f32.mrb[103].mxu1 }
0x2d47   :  { %v9097_v53 = vrot.slane %v8871_v42, %v13143_v26  ;;  %v9105_v5 = vrot.slane %v8942_v51, %v13143_v26 }
0x2d48   :  { %v9106_v2 = vmul.f32 %v9093_v32, %v15371_v28  ;;  %v9110_v33 = vmul.f32 %v9093_v32, %v15372_v52  ;;  %v9108_v7 = vmul.f32 %v9101_v11, %v15373_v23  ;;  %v9112_v37 = vmul.f32 %v9101_v11, %v15374_v57 }
0x2d49   :  { %v9107_v41 = vmul.f32 %v9097_v53, %v15375_v35  ;;  %v9111_v43 = vmul.f32 %v9097_v53, %v15376_v39  ;;  %v9109_v46 = vmul.f32 %v9105_v5, %v15377_v31  ;;  %v9113_v54 = vmul.f32 %v9105_v5, %v15378_v48  ;;  %v9014_v19 = vpop.f32.mrb[104].mxu0  ;;  %v9085_v34 = vpop.f32.mrb[104].mxu1 }
0x2d4a   :  { %v9117_v4 = vrot.slane %v9014_v19, %v13143_v26  ;;  %v9125_v3 = vrot.slane %v9085_v34, %v13143_v26  ;;  %v9016_v14 = vpop.f32.mrb[105].mxu0  ;;  %v9087_v49 = vpop.f32.mrb[105].mxu1 }
0x2d4b   :  { %v9121_v44 = vrot.slane %v9016_v14, %v13143_v26  ;;  %v9129_v50 = vrot.slane %v9087_v49, %v13143_v26 }
0x2d4c   :  { %v9130_v17 = vadd.f32 %v9117_v4, %v9106_v2  ;;  %v9134_v20 = vadd.f32 %v9117_v4, %v9110_v33  ;;  %v9132_v61 = vadd.f32 %v9125_v3, %v9108_v7  ;;  %v9136_v0 = vadd.f32 %v9125_v3, %v9112_v37 }
0x2d4d   :  { %v9131_v21 = vadd.f32 %v9121_v44, %v9107_v41  ;;  %v9135_v18 = vadd.f32 %v9121_v44, %v9111_v43  ;;  %v9133_v59 = vadd.f32 %v9129_v50, %v9109_v46  ;;  %v9137_v36 = vadd.f32 %v9129_v50, %v9113_v54 }
0x2d4e   :  { %v9138_v10 = vmax.f32 %v9130_v17, 0.0  ;;  %v9142_v30 = vmax.f32 %v9134_v20, 0.0  ;;  %v9140_v40 = vmax.f32 %v9132_v61, 0.0  ;;  %v9144_v26 = vmax.f32 %v9136_v0, 0.0 }
0x2d4f   :  { %v9139_v62 = vmax.f32 %v9131_v21, 0.0  ;;  %v9143_v63 = vmax.f32 %v9135_v18, 0.0  ;;  %v9141_v15 = vmax.f32 %v9133_v59, 0.0  ;;  %v9145_v6 = vmax.f32 %v9137_v36, 0.0  ;;  %v9262_v21 = vld [vmem:[%s15350_s14] sm:$0x1] }
0x2d50   :  { %v9146_v60 = vmax.f32 %v9138_v10, %v9140_v40  ;;  %v9148_v29 = vmax.f32 %v9142_v30, %v9144_v26  ;;  %s12588_s14 = scalar_lea.vmem %s9418_s29, 32 }
0x2d51   :  { %v9147_v58 = vmax.f32 %v9139_v62, %v9141_v15  ;;  %v9149_v56 = vmax.f32 %v9143_v63, %v9145_v6  ;;  %p12590_p2 = scmp.lt.s32.totalorder %s12588_s14, %s12584_s30 }
0x2d52   :  { %v9158_v16 = vmul.f32 %v9150_v45, %v9146_v60  ;;  %v9160_v38 = vmul.f32 %v9152_v27, %v9146_v60  ;;  %v9162_v22 = vmul.f32 %v9154_v55, %v9148_v29  ;;  %v9164_v13 = vmul.f32 %v9156_v12, %v9148_v29 }
0x2d53   :  { %v9159_v24 = vmul.f32 %v9151_v1, %v9147_v58  ;;  %v9161_v25 = vmul.f32 %v9153_v8, %v9147_v58  ;;  %v9163_v32 = vmul.f32 %v9155_v9, %v9149_v56  ;;  %v9165_v11 = vmul.f32 %v9157_v47, %v9149_v56  ;;  %p12591_p3 = por %p12590_p2, %p12589_p1 }
0x2d54   :  { %v9166_v42 = vsel %vm8368_vm5, %v9162_v22, 0.0  ;;  %v9182_v51 = vsel %vm8368_vm5, %v9164_v13, 0.0 }
0x2d55   :  { %v9167_v53 = vadd.f32 %v9166_v42, %v9158_v16  ;;  %v9183_v5 = vadd.f32 %v9182_v51, %v9160_v38  ;;  %v9174_v28 = vsel %vm8368_vm5, %v9163_v32, 0.0  ;;  %v9190_v2 = vsel %vm8368_vm5, %v9165_v11, 0.0  ;;  %p12592_p4 = pnand %p12591_p3, %p12585_p0 }
0x2d56   :  { %v9175_v52 = vadd.f32 %v9174_v28, %v9159_v24  ;;  %v9191_v33 = vadd.f32 %v9190_v2, %v9161_v25 }
0x2d57   :  { %v9168_v23 = vrot.slane %v9167_v53, 4  ;;  %v9184_v7 = vrot.slane %v9183_v5, 4 }
0x2d58   :  { %v9176_v57 = vrot.slane %v9175_v52, 4  ;;  %v9192_v37 = vrot.slane %v9191_v33, 4 }
0x2d59   :  { %v9169_v35 = vadd.f32 %v9168_v23, %v9167_v53  ;;  %v9185_v41 = vadd.f32 %v9184_v7, %v9183_v5 }
0x2d5a   :  { %v9177_v39 = vadd.f32 %v9176_v57, %v9175_v52  ;;  %v9193_v43 = vadd.f32 %v9192_v37, %v9191_v33 }
0x2d5b   :  { %v9170_v31 = vrot.slane %v9169_v35, 2  ;;  %v9186_v46 = vrot.slane %v9185_v41, 2 }
0x2d5c   :  { %v9178_v48 = vrot.slane %v9177_v39, 2  ;;  %v9194_v54 = vrot.slane %v9193_v43, 2 }
0x2d5d   :  { %v9171_v19 = vadd.f32 %v9170_v31, %v9169_v35  ;;  %v9187_v34 = vadd.f32 %v9186_v46, %v9185_v41 }
0x2d5e   :  { %v9179_v4 = vadd.f32 %v9178_v48, %v9177_v39  ;;  %v9195_v3 = vadd.f32 %v9194_v54, %v9193_v43 }
0x2d5f   :  { %v9172_v14 = vrot.slane %v9171_v19, 1  ;;  %v9188_v49 = vrot.slane %v9187_v34, 1 }
0x2d60   :  { %v9180_v44 = vrot.slane %v9179_v4, 1  ;;  %v9196_v50 = vrot.slane %v9195_v3, 1 }
0x2d61   :  { %v9173_v61 = vadd.f32 %v9172_v14, %v9171_v19  ;;  %v9189_v0 = vadd.f32 %v9188_v49, %v9187_v34 }
0x2d62   :  { %v9181_v17 = vadd.f32 %v9180_v44, %v9179_v4  ;;  %v9197_v20 = vadd.f32 %v9196_v50, %v9195_v3 }
0x2d64   :  { %9327 = vmatprep.mubr.f32.mxu0 %v9181_v17  ;;  %9397 = vmatprep.mubr.f32.mxu1 %v9197_v20 }
0x2d65   :  { %9328 = vmatmul.mubr.f32.vlgmr.msra.gmra.mrb[106].mxu0 %v9173_v61  ;;  %9398 = vmatmul.mubr.f32.vlgmr.msra.gmra.mrb[106].mxu1 %v9189_v0 }
0x2e38   :  { %v9791_v45 = vpop.f32.mrb[106].mxu0  ;;  %v9826_v55 = vpop.f32.mrb[106].mxu1 }
0x2e39   :  { %v9792_v18 = vpop.f32.mrb[107].mxu0  ;;  %v9827_v59 = vpop.f32.mrb[107].mxu1 }
0x2e3a   :  { %v9793_v36 = vadd.f32 %v9792_v18, %v9791_v45  ;;  %v9828_v10 = vadd.f32 %v9827_v59, %v9826_v55 }
0x2e3c   :  { %v9330_v30 = vadd.f32 %v9793_v36, %v9262_v21 }
0x2e3e   :  { %v9400_v40 = vadd.f32 %v9828_v10, %v9330_v30 }
0x2e40   :  { %v9559_v26 = vmul.f32 -1.442695, %v9400_v40 }
0x2e42   :  { %12580 = vpow2.f32 %v9559_v26 }
0x2e4c   :  { %v12581_v12 = vpop.eup %12580 }
0x2e4d   :  { %v9406_v27 = vadd.f32 1.0, %v12581_v12 }
0x2e4f   :  { %12582 = vrcp.f32 %v9406_v27 }
0x2e59   :  { %v12583_v62 = vpop.eup %12582 }
0x2e5a   :  { %9410 = vst.msk [vmem:[#allocation7] sm:$0x1] %vm9409_vm7, %v12583_v62 }
0x2e5b   :  { %12595 = shalt.err (!%p12592_p4)
}
0x2e5c   :  { %s12596_s3 = scalar_lea.hbm %s15351_s15, 16 }
0x2e5d   :  { %p12597_p5 = scmp.ne.s32.totalorder %s15351_s15, %s12596_s3  ;;  %p12600_p6 = scmp.lt.u32.totalorder %s12596_s3, %s15351_s15 }
0x2e5f   :  { %p12602_p7 = pnand %p12600_p6, %p12597_p5 }
0x2e61   :  { %12605 = shalt.err (!%p12602_p7)
}
0x2e62   :  { %9420 = dma.vmem_to_hbm [thread:$0]  %s9418_s29, 16, %s15351_s15, [#allocation8]  }
0x2e63   :  { %12608 = dma.done.wait [#allocation8], 16  }
0x2e64   :  { %12609 = vsyncadd [#allocation8], 4294967280 }
0x2e65   :  { %9424 = vsyncpa [#allocation8], 1 }
0x2e66   :  { %9425 = vsyncmov [#allocation6] }
0x2e69   :  { %s9426_s19 = vpop.sfrf %9425 }
0x2e6a   :  { %p9560_p8 = scmp.ne.s32.totalorder %s9426_s19, 0 }
0x2e6c   :  { %9430 = shalt.err (%p9560_p8)  }

</bundles_post_ra>
